<compile_context>
chip_gen: v6e
topology: v6e:2x2x1
jax: 0.10.0
libtpu: 0.0.40
codegen_flags: <defaults>
</compile_context>

<pallas_src>
import jax
import jax.numpy as jnp
from jax.experimental import pallas as pl
from jax.experimental.pallas import tpu as pltpu


def _lstm_predictor_kernel(x_ref,       # [B*T, D] f32, row b*T + t  = x[b, t, :]
                           wih0_ref,    # [D, 4H]  bf16
                           whh0_ref,    # [H, 4H]  bf16
                           b0_ref,      # [1, 4H]  f32  (b_ih + b_hh, layer 0)
                           wih1_ref,    # [H, 4H]  bf16
                           whh1_ref,    # [H, 4H]  bf16
                           b1_ref,      # [1, 4H]  f32  (b_ih + b_hh, layer 1)
                           wfc_ref,     # [1, H]   f32  (fc.weight as a row)
                           bfc_ref,     # [1, 1]   f32
                           o_ref):      # [B, 1]   f32
    B = o_ref.shape[0]
    TB = x_ref.shape[0]
    T = TB // B
    H = whh0_ref.shape[0]

    # ---- Hoisted layer-0 input projection (bias folded in), bf16 x bf16 -> f32.
    xw0 = (jnp.dot(x_ref[...].astype(jnp.bfloat16), wih0_ref[...],
                   preferred_element_type=jnp.float32)
           + b0_ref[...])                                   # [B*T, 4H] f32
    xw0 = xw0.reshape(B, T, 4 * H)                          # [B, T, 4H]

    # Hoist the layer-1 bias broadcast (JAX does not CSE broadcast_in_dim).
    b1b = jnp.broadcast_to(b1_ref[...], (B, 4 * H))         # [B, 4H] f32

    def gate_combine(gates, c):
        # Transcendentals only on the slices that need them; every slice is a
        # whole number of 128-lane tiles at H=128. Elementwise math stays f32.
        i_f = jax.nn.sigmoid(gates[:, 0:2 * H])             # i and f together
        i_g = i_f[:, 0:H]
        f_g = i_f[:, H:2 * H]
        g_g = jnp.tanh(gates[:, 2 * H:3 * H])
        o_g = jax.nn.sigmoid(gates[:, 3 * H:4 * H])
        c_new = f_g * c + i_g * g_g
        h_new = o_g * jnp.tanh(c_new)
        return h_new, c_new

    zeros = jnp.zeros((B, H), jnp.float32)
    h1, c1, h2, c2 = zeros, zeros, zeros, zeros
    # h2 starts at zero, so the layer-1 recurrent term is just the bias.
    g1b = b1b                                               # [B, 4H] f32

    # T is small and static: the Python loop fully unrolls at trace time, so
    # every slice is static and the scheduler can interleave the off-chain
    # g1b dot of step t with the layer-0 recurrent dot of step t+1.
    for t in range(T):
        # Layer 0: only the recurrent dot is on the per-step serial chain.
        gates0 = (xw0[:, t, :]
                  + jnp.dot(h1.astype(jnp.bfloat16), whh0_ref[...],
                            preferred_element_type=jnp.float32))
        h1, c1 = gate_combine(gates0, c1)

        # TODO(synk): inter-layer dropout (p=0.2) is a no-op in eval mode; not applied.

        # Layer 1: h2-dependent half (g1b) was already computed last step.
        gates1 = (jnp.dot(h1.astype(jnp.bfloat16), wih1_ref[...],
                          preferred_element_type=jnp.float32)
                  + g1b)
        h2, c2 = gate_combine(gates1, c2)

        if t + 1 < T:
            # Off-chain recurrent half of the NEXT step's layer-1 gates.
            g1b = (jnp.dot(h2.astype(jnp.bfloat16), whh1_ref[...],
                           preferred_element_type=jnp.float32)
                   + b1b)

    # fc(out[:, -1, :]) == h2 @ W_fc^T + b_fc, done as VPU multiply + lane
    # reduction (no 1-lane-wide MXU matmul at the epilogue). Kept in f32.
    out = jnp.sum(h2 * wfc_ref[...], axis=-1, keepdims=True) + bfc_ref[...]
    o_ref[...] = out.astype(o_ref.dtype)


def lstm_predictor_forward(x, params):
    """x: [B, T, D] (batch_first, like PyTorch). Returns [B, 1]."""
    B, T, D = x.shape

    # Free metadata reshape (no transpose / no extra copy kernel): row b*T + t.
    x_flat = x.reshape(B * T, D).astype(jnp.float32)

    args = (
        x_flat,
        params["wih0_t"], params["whh0_t"], params["b0"],
        params["wih1_t"], params["whh1_t"], params["b1"],
        params["wfc"], params["bfc"],
    )

    def full_spec(shape):
        # whole-array block, single grid point
        return pl.BlockSpec(shape, lambda *_: (0,) * len(shape))

    return pl.pallas_call(
        _lstm_predictor_kernel,
        out_shape=jax.ShapeDtypeStruct((B, 1), jnp.float32),
        grid=(1,),
        in_specs=[full_spec(a.shape) for a in args],
        out_specs=full_spec((B, 1)),
        compiler_params=pltpu.CompilerParams(
            dimension_semantics=("arbitrary",)),
    )(*args)


def init_params(key, input_dim, hidden_dim):
    """Deterministic init mirroring PyTorch nn.LSTM / nn.Linear shapes.

    PyTorch weight shapes:
      weight_ih_l0: [4H, D], weight_hh_l0: [4H, H], biases: [4H]
      weight_ih_l1: [4H, H], weight_hh_l1: [4H, H], biases: [4H]
      fc.weight: [1, H], fc.bias: [1]
    We store transposes for MXU-friendly `act @ W`, keep layer-1's two weight
    matrices SEPARATE (so the h2-dependent dot can run off the critical chain),
    fold b_ih + b_hh into one bias per layer, and keep the matmul weights in
    bf16 (f32 accumulation in-kernel). fc weights stay f32 (VPU path).
    """
    k = 1.0 / jnp.sqrt(hidden_dim)
    keys = jax.random.split(key, 12)
    u = lambda kk, shape: jax.random.uniform(kk, shape, jnp.float32, -k, k)
    bf = lambda a: a.astype(jnp.bfloat16)

    H, D = hidden_dim, input_dim
    params = {
        "wih0_t": bf(u(keys[0], (D, 4 * H))),
        "whh0_t": bf(u(keys[1], (H, 4 * H))),
        "b0":     (u(keys[2], (1, 4 * H)) + u(keys[3], (1, 4 * H))),
        "wih1_t": bf(u(keys[4], (H, 4 * H))),
        "whh1_t": bf(u(keys[5], (H, 4 * H))),
        "b1":     (u(keys[6], (1, 4 * H)) + u(keys[7], (1, 4 * H))),
        "wfc":    u(keys[8], (1, H)),
        "bfc":    u(keys[9], (1, 1)),
    }
    return params


def reference_forward(x, params, *, mixed_precision):
    """Pure-JAX reference (standard unfused LSTM math).

    mixed_precision=True mirrors the kernel's numerical contract
    (bf16 matmul operands, f32 accumulation); False is full-f32 HIGHEST.
    """
    B, T, D = x.shape
    H = params["whh0_t"].shape[0]

    if mixed_precision:
        mm = lambda a, w: jnp.dot(a.astype(jnp.bfloat16), w.astype(jnp.bfloat16),
                                  preferred_element_type=jnp.float32)
    else:
        mm = lambda a, w: jnp.dot(a.astype(jnp.float32), w.astype(jnp.float32),
                                  precision=jax.lax.Precision.HIGHEST)

    def cell(x_t, h, c, w_ih, w_hh, b):
        g = mm(x_t, w_ih) + mm(h, w_hh) + b
        i = jax.nn.sigmoid(g[:, 0:H])
        f = jax.nn.sigmoid(g[:, H:2 * H])
        gg = jnp.tanh(g[:, 2 * H:3 * H])
        o = jax.nn.sigmoid(g[:, 3 * H:4 * H])
        c = f * c + i * gg
        h = o * jnp.tanh(c)
        return h, c

    h1 = c1 = h2 = c2 = jnp.zeros((B, H), jnp.float32)
    for t in range(T):
        x_t = x[:, t, :].astype(jnp.float32)
        h1, c1 = cell(x_t, h1, c1, params["wih0_t"], params["whh0_t"], params["b0"])
        h2, c2 = cell(h1, h2, c2, params["wih1_t"], params["whh1_t"], params["b1"])
    return jnp.dot(h2, params["wfc"].T.astype(jnp.float32),
                   precision=jax.lax.Precision.HIGHEST) + params["bfc"]


if __name__ == "__main__":
    # Small shapes consistent with the module: input_dim=5, hidden_dim=128
    # (module default; keeps every gate slice lane-aligned), num_layers=2,
    # seq_len=8. Batch=8 (one f32 sublane tile) amortizes per-call fixed cost.
    B, T, D, H = 8, 8, 5, 128

    key = jax.random.PRNGKey(0)
    k_x, k_p = jax.random.split(key)
    x = jax.random.normal(k_x, (B, T, D), jnp.float32)
    params = init_params(k_p, input_dim=D, hidden_dim=H)

    out = lstm_predictor_forward(x, params)
    out = jax.block_until_ready(out)
    assert out.shape == (B, 1)

    # Tight check against a reference with the kernel's numerical contract
    # (bf16 operands, f32 accumulation).
    ref_mixed = reference_forward(x, params, mixed_precision=True)
    assert jnp.allclose(out, ref_mixed, atol=2e-3, rtol=2e-3), (out, ref_mixed)

    # Sanity check against full-f32 math (looser: bf16 operand quantization drift).
    ref_f32 = reference_forward(x, params, mixed_precision=False)
    assert jnp.allclose(out, ref_f32, atol=5e-2, rtol=5e-2), (out, ref_f32)

    print("KERNEL_OK")
</pallas_src>

<mosaic_0001>
module attributes {stable_mosaic.version = 11 : i64} {
  func.func @_lstm_predictor_kernel(%arg0: i32, %arg1: memref<64x5xf32, #tpu.memory_space<vmem>>, %arg2: memref<5x512xbf16, #tpu.memory_space<vmem>>, %arg3: memref<128x512xbf16, #tpu.memory_space<vmem>>, %arg4: memref<1x512xf32, #tpu.memory_space<vmem>>, %arg5: memref<128x512xbf16, #tpu.memory_space<vmem>>, %arg6: memref<128x512xbf16, #tpu.memory_space<vmem>>, %arg7: memref<1x512xf32, #tpu.memory_space<vmem>>, %arg8: memref<1x128xf32, #tpu.memory_space<vmem>>, %arg9: memref<1x1xf32, #tpu.memory_space<vmem>>, %arg10: memref<8x1xf32, #tpu.memory_space<vmem>>) attributes {dimension_semantics = [#tpu.dimension_semantics<arbitrary>], iteration_bounds = array<i64: 1>, scalar_prefetch = 0 : i64, scratch_operands = 0 : i64, tpu.core_type = #tpu.core_type<tc>, window_params = [{pipeline_mode = #tpu.pipeline_mode<synchronous>, transform_indices = @transform_0, window_bounds = array<i64: 64, 5>}, {pipeline_mode = #tpu.pipeline_mode<synchronous>, transform_indices = @transform_1, window_bounds = array<i64: 5, 512>}, {pipeline_mode = #tpu.pipeline_mode<synchronous>, transform_indices = @transform_2, window_bounds = array<i64: 128, 512>}, {pipeline_mode = #tpu.pipeline_mode<synchronous>, transform_indices = @transform_3, window_bounds = array<i64: 1, 512>}, {pipeline_mode = #tpu.pipeline_mode<synchronous>, transform_indices = @transform_4, window_bounds = array<i64: 128, 512>}, {pipeline_mode = #tpu.pipeline_mode<synchronous>, transform_indices = @transform_5, window_bounds = array<i64: 128, 512>}, {pipeline_mode = #tpu.pipeline_mode<synchronous>, transform_indices = @transform_6, window_bounds = array<i64: 1, 512>}, {pipeline_mode = #tpu.pipeline_mode<synchronous>, transform_indices = @transform_7, window_bounds = array<i64: 1, 128>}, {pipeline_mode = #tpu.pipeline_mode<synchronous>, transform_indices = @transform_8, window_bounds = array<i64: 1, 1>}, {pipeline_mode = #tpu.pipeline_mode<synchronous>, transform_indices = @transform_9, window_bounds = array<i64: 8, 1>}]} {
    %c0 = arith.constant 0 : index
    %c0_0 = arith.constant 0 : index
    %0 = vector.load %arg1[%c0, %c0_0] : memref<64x5xf32, #tpu.memory_space<vmem>>, vector<64x5xf32>
    %1 = arith.truncf %0 : vector<64x5xf32> to vector<64x5xbf16>
    %c0_1 = arith.constant 0 : index
    %c0_2 = arith.constant 0 : index
    %2 = vector.load %arg2[%c0_1, %c0_2] : memref<5x512xbf16, #tpu.memory_space<vmem>>, vector<5x512xbf16>
    %cst = arith.constant dense<0.000000e+00> : vector<64x512xf32>
    %3 = tpu.matmul %1, %2, %cst {dimension_numbers = #tpu.dot_dimension_numbers<[1], [0], [0], [1], [0, 0, 1, 1], [], []>} : vector<64x5xbf16>, vector<5x512xbf16>, vector<64x512xf32> -> vector<64x512xf32>
    %c0_3 = arith.constant 0 : index
    %c0_4 = arith.constant 0 : index
    %4 = vector.load %arg4[%c0_3, %c0_4] : memref<1x512xf32, #tpu.memory_space<vmem>>, vector<1x512xf32>
    %5 = vector.broadcast %4 : vector<1x512xf32> to vector<64x512xf32>
    %6 = arith.addf %3, %5 : vector<64x512xf32>
    %7 = vector.shape_cast %6 : vector<64x512xf32> to vector<8x8x512xf32>
    %c0_5 = arith.constant 0 : index
    %c0_6 = arith.constant 0 : index
    %8 = vector.load %arg7[%c0_5, %c0_6] : memref<1x512xf32, #tpu.memory_space<vmem>>, vector<1x512xf32>
    %9 = vector.shape_cast %8 : vector<1x512xf32> to vector<1x512xf32>
    %10 = vector.broadcast %9 : vector<1x512xf32> to vector<8x512xf32>
    %cst_7 = arith.constant 0.000000e+00 : f32
    %11 = vector.broadcast %cst_7 : f32 to vector<8x128xf32>
    %12 = vector.extract_strided_slice %7 {offsets = [0, 0, 0], sizes = [8, 1, 512], strides = [1, 1, 1]} : vector<8x8x512xf32> to vector<8x1x512xf32>
    %13 = vector.shape_cast %12 : vector<8x1x512xf32> to vector<8x512xf32>
    %14 = arith.truncf %11 : vector<8x128xf32> to vector<8x128xbf16>
    %c0_8 = arith.constant 0 : index
    %c0_9 = arith.constant 0 : index
    %15 = vector.load %arg3[%c0_8, %c0_9] : memref<128x512xbf16, #tpu.memory_space<vmem>>, vector<128x512xbf16>
    %cst_10 = arith.constant dense<0.000000e+00> : vector<8x512xf32>
    %16 = tpu.matmul %14, %15, %cst_10 {dimension_numbers = #tpu.dot_dimension_numbers<[1], [0], [0], [1], [0, 0, 1, 1], [], []>} : vector<8x128xbf16>, vector<128x512xbf16>, vector<8x512xf32> -> vector<8x512xf32>
    %17 = arith.addf %13, %16 : vector<8x512xf32>
    %18 = vector.extract_strided_slice %17 {offsets = [0, 0], sizes = [8, 256], strides = [1, 1]} : vector<8x512xf32> to vector<8x256xf32>
    %19 = arith.negf %18 : vector<8x256xf32>
    %20 = math.exp %19 : vector<8x256xf32>
    %cst_11 = arith.constant 1.000000e+00 : f32
    %21 = vector.broadcast %cst_11 : f32 to vector<8x256xf32>
    %22 = arith.addf %21, %20 : vector<8x256xf32>
    %23 = arith.divf %21, %22 : vector<8x256xf32>
    %24 = vector.extract_strided_slice %23 {offsets = [0, 0], sizes = [8, 128], strides = [1, 1]} : vector<8x256xf32> to vector<8x128xf32>
    %25 = vector.extract_strided_slice %23 {offsets = [0, 128], sizes = [8, 128], strides = [1, 1]} : vector<8x256xf32> to vector<8x128xf32>
    %26 = vector.extract_strided_slice %17 {offsets = [0, 256], sizes = [8, 128], strides = [1, 1]} : vector<8x512xf32> to vector<8x128xf32>
    %27 = math.tanh %26 : vector<8x128xf32>
    %28 = vector.extract_strided_slice %17 {offsets = [0, 384], sizes = [8, 128], strides = [1, 1]} : vector<8x512xf32> to vector<8x128xf32>
    %29 = arith.negf %28 : vector<8x128xf32>
    %30 = math.exp %29 : vector<8x128xf32>
    %cst_12 = arith.constant 1.000000e+00 : f32
    %31 = vector.broadcast %cst_12 : f32 to vector<8x128xf32>
    %32 = arith.addf %31, %30 : vector<8x128xf32>
    %33 = arith.divf %31, %32 : vector<8x128xf32>
    %34 = arith.mulf %25, %11 : vector<8x128xf32>
    %35 = arith.mulf %24, %27 : vector<8x128xf32>
    %36 = arith.addf %34, %35 : vector<8x128xf32>
    %37 = math.tanh %36 : vector<8x128xf32>
    %38 = arith.mulf %33, %37 : vector<8x128xf32>
    %39 = arith.truncf %38 : vector<8x128xf32> to vector<8x128xbf16>
    %c0_13 = arith.constant 0 : index
    %c0_14 = arith.constant 0 : index
    %40 = vector.load %arg5[%c0_13, %c0_14] : memref<128x512xbf16, #tpu.memory_space<vmem>>, vector<128x512xbf16>
    %cst_15 = arith.constant dense<0.000000e+00> : vector<8x512xf32>
    %41 = tpu.matmul %39, %40, %cst_15 {dimension_numbers = #tpu.dot_dimension_numbers<[1], [0], [0], [1], [0, 0, 1, 1], [], []>} : vector<8x128xbf16>, vector<128x512xbf16>, vector<8x512xf32> -> vector<8x512xf32>
    %42 = arith.addf %41, %10 : vector<8x512xf32>
    %43 = vector.extract_strided_slice %42 {offsets = [0, 0], sizes = [8, 256], strides = [1, 1]} : vector<8x512xf32> to vector<8x256xf32>
    %44 = arith.negf %43 : vector<8x256xf32>
    %45 = math.exp %44 : vector<8x256xf32>
    %cst_16 = arith.constant 1.000000e+00 : f32
    %46 = vector.broadcast %cst_16 : f32 to vector<8x256xf32>
    %47 = arith.addf %46, %45 : vector<8x256xf32>
    %48 = arith.divf %46, %47 : vector<8x256xf32>
    %49 = vector.extract_strided_slice %48 {offsets = [0, 0], sizes = [8, 128], strides = [1, 1]} : vector<8x256xf32> to vector<8x128xf32>
    %50 = vector.extract_strided_slice %48 {offsets = [0, 128], sizes = [8, 128], strides = [1, 1]} : vector<8x256xf32> to vector<8x128xf32>
    %51 = vector.extract_strided_slice %42 {offsets = [0, 256], sizes = [8, 128], strides = [1, 1]} : vector<8x512xf32> to vector<8x128xf32>
    %52 = math.tanh %51 : vector<8x128xf32>
    %53 = vector.extract_strided_slice %42 {offsets = [0, 384], sizes = [8, 128], strides = [1, 1]} : vector<8x512xf32> to vector<8x128xf32>
    %54 = arith.negf %53 : vector<8x128xf32>
    %55 = math.exp %54 : vector<8x128xf32>
    %cst_17 = arith.constant 1.000000e+00 : f32
    %56 = vector.broadcast %cst_17 : f32 to vector<8x128xf32>
    %57 = arith.addf %56, %55 : vector<8x128xf32>
    %58 = arith.divf %56, %57 : vector<8x128xf32>
    %59 = arith.mulf %50, %11 : vector<8x128xf32>
    %60 = arith.mulf %49, %52 : vector<8x128xf32>
    %61 = arith.addf %59, %60 : vector<8x128xf32>
    %62 = math.tanh %61 : vector<8x128xf32>
    %63 = arith.mulf %58, %62 : vector<8x128xf32>
    %64 = arith.truncf %63 : vector<8x128xf32> to vector<8x128xbf16>
    %c0_18 = arith.constant 0 : index
    %c0_19 = arith.constant 0 : index
    %65 = vector.load %arg6[%c0_18, %c0_19] : memref<128x512xbf16, #tpu.memory_space<vmem>>, vector<128x512xbf16>
    %cst_20 = arith.constant dense<0.000000e+00> : vector<8x512xf32>
    %66 = tpu.matmul %64, %65, %cst_20 {dimension_numbers = #tpu.dot_dimension_numbers<[1], [0], [0], [1], [0, 0, 1, 1], [], []>} : vector<8x128xbf16>, vector<128x512xbf16>, vector<8x512xf32> -> vector<8x512xf32>
    %67 = arith.addf %66, %10 : vector<8x512xf32>
    %68 = vector.extract_strided_slice %7 {offsets = [0, 1, 0], sizes = [8, 1, 512], strides = [1, 1, 1]} : vector<8x8x512xf32> to vector<8x1x512xf32>
    %69 = vector.shape_cast %68 : vector<8x1x512xf32> to vector<8x512xf32>
    %70 = arith.truncf %38 : vector<8x128xf32> to vector<8x128xbf16>
    %c0_21 = arith.constant 0 : index
    %c0_22 = arith.constant 0 : index
    %71 = vector.load %arg3[%c0_21, %c0_22] : memref<128x512xbf16, #tpu.memory_space<vmem>>, vector<128x512xbf16>
    %cst_23 = arith.constant dense<0.000000e+00> : vector<8x512xf32>
    %72 = tpu.matmul %70, %71, %cst_23 {dimension_numbers = #tpu.dot_dimension_numbers<[1], [0], [0], [1], [0, 0, 1, 1], [], []>} : vector<8x128xbf16>, vector<128x512xbf16>, vector<8x512xf32> -> vector<8x512xf32>
    %73 = arith.addf %69, %72 : vector<8x512xf32>
    %74 = vector.extract_strided_slice %73 {offsets = [0, 0], sizes = [8, 256], strides = [1, 1]} : vector<8x512xf32> to vector<8x256xf32>
    %75 = arith.negf %74 : vector<8x256xf32>
    %76 = math.exp %75 : vector<8x256xf32>
    %cst_24 = arith.constant 1.000000e+00 : f32
    %77 = vector.broadcast %cst_24 : f32 to vector<8x256xf32>
    %78 = arith.addf %77, %76 : vector<8x256xf32>
    %79 = arith.divf %77, %78 : vector<8x256xf32>
    %80 = vector.extract_strided_slice %79 {offsets = [0, 0], sizes = [8, 128], strides = [1, 1]} : vector<8x256xf32> to vector<8x128xf32>
    %81 = vector.extract_strided_slice %79 {offsets = [0, 128], sizes = [8, 128], strides = [1, 1]} : vector<8x256xf32> to vector<8x128xf32>
    %82 = vector.extract_strided_slice %73 {offsets = [0, 256], sizes = [8, 128], strides = [1, 1]} : vector<8x512xf32> to vector<8x128xf32>
    %83 = math.tanh %82 : vector<8x128xf32>
    %84 = vector.extract_strided_slice %73 {offsets = [0, 384], sizes = [8, 128], strides = [1, 1]} : vector<8x512xf32> to vector<8x128xf32>
    %85 = arith.negf %84 : vector<8x128xf32>
    %86 = math.exp %85 : vector<8x128xf32>
    %cst_25 = arith.constant 1.000000e+00 : f32
    %87 = vector.broadcast %cst_25 : f32 to vector<8x128xf32>
    %88 = arith.addf %87, %86 : vector<8x128xf32>
    %89 = arith.divf %87, %88 : vector<8x128xf32>
    %90 = arith.mulf %81, %36 : vector<8x128xf32>
    %91 = arith.mulf %80, %83 : vector<8x128xf32>
    %92 = arith.addf %90, %91 : vector<8x128xf32>
    %93 = math.tanh %92 : vector<8x128xf32>
    %94 = arith.mulf %89, %93 : vector<8x128xf32>
    %95 = arith.truncf %94 : vector<8x128xf32> to vector<8x128xbf16>
    %c0_26 = arith.constant 0 : index
    %c0_27 = arith.constant 0 : index
    %96 = vector.load %arg5[%c0_26, %c0_27] : memref<128x512xbf16, #tpu.memory_space<vmem>>, vector<128x512xbf16>
    %cst_28 = arith.constant dense<0.000000e+00> : vector<8x512xf32>
    %97 = tpu.matmul %95, %96, %cst_28 {dimension_numbers = #tpu.dot_dimension_numbers<[1], [0], [0], [1], [0, 0, 1, 1], [], []>} : vector<8x128xbf16>, vector<128x512xbf16>, vector<8x512xf32> -> vector<8x512xf32>
    %98 = arith.addf %97, %67 : vector<8x512xf32>
    %99 = vector.extract_strided_slice %98 {offsets = [0, 0], sizes = [8, 256], strides = [1, 1]} : vector<8x512xf32> to vector<8x256xf32>
    %100 = arith.negf %99 : vector<8x256xf32>
    %101 = math.exp %100 : vector<8x256xf32>
    %cst_29 = arith.constant 1.000000e+00 : f32
    %102 = vector.broadcast %cst_29 : f32 to vector<8x256xf32>
    %103 = arith.addf %102, %101 : vector<8x256xf32>
    %104 = arith.divf %102, %103 : vector<8x256xf32>
    %105 = vector.extract_strided_slice %104 {offsets = [0, 0], sizes = [8, 128], strides = [1, 1]} : vector<8x256xf32> to vector<8x128xf32>
    %106 = vector.extract_strided_slice %104 {offsets = [0, 128], sizes = [8, 128], strides = [1, 1]} : vector<8x256xf32> to vector<8x128xf32>
    %107 = vector.extract_strided_slice %98 {offsets = [0, 256], sizes = [8, 128], strides = [1, 1]} : vector<8x512xf32> to vector<8x128xf32>
    %108 = math.tanh %107 : vector<8x128xf32>
    %109 = vector.extract_strided_slice %98 {offsets = [0, 384], sizes = [8, 128], strides = [1, 1]} : vector<8x512xf32> to vector<8x128xf32>
    %110 = arith.negf %109 : vector<8x128xf32>
    %111 = math.exp %110 : vector<8x128xf32>
    %cst_30 = arith.constant 1.000000e+00 : f32
    %112 = vector.broadcast %cst_30 : f32 to vector<8x128xf32>
    %113 = arith.addf %112, %111 : vector<8x128xf32>
    %114 = arith.divf %112, %113 : vector<8x128xf32>
    %115 = arith.mulf %106, %61 : vector<8x128xf32>
    %116 = arith.mulf %105, %108 : vector<8x128xf32>
    %117 = arith.addf %115, %116 : vector<8x128xf32>
    %118 = math.tanh %117 : vector<8x128xf32>
    %119 = arith.mulf %114, %118 : vector<8x128xf32>
    %120 = arith.truncf %119 : vector<8x128xf32> to vector<8x128xbf16>
    %c0_31 = arith.constant 0 : index
    %c0_32 = arith.constant 0 : index
    %121 = vector.load %arg6[%c0_31, %c0_32] : memref<128x512xbf16, #tpu.memory_space<vmem>>, vector<128x512xbf16>
    %cst_33 = arith.constant dense<0.000000e+00> : vector<8x512xf32>
    %122 = tpu.matmul %120, %121, %cst_33 {dimension_numbers = #tpu.dot_dimension_numbers<[1], [0], [0], [1], [0, 0, 1, 1], [], []>} : vector<8x128xbf16>, vector<128x512xbf16>, vector<8x512xf32> -> vector<8x512xf32>
    %123 = arith.addf %122, %10 : vector<8x512xf32>
    %124 = vector.extract_strided_slice %7 {offsets = [0, 2, 0], sizes = [8, 1, 512], strides = [1, 1, 1]} : vector<8x8x512xf32> to vector<8x1x512xf32>
    %125 = vector.shape_cast %124 : vector<8x1x512xf32> to vector<8x512xf32>
    %126 = arith.truncf %94 : vector<8x128xf32> to vector<8x128xbf16>
    %c0_34 = arith.constant 0 : index
    %c0_35 = arith.constant 0 : index
    %127 = vector.load %arg3[%c0_34, %c0_35] : memref<128x512xbf16, #tpu.memory_space<vmem>>, vector<128x512xbf16>
    %cst_36 = arith.constant dense<0.000000e+00> : vector<8x512xf32>
    %128 = tpu.matmul %126, %127, %cst_36 {dimension_numbers = #tpu.dot_dimension_numbers<[1], [0], [0], [1], [0, 0, 1, 1], [], []>} : vector<8x128xbf16>, vector<128x512xbf16>, vector<8x512xf32> -> vector<8x512xf32>
    %129 = arith.addf %125, %128 : vector<8x512xf32>
    %130 = vector.extract_strided_slice %129 {offsets = [0, 0], sizes = [8, 256], strides = [1, 1]} : vector<8x512xf32> to vector<8x256xf32>
    %131 = arith.negf %130 : vector<8x256xf32>
    %132 = math.exp %131 : vector<8x256xf32>
    %cst_37 = arith.constant 1.000000e+00 : f32
    %133 = vector.broadcast %cst_37 : f32 to vector<8x256xf32>
    %134 = arith.addf %133, %132 : vector<8x256xf32>
    %135 = arith.divf %133, %134 : vector<8x256xf32>
    %136 = vector.extract_strided_slice %135 {offsets = [0, 0], sizes = [8, 128], strides = [1, 1]} : vector<8x256xf32> to vector<8x128xf32>
    %137 = vector.extract_strided_slice %135 {offsets = [0, 128], sizes = [8, 128], strides = [1, 1]} : vector<8x256xf32> to vector<8x128xf32>
    %138 = vector.extract_strided_slice %129 {offsets = [0, 256], sizes = [8, 128], strides = [1, 1]} : vector<8x512xf32> to vector<8x128xf32>
    %139 = math.tanh %138 : vector<8x128xf32>
    %140 = vector.extract_strided_slice %129 {offsets = [0, 384], sizes = [8, 128], strides = [1, 1]} : vector<8x512xf32> to vector<8x128xf32>
    %141 = arith.negf %140 : vector<8x128xf32>
    %142 = math.exp %141 : vector<8x128xf32>
    %cst_38 = arith.constant 1.000000e+00 : f32
    %143 = vector.broadcast %cst_38 : f32 to vector<8x128xf32>
    %144 = arith.addf %143, %142 : vector<8x128xf32>
    %145 = arith.divf %143, %144 : vector<8x128xf32>
    %146 = arith.mulf %137, %92 : vector<8x128xf32>
    %147 = arith.mulf %136, %139 : vector<8x128xf32>
    %148 = arith.addf %146, %147 : vector<8x128xf32>
    %149 = math.tanh %148 : vector<8x128xf32>
    %150 = arith.mulf %145, %149 : vector<8x128xf32>
    %151 = arith.truncf %150 : vector<8x128xf32> to vector<8x128xbf16>
    %c0_39 = arith.constant 0 : index
    %c0_40 = arith.constant 0 : index
    %152 = vector.load %arg5[%c0_39, %c0_40] : memref<128x512xbf16, #tpu.memory_space<vmem>>, vector<128x512xbf16>
    %cst_41 = arith.constant dense<0.000000e+00> : vector<8x512xf32>
    %153 = tpu.matmul %151, %152, %cst_41 {dimension_numbers = #tpu.dot_dimension_numbers<[1], [0], [0], [1], [0, 0, 1, 1], [], []>} : vector<8x128xbf16>, vector<128x512xbf16>, vector<8x512xf32> -> vector<8x512xf32>
    %154 = arith.addf %153, %123 : vector<8x512xf32>
    %155 = vector.extract_strided_slice %154 {offsets = [0, 0], sizes = [8, 256], strides = [1, 1]} : vector<8x512xf32> to vector<8x256xf32>
    %156 = arith.negf %155 : vector<8x256xf32>
    %157 = math.exp %156 : vector<8x256xf32>
    %cst_42 = arith.constant 1.000000e+00 : f32
    %158 = vector.broadcast %cst_42 : f32 to vector<8x256xf32>
    %159 = arith.addf %158, %157 : vector<8x256xf32>
    %160 = arith.divf %158, %159 : vector<8x256xf32>
    %161 = vector.extract_strided_slice %160 {offsets = [0, 0], sizes = [8, 128], strides = [1, 1]} : vector<8x256xf32> to vector<8x128xf32>
    %162 = vector.extract_strided_slice %160 {offsets = [0, 128], sizes = [8, 128], strides = [1, 1]} : vector<8x256xf32> to vector<8x128xf32>
    %163 = vector.extract_strided_slice %154 {offsets = [0, 256], sizes = [8, 128], strides = [1, 1]} : vector<8x512xf32> to vector<8x128xf32>
    %164 = math.tanh %163 : vector<8x128xf32>
    %165 = vector.extract_strided_slice %154 {offsets = [0, 384], sizes = [8, 128], strides = [1, 1]} : vector<8x512xf32> to vector<8x128xf32>
    %166 = arith.negf %165 : vector<8x128xf32>
    %167 = math.exp %166 : vector<8x128xf32>
    %cst_43 = arith.constant 1.000000e+00 : f32
    %168 = vector.broadcast %cst_43 : f32 to vector<8x128xf32>
    %169 = arith.addf %168, %167 : vector<8x128xf32>
    %170 = arith.divf %168, %169 : vector<8x128xf32>
    %171 = arith.mulf %162, %117 : vector<8x128xf32>
    %172 = arith.mulf %161, %164 : vector<8x128xf32>
    %173 = arith.addf %171, %172 : vector<8x128xf32>
    %174 = math.tanh %173 : vector<8x128xf32>
    %175 = arith.mulf %170, %174 : vector<8x128xf32>
    %176 = arith.truncf %175 : vector<8x128xf32> to vector<8x128xbf16>
    %c0_44 = arith.constant 0 : index
    %c0_45 = arith.constant 0 : index
    %177 = vector.load %arg6[%c0_44, %c0_45] : memref<128x512xbf16, #tpu.memory_space<vmem>>, vector<128x512xbf16>
    %cst_46 = arith.constant dense<0.000000e+00> : vector<8x512xf32>
    %178 = tpu.matmul %176, %177, %cst_46 {dimension_numbers = #tpu.dot_dimension_numbers<[1], [0], [0], [1], [0, 0, 1, 1], [], []>} : vector<8x128xbf16>, vector<128x512xbf16>, vector<8x512xf32> -> vector<8x512xf32>
    %179 = arith.addf %178, %10 : vector<8x512xf32>
    %180 = vector.extract_strided_slice %7 {offsets = [0, 3, 0], sizes = [8, 1, 512], strides = [1, 1, 1]} : vector<8x8x512xf32> to vector<8x1x512xf32>
    %181 = vector.shape_cast %180 : vector<8x1x512xf32> to vector<8x512xf32>
    %182 = arith.truncf %150 : vector<8x128xf32> to vector<8x128xbf16>
    %c0_47 = arith.constant 0 : index
    %c0_48 = arith.constant 0 : index
    %183 = vector.load %arg3[%c0_47, %c0_48] : memref<128x512xbf16, #tpu.memory_space<vmem>>, vector<128x512xbf16>
    %cst_49 = arith.constant dense<0.000000e+00> : vector<8x512xf32>
    %184 = tpu.matmul %182, %183, %cst_49 {dimension_numbers = #tpu.dot_dimension_numbers<[1], [0], [0], [1], [0, 0, 1, 1], [], []>} : vector<8x128xbf16>, vector<128x512xbf16>, vector<8x512xf32> -> vector<8x512xf32>
    %185 = arith.addf %181, %184 : vector<8x512xf32>
    %186 = vector.extract_strided_slice %185 {offsets = [0, 0], sizes = [8, 256], strides = [1, 1]} : vector<8x512xf32> to vector<8x256xf32>
    %187 = arith.negf %186 : vector<8x256xf32>
    %188 = math.exp %187 : vector<8x256xf32>
    %cst_50 = arith.constant 1.000000e+00 : f32
    %189 = vector.broadcast %cst_50 : f32 to vector<8x256xf32>
    %190 = arith.addf %189, %188 : vector<8x256xf32>
    %191 = arith.divf %189, %190 : vector<8x256xf32>
    %192 = vector.extract_strided_slice %191 {offsets = [0, 0], sizes = [8, 128], strides = [1, 1]} : vector<8x256xf32> to vector<8x128xf32>
    %193 = vector.extract_strided_slice %191 {offsets = [0, 128], sizes = [8, 128], strides = [1, 1]} : vector<8x256xf32> to vector<8x128xf32>
    %194 = vector.extract_strided_slice %185 {offsets = [0, 256], sizes = [8, 128], strides = [1, 1]} : vector<8x512xf32> to vector<8x128xf32>
    %195 = math.tanh %194 : vector<8x128xf32>
    %196 = vector.extract_strided_slice %185 {offsets = [0, 384], sizes = [8, 128], strides = [1, 1]} : vector<8x512xf32> to vector<8x128xf32>
    %197 = arith.negf %196 : vector<8x128xf32>
    %198 = math.exp %197 : vector<8x128xf32>
    %cst_51 = arith.constant 1.000000e+00 : f32
    %199 = vector.broadcast %cst_51 : f32 to vector<8x128xf32>
    %200 = arith.addf %199, %198 : vector<8x128xf32>
    %201 = arith.divf %199, %200 : vector<8x128xf32>
    %202 = arith.mulf %193, %148 : vector<8x128xf32>
    %203 = arith.mulf %192, %195 : vector<8x128xf32>
    %204 = arith.addf %202, %203 : vector<8x128xf32>
    %205 = math.tanh %204 : vector<8x128xf32>
    %206 = arith.mulf %201, %205 : vector<8x128xf32>
    %207 = arith.truncf %206 : vector<8x128xf32> to vector<8x128xbf16>
    %c0_52 = arith.constant 0 : index
    %c0_53 = arith.constant 0 : index
    %208 = vector.load %arg5[%c0_52, %c0_53] : memref<128x512xbf16, #tpu.memory_space<vmem>>, vector<128x512xbf16>
    %cst_54 = arith.constant dense<0.000000e+00> : vector<8x512xf32>
    %209 = tpu.matmul %207, %208, %cst_54 {dimension_numbers = #tpu.dot_dimension_numbers<[1], [0], [0], [1], [0, 0, 1, 1], [], []>} : vector<8x128xbf16>, vector<128x512xbf16>, vector<8x512xf32> -> vector<8x512xf32>
    %210 = arith.addf %209, %179 : vector<8x512xf32>
    %211 = vector.extract_strided_slice %210 {offsets = [0, 0], sizes = [8, 256], strides = [1, 1]} : vector<8x512xf32> to vector<8x256xf32>
    %212 = arith.negf %211 : vector<8x256xf32>
    %213 = math.exp %212 : vector<8x256xf32>
    %cst_55 = arith.constant 1.000000e+00 : f32
    %214 = vector.broadcast %cst_55 : f32 to vector<8x256xf32>
    %215 = arith.addf %214, %213 : vector<8x256xf32>
    %216 = arith.divf %214, %215 : vector<8x256xf32>
    %217 = vector.extract_strided_slice %216 {offsets = [0, 0], sizes = [8, 128], strides = [1, 1]} : vector<8x256xf32> to vector<8x128xf32>
    %218 = vector.extract_strided_slice %216 {offsets = [0, 128], sizes = [8, 128], strides = [1, 1]} : vector<8x256xf32> to vector<8x128xf32>
    %219 = vector.extract_strided_slice %210 {offsets = [0, 256], sizes = [8, 128], strides = [1, 1]} : vector<8x512xf32> to vector<8x128xf32>
    %220 = math.tanh %219 : vector<8x128xf32>
    %221 = vector.extract_strided_slice %210 {offsets = [0, 384], sizes = [8, 128], strides = [1, 1]} : vector<8x512xf32> to vector<8x128xf32>
    %222 = arith.negf %221 : vector<8x128xf32>
    %223 = math.exp %222 : vector<8x128xf32>
    %cst_56 = arith.constant 1.000000e+00 : f32
    %224 = vector.broadcast %cst_56 : f32 to vector<8x128xf32>
    %225 = arith.addf %224, %223 : vector<8x128xf32>
    %226 = arith.divf %224, %225 : vector<8x128xf32>
    %227 = arith.mulf %218, %173 : vector<8x128xf32>
    %228 = arith.mulf %217, %220 : vector<8x128xf32>
    %229 = arith.addf %227, %228 : vector<8x128xf32>
    %230 = math.tanh %229 : vector<8x128xf32>
    %231 = arith.mulf %226, %230 : vector<8x128xf32>
    %232 = arith.truncf %231 : vector<8x128xf32> to vector<8x128xbf16>
    %c0_57 = arith.constant 0 : index
    %c0_58 = arith.constant 0 : index
    %233 = vector.load %arg6[%c0_57, %c0_58] : memref<128x512xbf16, #tpu.memory_space<vmem>>, vector<128x512xbf16>
    %cst_59 = arith.constant dense<0.000000e+00> : vector<8x512xf32>
    %234 = tpu.matmul %232, %233, %cst_59 {dimension_numbers = #tpu.dot_dimension_numbers<[1], [0], [0], [1], [0, 0, 1, 1], [], []>} : vector<8x128xbf16>, vector<128x512xbf16>, vector<8x512xf32> -> vector<8x512xf32>
    %235 = arith.addf %234, %10 : vector<8x512xf32>
    %236 = vector.extract_strided_slice %7 {offsets = [0, 4, 0], sizes = [8, 1, 512], strides = [1, 1, 1]} : vector<8x8x512xf32> to vector<8x1x512xf32>
    %237 = vector.shape_cast %236 : vector<8x1x512xf32> to vector<8x512xf32>
    %238 = arith.truncf %206 : vector<8x128xf32> to vector<8x128xbf16>
    %c0_60 = arith.constant 0 : index
    %c0_61 = arith.constant 0 : index
    %239 = vector.load %arg3[%c0_60, %c0_61] : memref<128x512xbf16, #tpu.memory_space<vmem>>, vector<128x512xbf16>
    %cst_62 = arith.constant dense<0.000000e+00> : vector<8x512xf32>
    %240 = tpu.matmul %238, %239, %cst_62 {dimension_numbers = #tpu.dot_dimension_numbers<[1], [0], [0], [1], [0, 0, 1, 1], [], []>} : vector<8x128xbf16>, vector<128x512xbf16>, vector<8x512xf32> -> vector<8x512xf32>
    %241 = arith.addf %237, %240 : vector<8x512xf32>
    %242 = vector.extract_strided_slice %241 {offsets = [0, 0], sizes = [8, 256], strides = [1, 1]} : vector<8x512xf32> to vector<8x256xf32>
    %243 = arith.negf %242 : vector<8x256xf32>
    %244 = math.exp %243 : vector<8x256xf32>
    %cst_63 = arith.constant 1.000000e+00 : f32
    %245 = vector.broadcast %cst_63 : f32 to vector<8x256xf32>
    %246 = arith.addf %245, %244 : vector<8x256xf32>
    %247 = arith.divf %245, %246 : vector<8x256xf32>
    %248 = vector.extract_strided_slice %247 {offsets = [0, 0], sizes = [8, 128], strides = [1, 1]} : vector<8x256xf32> to vector<8x128xf32>
    %249 = vector.extract_strided_slice %247 {offsets = [0, 128], sizes = [8, 128], strides = [1, 1]} : vector<8x256xf32> to vector<8x128xf32>
    %250 = vector.extract_strided_slice %241 {offsets = [0, 256], sizes = [8, 128], strides = [1, 1]} : vector<8x512xf32> to vector<8x128xf32>
    %251 = math.tanh %250 : vector<8x128xf32>
    %252 = vector.extract_strided_slice %241 {offsets = [0, 384], sizes = [8, 128], strides = [1, 1]} : vector<8x512xf32> to vector<8x128xf32>
    %253 = arith.negf %252 : vector<8x128xf32>
    %254 = math.exp %253 : vector<8x128xf32>
    %cst_64 = arith.constant 1.000000e+00 : f32
    %255 = vector.broadcast %cst_64 : f32 to vector<8x128xf32>
    %256 = arith.addf %255, %254 : vector<8x128xf32>
    %257 = arith.divf %255, %256 : vector<8x128xf32>
    %258 = arith.mulf %249, %204 : vector<8x128xf32>
    %259 = arith.mulf %248, %251 : vector<8x128xf32>
    %260 = arith.addf %258, %259 : vector<8x128xf32>
    %261 = math.tanh %260 : vector<8x128xf32>
    %262 = arith.mulf %257, %261 : vector<8x128xf32>
    %263 = arith.truncf %262 : vector<8x128xf32> to vector<8x128xbf16>
    %c0_65 = arith.constant 0 : index
    %c0_66 = arith.constant 0 : index
    %264 = vector.load %arg5[%c0_65, %c0_66] : memref<128x512xbf16, #tpu.memory_space<vmem>>, vector<128x512xbf16>
    %cst_67 = arith.constant dense<0.000000e+00> : vector<8x512xf32>
    %265 = tpu.matmul %263, %264, %cst_67 {dimension_numbers = #tpu.dot_dimension_numbers<[1], [0], [0], [1], [0, 0, 1, 1], [], []>} : vector<8x128xbf16>, vector<128x512xbf16>, vector<8x512xf32> -> vector<8x512xf32>
    %266 = arith.addf %265, %235 : vector<8x512xf32>
    %267 = vector.extract_strided_slice %266 {offsets = [0, 0], sizes = [8, 256], strides = [1, 1]} : vector<8x512xf32> to vector<8x256xf32>
    %268 = arith.negf %267 : vector<8x256xf32>
    %269 = math.exp %268 : vector<8x256xf32>
    %cst_68 = arith.constant 1.000000e+00 : f32
    %270 = vector.broadcast %cst_68 : f32 to vector<8x256xf32>
    %271 = arith.addf %270, %269 : vector<8x256xf32>
    %272 = arith.divf %270, %271 : vector<8x256xf32>
    %273 = vector.extract_strided_slice %272 {offsets = [0, 0], sizes = [8, 128], strides = [1, 1]} : vector<8x256xf32> to vector<8x128xf32>
    %274 = vector.extract_strided_slice %272 {offsets = [0, 128], sizes = [8, 128], strides = [1, 1]} : vector<8x256xf32> to vector<8x128xf32>
    %275 = vector.extract_strided_slice %266 {offsets = [0, 256], sizes = [8, 128], strides = [1, 1]} : vector<8x512xf32> to vector<8x128xf32>
    %276 = math.tanh %275 : vector<8x128xf32>
    %277 = vector.extract_strided_slice %266 {offsets = [0, 384], sizes = [8, 128], strides = [1, 1]} : vector<8x512xf32> to vector<8x128xf32>
    %278 = arith.negf %277 : vector<8x128xf32>
    %279 = math.exp %278 : vector<8x128xf32>
    %cst_69 = arith.constant 1.000000e+00 : f32
    %280 = vector.broadcast %cst_69 : f32 to vector<8x128xf32>
    %281 = arith.addf %280, %279 : vector<8x128xf32>
    %282 = arith.divf %280, %281 : vector<8x128xf32>
    %283 = arith.mulf %274, %229 : vector<8x128xf32>
    %284 = arith.mulf %273, %276 : vector<8x128xf32>
    %285 = arith.addf %283, %284 : vector<8x128xf32>
    %286 = math.tanh %285 : vector<8x128xf32>
    %287 = arith.mulf %282, %286 : vector<8x128xf32>
    %288 = arith.truncf %287 : vector<8x128xf32> to vector<8x128xbf16>
    %c0_70 = arith.constant 0 : index
    %c0_71 = arith.constant 0 : index
    %289 = vector.load %arg6[%c0_70, %c0_71] : memref<128x512xbf16, #tpu.memory_space<vmem>>, vector<128x512xbf16>
    %cst_72 = arith.constant dense<0.000000e+00> : vector<8x512xf32>
    %290 = tpu.matmul %288, %289, %cst_72 {dimension_numbers = #tpu.dot_dimension_numbers<[1], [0], [0], [1], [0, 0, 1, 1], [], []>} : vector<8x128xbf16>, vector<128x512xbf16>, vector<8x512xf32> -> vector<8x512xf32>
    %291 = arith.addf %290, %10 : vector<8x512xf32>
    %292 = vector.extract_strided_slice %7 {offsets = [0, 5, 0], sizes = [8, 1, 512], strides = [1, 1, 1]} : vector<8x8x512xf32> to vector<8x1x512xf32>
    %293 = vector.shape_cast %292 : vector<8x1x512xf32> to vector<8x512xf32>
    %294 = arith.truncf %262 : vector<8x128xf32> to vector<8x128xbf16>
    %c0_73 = arith.constant 0 : index
    %c0_74 = arith.constant 0 : index
    %295 = vector.load %arg3[%c0_73, %c0_74] : memref<128x512xbf16, #tpu.memory_space<vmem>>, vector<128x512xbf16>
    %cst_75 = arith.constant dense<0.000000e+00> : vector<8x512xf32>
    %296 = tpu.matmul %294, %295, %cst_75 {dimension_numbers = #tpu.dot_dimension_numbers<[1], [0], [0], [1], [0, 0, 1, 1], [], []>} : vector<8x128xbf16>, vector<128x512xbf16>, vector<8x512xf32> -> vector<8x512xf32>
    %297 = arith.addf %293, %296 : vector<8x512xf32>
    %298 = vector.extract_strided_slice %297 {offsets = [0, 0], sizes = [8, 256], strides = [1, 1]} : vector<8x512xf32> to vector<8x256xf32>
    %299 = arith.negf %298 : vector<8x256xf32>
    %300 = math.exp %299 : vector<8x256xf32>
    %cst_76 = arith.constant 1.000000e+00 : f32
    %301 = vector.broadcast %cst_76 : f32 to vector<8x256xf32>
    %302 = arith.addf %301, %300 : vector<8x256xf32>
    %303 = arith.divf %301, %302 : vector<8x256xf32>
    %304 = vector.extract_strided_slice %303 {offsets = [0, 0], sizes = [8, 128], strides = [1, 1]} : vector<8x256xf32> to vector<8x128xf32>
    %305 = vector.extract_strided_slice %303 {offsets = [0, 128], sizes = [8, 128], strides = [1, 1]} : vector<8x256xf32> to vector<8x128xf32>
    %306 = vector.extract_strided_slice %297 {offsets = [0, 256], sizes = [8, 128], strides = [1, 1]} : vector<8x512xf32> to vector<8x128xf32>
    %307 = math.tanh %306 : vector<8x128xf32>
    %308 = vector.extract_strided_slice %297 {offsets = [0, 384], sizes = [8, 128], strides = [1, 1]} : vector<8x512xf32> to vector<8x128xf32>
    %309 = arith.negf %308 : vector<8x128xf32>
    %310 = math.exp %309 : vector<8x128xf32>
    %cst_77 = arith.constant 1.000000e+00 : f32
    %311 = vector.broadcast %cst_77 : f32 to vector<8x128xf32>
    %312 = arith.addf %311, %310 : vector<8x128xf32>
    %313 = arith.divf %311, %312 : vector<8x128xf32>
    %314 = arith.mulf %305, %260 : vector<8x128xf32>
    %315 = arith.mulf %304, %307 : vector<8x128xf32>
    %316 = arith.addf %314, %315 : vector<8x128xf32>
    %317 = math.tanh %316 : vector<8x128xf32>
    %318 = arith.mulf %313, %317 : vector<8x128xf32>
    %319 = arith.truncf %318 : vector<8x128xf32> to vector<8x128xbf16>
    %c0_78 = arith.constant 0 : index
    %c0_79 = arith.constant 0 : index
    %320 = vector.load %arg5[%c0_78, %c0_79] : memref<128x512xbf16, #tpu.memory_space<vmem>>, vector<128x512xbf16>
    %cst_80 = arith.constant dense<0.000000e+00> : vector<8x512xf32>
    %321 = tpu.matmul %319, %320, %cst_80 {dimension_numbers = #tpu.dot_dimension_numbers<[1], [0], [0], [1], [0, 0, 1, 1], [], []>} : vector<8x128xbf16>, vector<128x512xbf16>, vector<8x512xf32> -> vector<8x512xf32>
    %322 = arith.addf %321, %291 : vector<8x512xf32>
    %323 = vector.extract_strided_slice %322 {offsets = [0, 0], sizes = [8, 256], strides = [1, 1]} : vector<8x512xf32> to vector<8x256xf32>
    %324 = arith.negf %323 : vector<8x256xf32>
    %325 = math.exp %324 : vector<8x256xf32>
    %cst_81 = arith.constant 1.000000e+00 : f32
    %326 = vector.broadcast %cst_81 : f32 to vector<8x256xf32>
    %327 = arith.addf %326, %325 : vector<8x256xf32>
    %328 = arith.divf %326, %327 : vector<8x256xf32>
    %329 = vector.extract_strided_slice %328 {offsets = [0, 0], sizes = [8, 128], strides = [1, 1]} : vector<8x256xf32> to vector<8x128xf32>
    %330 = vector.extract_strided_slice %328 {offsets = [0, 128], sizes = [8, 128], strides = [1, 1]} : vector<8x256xf32> to vector<8x128xf32>
    %331 = vector.extract_strided_slice %322 {offsets = [0, 256], sizes = [8, 128], strides = [1, 1]} : vector<8x512xf32> to vector<8x128xf32>
    %332 = math.tanh %331 : vector<8x128xf32>
    %333 = vector.extract_strided_slice %322 {offsets = [0, 384], sizes = [8, 128], strides = [1, 1]} : vector<8x512xf32> to vector<8x128xf32>
    %334 = arith.negf %333 : vector<8x128xf32>
    %335 = math.exp %334 : vector<8x128xf32>
    %cst_82 = arith.constant 1.000000e+00 : f32
    %336 = vector.broadcast %cst_82 : f32 to vector<8x128xf32>
    %337 = arith.addf %336, %335 : vector<8x128xf32>
    %338 = arith.divf %336, %337 : vector<8x128xf32>
    %339 = arith.mulf %330, %285 : vector<8x128xf32>
    %340 = arith.mulf %329, %332 : vector<8x128xf32>
    %341 = arith.addf %339, %340 : vector<8x128xf32>
    %342 = math.tanh %341 : vector<8x128xf32>
    %343 = arith.mulf %338, %342 : vector<8x128xf32>
    %344 = arith.truncf %343 : vector<8x128xf32> to vector<8x128xbf16>
    %c0_83 = arith.constant 0 : index
    %c0_84 = arith.constant 0 : index
    %345 = vector.load %arg6[%c0_83, %c0_84] : memref<128x512xbf16, #tpu.memory_space<vmem>>, vector<128x512xbf16>
    %cst_85 = arith.constant dense<0.000000e+00> : vector<8x512xf32>
    %346 = tpu.matmul %344, %345, %cst_85 {dimension_numbers = #tpu.dot_dimension_numbers<[1], [0], [0], [1], [0, 0, 1, 1], [], []>} : vector<8x128xbf16>, vector<128x512xbf16>, vector<8x512xf32> -> vector<8x512xf32>
    %347 = arith.addf %346, %10 : vector<8x512xf32>
    %348 = vector.extract_strided_slice %7 {offsets = [0, 6, 0], sizes = [8, 1, 512], strides = [1, 1, 1]} : vector<8x8x512xf32> to vector<8x1x512xf32>
    %349 = vector.shape_cast %348 : vector<8x1x512xf32> to vector<8x512xf32>
    %350 = arith.truncf %318 : vector<8x128xf32> to vector<8x128xbf16>
    %c0_86 = arith.constant 0 : index
    %c0_87 = arith.constant 0 : index
    %351 = vector.load %arg3[%c0_86, %c0_87] : memref<128x512xbf16, #tpu.memory_space<vmem>>, vector<128x512xbf16>
    %cst_88 = arith.constant dense<0.000000e+00> : vector<8x512xf32>
    %352 = tpu.matmul %350, %351, %cst_88 {dimension_numbers = #tpu.dot_dimension_numbers<[1], [0], [0], [1], [0, 0, 1, 1], [], []>} : vector<8x128xbf16>, vector<128x512xbf16>, vector<8x512xf32> -> vector<8x512xf32>
    %353 = arith.addf %349, %352 : vector<8x512xf32>
    %354 = vector.extract_strided_slice %353 {offsets = [0, 0], sizes = [8, 256], strides = [1, 1]} : vector<8x512xf32> to vector<8x256xf32>
    %355 = arith.negf %354 : vector<8x256xf32>
    %356 = math.exp %355 : vector<8x256xf32>
    %cst_89 = arith.constant 1.000000e+00 : f32
    %357 = vector.broadcast %cst_89 : f32 to vector<8x256xf32>
    %358 = arith.addf %357, %356 : vector<8x256xf32>
    %359 = arith.divf %357, %358 : vector<8x256xf32>
    %360 = vector.extract_strided_slice %359 {offsets = [0, 0], sizes = [8, 128], strides = [1, 1]} : vector<8x256xf32> to vector<8x128xf32>
    %361 = vector.extract_strided_slice %359 {offsets = [0, 128], sizes = [8, 128], strides = [1, 1]} : vector<8x256xf32> to vector<8x128xf32>
    %362 = vector.extract_strided_slice %353 {offsets = [0, 256], sizes = [8, 128], strides = [1, 1]} : vector<8x512xf32> to vector<8x128xf32>
    %363 = math.tanh %362 : vector<8x128xf32>
    %364 = vector.extract_strided_slice %353 {offsets = [0, 384], sizes = [8, 128], strides = [1, 1]} : vector<8x512xf32> to vector<8x128xf32>
    %365 = arith.negf %364 : vector<8x128xf32>
    %366 = math.exp %365 : vector<8x128xf32>
    %cst_90 = arith.constant 1.000000e+00 : f32
    %367 = vector.broadcast %cst_90 : f32 to vector<8x128xf32>
    %368 = arith.addf %367, %366 : vector<8x128xf32>
    %369 = arith.divf %367, %368 : vector<8x128xf32>
    %370 = arith.mulf %361, %316 : vector<8x128xf32>
    %371 = arith.mulf %360, %363 : vector<8x128xf32>
    %372 = arith.addf %370, %371 : vector<8x128xf32>
    %373 = math.tanh %372 : vector<8x128xf32>
    %374 = arith.mulf %369, %373 : vector<8x128xf32>
    %375 = arith.truncf %374 : vector<8x128xf32> to vector<8x128xbf16>
    %c0_91 = arith.constant 0 : index
    %c0_92 = arith.constant 0 : index
    %376 = vector.load %arg5[%c0_91, %c0_92] : memref<128x512xbf16, #tpu.memory_space<vmem>>, vector<128x512xbf16>
    %cst_93 = arith.constant dense<0.000000e+00> : vector<8x512xf32>
    %377 = tpu.matmul %375, %376, %cst_93 {dimension_numbers = #tpu.dot_dimension_numbers<[1], [0], [0], [1], [0, 0, 1, 1], [], []>} : vector<8x128xbf16>, vector<128x512xbf16>, vector<8x512xf32> -> vector<8x512xf32>
    %378 = arith.addf %377, %347 : vector<8x512xf32>
    %379 = vector.extract_strided_slice %378 {offsets = [0, 0], sizes = [8, 256], strides = [1, 1]} : vector<8x512xf32> to vector<8x256xf32>
    %380 = arith.negf %379 : vector<8x256xf32>
    %381 = math.exp %380 : vector<8x256xf32>
    %cst_94 = arith.constant 1.000000e+00 : f32
    %382 = vector.broadcast %cst_94 : f32 to vector<8x256xf32>
    %383 = arith.addf %382, %381 : vector<8x256xf32>
    %384 = arith.divf %382, %383 : vector<8x256xf32>
    %385 = vector.extract_strided_slice %384 {offsets = [0, 0], sizes = [8, 128], strides = [1, 1]} : vector<8x256xf32> to vector<8x128xf32>
    %386 = vector.extract_strided_slice %384 {offsets = [0, 128], sizes = [8, 128], strides = [1, 1]} : vector<8x256xf32> to vector<8x128xf32>
    %387 = vector.extract_strided_slice %378 {offsets = [0, 256], sizes = [8, 128], strides = [1, 1]} : vector<8x512xf32> to vector<8x128xf32>
    %388 = math.tanh %387 : vector<8x128xf32>
    %389 = vector.extract_strided_slice %378 {offsets = [0, 384], sizes = [8, 128], strides = [1, 1]} : vector<8x512xf32> to vector<8x128xf32>
    %390 = arith.negf %389 : vector<8x128xf32>
    %391 = math.exp %390 : vector<8x128xf32>
    %cst_95 = arith.constant 1.000000e+00 : f32
    %392 = vector.broadcast %cst_95 : f32 to vector<8x128xf32>
    %393 = arith.addf %392, %391 : vector<8x128xf32>
    %394 = arith.divf %392, %393 : vector<8x128xf32>
    %395 = arith.mulf %386, %341 : vector<8x128xf32>
    %396 = arith.mulf %385, %388 : vector<8x128xf32>
    %397 = arith.addf %395, %396 : vector<8x128xf32>
    %398 = math.tanh %397 : vector<8x128xf32>
    %399 = arith.mulf %394, %398 : vector<8x128xf32>
    %400 = arith.truncf %399 : vector<8x128xf32> to vector<8x128xbf16>
    %c0_96 = arith.constant 0 : index
    %c0_97 = arith.constant 0 : index
    %401 = vector.load %arg6[%c0_96, %c0_97] : memref<128x512xbf16, #tpu.memory_space<vmem>>, vector<128x512xbf16>
    %cst_98 = arith.constant dense<0.000000e+00> : vector<8x512xf32>
    %402 = tpu.matmul %400, %401, %cst_98 {dimension_numbers = #tpu.dot_dimension_numbers<[1], [0], [0], [1], [0, 0, 1, 1], [], []>} : vector<8x128xbf16>, vector<128x512xbf16>, vector<8x512xf32> -> vector<8x512xf32>
    %403 = arith.addf %402, %10 : vector<8x512xf32>
    %404 = vector.extract_strided_slice %7 {offsets = [0, 7, 0], sizes = [8, 1, 512], strides = [1, 1, 1]} : vector<8x8x512xf32> to vector<8x1x512xf32>
    %405 = vector.shape_cast %404 : vector<8x1x512xf32> to vector<8x512xf32>
    %406 = arith.truncf %374 : vector<8x128xf32> to vector<8x128xbf16>
    %c0_99 = arith.constant 0 : index
    %c0_100 = arith.constant 0 : index
    %407 = vector.load %arg3[%c0_99, %c0_100] : memref<128x512xbf16, #tpu.memory_space<vmem>>, vector<128x512xbf16>
    %cst_101 = arith.constant dense<0.000000e+00> : vector<8x512xf32>
    %408 = tpu.matmul %406, %407, %cst_101 {dimension_numbers = #tpu.dot_dimension_numbers<[1], [0], [0], [1], [0, 0, 1, 1], [], []>} : vector<8x128xbf16>, vector<128x512xbf16>, vector<8x512xf32> -> vector<8x512xf32>
    %409 = arith.addf %405, %408 : vector<8x512xf32>
    %410 = vector.extract_strided_slice %409 {offsets = [0, 0], sizes = [8, 256], strides = [1, 1]} : vector<8x512xf32> to vector<8x256xf32>
    %411 = arith.negf %410 : vector<8x256xf32>
    %412 = math.exp %411 : vector<8x256xf32>
    %cst_102 = arith.constant 1.000000e+00 : f32
    %413 = vector.broadcast %cst_102 : f32 to vector<8x256xf32>
    %414 = arith.addf %413, %412 : vector<8x256xf32>
    %415 = arith.divf %413, %414 : vector<8x256xf32>
    %416 = vector.extract_strided_slice %415 {offsets = [0, 0], sizes = [8, 128], strides = [1, 1]} : vector<8x256xf32> to vector<8x128xf32>
    %417 = vector.extract_strided_slice %415 {offsets = [0, 128], sizes = [8, 128], strides = [1, 1]} : vector<8x256xf32> to vector<8x128xf32>
    %418 = vector.extract_strided_slice %409 {offsets = [0, 256], sizes = [8, 128], strides = [1, 1]} : vector<8x512xf32> to vector<8x128xf32>
    %419 = math.tanh %418 : vector<8x128xf32>
    %420 = vector.extract_strided_slice %409 {offsets = [0, 384], sizes = [8, 128], strides = [1, 1]} : vector<8x512xf32> to vector<8x128xf32>
    %421 = arith.negf %420 : vector<8x128xf32>
    %422 = math.exp %421 : vector<8x128xf32>
    %cst_103 = arith.constant 1.000000e+00 : f32
    %423 = vector.broadcast %cst_103 : f32 to vector<8x128xf32>
    %424 = arith.addf %423, %422 : vector<8x128xf32>
    %425 = arith.divf %423, %424 : vector<8x128xf32>
    %426 = arith.mulf %417, %372 : vector<8x128xf32>
    %427 = arith.mulf %416, %419 : vector<8x128xf32>
    %428 = arith.addf %426, %427 : vector<8x128xf32>
    %429 = math.tanh %428 : vector<8x128xf32>
    %430 = arith.mulf %425, %429 : vector<8x128xf32>
    %431 = arith.truncf %430 : vector<8x128xf32> to vector<8x128xbf16>
    %c0_104 = arith.constant 0 : index
    %c0_105 = arith.constant 0 : index
    %432 = vector.load %arg5[%c0_104, %c0_105] : memref<128x512xbf16, #tpu.memory_space<vmem>>, vector<128x512xbf16>
    %cst_106 = arith.constant dense<0.000000e+00> : vector<8x512xf32>
    %433 = tpu.matmul %431, %432, %cst_106 {dimension_numbers = #tpu.dot_dimension_numbers<[1], [0], [0], [1], [0, 0, 1, 1], [], []>} : vector<8x128xbf16>, vector<128x512xbf16>, vector<8x512xf32> -> vector<8x512xf32>
    %434 = arith.addf %433, %403 : vector<8x512xf32>
    %435 = vector.extract_strided_slice %434 {offsets = [0, 0], sizes = [8, 256], strides = [1, 1]} : vector<8x512xf32> to vector<8x256xf32>
    %436 = arith.negf %435 : vector<8x256xf32>
    %437 = math.exp %436 : vector<8x256xf32>
    %cst_107 = arith.constant 1.000000e+00 : f32
    %438 = vector.broadcast %cst_107 : f32 to vector<8x256xf32>
    %439 = arith.addf %438, %437 : vector<8x256xf32>
    %440 = arith.divf %438, %439 : vector<8x256xf32>
    %441 = vector.extract_strided_slice %440 {offsets = [0, 0], sizes = [8, 128], strides = [1, 1]} : vector<8x256xf32> to vector<8x128xf32>
    %442 = vector.extract_strided_slice %440 {offsets = [0, 128], sizes = [8, 128], strides = [1, 1]} : vector<8x256xf32> to vector<8x128xf32>
    %443 = vector.extract_strided_slice %434 {offsets = [0, 256], sizes = [8, 128], strides = [1, 1]} : vector<8x512xf32> to vector<8x128xf32>
    %444 = math.tanh %443 : vector<8x128xf32>
    %445 = vector.extract_strided_slice %434 {offsets = [0, 384], sizes = [8, 128], strides = [1, 1]} : vector<8x512xf32> to vector<8x128xf32>
    %446 = arith.negf %445 : vector<8x128xf32>
    %447 = math.exp %446 : vector<8x128xf32>
    %cst_108 = arith.constant 1.000000e+00 : f32
    %448 = vector.broadcast %cst_108 : f32 to vector<8x128xf32>
    %449 = arith.addf %448, %447 : vector<8x128xf32>
    %450 = arith.divf %448, %449 : vector<8x128xf32>
    %451 = arith.mulf %442, %397 : vector<8x128xf32>
    %452 = arith.mulf %441, %444 : vector<8x128xf32>
    %453 = arith.addf %451, %452 : vector<8x128xf32>
    %454 = math.tanh %453 : vector<8x128xf32>
    %455 = arith.mulf %450, %454 : vector<8x128xf32>
    %c0_109 = arith.constant 0 : index
    %c0_110 = arith.constant 0 : index
    %456 = vector.load %arg8[%c0_109, %c0_110] : memref<1x128xf32, #tpu.memory_space<vmem>>, vector<1x128xf32>
    %457 = vector.broadcast %456 : vector<1x128xf32> to vector<8x128xf32>
    %458 = arith.mulf %455, %457 : vector<8x128xf32>
    %cst_111 = arith.constant dense<0.000000e+00> : vector<8xf32>
    %459 = vector.multi_reduction <add>, %458, %cst_111 [1] : vector<8x128xf32> to vector<8xf32>
    %460 = vector.shape_cast %459 : vector<8xf32> to vector<8x1xf32>
    %c0_112 = arith.constant 0 : index
    %c0_113 = arith.constant 0 : index
    %461 = vector.load %arg9[%c0_112, %c0_113] : memref<1x1xf32, #tpu.memory_space<vmem>>, vector<1x1xf32>
    %462 = vector.broadcast %461 : vector<1x1xf32> to vector<8x1xf32>
    %463 = arith.addf %460, %462 : vector<8x1xf32>
    %c0_114 = arith.constant 0 : index
    %c0_115 = arith.constant 0 : index
    %464 = vector.load %arg10[%c0_114, %c0_115] : memref<8x1xf32, #tpu.memory_space<vmem>>, vector<8x1xf32>
    tpu.vector_store %arg10[%c0_114, %c0_115], %463 {strides = array<i32>} : memref<8x1xf32, #tpu.memory_space<vmem>>, vector<8x1xf32>,
    return
  }
  func.func @transform_0(%arg0: i32) -> (i32, i32) {
    %c0_i32 = arith.constant 0 : i32
    %c0_i32_0 = arith.constant 0 : i32
    %c0_i32_1 = arith.constant 0 : i32
    return %c0_i32, %c0_i32_0 : i32, i32
  }
  func.func @transform_1(%arg0: i32) -> (i32, i32) {
    %c0_i32 = arith.constant 0 : i32
    %c0_i32_0 = arith.constant 0 : i32
    %c0_i32_1 = arith.constant 0 : i32
    return %c0_i32, %c0_i32_0 : i32, i32
  }
  func.func @transform_2(%arg0: i32) -> (i32, i32) {
    %c0_i32 = arith.constant 0 : i32
    %c0_i32_0 = arith.constant 0 : i32
    %c0_i32_1 = arith.constant 0 : i32
    return %c0_i32, %c0_i32_0 : i32, i32
  }
  func.func @transform_3(%arg0: i32) -> (i32, i32) {
    %c0_i32 = arith.constant 0 : i32
    %c0_i32_0 = arith.constant 0 : i32
    %c0_i32_1 = arith.constant 0 : i32
    return %c0_i32, %c0_i32_0 : i32, i32
  }
  func.func @transform_4(%arg0: i32) -> (i32, i32) {
    %c0_i32 = arith.constant 0 : i32
    %c0_i32_0 = arith.constant 0 : i32
    %c0_i32_1 = arith.constant 0 : i32
    return %c0_i32, %c0_i32_0 : i32, i32
  }
  func.func @transform_5(%arg0: i32) -> (i32, i32) {
    %c0_i32 = arith.constant 0 : i32
    %c0_i32_0 = arith.constant 0 : i32
    %c0_i32_1 = arith.constant 0 : i32
    return %c0_i32, %c0_i32_0 : i32, i32
  }
  func.func @transform_6(%arg0: i32) -> (i32, i32) {
    %c0_i32 = arith.constant 0 : i32
    %c0_i32_0 = arith.constant 0 : i32
    %c0_i32_1 = arith.constant 0 : i32
    return %c0_i32, %c0_i32_0 : i32, i32
  }
  func.func @transform_7(%arg0: i32) -> (i32, i32) {
    %c0_i32 = arith.constant 0 : i32
    %c0_i32_0 = arith.constant 0 : i32
    %c0_i32_1 = arith.constant 0 : i32
    return %c0_i32, %c0_i32_0 : i32, i32
  }
  func.func @transform_8(%arg0: i32) -> (i32, i32) {
    %c0_i32 = arith.constant 0 : i32
    %c0_i32_0 = arith.constant 0 : i32
    %c0_i32_1 = arith.constant 0 : i32
    return %c0_i32, %c0_i32_0 : i32, i32
  }
  func.func @transform_9(%arg0: i32) -> (i32, i32) {
    %c0_i32 = arith.constant 0 : i32
    %c0_i32_0 = arith.constant 0 : i32
    %c0_i32_1 = arith.constant 0 : i32
    return %c0_i32, %c0_i32_0 : i32, i32
  }
}

</mosaic_0001>

<bundles_post_ra>
// kernel: tpu_custom_call.1
= control target key start
LH: loop header
LB: loop body
LE: loop exit
PB: predicated region body
PF: predicated region fallthrough
CT: control target
= control target key end

     0   :  { %s10653_s0 = inlined_call_operand.vmem [shape: f32[64,5], index: 0, kind: input, shape index: {}]   ;;  %s10654_s1 = inlined_call_operand.vmem [shape: bf16[5,512], index: 1, kind: input, shape index: {}]   ;;  %s10655_s2 = inlined_call_operand.hbm [shape: bf16[128,512], index: 2, kind: input, shape index: {}]   ;;  %s10656_s3 = inlined_call_operand.vmem [shape: f32[1,512], index: 3, kind: input, shape index: {}]   ;;  %s10657_s4 = inlined_call_operand.hbm [shape: bf16[128,512], index: 4, kind: input, shape index: {}]   ;;  %s10658_s5 = inlined_call_operand.hbm [shape: bf16[128,512], index: 5, kind: input, shape index: {}]   ;;  %s10659_s6 = inlined_call_operand.vmem [shape: f32[1,512], index: 6, kind: input, shape index: {}]   ;;  %s10660_s7 = inlined_call_operand.vmem [shape: f32[1,128], index: 7, kind: input, shape index: {}]   ;;  %s10661_s8 = inlined_call_operand.<no memory space> [shape: f32[1,1], index: 8, kind: input, shape index: {}]   ;;  %s10662_s9 = inlined_call_operand.vmem [shape: f32[8,1], index: 9, kind: output, shape index: {}]  }
   0x1   :  { %v14_v0 = vstv %s10661_s8 }
   0x2   :  { %15 = vst [vmem:[#allocation2] sm:$0x1] %v14_v0 }
   0x3   :  { %16 = vsyncpa [#allocation4], 0 }
   0x4   :  { %17 = vsyncpa [#allocation6], 0  ;;  %s7854_s11 = smov [#allocation5]   ;;  %s7855_s13 = smov [#allocation3]  }
   0x5   :  { %s41_s12 = sshll.u32 %s7854_s11, 4  ;;  %s27_s14 = sshll.u32 %s7855_s13, 4  ;;  %s42_s12 = int_to_ptr.vmem [resolvable:$true] %s41_s12  ;;  %s28_s14 = int_to_ptr.vmem [resolvable:$true] %s27_s14 }
   0x6   :  { %s7798_s15 = scalar_lea.vmem %s42_s12, 4096  ;;  %p7803_p1 = scmp.lt.s32.totalorder %s42_s12, %s42_s12 }
   0x7   :  { %p7799_p0 = scmp.ne.s32.totalorder %s42_s12, %s7798_s15  ;;  %p7804_p2 = scmp.lt.s32.totalorder %s7798_s15, %s7798_s15 }
   0x9   :  { %p7805_p3 = por %p7804_p2, %p7803_p1 }
   0xb   :  { %p7806_p4 = pnand %p7805_p3, %p7799_p0 }
   0xd   :  { %7809 = shalt.err (!%p7806_p4)
}
   0xe   :  { %s7856_s16 = smov 256   ;;  %s7857_s17 = smov 16  }
   0xf   :  { %47 = dma.hbm_to_vmem [thread:$0]  %s10657_s4, 4096, %s42_s12, [#allocation6], %s7856_s16, %s7856_s16, %s7857_s17  }
  0x10   :  { %s7818_s19 = scalar_lea.vmem %s28_s14, 4096  ;;  %p7823_p6 = scmp.lt.s32.totalorder %s28_s14, %s28_s14 }
  0x11   :  { %p7819_p5 = scmp.ne.s32.totalorder %s28_s14, %s7818_s19  ;;  %p7824_p7 = scmp.lt.s32.totalorder %s7818_s19, %s7818_s19 }
  0x13   :  { %p7825_p8 = por %p7824_p7, %p7823_p6 }
  0x15   :  { %p7826_p9 = pnand %p7825_p8, %p7819_p5 }
  0x17   :  { %7829 = shalt.err (!%p7826_p9)
}
  0x18   :  { %33 = dma.hbm_to_vmem [thread:$0]  %s10655_s2, 4096, %s28_s14, [#allocation4], %s7856_s16, %s7856_s16, %s7857_s17  }
  0x19   :  { %s7858_s22 = smov [#allocation7]  }
  0x1a   :  { %s53_s23 = sshll.u32 %s7858_s22, 4  ;;  %s54_s23 = int_to_ptr.vmem [resolvable:$true] %s53_s23 }
  0x1b   :  { %s7838_s24 = scalar_lea.vmem %s54_s23, 4096  ;;  %p7843_p11 = scmp.lt.s32.totalorder %s54_s23, %s54_s23 }
  0x1c   :  { %p7839_p10 = scmp.ne.s32.totalorder %s54_s23, %s7838_s24  ;;  %p7844_p12 = scmp.lt.s32.totalorder %s7838_s24, %s7838_s24 }
  0x1e   :  { %p7845_p13 = por %p7844_p12, %p7843_p11 }
  0x20   :  { %p7846_p0 = pnand %p7845_p13, %p7839_p10 }
  0x22   :  { %7849 = shalt.err (!%p7846_p0)
}
  0x23   :  { %59 = dma.hbm_to_vmem [thread:$0]  %s10658_s5, 4096, %s54_s23, [#allocation6], %s7856_s16, %s7856_s16, %s7857_s17  }
  0x24   :  { %7850 = dma.done.wait [#allocation4], 4096  }
  0x25   :  { %7851 = vsyncadd [#allocation4], 4294963200 }
  0x26   :  { %7852 = dma.done.wait [#allocation6], 8192  }
  0x27   :  { %7853 = vsyncadd [#allocation6], 4294959104  ;;  %vm135_vm0 = vcmask 1041408   ;;  %v10667_v1 = vmov 0   ;;  %vm136_vm1 = vcmask 1042432   ;;  %v7860_v2 = vmov 65535  }
  0x28   :  { %183 = vmatprep.mubr.bf16.mxu0 %v10667_v1  ;;  %256 = vmatprep.mubr.bf16.mxu1 %v10667_v1  ;;  %v137_v3 = vsel %vm135_vm0, 4294967295, %v7860_v2  ;;  %v88_v4 = vld [vmem:[%s10654_s1] sm:$0x77]  ;;  %v89_v6 = vld [vmem:[%s10654_s1 + $0x8] sm:$0x77]  ;;  %vm122_vm2 = vcmask 39936  }
  0x29   :  { %v138_v5 = vsel %vm136_vm1, %v137_v3, 0  ;;  %v5806_v7 = vcombine.high %v88_v4, %v88_v4  ;;  %v5808_v8 = vcombine.high %v89_v6, %v89_v6  ;;  %v5805_v9 = vcombine.low %v88_v4, %v88_v4  ;;  %v76_v11 = vld [vmem:[%s10653_s0] sm:$0xff]  ;;  %v77_v12 = vld [vmem:[%s10653_s0 + $0x8] sm:$0xff]  ;;  %v78_v26 = vld [vmem:[%s10653_s0 + $0x10] sm:$0xff] }
  0x2a   :  { %v5807_v10 = vcombine.low %v89_v6, %v89_v6  ;;  %v6142_v17 = vld [vmem:[#allocation3 + $0xe4] ss:$16 sps:$4 sm:$0xff]   ;;  %v6144_v18 = vld [vmem:[#allocation3 + $0xec] ss:$16 sps:$4 sm:$0xff]   ;;  %v84_v19 = vpack.c.bf16 %v77_v12, %v76_v11  ;;  %v6146_v20 = vld [vmem:[#allocation3 + $0xe0] ss:$16 sps:$4 sm:$0xff]  }
  0x2b   :  { %v143_v13 = vand.u32 %v5806_v7, %v138_v5  ;;  %v149_v14 = vand.u32 %v5808_v8, %v138_v5  ;;  %v140_v15 = vand.u32 %v5805_v9, %v138_v5  ;;  %v6147_v21 = vld [vmem:[#allocation3 + $0xe8] ss:$16 sps:$4 sm:$0xff]   ;;  %v6148_v22 = vld [vmem:[#allocation3 + $0xc4] ss:$16 sps:$4 sm:$0xff]   ;;  %v6150_v23 = vld [vmem:[#allocation3 + $0xcc] ss:$16 sps:$4 sm:$0xff]  }
  0x2c   :  { %v146_v16 = vand.u32 %v5807_v10, %v138_v5  ;;  %v6152_v24 = vld [vmem:[#allocation3 + $0xc0] ss:$16 sps:$4 sm:$0xff]   ;;  %v6153_v25 = vld [vmem:[#allocation3 + $0xc8] ss:$16 sps:$4 sm:$0xff]   ;;  %v6154_v28 = vld [vmem:[#allocation3 + $0xa4] ss:$16 sps:$4 sm:$0xff]  }
  0x2d   :  { %165 = vmatprep.subr.bf16.mxu0 %v143_v13  ;;  %238 = vmatprep.subr.bf16.mxu1 %v149_v14  ;;  %v79_v27 = vld [vmem:[%s10653_s0 + $0x18] sm:$0xff]  ;;  %v6158_v31 = vld [vmem:[#allocation3 + $0xa0] ss:$16 sps:$4 sm:$0xff]   ;;  %v81_v38 = vld [vmem:[%s10653_s0 + $0x28] sm:$0xff]  ;;  %vm938_vm3 = vcmask 1041409   ;;  %vm941_vm4 = vcmask 1042434  }
  0x2e   :  { %166 = vmatpush1.bf16.msra.mxu0 %v140_v15  ;;  %239 = vmatpush1.bf16.msra.mxu1 %v146_v16  ;;  %v6156_v29 = vld [vmem:[#allocation3 + $0xac] ss:$16 sps:$4 sm:$0xff]   ;;  %v85_v30 = vpack.c.bf16 %v79_v27, %v78_v26  ;;  %v6159_v32 = vld [vmem:[#allocation3 + $0xa8] ss:$16 sps:$4 sm:$0xff]   ;;  %v6160_v33 = vld [vmem:[#allocation3 + $0x84] ss:$16 sps:$4 sm:$0xff]  }
  0x2f   :  { %511 = vmatprep.subr.bf16.mxu0 %v6142_v17  ;;  %552 = vmatprep.subr.bf16.mxu1 %v6144_v18  ;;  %v6162_v34 = vld [vmem:[#allocation3 + $0x8c] ss:$16 sps:$4 sm:$0xff]   ;;  %v6164_v35 = vld [vmem:[#allocation3 + $0x80] ss:$16 sps:$4 sm:$0xff]   ;;  %v6165_v36 = vld [vmem:[#allocation3 + $0x88] ss:$16 sps:$4 sm:$0xff]  }
  0x30   :  { %v80_v37 = vld [vmem:[%s10653_s0 + $0x20] sm:$0xff]  ;;  %v6171_v43 = vld [vmem:[#allocation3 + $0x68] ss:$16 sps:$4 sm:$0xff]   ;;  %v82_v48 = vld [vmem:[%s10653_s0 + $0x30] sm:$0xff]  ;;  %vm944_vm5 = vcmask 1043459   ;;  %vm947_vm6 = vcmask 1044484  }
  0x31   :  { %5809 = vmatmul.mubr.msk.bf16.vlgmr.msra.gmra.mxu0 %vm122_vm2, %v84_v19  ;;  %5813 = vmatmul.mubr.msk.bf16.vlgmr.msra.gmra.mxu1 %vm122_vm2, %v84_v19  ;;  %v6166_v39 = vld [vmem:[#allocation3 + $0x64] ss:$16 sps:$4 sm:$0xff]   ;;  %v6168_v40 = vld [vmem:[#allocation3 + $0x6c] ss:$16 sps:$4 sm:$0xff]   ;;  %v86_v41 = vpack.c.bf16 %v81_v38, %v80_v37  ;;  %v6170_v42 = vld [vmem:[#allocation3 + $0x60] ss:$16 sps:$4 sm:$0xff]  }
  0x32   :  { %512 = vmatpush1.bf16.msra.mxu0 %v6146_v20  ;;  %553 = vmatpush1.bf16.msra.mxu1 %v6147_v21  ;;  %v6172_v44 = vld [vmem:[#allocation3 + $0x44] ss:$16 sps:$4 sm:$0xff]   ;;  %v6174_v45 = vld [vmem:[#allocation3 + $0x4c] ss:$16 sps:$4 sm:$0xff]   ;;  %v6176_v46 = vld [vmem:[#allocation3 + $0x40] ss:$16 sps:$4 sm:$0xff]  }
  0x33   :  { %513 = vmatprep.subr.bf16.mxu0 %v6148_v22  ;;  %554 = vmatprep.subr.bf16.mxu1 %v6150_v23  ;;  %v6177_v47 = vld [vmem:[#allocation3 + $0x48] ss:$16 sps:$4 sm:$0xff]   ;;  %v6178_v50 = vld [vmem:[#allocation3 + $0x24] ss:$16 sps:$4 sm:$0xff]   ;;  %v6180_v51 = vld [vmem:[#allocation3 + $0x2c] ss:$16 sps:$4 sm:$0xff]  }
  0x34   :  { %193 = vmatprep.mubr.bf16.mxu0 %v10667_v1  ;;  %266 = vmatprep.mubr.bf16.mxu1 %v10667_v1  ;;  %v83_v49 = vld [vmem:[%s10653_s0 + $0x38] sm:$0xff]  ;;  %v6182_v52 = vld [vmem:[#allocation3 + $0x20] ss:$16 sps:$4 sm:$0xff]   ;;  %vm950_vm7 = vcmask 1045509   ;;  %vm953_vm8 = vcmask 1046534   ;;  %vm956_vm9 = vcmask 1047559  }
  0x35   :  { %v6183_v53 = vld [vmem:[#allocation3 + $0x28] ss:$16 sps:$4 sm:$0xff]   ;;  %v87_v54 = vpack.c.bf16 %v83_v49, %v82_v48  ;;  %v6184_v55 = vld [vmem:[#allocation3 + $0x4] ss:$16 sps:$4 sm:$0xff]   ;;  %v6186_v56 = vld [vmem:[#allocation3 + $0xc] ss:$16 sps:$4 sm:$0xff]  }
  0x36   :  { %514 = vmatpush1.bf16.msra.mxu0 %v6152_v24  ;;  %555 = vmatpush1.bf16.msra.mxu1 %v6153_v25  ;;  %v6188_v57 = vld [vmem:[#allocation3] ss:$16 sps:$4 sm:$0xff]   ;;  %v6189_v58 = vld [vmem:[#allocation3 + $0x8] ss:$16 sps:$4 sm:$0xff]   ;;  %v6190_v59 = vld [vmem:[#allocation5 + $0xe4] ss:$16 sps:$4 sm:$0xff]  }
  0x37   :  { %515 = vmatprep.subr.bf16.mxu0 %v6154_v28  ;;  %556 = vmatprep.subr.bf16.mxu1 %v6156_v29  ;;  %v6192_v60 = vld [vmem:[#allocation5 + $0xec] ss:$16 sps:$4 sm:$0xff]   ;;  %v6194_v61 = vld [vmem:[#allocation5 + $0xe0] ss:$16 sps:$4 sm:$0xff]   ;;  %v6195_v62 = vld [vmem:[#allocation5 + $0xe8] ss:$16 sps:$4 sm:$0xff]  }
  0x38   :  { %v6196_v63 = vld [vmem:[#allocation5 + $0xc4] ss:$16 sps:$4 sm:$0xff]   ;;  %v6198_v0 = vld [vmem:[#allocation5 + $0xcc] ss:$16 sps:$4 sm:$0xff]   ;;  %v6200_v2 = vld [vmem:[#allocation5 + $0xc0] ss:$16 sps:$4 sm:$0xff]  }
  0x39   :  { %5810 = vmatmul.mubr.msk.bf16.gmra.mxu0 %vm122_vm2, %v85_v30  ;;  %5814 = vmatmul.mubr.msk.bf16.gmra.mxu1 %vm122_vm2, %v85_v30  ;;  %v6201_v3 = vld [vmem:[#allocation5 + $0xc8] ss:$16 sps:$4 sm:$0xff]   ;;  %v6202_v4 = vld [vmem:[#allocation5 + $0xa4] ss:$16 sps:$4 sm:$0xff]   ;;  %v6204_v5 = vld [vmem:[#allocation5 + $0xac] ss:$16 sps:$4 sm:$0xff]  }
  0x3a   :  { %516 = vmatpush1.bf16.msra.mxu0 %v6158_v31  ;;  %557 = vmatpush1.bf16.msra.mxu1 %v6159_v32  ;;  %v6206_v6 = vld [vmem:[#allocation5 + $0xa0] ss:$16 sps:$4 sm:$0xff]   ;;  %v6207_v7 = vld [vmem:[#allocation5 + $0xa8] ss:$16 sps:$4 sm:$0xff]   ;;  %v6208_v8 = vld [vmem:[#allocation5 + $0x84] ss:$16 sps:$4 sm:$0xff]  }
  0x3b   :  { %517 = vmatprep.subr.bf16.mxu0 %v6160_v33  ;;  %558 = vmatprep.subr.bf16.mxu1 %v6162_v34  ;;  %v6210_v9 = vld [vmem:[#allocation5 + $0x8c] ss:$16 sps:$4 sm:$0xff]   ;;  %v6212_v10 = vld [vmem:[#allocation5 + $0x80] ss:$16 sps:$4 sm:$0xff]   ;;  %v6213_v11 = vld [vmem:[#allocation5 + $0x88] ss:$16 sps:$4 sm:$0xff]  }
  0x3c   :  { %203 = vmatprep.mubr.bf16.mxu0 %v10667_v1  ;;  %276 = vmatprep.mubr.bf16.mxu1 %v10667_v1  ;;  %v6214_v12 = vld [vmem:[#allocation5 + $0x64] ss:$16 sps:$4 sm:$0xff]   ;;  %v6216_v13 = vld [vmem:[#allocation5 + $0x6c] ss:$16 sps:$4 sm:$0xff]   ;;  %v6218_v14 = vld [vmem:[#allocation5 + $0x60] ss:$16 sps:$4 sm:$0xff]  }
  0x3d   :  { %v6219_v15 = vld [vmem:[#allocation5 + $0x68] ss:$16 sps:$4 sm:$0xff]   ;;  %v6220_v16 = vld [vmem:[#allocation5 + $0x44] ss:$16 sps:$4 sm:$0xff]   ;;  %v6222_v17 = vld [vmem:[#allocation5 + $0x4c] ss:$16 sps:$4 sm:$0xff]  }
  0x3e   :  { %518 = vmatpush1.bf16.msra.mxu0 %v6164_v35  ;;  %559 = vmatpush1.bf16.msra.mxu1 %v6165_v36  ;;  %v6224_v18 = vld [vmem:[#allocation5 + $0x40] ss:$16 sps:$4 sm:$0xff]   ;;  %v6225_v19 = vld [vmem:[#allocation5 + $0x48] ss:$16 sps:$4 sm:$0xff]   ;;  %v6226_v20 = vld [vmem:[#allocation5 + $0x24] ss:$16 sps:$4 sm:$0xff]  }
  0x3f   :  { %519 = vmatprep.subr.bf16.mxu0 %v6166_v39  ;;  %560 = vmatprep.subr.bf16.mxu1 %v6168_v40  ;;  %v6228_v21 = vld [vmem:[#allocation5 + $0x2c] ss:$16 sps:$4 sm:$0xff]   ;;  %v6230_v22 = vld [vmem:[#allocation5 + $0x20] ss:$16 sps:$4 sm:$0xff]   ;;  %v6231_v23 = vld [vmem:[#allocation5 + $0x28] ss:$16 sps:$4 sm:$0xff]  }
  0x40   :  { %v6232_v24 = vld [vmem:[#allocation5 + $0x4] ss:$16 sps:$4 sm:$0xff]   ;;  %v6234_v25 = vld [vmem:[#allocation5 + $0xc] ss:$16 sps:$4 sm:$0xff]   ;;  %v6236_v28 = vld [vmem:[#allocation5] ss:$16 sps:$4 sm:$0xff]  }
  0x41   :  { %5811 = vmatmul.mubr.msk.bf16.gmra.mxu0 %vm122_vm2, %v86_v41  ;;  %5815 = vmatmul.mubr.msk.bf16.gmra.mxu1 %vm122_vm2, %v86_v41  ;;  %v6237_v29 = vld [vmem:[#allocation5 + $0x8] ss:$16 sps:$4 sm:$0xff]   ;;  %vm5797_vm10 = vcmask 7168  }
  0x42   :  { %520 = vmatpush1.bf16.msra.mxu0 %v6170_v42  ;;  %561 = vmatpush1.bf16.msra.mxu1 %v6171_v43 }
  0x43   :  { %521 = vmatprep.subr.bf16.mxu0 %v6172_v44  ;;  %562 = vmatprep.subr.bf16.mxu1 %v6174_v45  ;;  %v92_v44 = vlaneseq }
  0x44   :  { %213 = vmatprep.mubr.bf16.mxu0 %v10667_v1  ;;  %286 = vmatprep.mubr.bf16.mxu1 %v10667_v1 }
  0x45   :  { %v8005_v49 = vshrl.u32 %v92_v44, 7 }
  0x46   :  { %522 = vmatpush1.bf16.msra.mxu0 %v6176_v46  ;;  %563 = vmatpush1.bf16.msra.mxu1 %v6177_v47 }
  0x47   :  { %523 = vmatprep.subr.bf16.mxu0 %v6178_v50  ;;  %564 = vmatprep.subr.bf16.mxu1 %v6180_v51 }
  0x49   :  { %5812 = vmatmul.mubr.msk.bf16.gmra.mxu0 %vm122_vm2, %v87_v54  ;;  %5816 = vmatmul.mubr.msk.bf16.gmra.mxu1 %vm122_vm2, %v87_v54  ;;  %v10666_v54 = vsub.s32 0, %v8005_v49 }
  0x4a   :  { %524 = vmatpush1.bf16.msra.mxu0 %v6182_v52  ;;  %565 = vmatpush1.bf16.msra.mxu1 %v6183_v53 }
  0x4b   :  { %525 = vmatprep.subr.bf16.mxu0 %v6184_v55  ;;  %566 = vmatprep.subr.bf16.mxu1 %v6186_v56  ;;  %v90_v55 = vld [vmem:[%s10656_s3] sm:$0xf] }
  0x4c   :  { %543 = vmatprep.mubr.bf16.mxu0 %v10667_v1  ;;  %584 = vmatprep.mubr.bf16.mxu1 %v10667_v1 }
  0x4e   :  { %526 = vmatpush1.bf16.msra.mxu0 %v6188_v57  ;;  %567 = vmatpush1.bf16.msra.mxu1 %v6189_v58  ;;  %v10663_v58 = vsub.s32 2, %v8005_v49 }
  0x4f   :  { %1120 = vmatprep.subr.bf16.mxu0 %v6190_v59  ;;  %1161 = vmatprep.subr.bf16.mxu1 %v6192_v60  ;;  %v10665_v59 = vsub.s32 1, %v8005_v49  ;;  %v10664_v60 = vsub.s32 3, %v8005_v49 }
  0x51   :  { %544 = vmatmul.mubr.bf16.vlgmr.msra.gmra.mxu0 %v10667_v1  ;;  %585 = vmatmul.mubr.bf16.vlgmr.msra.gmra.mxu1 %v10667_v1 }
  0x52   :  { %1152 = vmatprep.mubr.bf16.mxu0 %v10667_v1  ;;  %1193 = vmatprep.mubr.bf16.mxu1 %v10667_v1 }
  0x53   :  { %1121 = vmatpush1.bf16.msra.mxu0 %v6194_v61  ;;  %1162 = vmatpush1.bf16.msra.mxu1 %v6195_v62 }
  0x54   :  { %1122 = vmatprep.subr.bf16.mxu0 %v6196_v63  ;;  %1163 = vmatprep.subr.bf16.mxu1 %v6198_v0  ;;  %v95_v63 = vrot.slane %v90_v55, %v10666_v54 }
  0x57   :  { %1123 = vmatpush1.bf16.msra.mxu0 %v6200_v2  ;;  %1164 = vmatpush1.bf16.msra.mxu1 %v6201_v3  ;;  %v8032_v3 = vrot.slane %v90_v55, %v10663_v58 }
  0x58   :  { %1124 = vmatprep.subr.bf16.mxu0 %v6202_v4  ;;  %1165 = vmatprep.subr.bf16.mxu1 %v6204_v5  ;;  %v8036_v4 = vrot.slane %v90_v55, %v10665_v59  ;;  %v8040_v5 = vrot.slane %v90_v55, %v10664_v60 }
  0x5b   :  { %1125 = vmatpush1.bf16.msra.mxu0 %v6206_v6  ;;  %1166 = vmatpush1.bf16.msra.mxu1 %v6207_v7 }
  0x5c   :  { %1126 = vmatprep.subr.bf16.mxu0 %v6208_v8  ;;  %1167 = vmatprep.subr.bf16.mxu1 %v6210_v9 }
  0x5f   :  { %1127 = vmatpush1.bf16.msra.mxu0 %v6212_v10  ;;  %1168 = vmatpush1.bf16.msra.mxu1 %v6213_v11 }
  0x60   :  { %1128 = vmatprep.subr.bf16.mxu0 %v6214_v12  ;;  %1169 = vmatprep.subr.bf16.mxu1 %v6216_v13 }
  0x63   :  { %1129 = vmatpush1.bf16.msra.mxu0 %v6218_v14  ;;  %1170 = vmatpush1.bf16.msra.mxu1 %v6219_v15 }
  0x64   :  { %1130 = vmatprep.subr.bf16.mxu0 %v6220_v16  ;;  %1171 = vmatprep.subr.bf16.mxu1 %v6222_v17 }
  0x67   :  { %1131 = vmatpush1.bf16.msra.mxu0 %v6224_v18  ;;  %1172 = vmatpush1.bf16.msra.mxu1 %v6225_v19 }
  0x68   :  { %1132 = vmatprep.subr.bf16.mxu0 %v6226_v20  ;;  %1173 = vmatprep.subr.bf16.mxu1 %v6228_v21 }
  0x6b   :  { %1133 = vmatpush1.bf16.msra.mxu0 %v6230_v22  ;;  %1174 = vmatpush1.bf16.msra.mxu1 %v6231_v23 }
  0x6c   :  { %1134 = vmatprep.subr.bf16.mxu0 %v6232_v24  ;;  %1175 = vmatprep.subr.bf16.mxu1 %v6234_v25 }
  0x6f   :  { %1135 = vmatpush1.bf16.msra.mxu0 %v6236_v28  ;;  %1176 = vmatpush1.bf16.msra.mxu1 %v6237_v29 }
  0xf1   :  { %v185_v26 = vpop.f32.mrf.mxu0  ;;  %v7975_v27 = vpop.f32.mrf.mxu1 }
  0xf2   :  { %v8046_v8 = vadd.f32 %v185_v26, %v95_v63  ;;  %v8075_v44 = vadd.f32 %v7975_v27, %v8032_v3 }
  0xf3   :  { %v7977_v30 = vpop.f32.mrf.mxu0  ;;  %v7979_v31 = vpop.f32.mrf.mxu1 }
  0xf4   :  { %11004 = vst [vmem:[#allocation10_spill] sm:$0xff] %v8046_v8  ;;  %11012 = vst [vmem:[#allocation18_spill] sm:$0xff] %v8075_v44  ;;  %v8086_v27 = vadd.f32 %v7979_v31, %v8040_v5 }
  0xf5   :  { %v189_v32 = vpop.f32.mrf.mxu0  ;;  %v7981_v33 = vpop.f32.mrf.mxu1 }
  0xf6   :  { %v8048_v9 = vadd.f32 %v189_v32, %v95_v63  ;;  %11014 = vst [vmem:[#allocation20_spill] sm:$0xff] %v8086_v27 }
  0xf7   :  { %v7983_v34 = vpop.f32.mrf.mxu0  ;;  %v7985_v35 = vpop.f32.mrf.mxu1 }
  0xf8   :  { %11005 = vst [vmem:[#allocation11_spill] sm:$0xff] %v8048_v9 }
  0xf9   :  { %v195_v36 = vpop.f32.mrf.mxu0  ;;  %v7987_v37 = vpop.f32.mrf.mxu1 }
  0xfa   :  { %v8050_v10 = vadd.f32 %v195_v36, %v95_v63 }
  0xfb   :  { %v7989_v38 = vpop.f32.mrf.mxu0  ;;  %v7991_v39 = vpop.f32.mrf.mxu1 }
  0xfc   :  { %11006 = vst [vmem:[#allocation12_spill] sm:$0xff] %v8050_v10 }
  0xfd   :  { %v199_v40 = vpop.f32.mrf.mxu0  ;;  %v7993_v41 = vpop.f32.mrf.mxu1 }
  0xfe   :  { %v8052_v11 = vadd.f32 %v199_v40, %v95_v63 }
  0xff   :  { %v7995_v42 = vpop.f32.mrf.mxu0  ;;  %v7997_v43 = vpop.f32.mrf.mxu1 }
 0x100   :  { %11007 = vst [vmem:[#allocation13_spill] sm:$0xff] %v8052_v11 }
 0x101   :  { %v205_v45 = vpop.f32.mrf.mxu0  ;;  %v7999_v46 = vpop.f32.mrf.mxu1 }
 0x102   :  { %v8054_v12 = vadd.f32 %v205_v45, %v95_v63 }
 0x103   :  { %v8001_v47 = vpop.f32.mrf.mxu0  ;;  %v8003_v48 = vpop.f32.mrf.mxu1 }
 0x104   :  { %11008 = vst [vmem:[#allocation14_spill] sm:$0xff] %v8054_v12 }
 0x105   :  { %v209_v50 = vpop.f32.mrf.mxu0  ;;  %v8007_v51 = vpop.f32.mrf.mxu1 }
 0x106   :  { %v8056_v13 = vadd.f32 %v209_v50, %v95_v63 }
 0x107   :  { %v8009_v52 = vpop.f32.mrf.mxu0  ;;  %v8011_v53 = vpop.f32.mrf.mxu1 }
 0x108   :  { %11009 = vst [vmem:[#allocation15_spill] sm:$0xff] %v8056_v13 }
 0x109   :  { %v215_v56 = vpop.f32.mrf.mxu0  ;;  %v8017_v57 = vpop.f32.mrf.mxu1 }
 0x10a   :  { %v8058_v14 = vadd.f32 %v215_v56, %v95_v63 }
 0x10b   :  { %v8022_v61 = vpop.f32.mrf.mxu0  ;;  %v8024_v62 = vpop.f32.mrf.mxu1 }
 0x10c   :  { %11010 = vst [vmem:[#allocation16_spill] sm:$0xff] %v8058_v14 }
 0x10d   :  { %v219_v0 = vpop.f32.mrf.mxu0  ;;  %v8028_v2 = vpop.f32.mrf.mxu1 }
 0x10e   :  { %v8060_v15 = vadd.f32 %v219_v0, %v95_v63 }
 0x10f   :  { %v8042_v6 = vpop.f32.mrf.mxu0  ;;  %v8044_v7 = vpop.f32.mrf.mxu1 }
 0x110   :  { %11011 = vst [vmem:[#allocation17_spill] sm:$0xff] %v8060_v15 }
 0x111   :  { %v545_v16 = vpop.f32.mrf.mxu0  ;;  %v8062_v17 = vpop.f32.mrf.mxu1 }
 0x112   :  { %v597_v18 = vrot.slane %v545_v16, 1  ;;  %v601_v19 = vrot.slane %v545_v16, 2  ;;  %v605_v20 = vrot.slane %v545_v16, 3  ;;  %v609_v21 = vrot.slane %v545_v16, 4 }
 0x113   :  { %v613_v22 = vrot.slane %v545_v16, 5  ;;  %v617_v23 = vrot.slane %v545_v16, 6  ;;  %v621_v24 = vrot.slane %v545_v16, 7  ;;  %v657_v25 = vadd.f32 %v545_v16, %v8046_v8  ;;  %v8065_v26 = vpop.f32.mrf.mxu0  ;;  %v8067_v28 = vpop.f32.mrf.mxu1 }
 0x114   :  { %v661_v29 = vadd.f32 %v597_v18, %v8048_v9  ;;  %v665_v32 = vadd.f32 %v601_v19, %v8050_v10  ;;  %v669_v36 = vadd.f32 %v605_v20, %v8052_v11  ;;  %v673_v40 = vadd.f32 %v609_v21, %v8054_v12 }
 0x115   :  { %v677_v45 = vadd.f32 %v613_v22, %v8056_v13  ;;  %v681_v50 = vadd.f32 %v617_v23, %v8058_v14  ;;  %v5849_v55 = vmul.f32 -1.442695, %v657_v25  ;;  %v549_v56 = vpop.f32.mrf.mxu0  ;;  %v590_v63 = vpop.f32.mrf.mxu1  ;;  %v685_v0 = vadd.f32 %v621_v24, %v8060_v15 }
 0x116   :  { %v5851_v16 = vmul.f32 -1.442695, %v661_v29  ;;  %v5853_v18 = vmul.f32 -1.442695, %v665_v32  ;;  %v5855_v19 = vmul.f32 -1.442695, %v669_v36  ;;  %v8082_v20 = vadd.f32 %v7977_v30, %v8036_v4 }
 0x117   :  { %6286 = vpow2.f32 %v5849_v55  ;;  %v5857_v21 = vmul.f32 -1.442695, %v673_v40  ;;  %v550_v22 = vpop.f32.mrf.mxu0  ;;  %v591_v23 = vpop.f32.mrf.mxu1  ;;  %v8090_v25 = vadd.f32 %v7981_v33, %v8032_v3  ;;  %v5859_v24 = vmul.f32 -1.442695, %v677_v45 }
 0x118   :  { %11013 = vst [vmem:[#allocation19_spill] sm:$0xff] %v8082_v20  ;;  %6288 = vpow2.f32 %v5851_v16  ;;  %v599_v29 = vrot.slane %v8062_v17, 1  ;;  %v8095_v30 = vadd.f32 %v7987_v37, %v8032_v3  ;;  %v5861_v32 = vmul.f32 -1.442695, %v681_v50 }
 0x119   :  { %11015 = vst [vmem:[#allocation21_spill] sm:$0xff] %v8090_v25  ;;  %6290 = vpow2.f32 %v5853_v18  ;;  %v603_v31 = vrot.slane %v8062_v17, 2  ;;  %v8100_v36 = vadd.f32 %v7993_v41, %v8032_v3  ;;  %v5863_v40 = vmul.f32 -1.442695, %v685_v0 }
 0x11a   :  { %11016 = vst [vmem:[#allocation22_spill] sm:$0xff] %v8095_v30  ;;  %6292 = vpow2.f32 %v5855_v19  ;;  %v607_v33 = vrot.slane %v8062_v17, 3  ;;  %v8105_v45 = vadd.f32 %v7999_v46, %v8032_v3  ;;  %v611_v37 = vrot.slane %v8062_v17, 4 }
 0x11b   :  { %11017 = vst [vmem:[#allocation23_spill] sm:$0xff] %v8100_v36  ;;  %6294 = vpow2.f32 %v5857_v21  ;;  %v659_v50 = vadd.f32 %v8062_v17, %v8075_v44  ;;  %v8112_v55 = vadd.f32 %v8007_v51, %v8032_v3  ;;  %v615_v41 = vrot.slane %v8062_v17, 5 }
 0x11c   :  { %11018 = vst [vmem:[#allocation24_spill] sm:$0xff] %v8105_v45  ;;  %6296 = vpow2.f32 %v5859_v24  ;;  %v663_v56 = vadd.f32 %v599_v29, %v8090_v25  ;;  %v8118_v63 = vadd.f32 %v8017_v57, %v8032_v3  ;;  %v619_v46 = vrot.slane %v8062_v17, 6 }
 0x11d   :  { %11019 = vst [vmem:[#allocation25_spill] sm:$0xff] %v8112_v55  ;;  %6298 = vpow2.f32 %v5861_v32  ;;  %v667_v0 = vadd.f32 %v603_v31, %v8095_v30  ;;  %v8124_v16 = vadd.f32 %v8028_v2, %v8032_v3  ;;  %v623_v51 = vrot.slane %v8062_v17, 7 }
 0x11e   :  { %11020 = vst [vmem:[#allocation26_spill] sm:$0xff] %v8118_v63  ;;  %6300 = vpow2.f32 %v5863_v40  ;;  %v671_v18 = vadd.f32 %v607_v33, %v8100_v36  ;;  %v8130_v19 = vadd.f32 %v7983_v34, %v8036_v4  ;;  %v8134_v57 = vadd.f32 %v7985_v35, %v8040_v5 }
 0x11f   :  { %11021 = vst [vmem:[#allocation27_spill] sm:$0xff] %v8124_v16  ;;  %v675_v21 = vadd.f32 %v611_v37, %v8105_v45  ;;  %6302 = vtanh.f32 %v659_v50  ;;  %v8139_v2 = vadd.f32 %v7989_v38, %v8036_v4  ;;  %v8143_v3 = vadd.f32 %v7991_v39, %v8040_v5 }
 0x120   :  { %11022 = vst [vmem:[#allocation28_spill] sm:$0xff] %v8130_v19  ;;  %11023 = vst [vmem:[#allocation29_spill] sm:$0xff] %v8134_v57  ;;  %v679_v17 = vadd.f32 %v615_v41, %v8112_v55  ;;  %6304 = vtanh.f32 %v663_v56  ;;  %v8148_v34 = vadd.f32 %v7995_v42, %v8036_v4  ;;  %v8152_v35 = vadd.f32 %v7997_v43, %v8040_v5 }
 0x121   :  { %11024 = vst [vmem:[#allocation30_spill] sm:$0xff] %v8139_v2  ;;  %11025 = vst [vmem:[#allocation31_spill] sm:$0xff] %v8143_v3  ;;  %v683_v22 = vadd.f32 %v619_v46, %v8118_v63  ;;  %6306 = vtanh.f32 %v667_v0  ;;  %v8157_v38 = vadd.f32 %v8001_v47, %v8036_v4  ;;  %v8161_v39 = vadd.f32 %v8003_v48, %v8040_v5 }
 0x122   :  { %11026 = vst [vmem:[#allocation32_spill] sm:$0xff] %v8148_v34  ;;  %11027 = vst [vmem:[#allocation33_spill] sm:$0xff] %v8152_v35  ;;  %v687_v23 = vadd.f32 %v623_v51, %v8124_v16  ;;  %6308 = vtanh.f32 %v671_v18  ;;  %v8166_v42 = vadd.f32 %v8009_v52, %v8036_v4  ;;  %v8170_v43 = vadd.f32 %v8011_v53, %v8040_v5 }
 0x123   :  { %11028 = vst [vmem:[#allocation34_spill] sm:$0xff] %v8157_v38  ;;  %11029 = vst [vmem:[#allocation35_spill] sm:$0xff] %v8161_v39  ;;  %v8174_v24 = vadd.f32 %v8022_v61, %v8036_v4  ;;  %6310 = vtanh.f32 %v675_v21  ;;  %v8178_v48 = vadd.f32 %v8024_v62, %v8040_v5  ;;  %v8182_v29 = vadd.f32 %v8042_v6, %v8036_v4 }
 0x124   :  { %11030 = vst [vmem:[#allocation36_spill] sm:$0xff] %v8166_v42  ;;  %11031 = vst [vmem:[#allocation37_spill] sm:$0xff] %v8170_v43  ;;  %v6287_v47 = vpop.eup %6286  ;;  %6312 = vtanh.f32 %v679_v17  ;;  %v598_v52 = vrot.slane %v8065_v26, 1  ;;  %v8187_v53 = vadd.f32 %v8044_v7, %v8040_v5  ;;  %v602_v31 = vrot.slane %v8065_v26, 2 }
 0x125   :  { %11032 = vst [vmem:[#allocation38_spill] sm:$0xff] %v8174_v24  ;;  %11033 = vst [vmem:[#allocation39_spill] sm:$0xff] %v8178_v48  ;;  %v6289_v32 = vpop.eup %6288  ;;  %v737_v61 = vadd.f32 1.0, %v6287_v47  ;;  %6314 = vtanh.f32 %v683_v22  ;;  %v606_v62 = vrot.slane %v8065_v26, 3  ;;  %v610_v4 = vrot.slane %v8065_v26, 4 }
 0x126   :  { %11034 = vst [vmem:[#allocation40_spill] sm:$0xff] %v8182_v29  ;;  %11035 = vst [vmem:[#allocation41_spill] sm:$0xff] %v8187_v53  ;;  %v6291_v40 = vpop.eup %6290  ;;  %v739_v33 = vadd.f32 1.0, %v6289_v32  ;;  %6316 = vtanh.f32 %v687_v23  ;;  %v614_v50 = vrot.slane %v8065_v26, 5  ;;  %v658_v5 = vadd.f32 %v8065_v26, %v8082_v20 }
 0x127   :  { %v6293_v6 = vpop.eup %6292  ;;  %v741_v37 = vadd.f32 1.0, %v6291_v40  ;;  %6318 = vrcp.f32 %v737_v61  ;;  %v618_v56 = vrot.slane %v8065_v26, 6  ;;  %v662_v46 = vadd.f32 %v598_v52, %v8130_v19 }
 0x128   :  { %v6295_v7 = vpop.eup %6294  ;;  %v743_v41 = vadd.f32 1.0, %v6293_v6  ;;  %6320 = vrcp.f32 %v739_v33  ;;  %v622_v18 = vrot.slane %v8065_v26, 7  ;;  %v666_v21 = vadd.f32 %v602_v31, %v8139_v2 }
 0x129   :  { %v6297_v0 = vpop.eup %6296  ;;  %v745_v51 = vadd.f32 1.0, %v6295_v7  ;;  %6322 = vrcp.f32 %v741_v37  ;;  %v670_v23 = vadd.f32 %v606_v62, %v8148_v34  ;;  %v674_v47 = vadd.f32 %v610_v4, %v8157_v38 }
 0x12a   :  { %v6299_v17 = vpop.eup %6298  ;;  %v747_v22 = vadd.f32 1.0, %v6297_v0  ;;  %6324 = vrcp.f32 %v743_v41  ;;  %v678_v40 = vadd.f32 %v614_v50, %v8166_v42  ;;  %v5850_v52 = vmul.f32 -1.442695, %v658_v5 }
 0x12b   :  { %v6301_v32 = vpop.eup %6300  ;;  %v749_v61 = vadd.f32 1.0, %v6299_v17  ;;  %6326 = vrcp.f32 %v745_v51  ;;  %v5852_v26 = vmul.f32 -1.442695, %v662_v46  ;;  %v600_v31 = vrot.slane %v8067_v28, 1 }
 0x12c   :  { %v8202_v33 = vpop.eup %6302  ;;  %v751_v6 = vadd.f32 1.0, %v6301_v32  ;;  %6328 = vrcp.f32 %v747_v22  ;;  %v682_v62 = vadd.f32 %v618_v56, %v8174_v24  ;;  %v5854_v7 = vmul.f32 -1.442695, %v666_v21 }
 0x12d   :  { %v8205_v37 = vpop.eup %6304  ;;  %6330 = vrcp.f32 %v749_v61  ;;  %v604_v4 = vrot.slane %v8067_v28, 2  ;;  %v686_v50 = vadd.f32 %v622_v18, %v8182_v29  ;;  %v5856_v5 = vmul.f32 -1.442695, %v670_v23 }
 0x12e   :  { %v8209_v41 = vpop.eup %6306  ;;  %6332 = vrcp.f32 %v751_v6  ;;  %v608_v0 = vrot.slane %v8067_v28, 3  ;;  %v5858_v46 = vmul.f32 -1.442695, %v674_v47  ;;  %v612_v17 = vrot.slane %v8067_v28, 4 }
 0x12f   :  { %v8213_v51 = vpop.eup %6308  ;;  %6334 = vpow2.f32 %v5850_v52  ;;  %v660_v56 = vadd.f32 %v8067_v28, %v8086_v27  ;;  %v5860_v22 = vmul.f32 -1.442695, %v678_v40  ;;  %v616_v32 = vrot.slane %v8067_v28, 5 }
 0x130   :  { %v8218_v21 = vpop.eup %6310  ;;  %6336 = vpow2.f32 %v5852_v26  ;;  %v664_v18 = vadd.f32 %v600_v31, %v8134_v57  ;;  %v5862_v61 = vmul.f32 -1.442695, %v682_v62  ;;  %v620_v52 = vrot.slane %v8067_v28, 6 }
 0x131   :  { %v8222_v23 = vpop.eup %6312  ;;  %6338 = vpow2.f32 %v5854_v7  ;;  %v668_v47 = vadd.f32 %v604_v4, %v8143_v3  ;;  %v5864_v58 = vmul.f32 -1.442695, %v686_v50  ;;  %v624_v60 = vrot.slane %v8067_v28, 7 }
 0x132   :  { %v8226_v6 = vpop.eup %6314  ;;  %6340 = vpow2.f32 %v5856_v5  ;;  %v672_v40 = vadd.f32 %v608_v0, %v8152_v35  ;;  %v676_v31 = vadd.f32 %v612_v17, %v8161_v39  ;;  %v5865_v59 = vmul.f32 -1.442695, %v660_v56 }
 0x133   :  { %v8230_v26 = vpop.eup %6316  ;;  %6342 = vpow2.f32 %v5858_v46  ;;  %v680_v62 = vadd.f32 %v616_v32, %v8170_v43  ;;  %v5866_v4 = vmul.f32 -1.442695, %v664_v18  ;;  %v684_v50 = vadd.f32 %v620_v52, %v8178_v48 }
 0x134   :  { %v8233_v7 = vpop.eup %6318  ;;  %6344 = vpow2.f32 %v5860_v22  ;;  %v5867_v28 = vmul.f32 -1.442695, %v668_v47  ;;  %v688_v0 = vadd.f32 %v624_v60, %v8187_v53  ;;  %v5868_v46 = vmul.f32 -1.442695, %v672_v40 }
 0x135   :  { %v8236_v54 = vpop.eup %6320  ;;  %6346 = vpow2.f32 %v5862_v61  ;;  %v5869_v56 = vmul.f32 -1.442695, %v676_v31  ;;  %v5870_v32 = vmul.f32 -1.442695, %v680_v62  ;;  %v5871_v61 = vmul.f32 -1.442695, %v684_v50 }
 0x136   :  { %v8239_v5 = vpop.eup %6322  ;;  %6348 = vpow2.f32 %v5864_v58  ;;  %v5872_v47 = vmul.f32 -1.442695, %v688_v0 }
 0x137   :  { %v8242_v17 = vpop.eup %6324  ;;  %6350 = vpow2.f32 %v5865_v59 }
 0x138   :  { %v8244_v22 = vpop.eup %6326  ;;  %6352 = vpow2.f32 %v5866_v4 }
 0x139   :  { %v8246_v18 = vpop.eup %6328  ;;  %6354 = vpow2.f32 %v5867_v28 }
 0x13a   :  { %v8248_v52 = vpop.eup %6330  ;;  %6356 = vpow2.f32 %v5868_v46 }
 0x13b   :  { %v8250_v58 = vpop.eup %6332  ;;  %6358 = vpow2.f32 %v5869_v56 }
 0x13c   :  { %v6335_v60 = vpop.eup %6334  ;;  %6360 = vpow2.f32 %v5870_v32 }
 0x13d   :  { %v6337_v40 = vpop.eup %6336  ;;  %v738_v59 = vadd.f32 1.0, %v6335_v60  ;;  %6362 = vpow2.f32 %v5871_v61 }
 0x13e   :  { %v6339_v31 = vpop.eup %6338  ;;  %v740_v1 = vadd.f32 1.0, %v6337_v40  ;;  %6364 = vpow2.f32 %v5872_v47 }
 0x13f   :  { %v6341_v62 = vpop.eup %6340  ;;  %v742_v4 = vadd.f32 1.0, %v6339_v31  ;;  %6366 = vrcp.f32 %v738_v59 }
 0x140   :  { %v6343_v28 = vpop.eup %6342  ;;  %v744_v50 = vadd.f32 1.0, %v6341_v62  ;;  %6368 = vrcp.f32 %v740_v1 }
 0x141   :  { %v6345_v53 = vpop.eup %6344  ;;  %v746_v46 = vadd.f32 1.0, %v6343_v28  ;;  %6370 = vrcp.f32 %v742_v4 }
 0x142   :  { %v6347_v0 = vpop.eup %6346  ;;  %v748_v48 = vadd.f32 1.0, %v6345_v53  ;;  %6372 = vrcp.f32 %v744_v50 }
 0x143   :  { %v6349_v56 = vpop.eup %6348  ;;  %v750_v32 = vadd.f32 1.0, %v6347_v0  ;;  %6374 = vrcp.f32 %v746_v46 }
 0x144   :  { %v6351_v60 = vpop.eup %6350  ;;  %v752_v61 = vadd.f32 1.0, %v6349_v56  ;;  %6376 = vrcp.f32 %v748_v48 }
 0x145   :  { %v6353_v40 = vpop.eup %6352  ;;  %6378 = vrcp.f32 %v750_v32  ;;  %v817_v47 = vadd.f32 1.0, %v6351_v60 }
 0x146   :  { %v6355_v31 = vpop.eup %6354  ;;  %6380 = vrcp.f32 %v752_v61  ;;  %v818_v59 = vadd.f32 1.0, %v6353_v40  ;;  %v849_v61 = vmul.f32 %v8233_v7, %v8202_v33  ;;  %v852_v33 = vmul.f32 %v8242_v17, %v8213_v51 }
 0x147   :  { %v6357_v62 = vpop.eup %6356  ;;  %v819_v1 = vadd.f32 1.0, %v6355_v31  ;;  %6382 = vrcp.f32 %v817_v47 }
 0x148   :  { %v6359_v43 = vpop.eup %6358  ;;  %v820_v28 = vadd.f32 1.0, %v6357_v62  ;;  %6384 = vrcp.f32 %v818_v59  ;;  %v851_v62 = vmul.f32 %v8239_v5, %v8209_v41 }
 0x149   :  { %v6361_v4 = vpop.eup %6360  ;;  %v821_v39 = vadd.f32 1.0, %v6359_v43  ;;  %6386 = vrcp.f32 %v819_v1  ;;  %v850_v43 = vmul.f32 %v8236_v54, %v8205_v37  ;;  %v853_v54 = vmul.f32 %v8244_v22, %v8218_v21 }
 0x14a   :  { %v6363_v53 = vpop.eup %6362  ;;  %v822_v50 = vadd.f32 1.0, %v6361_v4  ;;  %6388 = vrcp.f32 %v820_v28  ;;  %v855_v21 = vmul.f32 %v8248_v52, %v8226_v6 }
 0x14b   :  { %v6365_v46 = vpop.eup %6364  ;;  %v823_v0 = vadd.f32 1.0, %v6363_v53  ;;  %6390 = vrcp.f32 %v821_v39 }
 0x14c   :  { %v6367_v48 = vpop.eup %6366  ;;  %v824_v56 = vadd.f32 1.0, %v6365_v46  ;;  %6392 = vrcp.f32 %v822_v50  ;;  %v854_v50 = vmul.f32 %v8246_v18, %v8222_v23  ;;  %v856_v23 = vmul.f32 %v8250_v58, %v8230_v26 }
 0x14d   :  { %v6369_v32 = vpop.eup %6368  ;;  %v841_v60 = vmul.f32 0.0, %v6367_v48  ;;  %6394 = vrcp.f32 %v823_v0 }
 0x14e   :  { %v6371_v40 = vpop.eup %6370  ;;  %v842_v31 = vmul.f32 0.0, %v6369_v32  ;;  %6396 = vrcp.f32 %v824_v56 }
 0x14f   :  { %v6373_v47 = vpop.eup %6372  ;;  %v843_v59 = vmul.f32 0.0, %v6371_v40  ;;  %v8258_v1 = vadd.f32 %v849_v61, %v841_v60 }
 0x150   :  { %v6375_v28 = vpop.eup %6374  ;;  %v844_v4 = vmul.f32 0.0, %v6373_v47  ;;  %v8262_v39 = vadd.f32 %v850_v43, %v842_v31 }
 0x151   :  { %v6377_v7 = vpop.eup %6376  ;;  %v845_v53 = vmul.f32 0.0, %v6375_v28  ;;  %v8266_v37 = vadd.f32 %v851_v62, %v843_v59  ;;  %6398 = vtanh.f32 %v8258_v1 }
 0x152   :  { %v6379_v41 = vpop.eup %6378  ;;  %v846_v5 = vmul.f32 0.0, %v6377_v7  ;;  %v8271_v46 = vadd.f32 %v852_v33, %v844_v4  ;;  %6400 = vtanh.f32 %v8262_v39 }
 0x153   :  { %v6381_v51 = vpop.eup %6380  ;;  %v847_v17 = vmul.f32 0.0, %v6379_v41  ;;  %v8274_v0 = vadd.f32 %v853_v54, %v845_v53  ;;  %6402 = vtanh.f32 %v8266_v37 }
 0x154   :  { %v848_v22 = vmul.f32 0.0, %v6381_v51  ;;  %v8279_v48 = vadd.f32 %v854_v50, %v846_v5  ;;  %6404 = vtanh.f32 %v8271_v46  ;;  %v6383_v56 = vpop.eup %6382 }
 0x155   :  { %6406 = vtanh.f32 %v8274_v0  ;;  %v8285_v18 = vadd.f32 %v855_v21, %v847_v17  ;;  %v6385_v60 = vpop.eup %6384 }
 0x156   :  { %v8287_v32 = vadd.f32 %v856_v23, %v848_v22  ;;  %6408 = vtanh.f32 %v8279_v48  ;;  %v6387_v6 = vpop.eup %6386 }
 0x157   :  { %6410 = vtanh.f32 %v8285_v18  ;;  %v6389_v52 = vpop.eup %6388 }
 0x158   :  { %6412 = vtanh.f32 %v8287_v32  ;;  %v6391_v61 = vpop.eup %6390 }
 0x159   :  { %v6393_v40 = vpop.eup %6392 }
 0x15a   :  { %v6395_v31 = vpop.eup %6394 }
 0x15b   :  { %v6397_v26 = vpop.eup %6396 }
 0x15e   :  { %v6399_v58 = vpop.eup %6398 }
 0x15f   :  { %v6401_v43 = vpop.eup %6400  ;;  %v873_v47 = vmul.f32 %v6399_v58, %v6383_v56 }
 0x160   :  { %v6403_v59 = vpop.eup %6402  ;;  %v874_v62 = vmul.f32 %v6401_v43, %v6385_v60 }
 0x161   :  { %v6405_v28 = vpop.eup %6404  ;;  %v875_v4 = vmul.f32 %v6403_v59, %v6387_v6  ;;  %v881_v33 = vpack.c.bf16 %v873_v47, %v873_v47 }
 0x162   :  { %v6407_v7 = vpop.eup %6406  ;;  %v876_v53 = vmul.f32 %v6405_v28, %v6389_v52  ;;  %v882_v54 = vpack.c.bf16 %v874_v62, %v874_v62 }
 0x163   :  { %v6409_v41 = vpop.eup %6408  ;;  %v877_v5 = vmul.f32 %v6407_v7, %v6391_v61  ;;  %v883_v50 = vpack.c.bf16 %v875_v4, %v875_v4  ;;  %v929_v60 = vunpack.c.l.b16 %v881_v33 }
 0x164   :  { %v6411_v51 = vpop.eup %6410  ;;  %v878_v17 = vmul.f32 %v6409_v41, %v6393_v40  ;;  %v884_v21 = vpack.c.bf16 %v876_v53, %v876_v53  ;;  %v930_v22 = vunpack.c.l.b16 %v882_v54 }
 0x165   :  { %v6413_v23 = vpop.eup %6412  ;;  %v879_v56 = vmul.f32 %v6411_v51, %v6395_v31  ;;  %v885_v58 = vpack.c.bf16 %v877_v5, %v877_v5  ;;  %v931_v43 = vunpack.c.l.b16 %v883_v50 }
 0x166   :  { %v880_v6 = vmul.f32 %v6413_v23, %v6397_v26  ;;  %v886_v47 = vpack.c.bf16 %v878_v17, %v878_v17  ;;  %v932_v59 = vunpack.c.l.b16 %v884_v21  ;;  %v937_v52 = vrot.slane %v930_v22, 7 }
 0x167   :  { %v887_v62 = vpack.c.bf16 %v879_v56, %v879_v56  ;;  %v933_v28 = vunpack.c.l.b16 %v885_v58  ;;  %v940_v61 = vrot.slane %v931_v43, 6  ;;  %v11036_v58 = vmov 0   ;;  %v8307_v43 = vld [vmem:[#allocation7 + $0xec] ss:$16 sps:$4 sm:$0xff]  }
 0x168   :  { %v888_v4 = vpack.c.bf16 %v880_v6, %v880_v6  ;;  %v934_v7 = vunpack.c.l.b16 %v886_v47  ;;  %v939_v40 = vsel %vm938_vm3, %v937_v52, %v929_v60  ;;  %v943_v53 = vrot.slane %v932_v59, 5  ;;  %v8305_v60 = vld [vmem:[#allocation7 + $0xe4] ss:$16 sps:$4 sm:$0xff]   ;;  %v8309_v6 = vld [vmem:[#allocation7 + $0xe0] ss:$16 sps:$4 sm:$0xff]   ;;  %1460 = vmatprep.subr.bf16.mxu1 %v8307_v43 }
 0x169   :  { %v935_v54 = vunpack.c.l.b16 %v887_v62  ;;  %v942_v41 = vsel %vm941_vm4, %v940_v61, %v939_v40  ;;  %v946_v31 = vrot.slane %v933_v28, 4  ;;  %v8311_v47 = vld [vmem:[#allocation7 + $0xe8] ss:$16 sps:$4 sm:$0xff]   ;;  %1419 = vmatprep.subr.bf16.mxu0 %v8305_v60  ;;  %v8317_v59 = vld [vmem:[#allocation7 + $0xc4] ss:$16 sps:$4 sm:$0xff]  }
 0x16a   :  { %v936_v33 = vunpack.c.l.b16 %v888_v4  ;;  %v945_v26 = vsel %vm944_vm5, %v943_v53, %v942_v41  ;;  %v949_v5 = vrot.slane %v934_v7, 3  ;;  %v8319_v52 = vld [vmem:[#allocation7 + $0xcc] ss:$16 sps:$4 sm:$0xff]   ;;  %v8321_v62 = vld [vmem:[#allocation7 + $0xc0] ss:$16 sps:$4 sm:$0xff]  }
 0x16b   :  { %v948_v50 = vsel %vm947_vm6, %v946_v31, %v945_v26  ;;  %v952_v51 = vrot.slane %v935_v54, 2  ;;  %11037 = vst [vmem:[#allocation42_spill] sm:$0xff] %v8321_v62  ;;  %v8323_v28 = vld [vmem:[#allocation7 + $0xc8] ss:$16 sps:$4 sm:$0xff]   ;;  %v8325_v61 = vld [vmem:[#allocation7 + $0xa4] ss:$16 sps:$4 sm:$0xff]  }
 0x16c   :  { %v951_v17 = vsel %vm950_vm7, %v949_v5, %v948_v50  ;;  %v955_v21 = vrot.slane %v936_v33, 1  ;;  %11038 = vst [vmem:[#allocation43_spill] sm:$0xff] %v8323_v28  ;;  %11039 = vst [vmem:[#allocation44_spill] sm:$0xff] %v8325_v61  ;;  %v8329_v4 = vld [vmem:[#allocation7 + $0xac] ss:$16 sps:$4 sm:$0xff]  }
 0x16d   :  { %v954_v22 = vsel %vm953_vm8, %v952_v51, %v951_v17  ;;  %11040 = vst [vmem:[#allocation45_spill] sm:$0xff] %v8329_v4  ;;  %v8333_v7 = vld [vmem:[#allocation7 + $0xa0] ss:$16 sps:$4 sm:$0xff]   ;;  %v8335_v40 = vld [vmem:[#allocation7 + $0xa8] ss:$16 sps:$4 sm:$0xff]  }
 0x16e   :  { %v957_v23 = vsel %vm956_vm9, %v955_v21, %v954_v22  ;;  %11041 = vst [vmem:[#allocation46_spill] sm:$0xff] %v8333_v7  ;;  %11042 = vst [vmem:[#allocation47_spill] sm:$0xff] %v8335_v40  ;;  %v8339_v53 = vld [vmem:[#allocation7 + $0x84] ss:$16 sps:$4 sm:$0xff]   ;;  %v8341_v54 = vld [vmem:[#allocation7 + $0x8c] ss:$16 sps:$4 sm:$0xff]  }
 0x16f   :  { %v8299_v56 = vpack.c.b16 %v957_v23, %v957_v23  ;;  %11043 = vst [vmem:[#allocation48_spill] sm:$0xff] %v8339_v53  ;;  %11044 = vst [vmem:[#allocation49_spill] sm:$0xff] %v8341_v54  ;;  %v8345_v41 = vld [vmem:[#allocation7 + $0x80] ss:$16 sps:$4 sm:$0xff]   ;;  %v8347_v31 = vld [vmem:[#allocation7 + $0x88] ss:$16 sps:$4 sm:$0xff]  }
 0x170   :  { %11045 = vst [vmem:[#allocation50_spill] sm:$0xff] %v8345_v41  ;;  %11046 = vst [vmem:[#allocation51_spill] sm:$0xff] %v8347_v31  ;;  %v8351_v33 = vld [vmem:[#allocation7 + $0x64] ss:$16 sps:$4 sm:$0xff]   ;;  %v8353_v26 = vld [vmem:[#allocation7 + $0x6c] ss:$16 sps:$4 sm:$0xff]  }
 0x171   :  { %1153 = vmatmul.mubr.bf16.vlgmr.msra.gmra.mxu0 %v8299_v56  ;;  %1194 = vmatmul.mubr.bf16.vlgmr.msra.gmra.mxu1 %v8299_v56  ;;  %11047 = vst [vmem:[#allocation52_spill] sm:$0xff] %v8351_v33  ;;  %11048 = vst [vmem:[#allocation53_spill] sm:$0xff] %v8353_v26  ;;  %v8357_v5 = vld [vmem:[#allocation7 + $0x60] ss:$16 sps:$4 sm:$0xff]   ;;  %v8359_v50 = vld [vmem:[#allocation7 + $0x68] ss:$16 sps:$4 sm:$0xff]  }
 0x172   :  { %1451 = vmatprep.mubr.bf16.mxu0 %v11036_v58  ;;  %1492 = vmatprep.mubr.bf16.mxu1 %v11036_v58  ;;  %11049 = vst [vmem:[#allocation54_spill] sm:$0xff] %v8357_v5  ;;  %11050 = vst [vmem:[#allocation55_spill] sm:$0xff] %v8359_v50  ;;  %v8363_v51 = vld [vmem:[#allocation7 + $0x44] ss:$16 sps:$4 sm:$0xff]   ;;  %v8365_v17 = vld [vmem:[#allocation7 + $0x4c] ss:$16 sps:$4 sm:$0xff]  }
 0x173   :  { %1420 = vmatpush1.bf16.msra.mxu0 %v8309_v6  ;;  %1461 = vmatpush1.bf16.msra.mxu1 %v8311_v47  ;;  %11051 = vst [vmem:[#allocation56_spill] sm:$0xff] %v8363_v51  ;;  %11052 = vst [vmem:[#allocation57_spill] sm:$0xff] %v8365_v17  ;;  %v8369_v21 = vld [vmem:[#allocation7 + $0x40] ss:$16 sps:$4 sm:$0xff]   ;;  %v8371_v22 = vld [vmem:[#allocation7 + $0x48] ss:$16 sps:$4 sm:$0xff]  }
 0x174   :  { %1421 = vmatprep.subr.bf16.mxu0 %v8317_v59  ;;  %1462 = vmatprep.subr.bf16.mxu1 %v8319_v52  ;;  %11053 = vst [vmem:[#allocation58_spill] sm:$0xff] %v8369_v21  ;;  %11054 = vst [vmem:[#allocation59_spill] sm:$0xff] %v8371_v22  ;;  %v8375_v23 = vld [vmem:[#allocation7 + $0x24] ss:$16 sps:$4 sm:$0xff]  }
 0x175   :  { %11055 = vst [vmem:[#allocation60_spill] sm:$0xff] %v8375_v23 }
 0x177   :  { %1422 = vmatpush1.bf16.msra.mxu0 %v8321_v62  ;;  %1463 = vmatpush1.bf16.msra.mxu1 %v8323_v28 }
 0x178   :  { %1423 = vmatprep.subr.bf16.mxu0 %v8325_v61  ;;  %1464 = vmatprep.subr.bf16.mxu1 %v8329_v4  ;;  %v11069_v61 = vsub.s32 3, %v8005_v49 }
 0x17b   :  { %1424 = vmatpush1.bf16.msra.mxu0 %v8333_v7  ;;  %1465 = vmatpush1.bf16.msra.mxu1 %v8335_v40 }
 0x17c   :  { %1425 = vmatprep.subr.bf16.mxu0 %v8339_v53  ;;  %1466 = vmatprep.subr.bf16.mxu1 %v8341_v54 }
 0x17f   :  { %1426 = vmatpush1.bf16.msra.mxu0 %v8345_v41  ;;  %1467 = vmatpush1.bf16.msra.mxu1 %v8347_v31 }
 0x180   :  { %1427 = vmatprep.subr.bf16.mxu0 %v8351_v33  ;;  %1468 = vmatprep.subr.bf16.mxu1 %v8353_v26  ;;  %v8377_v33 = vld [vmem:[#allocation7 + $0x2c] ss:$16 sps:$4 sm:$0xff]   ;;  %v8381_v26 = vld [vmem:[#allocation7 + $0x20] ss:$16 sps:$4 sm:$0xff]  }
 0x181   :  { %11056 = vst [vmem:[#allocation61_spill] sm:$0xff] %v8377_v33  ;;  %11057 = vst [vmem:[#allocation62_spill] sm:$0xff] %v8381_v26 }
 0x183   :  { %1428 = vmatpush1.bf16.msra.mxu0 %v8357_v5  ;;  %1469 = vmatpush1.bf16.msra.mxu1 %v8359_v50  ;;  %v8383_v5 = vld [vmem:[#allocation7 + $0x28] ss:$16 sps:$4 sm:$0xff]   ;;  %v8387_v50 = vld [vmem:[#allocation7 + $0x4] ss:$16 sps:$4 sm:$0xff]  }
 0x184   :  { %1429 = vmatprep.subr.bf16.mxu0 %v8363_v51  ;;  %1470 = vmatprep.subr.bf16.mxu1 %v8365_v17  ;;  %11058 = vst [vmem:[#allocation63_spill] sm:$0xff] %v8383_v5  ;;  %11059 = vst [vmem:[#allocation64_spill] sm:$0xff] %v8387_v50  ;;  %v8389_v51 = vld [vmem:[#allocation7 + $0xc] ss:$16 sps:$4 sm:$0xff]   ;;  %v8393_v17 = vld [vmem:[#allocation7] ss:$16 sps:$4 sm:$0xff]  }
 0x185   :  { %11060 = vst [vmem:[#allocation65_spill] sm:$0xff] %v8389_v51  ;;  %11061 = vst [vmem:[#allocation66_spill] sm:$0xff] %v8393_v17 }
 0x187   :  { %1430 = vmatpush1.bf16.msra.mxu0 %v8369_v21  ;;  %1471 = vmatpush1.bf16.msra.mxu1 %v8371_v22  ;;  %v8395_v21 = vld [vmem:[#allocation7 + $0x8] ss:$16 sps:$4 sm:$0xff]  }
 0x188   :  { %1431 = vmatprep.subr.bf16.mxu0 %v8375_v23  ;;  %1472 = vmatprep.subr.bf16.mxu1 %v8377_v33  ;;  %11062 = vst [vmem:[#allocation67_spill] sm:$0xff] %v8395_v21  ;;  %v8401_v33 = vld [vmem:[#allocation3 + $0xe4] ss:$16 sps:$4 sm:$0xff]   ;;  %v8404_v23 = vld [vmem:[#allocation3 + $0xec] ss:$16 sps:$4 sm:$0xff]  }
 0x189   :  { %11063 = vst [vmem:[#allocation68_spill] sm:$0xff] %v8401_v33  ;;  %11064 = vst [vmem:[#allocation69_spill] sm:$0xff] %v8404_v23 }
 0x18b   :  { %1432 = vmatpush1.bf16.msra.mxu0 %v8381_v26  ;;  %1473 = vmatpush1.bf16.msra.mxu1 %v8383_v5  ;;  %v297_v5 = vld [vmem:[%s10659_s6] sm:$0xf] }
 0x18c   :  { %1433 = vmatprep.subr.bf16.mxu0 %v8387_v50  ;;  %1474 = vmatprep.subr.bf16.mxu1 %v8389_v51  ;;  %v11065_v50 = vsub.s32 0, %v8005_v49 }
 0x18e   :  { %v8412_v26 = vrot.slane %v297_v5, %v11065_v50 }
 0x18f   :  { %1434 = vmatpush1.bf16.msra.mxu0 %v8393_v17  ;;  %1475 = vmatpush1.bf16.msra.mxu1 %v8395_v21  ;;  %v11067_v17 = vsub.s32 1, %v8005_v49 }
 0x190   :  { %1501 = vmatprep.subr.bf16.mxu0 %v8401_v33  ;;  %1542 = vmatprep.subr.bf16.mxu1 %v8404_v23  ;;  %11066 = vst [vmem:[#allocation70_spill] sm:$0xff] %v8412_v26 }
 0x191   :  { %v8416_v51 = vrot.slane %v297_v5, %v11067_v17  ;;  %v8422_v17 = vrot.slane %v297_v5, %v11069_v61 }
 0x193   :  { %11068 = vst [vmem:[#allocation71_spill] sm:$0xff] %v8416_v51  ;;  %11070 = vst [vmem:[#allocation72_spill] sm:$0xff] %v8422_v17 }
 0x231   :  { %v1154_v21 = vpop.f32.mrf.mxu0  ;;  %v1195_v22 = vpop.f32.mrf.mxu1 }
 0x232   :  { %v1155_v33 = vadd.f32 %v1154_v21, %v8412_v26  ;;  %v11071_v21 = vsub.s32 2, %v8005_v49 }
 0x233   :  { %v1156_v31 = vpop.f32.mrf.mxu0  ;;  %v1197_v41 = vpop.f32.mrf.mxu1 }
 0x234   :  { %v5905_v54 = vmul.f32 -1.442695, %v1155_v33  ;;  %v1157_v23 = vadd.f32 %v1156_v31, %v8416_v51  ;;  %v1198_v28 = vadd.f32 %v1197_v41, %v8422_v17  ;;  %v8427_v26 = vrot.slane %v297_v5, %v11071_v21 }
 0x235   :  { %v1158_v53 = vpop.f32.mrf.mxu0  ;;  %v1199_v40 = vpop.f32.mrf.mxu1 }
 0x236   :  { %6414 = vpow2.f32 %v5905_v54  ;;  %v5906_v7 = vmul.f32 -1.442695, %v1157_v23  ;;  %11072 = vst [vmem:[#allocation73_spill] sm:$0xff] %v8427_v26  ;;  %v5907_v33 = vmul.f32 -1.442695, %v1198_v28  ;;  %v1196_v53 = vadd.f32 %v1195_v22, %v8427_v26 }
 0x237   :  { %v1159_v4 = vpop.f32.mrf.mxu0  ;;  %v1200_v50 = vpop.f32.mrf.mxu1 }
 0x238   :  { %6416 = vpow2.f32 %v5906_v7 }
 0x239   :  { %6418 = vpow2.f32 %v5907_v33  ;;  %v8433_v33 = vld [vmem:[#allocation3 + $0xe0] ss:$16 sps:$4 sm:$0xff]  }
 0x23a   :  { %11074 = vst [vmem:[#allocation75_spill] sm:$0xff] %v8433_v33 }
 0x243   :  { %v6415_v62 = vpop.eup %6414 }
 0x244   :  { %v1208_v40 = vadd.f32 1.0, %v6415_v62 }
 0x245   :  { %v6417_v54 = vpop.eup %6416 }
 0x246   :  { %6420 = vrcp.f32 %v1208_v40  ;;  %v1209_v4 = vadd.f32 1.0, %v6417_v54  ;;  %v6419_v7 = vpop.eup %6418  ;;  %v8439_v40 = vld [vmem:[#allocation3 + $0xc4] ss:$16 sps:$4 sm:$0xff]   ;;  %v8442_v54 = vld [vmem:[#allocation3 + $0xcc] ss:$16 sps:$4 sm:$0xff]  }
 0x247   :  { %6422 = vtanh.f32 %v1196_v53  ;;  %v1218_v41 = vadd.f32 1.0, %v6419_v7  ;;  %v8436_v53 = vld [vmem:[#allocation3 + $0xe8] ss:$16 sps:$4 sm:$0xff]   ;;  %11076 = vst [vmem:[#allocation77_spill] sm:$0xff] %v8439_v40  ;;  %11077 = vst [vmem:[#allocation78_spill] sm:$0xff] %v8442_v54 }
 0x248   :  { %6424 = vrcp.f32 %v1209_v4  ;;  %11075 = vst [vmem:[#allocation76_spill] sm:$0xff] %v8436_v53  ;;  %v8447_v4 = vld [vmem:[#allocation3 + $0xc0] ss:$16 sps:$4 sm:$0xff]   ;;  %v8450_v7 = vld [vmem:[#allocation3 + $0xc8] ss:$16 sps:$4 sm:$0xff]  }
 0x249   :  { %6426 = vrcp.f32 %v1218_v41  ;;  %11078 = vst [vmem:[#allocation79_spill] sm:$0xff] %v8447_v4  ;;  %11079 = vst [vmem:[#allocation80_spill] sm:$0xff] %v8450_v7  ;;  %v8462_v41 = vld [vmem:[#allocation3 + $0xa8] ss:$16 sps:$4 sm:$0xff]  }
 0x24a   :  { %11083 = vst [vmem:[#allocation84_spill] sm:$0xff] %v8462_v41 }
 0x253   :  { %v6421_v61 = vpop.eup %6420 }
 0x254   :  { %v6423_v31 = vpop.eup %6422 }
 0x255   :  { %v6425_v23 = vpop.eup %6424  ;;  %v1222_v49 = vmul.f32 %v6423_v31, %v6421_v61  ;;  %v8453_v61 = vld [vmem:[#allocation3 + $0xa4] ss:$16 sps:$4 sm:$0xff]   ;;  %v8456_v31 = vld [vmem:[#allocation3 + $0xac] ss:$16 sps:$4 sm:$0xff]  }
 0x256   :  { %v1221_v50 = vmul.f32 0.0, %v6425_v23  ;;  %v6427_v28 = vpop.eup %6426  ;;  %11080 = vst [vmem:[#allocation81_spill] sm:$0xff] %v8453_v61  ;;  %11081 = vst [vmem:[#allocation82_spill] sm:$0xff] %v8456_v31  ;;  %v8459_v23 = vld [vmem:[#allocation3 + $0xa0] ss:$16 sps:$4 sm:$0xff]  }
 0x257   :  { %11082 = vst [vmem:[#allocation83_spill] sm:$0xff] %v8459_v23 }
 0x258   :  { %v8430_v5 = vadd.f32 %v1222_v49, %v1221_v50  ;;  %v8465_v50 = vld [vmem:[#allocation3 + $0x84] ss:$16 sps:$4 sm:$0xff]   ;;  %v8468_v49 = vld [vmem:[#allocation3 + $0x8c] ss:$16 sps:$4 sm:$0xff]  }
 0x259   :  { %11084 = vst [vmem:[#allocation85_spill] sm:$0xff] %v8465_v50  ;;  %11085 = vst [vmem:[#allocation86_spill] sm:$0xff] %v8468_v49 }
 0x25a   :  { %11073 = vst [vmem:[#allocation74_spill] sm:$0xff] %v8430_v5  ;;  %6428 = vtanh.f32 %v8430_v5 }
 0x267   :  { %v6429_v62 = vpop.eup %6428 }
 0x268   :  { %v1225_v22 = vmul.f32 %v6429_v62, %v6427_v28  ;;  %v8471_v28 = vld [vmem:[#allocation3 + $0x80] ss:$16 sps:$4 sm:$0xff]   ;;  %v8474_v62 = vld [vmem:[#allocation3 + $0x88] ss:$16 sps:$4 sm:$0xff]  }
 0x269   :  { %11086 = vst [vmem:[#allocation87_spill] sm:$0xff] %v8471_v28  ;;  %11087 = vst [vmem:[#allocation88_spill] sm:$0xff] %v8474_v62 }
 0x26a   :  { %v1226_v21 = vpack.c.bf16 %v1225_v22, %v1225_v22  ;;  %v8477_v22 = vld [vmem:[#allocation3 + $0x64] ss:$16 sps:$4 sm:$0xff]  }
 0x26b   :  { %11088 = vst [vmem:[#allocation89_spill] sm:$0xff] %v8477_v22 }
 0x26c   :  { %1452 = vmatmul.mubr.bf16.vlgmr.msra.gmra.mxu0 %v1226_v21  ;;  %1493 = vmatmul.mubr.bf16.vlgmr.msra.gmra.mxu1 %v1226_v21  ;;  %v8480_v21 = vld [vmem:[#allocation3 + $0x6c] ss:$16 sps:$4 sm:$0xff]  }
 0x26d   :  { %1502 = vmatpush1.bf16.msra.mxu0 %v8433_v33  ;;  %1543 = vmatpush1.bf16.msra.mxu1 %v8436_v53  ;;  %11089 = vst [vmem:[#allocation90_spill] sm:$0xff] %v8480_v21 }
 0x26e   :  { %1503 = vmatprep.subr.bf16.mxu0 %v8439_v40  ;;  %1544 = vmatprep.subr.bf16.mxu1 %v8442_v54 }
 0x26f   :  { %1533 = vmatprep.mubr.bf16.mxu0 %v11036_v58  ;;  %1574 = vmatprep.mubr.bf16.mxu1 %v11036_v58 }
 0x271   :  { %1504 = vmatpush1.bf16.msra.mxu0 %v8447_v4  ;;  %1545 = vmatpush1.bf16.msra.mxu1 %v8450_v7 }
 0x272   :  { %1505 = vmatprep.subr.bf16.mxu0 %v8453_v61  ;;  %1546 = vmatprep.subr.bf16.mxu1 %v8456_v31 }
 0x275   :  { %1506 = vmatpush1.bf16.msra.mxu0 %v8459_v23  ;;  %1547 = vmatpush1.bf16.msra.mxu1 %v8462_v41 }
 0x276   :  { %1507 = vmatprep.subr.bf16.mxu0 %v8465_v50  ;;  %1548 = vmatprep.subr.bf16.mxu1 %v8468_v49  ;;  %v8483_v50 = vld [vmem:[#allocation3 + $0x60] ss:$16 sps:$4 sm:$0xff]   ;;  %v8486_v49 = vld [vmem:[#allocation3 + $0x68] ss:$16 sps:$4 sm:$0xff]  }
 0x277   :  { %11090 = vst [vmem:[#allocation91_spill] sm:$0xff] %v8483_v50  ;;  %11091 = vst [vmem:[#allocation92_spill] sm:$0xff] %v8486_v49 }
 0x279   :  { %1508 = vmatpush1.bf16.msra.mxu0 %v8471_v28  ;;  %1549 = vmatpush1.bf16.msra.mxu1 %v8474_v62  ;;  %v8489_v28 = vld [vmem:[#allocation3 + $0x44] ss:$16 sps:$4 sm:$0xff]   ;;  %v8492_v62 = vld [vmem:[#allocation3 + $0x4c] ss:$16 sps:$4 sm:$0xff]  }
 0x27a   :  { %1509 = vmatprep.subr.bf16.mxu0 %v8477_v22  ;;  %1550 = vmatprep.subr.bf16.mxu1 %v8480_v21  ;;  %11092 = vst [vmem:[#allocation93_spill] sm:$0xff] %v8489_v28  ;;  %11093 = vst [vmem:[#allocation94_spill] sm:$0xff] %v8492_v62  ;;  %v8495_v22 = vld [vmem:[#allocation3 + $0x40] ss:$16 sps:$4 sm:$0xff]   ;;  %v8498_v21 = vld [vmem:[#allocation3 + $0x48] ss:$16 sps:$4 sm:$0xff]  }
 0x27b   :  { %11094 = vst [vmem:[#allocation95_spill] sm:$0xff] %v8495_v22  ;;  %11095 = vst [vmem:[#allocation96_spill] sm:$0xff] %v8498_v21 }
 0x27d   :  { %1510 = vmatpush1.bf16.msra.mxu0 %v8483_v50  ;;  %1551 = vmatpush1.bf16.msra.mxu1 %v8486_v49  ;;  %v8501_v50 = vld [vmem:[#allocation3 + $0x24] ss:$16 sps:$4 sm:$0xff]   ;;  %v8504_v49 = vld [vmem:[#allocation3 + $0x2c] ss:$16 sps:$4 sm:$0xff]  }
 0x27e   :  { %1511 = vmatprep.subr.bf16.mxu0 %v8489_v28  ;;  %1552 = vmatprep.subr.bf16.mxu1 %v8492_v62  ;;  %11096 = vst [vmem:[#allocation97_spill] sm:$0xff] %v8501_v50  ;;  %11097 = vst [vmem:[#allocation98_spill] sm:$0xff] %v8504_v49  ;;  %v8507_v28 = vld [vmem:[#allocation3 + $0x20] ss:$16 sps:$4 sm:$0xff]   ;;  %v8510_v62 = vld [vmem:[#allocation3 + $0x28] ss:$16 sps:$4 sm:$0xff]  }
 0x27f   :  { %11098 = vst [vmem:[#allocation99_spill] sm:$0xff] %v8507_v28  ;;  %11099 = vst [vmem:[#allocation100_spill] sm:$0xff] %v8510_v62 }
 0x281   :  { %1512 = vmatpush1.bf16.msra.mxu0 %v8495_v22  ;;  %1553 = vmatpush1.bf16.msra.mxu1 %v8498_v21  ;;  %v8513_v22 = vld [vmem:[#allocation3 + $0x4] ss:$16 sps:$4 sm:$0xff]   ;;  %v8516_v21 = vld [vmem:[#allocation3 + $0xc] ss:$16 sps:$4 sm:$0xff]  }
 0x282   :  { %1513 = vmatprep.subr.bf16.mxu0 %v8501_v50  ;;  %1554 = vmatprep.subr.bf16.mxu1 %v8504_v49  ;;  %11100 = vst [vmem:[#allocation101_spill] sm:$0xff] %v8513_v22  ;;  %11101 = vst [vmem:[#allocation102_spill] sm:$0xff] %v8516_v21  ;;  %v8519_v50 = vld [vmem:[#allocation3] ss:$16 sps:$4 sm:$0xff]   ;;  %v8522_v49 = vld [vmem:[#allocation3 + $0x8] ss:$16 sps:$4 sm:$0xff]  }
 0x283   :  { %11102 = vst [vmem:[#allocation103_spill] sm:$0xff] %v8519_v50  ;;  %11103 = vst [vmem:[#allocation104_spill] sm:$0xff] %v8522_v49 }
 0x285   :  { %1514 = vmatpush1.bf16.msra.mxu0 %v8507_v28  ;;  %1555 = vmatpush1.bf16.msra.mxu1 %v8510_v62  ;;  %v8525_v28 = vld [vmem:[#allocation5 + $0xe4] ss:$16 sps:$4 sm:$0xff]   ;;  %v8528_v62 = vld [vmem:[#allocation5 + $0xec] ss:$16 sps:$4 sm:$0xff]  }
 0x286   :  { %1515 = vmatprep.subr.bf16.mxu0 %v8513_v22  ;;  %1556 = vmatprep.subr.bf16.mxu1 %v8516_v21  ;;  %11104 = vst [vmem:[#allocation105_spill] sm:$0xff] %v8525_v28  ;;  %11105 = vst [vmem:[#allocation106_spill] sm:$0xff] %v8528_v62  ;;  %v8533_v21 = vld [vmem:[#allocation5 + $0xe0] ss:$16 sps:$4 sm:$0xff]  }
 0x287   :  { %11106 = vst [vmem:[#allocation107_spill] sm:$0xff] %v8533_v21 }
 0x289   :  { %1516 = vmatpush1.bf16.msra.mxu0 %v8519_v50  ;;  %1557 = vmatpush1.bf16.msra.mxu1 %v8522_v49  ;;  %v8536_v50 = vld [vmem:[#allocation5 + $0xe8] ss:$16 sps:$4 sm:$0xff]   ;;  %v8539_v49 = vld [vmem:[#allocation5 + $0xc4] ss:$16 sps:$4 sm:$0xff]  }
 0x28a   :  { %1935 = vmatprep.subr.bf16.mxu0 %v8525_v28  ;;  %1976 = vmatprep.subr.bf16.mxu1 %v8528_v62  ;;  %11107 = vst [vmem:[#allocation108_spill] sm:$0xff] %v8536_v50  ;;  %11108 = vst [vmem:[#allocation109_spill] sm:$0xff] %v8539_v49  ;;  %v8542_v28 = vld [vmem:[#allocation5 + $0xcc] ss:$16 sps:$4 sm:$0xff]   ;;  %v8562_v62 = vld [vmem:[#allocation5 + $0xa8] ss:$16 sps:$4 sm:$0xff]  }
 0x28b   :  { %11109 = vst [vmem:[#allocation110_spill] sm:$0xff] %v8542_v28  ;;  %11115 = vst [vmem:[#allocation116_spill] sm:$0xff] %v8562_v62 }
 0x28c   :  { %1534 = vmatmul.mubr.bf16.vlgmr.msra.gmra.mxu0 %v8299_v56  ;;  %1575 = vmatmul.mubr.bf16.vlgmr.msra.gmra.mxu1 %v8299_v56  ;;  %v8547_v56 = vld [vmem:[#allocation5 + $0xc0] ss:$16 sps:$4 sm:$0xff]  }
 0x28d   :  { %1936 = vmatpush1.bf16.msra.mxu0 %v8533_v21  ;;  %1977 = vmatpush1.bf16.msra.mxu1 %v8536_v50  ;;  %11110 = vst [vmem:[#allocation111_spill] sm:$0xff] %v8547_v56  ;;  %v8550_v21 = vld [vmem:[#allocation5 + $0xc8] ss:$16 sps:$4 sm:$0xff]   ;;  %v8553_v50 = vld [vmem:[#allocation5 + $0xa4] ss:$16 sps:$4 sm:$0xff]  }
 0x28e   :  { %1937 = vmatprep.subr.bf16.mxu0 %v8539_v49  ;;  %1978 = vmatprep.subr.bf16.mxu1 %v8542_v28  ;;  %11111 = vst [vmem:[#allocation112_spill] sm:$0xff] %v8550_v21  ;;  %11112 = vst [vmem:[#allocation113_spill] sm:$0xff] %v8553_v50  ;;  %v8556_v49 = vld [vmem:[#allocation5 + $0xac] ss:$16 sps:$4 sm:$0xff]   ;;  %v8559_v28 = vld [vmem:[#allocation5 + $0xa0] ss:$16 sps:$4 sm:$0xff]  }
 0x28f   :  { %1967 = vmatprep.mubr.bf16.mxu0 %v11036_v58  ;;  %2008 = vmatprep.mubr.bf16.mxu1 %v11036_v58  ;;  %11113 = vst [vmem:[#allocation114_spill] sm:$0xff] %v8556_v49  ;;  %11114 = vst [vmem:[#allocation115_spill] sm:$0xff] %v8559_v28 }
 0x291   :  { %1938 = vmatpush1.bf16.msra.mxu0 %v8547_v56  ;;  %1979 = vmatpush1.bf16.msra.mxu1 %v8550_v21  ;;  %v8565_v56 = vld [vmem:[#allocation5 + $0x84] ss:$16 sps:$4 sm:$0xff]   ;;  %v8568_v21 = vld [vmem:[#allocation5 + $0x8c] ss:$16 sps:$4 sm:$0xff]  }
 0x292   :  { %1939 = vmatprep.subr.bf16.mxu0 %v8553_v50  ;;  %1980 = vmatprep.subr.bf16.mxu1 %v8556_v49  ;;  %11116 = vst [vmem:[#allocation117_spill] sm:$0xff] %v8565_v56  ;;  %11117 = vst [vmem:[#allocation118_spill] sm:$0xff] %v8568_v21  ;;  %v8571_v50 = vld [vmem:[#allocation5 + $0x80] ss:$16 sps:$4 sm:$0xff]   ;;  %v8574_v49 = vld [vmem:[#allocation5 + $0x88] ss:$16 sps:$4 sm:$0xff]  }
 0x293   :  { %11118 = vst [vmem:[#allocation119_spill] sm:$0xff] %v8571_v50  ;;  %11119 = vst [vmem:[#allocation120_spill] sm:$0xff] %v8574_v49 }
 0x295   :  { %1940 = vmatpush1.bf16.msra.mxu0 %v8559_v28  ;;  %1981 = vmatpush1.bf16.msra.mxu1 %v8562_v62  ;;  %v8577_v28 = vld [vmem:[#allocation5 + $0x64] ss:$16 sps:$4 sm:$0xff]   ;;  %v8580_v62 = vld [vmem:[#allocation5 + $0x6c] ss:$16 sps:$4 sm:$0xff]  }
 0x296   :  { %1941 = vmatprep.subr.bf16.mxu0 %v8565_v56  ;;  %1982 = vmatprep.subr.bf16.mxu1 %v8568_v21  ;;  %11120 = vst [vmem:[#allocation121_spill] sm:$0xff] %v8577_v28  ;;  %11121 = vst [vmem:[#allocation122_spill] sm:$0xff] %v8580_v62  ;;  %v8583_v56 = vld [vmem:[#allocation5 + $0x60] ss:$16 sps:$4 sm:$0xff]   ;;  %v8586_v21 = vld [vmem:[#allocation5 + $0x68] ss:$16 sps:$4 sm:$0xff]  }
 0x297   :  { %11122 = vst [vmem:[#allocation123_spill] sm:$0xff] %v8583_v56  ;;  %11123 = vst [vmem:[#allocation124_spill] sm:$0xff] %v8586_v21 }
 0x299   :  { %1942 = vmatpush1.bf16.msra.mxu0 %v8571_v50  ;;  %1983 = vmatpush1.bf16.msra.mxu1 %v8574_v49  ;;  %v8589_v50 = vld [vmem:[#allocation5 + $0x44] ss:$16 sps:$4 sm:$0xff]   ;;  %v8592_v49 = vld [vmem:[#allocation5 + $0x4c] ss:$16 sps:$4 sm:$0xff]  }
 0x29a   :  { %1943 = vmatprep.subr.bf16.mxu0 %v8577_v28  ;;  %1984 = vmatprep.subr.bf16.mxu1 %v8580_v62  ;;  %11124 = vst [vmem:[#allocation125_spill] sm:$0xff] %v8589_v50  ;;  %11125 = vst [vmem:[#allocation126_spill] sm:$0xff] %v8592_v49  ;;  %v8595_v28 = vld [vmem:[#allocation5 + $0x40] ss:$16 sps:$4 sm:$0xff]   ;;  %v8598_v62 = vld [vmem:[#allocation5 + $0x48] ss:$16 sps:$4 sm:$0xff]  }
 0x29b   :  { %11126 = vst [vmem:[#allocation127_spill] sm:$0xff] %v8595_v28  ;;  %11127 = vst [vmem:[#allocation128_spill] sm:$0xff] %v8598_v62 }
 0x29d   :  { %1944 = vmatpush1.bf16.msra.mxu0 %v8583_v56  ;;  %1985 = vmatpush1.bf16.msra.mxu1 %v8586_v21  ;;  %v8601_v56 = vld [vmem:[#allocation5 + $0x24] ss:$16 sps:$4 sm:$0xff]   ;;  %v8604_v21 = vld [vmem:[#allocation5 + $0x2c] ss:$16 sps:$4 sm:$0xff]  }
 0x29e   :  { %1945 = vmatprep.subr.bf16.mxu0 %v8589_v50  ;;  %1986 = vmatprep.subr.bf16.mxu1 %v8592_v49  ;;  %11128 = vst [vmem:[#allocation129_spill] sm:$0xff] %v8601_v56  ;;  %11129 = vst [vmem:[#allocation130_spill] sm:$0xff] %v8604_v21  ;;  %v8607_v50 = vld [vmem:[#allocation5 + $0x20] ss:$16 sps:$4 sm:$0xff]   ;;  %v8610_v49 = vld [vmem:[#allocation5 + $0x28] ss:$16 sps:$4 sm:$0xff]  }
 0x29f   :  { %11130 = vst [vmem:[#allocation131_spill] sm:$0xff] %v8607_v50  ;;  %11131 = vst [vmem:[#allocation132_spill] sm:$0xff] %v8610_v49 }
 0x2a1   :  { %1946 = vmatpush1.bf16.msra.mxu0 %v8595_v28  ;;  %1987 = vmatpush1.bf16.msra.mxu1 %v8598_v62  ;;  %v8613_v28 = vld [vmem:[#allocation5 + $0x4] ss:$16 sps:$4 sm:$0xff]   ;;  %v8616_v62 = vld [vmem:[#allocation5 + $0xc] ss:$16 sps:$4 sm:$0xff]  }
 0x2a2   :  { %1947 = vmatprep.subr.bf16.mxu0 %v8601_v56  ;;  %1988 = vmatprep.subr.bf16.mxu1 %v8604_v21  ;;  %11132 = vst [vmem:[#allocation133_spill] sm:$0xff] %v8613_v28  ;;  %11133 = vst [vmem:[#allocation134_spill] sm:$0xff] %v8616_v62  ;;  %v8619_v56 = vld [vmem:[#allocation5] ss:$16 sps:$4 sm:$0xff]   ;;  %v8622_v21 = vld [vmem:[#allocation5 + $0x8] ss:$16 sps:$4 sm:$0xff]  }
 0x2a3   :  { %11134 = vst [vmem:[#allocation135_spill] sm:$0xff] %v8619_v56  ;;  %11135 = vst [vmem:[#allocation136_spill] sm:$0xff] %v8622_v21 }
 0x2a5   :  { %1948 = vmatpush1.bf16.msra.mxu0 %v8607_v50  ;;  %1989 = vmatpush1.bf16.msra.mxu1 %v8610_v49 }
 0x2a6   :  { %1949 = vmatprep.subr.bf16.mxu0 %v8613_v28  ;;  %1990 = vmatprep.subr.bf16.mxu1 %v8616_v62 }
 0x2a9   :  { %1950 = vmatpush1.bf16.msra.mxu0 %v8619_v56  ;;  %1991 = vmatpush1.bf16.msra.mxu1 %v8622_v21 }
 0x2aa   :  { %2042 = vmatprep.subr.bf16.mxu0 %v8305_v60  ;;  %2083 = vmatprep.subr.bf16.mxu1 %v8307_v43 }
 0x32c   :  { %v8627_v49 = vpop.f32.mrf.mxu0  ;;  %v8629_v50 = vpop.f32.mrf.mxu1 }
 0x32d   :  { %11136 = vst [vmem:[#allocation137_spill] sm:$0xff] %v8627_v49  ;;  %11137 = vst [vmem:[#allocation138_spill] sm:$0xff] %v8629_v50 }
 0x32e   :  { %v8631_v28 = vpop.f32.mrf.mxu0  ;;  %v8633_v22 = vpop.f32.mrf.mxu1 }
 0x32f   :  { %11138 = vst [vmem:[#allocation139_spill] sm:$0xff] %v8631_v28  ;;  %11139 = vst [vmem:[#allocation140_spill] sm:$0xff] %v8633_v22 }
 0x330   :  { %v1457_v62 = vpop.f32.mrf.mxu0  ;;  %v1498_v41 = vpop.f32.mrf.mxu1 }
 0x332   :  { %v1458_v23 = vpop.f32.mrf.mxu0  ;;  %v1499_v56 = vpop.f32.mrf.mxu1 }
 0x34c   :  { %v1535_v31 = vpop.f32.mrf.mxu0  ;;  %v1576_v61 = vpop.f32.mrf.mxu1 }
 0x34d   :  { %v1587_v7 = vrot.slane %v1535_v31, 7  ;;  %v1591_v21 = vrot.slane %v1535_v31, 1  ;;  %v1595_v4 = vrot.slane %v1535_v31, 2  ;;  %v1599_v60 = vrot.slane %v1535_v31, 3 }
 0x34e   :  { %v1603_v54 = vrot.slane %v1535_v31, 4  ;;  %v1607_v43 = vrot.slane %v1535_v31, 5  ;;  %v1611_v40 = vrot.slane %v1535_v31, 6  ;;  %v1651_v53 = vadd.f32 %v1535_v31, %v8048_v9  ;;  %v8636_v33 = vpop.f32.mrf.mxu0  ;;  %v8638_v5 = vpop.f32.mrf.mxu1 }
 0x34f   :  { %v1647_v62 = vadd.f32 %v1587_v7, %v8046_v8  ;;  %v1655_v23 = vadd.f32 %v1591_v21, %v8050_v10  ;;  %v1659_v41 = vadd.f32 %v1595_v4, %v8052_v11  ;;  %v1663_v56 = vadd.f32 %v1599_v60, %v8054_v12 }
 0x350   :  { %v1667_v50 = vadd.f32 %v1603_v54, %v8056_v13  ;;  %v1671_v26 = vadd.f32 %v1607_v43, %v8058_v14  ;;  %v5942_v22 = vmul.f32 -1.442695, %v1651_v53  ;;  %v1539_v17 = vpop.f32.mrf.mxu0  ;;  %v1580_v28 = vpop.f32.mrf.mxu1  ;;  %v1675_v31 = vadd.f32 %v1611_v40, %v8060_v15 }
 0x351   :  { %v5940_v9 = vmul.f32 -1.442695, %v1647_v62  ;;  %v5944_v51 = vmul.f32 -1.442695, %v1655_v23  ;;  %v5946_v49 = vmul.f32 -1.442695, %v1659_v41 }
 0x352   :  { %6430 = vpow2.f32 %v5942_v22  ;;  %v5948_v7 = vmul.f32 -1.442695, %v1663_v56  ;;  %v1540_v8 = vpop.f32.mrf.mxu0  ;;  %v1581_v21 = vpop.f32.mrf.mxu1  ;;  %v5950_v4 = vmul.f32 -1.442695, %v1667_v50  ;;  %v1589_v11 = vrot.slane %v1576_v61, 7 }
 0x353   :  { %6432 = vpow2.f32 %v5940_v9  ;;  %v5952_v60 = vmul.f32 -1.442695, %v1671_v26  ;;  %v1593_v54 = vrot.slane %v1576_v61, 1  ;;  %v5954_v43 = vmul.f32 -1.442695, %v1675_v31 }
 0x354   :  { %6434 = vpow2.f32 %v5944_v51  ;;  %v1597_v53 = vrot.slane %v1576_v61, 2  ;;  %v1601_v17 = vrot.slane %v1576_v61, 3  ;;  %v1649_v40 = vadd.f32 %v1589_v11, %v8075_v44 }
 0x355   :  { %6436 = vpow2.f32 %v5946_v49  ;;  %v1605_v28 = vrot.slane %v1576_v61, 4  ;;  %v1653_v22 = vadd.f32 %v1576_v61, %v8090_v25  ;;  %v1609_v8 = vrot.slane %v1576_v61, 5 }
 0x356   :  { %6438 = vpow2.f32 %v5948_v7  ;;  %v1657_v9 = vadd.f32 %v1593_v54, %v8095_v30  ;;  %v1613_v50 = vrot.slane %v1576_v61, 6  ;;  %v1661_v26 = vadd.f32 %v1597_v53, %v8100_v36 }
 0x357   :  { %6440 = vpow2.f32 %v5950_v4  ;;  %v1665_v51 = vadd.f32 %v1601_v17, %v8105_v45  ;;  %v1669_v49 = vadd.f32 %v1605_v28, %v8112_v55  ;;  %v1673_v11 = vadd.f32 %v1609_v8, %v8118_v63 }
 0x358   :  { %6442 = vpow2.f32 %v5952_v60  ;;  %v1677_v62 = vadd.f32 %v1613_v50, %v8124_v16  ;;  %v1588_v23 = vrot.slane %v8636_v33, 7  ;;  %v1592_v31 = vrot.slane %v8636_v33, 1 }
 0x359   :  { %6444 = vpow2.f32 %v5954_v43  ;;  %v1596_v4 = vrot.slane %v8636_v33, 2  ;;  %v1600_v60 = vrot.slane %v8636_v33, 3  ;;  %v1604_v53 = vrot.slane %v8636_v33, 4 }
 0x35a   :  { %6446 = vtanh.f32 %v1649_v40  ;;  %v1648_v17 = vadd.f32 %v1588_v23, %v8082_v20  ;;  %v1652_v8 = vadd.f32 %v8636_v33, %v8130_v19 }
 0x35b   :  { %6448 = vtanh.f32 %v1653_v22  ;;  %v1608_v22 = vrot.slane %v8636_v33, 5  ;;  %v1664_v23 = vadd.f32 %v1600_v60, %v8157_v38  ;;  %v1594_v60 = vrot.slane %v8638_v5, 1 }
 0x35c   :  { %6450 = vtanh.f32 %v1657_v9 }
 0x35d   :  { %6452 = vtanh.f32 %v1661_v26  ;;  %v1612_v26 = vrot.slane %v8636_v33, 6  ;;  %v1668_v33 = vadd.f32 %v1604_v53, %v8166_v42  ;;  %v5949_v53 = vmul.f32 -1.442695, %v1664_v23 }
 0x35e   :  { %6454 = vtanh.f32 %v1665_v51  ;;  %v1656_v51 = vadd.f32 %v1592_v31, %v8139_v2  ;;  %v5943_v31 = vmul.f32 -1.442695, %v1652_v8  ;;  %v1602_v8 = vrot.slane %v8638_v5, 3 }
 0x35f   :  { %v6431_v41 = vpop.eup %6430  ;;  %6456 = vtanh.f32 %v1669_v49  ;;  %v1658_v23 = vadd.f32 %v1594_v60, %v8143_v3 }
 0x360   :  { %v6433_v61 = vpop.eup %6432  ;;  %v1729_v56 = vadd.f32 1.0, %v6431_v41  ;;  %6458 = vtanh.f32 %v1673_v11 }
 0x361   :  { %v6435_v7 = vpop.eup %6434  ;;  %v1727_v21 = vadd.f32 1.0, %v6433_v61  ;;  %6460 = vtanh.f32 %v1677_v62  ;;  %v1660_v62 = vadd.f32 %v1596_v4, %v8148_v34  ;;  %v1672_v4 = vadd.f32 %v1608_v22, %v8174_v24 }
 0x362   :  { %v6437_v54 = vpop.eup %6436  ;;  %v1731_v43 = vadd.f32 1.0, %v6435_v7  ;;  %6462 = vrcp.f32 %v1729_v56  ;;  %v5941_v56 = vmul.f32 -1.442695, %v1648_v17  ;;  %v1590_v7 = vrot.slane %v8638_v5, 7 }
 0x363   :  { %v6439_v40 = vpop.eup %6438  ;;  %v1733_v28 = vadd.f32 1.0, %v6437_v54  ;;  %6464 = vrcp.f32 %v1727_v21  ;;  %v1676_v17 = vadd.f32 %v1612_v26, %v8182_v29  ;;  %v1654_v26 = vadd.f32 %v8638_v5, %v8134_v57  ;;  %v11140_v57 = vld [vmem:[#allocation35_spill] sm:$0xff] }
 0x364   :  { %v6441_v9 = vpop.eup %6440  ;;  %v1735_v50 = vadd.f32 1.0, %v6439_v40  ;;  %6466 = vrcp.f32 %v1731_v43  ;;  %v5945_v40 = vmul.f32 -1.442695, %v1656_v51  ;;  %v5951_v51 = vmul.f32 -1.442695, %v1668_v33 }
 0x365   :  { %v6443_v49 = vpop.eup %6442  ;;  %v1737_v11 = vadd.f32 1.0, %v6441_v9  ;;  %6468 = vrcp.f32 %v1733_v28  ;;  %v5947_v9 = vmul.f32 -1.442695, %v1660_v62  ;;  %v1666_v29 = vadd.f32 %v1602_v8, %v11140_v57 }
 0x366   :  { %v6445_v41 = vpop.eup %6444  ;;  %v1739_v61 = vadd.f32 1.0, %v6443_v49  ;;  %6470 = vrcp.f32 %v1735_v50  ;;  %v1598_v50 = vrot.slane %v8638_v5, 2  ;;  %v5957_v60 = vmul.f32 -1.442695, %v1654_v26 }
 0x367   :  { %v8669_v21 = vpop.eup %6446  ;;  %v1741_v54 = vadd.f32 1.0, %v6445_v41  ;;  %6472 = vrcp.f32 %v1737_v11  ;;  %v1650_v11 = vadd.f32 %v1590_v7, %v8086_v27  ;;  %v1606_v41 = vrot.slane %v8638_v5, 4 }
 0x368   :  { %v8672_v43 = vpop.eup %6448  ;;  %6474 = vrcp.f32 %v1739_v61  ;;  %v5953_v61 = vmul.f32 -1.442695, %v1672_v4  ;;  %v5955_v7 = vmul.f32 -1.442695, %v1676_v17  ;;  %v1662_v33 = vadd.f32 %v1598_v50, %v8152_v35  ;;  %v11141_v4 = vld [vmem:[#allocation37_spill] sm:$0xff]  ;;  %v11142_v17 = vld [vmem:[#allocation39_spill] sm:$0xff] }
 0x369   :  { %v8676_v28 = vpop.eup %6450  ;;  %6476 = vrcp.f32 %v1741_v54  ;;  %v5956_v24 = vmul.f32 -1.442695, %v1650_v11  ;;  %v1670_v42 = vadd.f32 %v1606_v41, %v11141_v4  ;;  %v11143_v50 = vld [vmem:[#allocation41_spill] sm:$0xff]  ;;  %v5960_v11 = vmul.f32 -1.442695, %v1666_v29 }
 0x36a   :  { %v8680_v49 = vpop.eup %6452  ;;  %6478 = vpow2.f32 %v5941_v56  ;;  %v1610_v56 = vrot.slane %v8638_v5, 5  ;;  %v5959_v35 = vmul.f32 -1.442695, %v1662_v33 }
 0x36b   :  { %v8684_v22 = vpop.eup %6454  ;;  %6480 = vpow2.f32 %v5943_v31  ;;  %v1614_v31 = vrot.slane %v8638_v5, 6  ;;  %v5958_v5 = vmul.f32 -1.442695, %v1658_v23  ;;  %v5961_v41 = vmul.f32 -1.442695, %v1670_v42 }
 0x36c   :  { %v8689_v62 = vpop.eup %6456  ;;  %6482 = vpow2.f32 %v5945_v40 }
 0x36d   :  { %v8693_v54 = vpop.eup %6458  ;;  %6484 = vpow2.f32 %v5947_v9  ;;  %v1674_v9 = vadd.f32 %v1610_v56, %v11142_v17 }
 0x36e   :  { %v8697_v27 = vpop.eup %6460  ;;  %6486 = vpow2.f32 %v5949_v53  ;;  %v1678_v53 = vadd.f32 %v1614_v31, %v11143_v50 }
 0x36f   :  { %v8700_v40 = vpop.eup %6462  ;;  %6488 = vpow2.f32 %v5951_v51 }
 0x370   :  { %v8703_v3 = vpop.eup %6464  ;;  %6490 = vpow2.f32 %v5953_v61  ;;  %v5962_v61 = vmul.f32 -1.442695, %v1674_v9  ;;  %v5963_v23 = vmul.f32 -1.442695, %v1678_v53 }
 0x371   :  { %v8706_v38 = vpop.eup %6466  ;;  %6492 = vpow2.f32 %v5955_v7 }
 0x372   :  { %v8709_v8 = vpop.eup %6468  ;;  %6494 = vpow2.f32 %v5956_v24 }
 0x373   :  { %v8711_v51 = vpop.eup %6470  ;;  %6496 = vpow2.f32 %v5957_v60 }
 0x374   :  { %v8713_v26 = vpop.eup %6472  ;;  %6498 = vpow2.f32 %v5958_v5 }
 0x375   :  { %v8715_v56 = vpop.eup %6474  ;;  %6500 = vpow2.f32 %v5959_v35 }
 0x376   :  { %v8717_v7 = vpop.eup %6476  ;;  %6502 = vpow2.f32 %v5960_v11 }
 0x377   :  { %v6479_v31 = vpop.eup %6478  ;;  %6504 = vpow2.f32 %v5961_v41 }
 0x378   :  { %v6481_v33 = vpop.eup %6480  ;;  %v1728_v24 = vadd.f32 1.0, %v6479_v31  ;;  %6506 = vpow2.f32 %v5962_v61 }
 0x379   :  { %v6483_v29 = vpop.eup %6482  ;;  %v1730_v50 = vadd.f32 1.0, %v6481_v33  ;;  %6508 = vpow2.f32 %v5963_v23 }
 0x37a   :  { %v6485_v42 = vpop.eup %6484  ;;  %v1732_v60 = vadd.f32 1.0, %v6483_v29  ;;  %6510 = vrcp.f32 %v1728_v24 }
 0x37b   :  { %v6487_v5 = vpop.eup %6486  ;;  %v1734_v9 = vadd.f32 1.0, %v6485_v42  ;;  %6512 = vrcp.f32 %v1730_v50 }
 0x37c   :  { %v6489_v17 = vpop.eup %6488  ;;  %v1736_v35 = vadd.f32 1.0, %v6487_v5  ;;  %6514 = vrcp.f32 %v1732_v60 }
 0x37d   :  { %v6491_v53 = vpop.eup %6490  ;;  %v1738_v4 = vadd.f32 1.0, %v6489_v17  ;;  %6516 = vrcp.f32 %v1734_v9  ;;  %v1839_v9 = vrot.slane %v8258_v1, 7  ;;  %v1845_v1 = vrot.slane %v8285_v18, 7 }
 0x37e   :  { %v6493_v11 = vpop.eup %6492  ;;  %v1740_v41 = vadd.f32 1.0, %v6491_v53  ;;  %6518 = vrcp.f32 %v1736_v35  ;;  %v1840_v35 = vrot.slane %v8262_v39, 7  ;;  %v1863_v39 = vmul.f32 %v8703_v3, %v8669_v21 }
 0x37f   :  { %v6495_v31 = vpop.eup %6494  ;;  %v1742_v61 = vadd.f32 1.0, %v6493_v11  ;;  %6520 = vrcp.f32 %v1738_v4  ;;  %v1841_v11 = vrot.slane %v8266_v37, 7  ;;  %v1866_v3 = vmul.f32 %v8709_v8, %v8680_v49 }
 0x380   :  { %v6497_v33 = vpop.eup %6496  ;;  %6522 = vrcp.f32 %v1740_v41  ;;  %v1807_v23 = vadd.f32 1.0, %v6495_v31  ;;  %v1842_v41 = vrot.slane %v8271_v46, 7  ;;  %v1846_v46 = vrot.slane %v8287_v32, 7 }
 0x381   :  { %v6499_v29 = vpop.eup %6498  ;;  %6524 = vrcp.f32 %v1742_v61  ;;  %v1808_v24 = vadd.f32 1.0, %v6497_v33  ;;  %v1843_v33 = vrot.slane %v8274_v0, 7 }
 0x382   :  { %v6501_v42 = vpop.eup %6500  ;;  %v1809_v50 = vadd.f32 1.0, %v6499_v29  ;;  %6526 = vrcp.f32 %v1807_v23 }
 0x383   :  { %v6503_v57 = vpop.eup %6502  ;;  %v1810_v5 = vadd.f32 1.0, %v6501_v42  ;;  %6528 = vrcp.f32 %v1808_v24  ;;  %v1864_v42 = vmul.f32 %v8700_v40, %v8672_v43  ;;  %v1867_v43 = vmul.f32 %v8711_v51, %v8684_v22 }
 0x384   :  { %v6505_v60 = vpop.eup %6504  ;;  %v1811_v34 = vadd.f32 1.0, %v6503_v57  ;;  %6530 = vrcp.f32 %v1809_v50  ;;  %v1844_v57 = vrot.slane %v8279_v48, 7  ;;  %v1865_v48 = vmul.f32 %v8706_v38, %v8676_v28 }
 0x385   :  { %v6507_v17 = vpop.eup %6506  ;;  %v1812_v53 = vadd.f32 1.0, %v6505_v60  ;;  %6532 = vrcp.f32 %v1810_v5 }
 0x386   :  { %v6509_v4 = vpop.eup %6508  ;;  %v1813_v31 = vadd.f32 1.0, %v6507_v17  ;;  %6534 = vrcp.f32 %v1811_v34 }
 0x387   :  { %v6511_v61 = vpop.eup %6510  ;;  %v1814_v23 = vadd.f32 1.0, %v6509_v4  ;;  %6536 = vrcp.f32 %v1812_v53  ;;  %v1869_v53 = vmul.f32 %v8715_v56, %v8693_v54  ;;  %v1870_v4 = vmul.f32 %v8717_v7, %v8697_v27 }
 0x388   :  { %v6513_v29 = vpop.eup %6512  ;;  %v1855_v24 = vmul.f32 %v6511_v61, %v1839_v9  ;;  %6538 = vrcp.f32 %v1813_v31  ;;  %v1868_v9 = vmul.f32 %v8713_v26, %v8689_v62 }
 0x389   :  { %v6515_v37 = vpop.eup %6514  ;;  %v1856_v50 = vmul.f32 %v6513_v29, %v1840_v35  ;;  %6540 = vrcp.f32 %v1814_v23 }
 0x38a   :  { %v6517_v0 = vpop.eup %6516  ;;  %v1857_v5 = vmul.f32 %v6515_v37, %v1841_v11  ;;  %v8733_v60 = vadd.f32 %v1863_v39, %v1855_v24 }
 0x38b   :  { %v6519_v18 = vpop.eup %6518  ;;  %v8737_v34 = vadd.f32 %v1864_v42, %v1856_v50  ;;  %v1858_v32 = vmul.f32 %v6517_v0, %v1842_v41 }
 0x38c   :  { %v6521_v21 = vpop.eup %6520  ;;  %v1859_v40 = vmul.f32 %v6519_v18, %v1843_v33  ;;  %v8741_v17 = vadd.f32 %v1865_v48, %v1857_v5  ;;  %6542 = vtanh.f32 %v8733_v60 }
 0x38d   :  { %v6523_v38 = vpop.eup %6522  ;;  %v1860_v28 = vmul.f32 %v6521_v21, %v1844_v57  ;;  %v8746_v35 = vadd.f32 %v1866_v3, %v1858_v32  ;;  %6544 = vtanh.f32 %v8737_v34 }
 0x38e   :  { %v6525_v49 = vpop.eup %6524  ;;  %v1861_v8 = vmul.f32 %v6523_v38, %v1845_v1  ;;  %v8751_v22 = vadd.f32 %v1867_v43, %v1859_v40  ;;  %6546 = vtanh.f32 %v8741_v17 }
 0x38f   :  { %v1862_v51 = vmul.f32 %v6525_v49, %v1846_v46  ;;  %v8756_v11 = vadd.f32 %v1868_v9, %v1860_v28  ;;  %6548 = vtanh.f32 %v8746_v35  ;;  %v6527_v26 = vpop.eup %6526 }
 0x390   :  { %v8759_v62 = vadd.f32 %v1869_v53, %v1861_v8  ;;  %6550 = vtanh.f32 %v8751_v22  ;;  %v6529_v54 = vpop.eup %6528 }
 0x391   :  { %v8762_v41 = vadd.f32 %v1870_v4, %v1862_v51  ;;  %6552 = vtanh.f32 %v8756_v11  ;;  %v6531_v56 = vpop.eup %6530 }
 0x392   :  { %6554 = vtanh.f32 %v8759_v62  ;;  %v6533_v27 = vpop.eup %6532 }
 0x393   :  { %6556 = vtanh.f32 %v8762_v41  ;;  %v6535_v7 = vpop.eup %6534 }
 0x394   :  { %v6537_v31 = vpop.eup %6536 }
 0x395   :  { %v6539_v61 = vpop.eup %6538 }
 0x396   :  { %v6541_v33 = vpop.eup %6540 }
 0x399   :  { %v6543_v57 = vpop.eup %6542 }
 0x39a   :  { %v6545_v23 = vpop.eup %6544  ;;  %v1887_v29 = vmul.f32 %v6543_v57, %v6527_v26 }
 0x39b   :  { %v6547_v1 = vpop.eup %6546  ;;  %v1888_v39 = vmul.f32 %v6545_v23, %v6529_v54 }
 0x39c   :  { %v6549_v24 = vpop.eup %6548  ;;  %v1889_v37 = vmul.f32 %v6547_v1, %v6531_v56  ;;  %v1895_v46 = vpack.c.bf16 %v1887_v29, %v1887_v29 }
 0x39d   :  { %v6551_v42 = vpop.eup %6550  ;;  %v1890_v50 = vmul.f32 %v6549_v24, %v6533_v27  ;;  %v1896_v0 = vpack.c.bf16 %v1888_v39, %v1888_v39 }
 0x39e   :  { %v6553_v48 = vpop.eup %6552  ;;  %v1891_v5 = vmul.f32 %v6551_v42, %v6535_v7  ;;  %v1897_v18 = vpack.c.bf16 %v1889_v37, %v1889_v37  ;;  %v1911_v3 = vunpack.c.l.b16 %v1895_v46 }
 0x39f   :  { %v6555_v32 = vpop.eup %6554  ;;  %v1892_v21 = vmul.f32 %v6553_v48, %v6537_v31  ;;  %v1898_v43 = vpack.c.bf16 %v1890_v50, %v1890_v50  ;;  %v1912_v40 = vunpack.c.l.b16 %v1896_v0 }
 0x3a0   :  { %v6557_v38 = vpop.eup %6556  ;;  %v1893_v28 = vmul.f32 %v6555_v32, %v6539_v61  ;;  %v1899_v9 = vpack.c.bf16 %v1891_v5, %v1891_v5  ;;  %v1913_v49 = vunpack.c.l.b16 %v1897_v18  ;;  %v1919_v8 = vrot.slane %v1911_v3, 1  ;;  %v11144_v5 = vld [vmem:[#allocation42_spill] sm:$0xff]  ;;  %v11145_v18 = vld [vmem:[#allocation43_spill] sm:$0xff]  ;;  %v11146_v3 = vld [vmem:[#allocation44_spill] sm:$0xff] }
 0x3a1   :  { %v1894_v53 = vmul.f32 %v6557_v38, %v6541_v33  ;;  %v1900_v51 = vpack.c.bf16 %v1892_v21, %v1892_v21  ;;  %v1914_v4 = vunpack.c.l.b16 %v1898_v43  ;;  %v11147_v32 = vld [vmem:[#allocation45_spill] sm:$0xff]  ;;  %v11148_v21 = vld [vmem:[#allocation46_spill] sm:$0xff]  ;;  %v11153_v43 = vld [vmem:[#allocation51_spill] sm:$0xff] }
 0x3a2   :  { %v1901_v26 = vpack.c.bf16 %v1893_v28, %v1893_v28  ;;  %v1915_v54 = vunpack.c.l.b16 %v1899_v9  ;;  %v1920_v56 = vsel %vm938_vm3, %v1912_v40, %v1919_v8  ;;  %v1921_v27 = vrot.slane %v1913_v49, 7  ;;  %v11154_v40 = vld [vmem:[#allocation52_spill] sm:$0xff]  ;;  %v11155_v38 = vld [vmem:[#allocation53_spill] sm:$0xff]  ;;  %v11156_v28 = vld [vmem:[#allocation54_spill] sm:$0xff] }
 0x3a3   :  { %v1902_v7 = vpack.c.bf16 %v1894_v53, %v1894_v53  ;;  %v1916_v57 = vunpack.c.l.b16 %v1900_v51  ;;  %v1923_v23 = vrot.slane %v1914_v4, 6  ;;  %v11157_v9 = vld [vmem:[#allocation55_spill] sm:$0xff]  ;;  %v11158_v49 = vld [vmem:[#allocation56_spill] sm:$0xff]  ;;  %v11159_v8 = vld [vmem:[#allocation57_spill] sm:$0xff] }
 0x3a4   :  { %v1917_v29 = vunpack.c.l.b16 %v1901_v26  ;;  %v1922_v31 = vsel %vm941_vm4, %v1921_v27, %v1920_v56  ;;  %v1925_v1 = vrot.slane %v1915_v54, 5  ;;  %v11160_v53 = vld [vmem:[#allocation58_spill] sm:$0xff]  ;;  %v11161_v51 = vld [vmem:[#allocation59_spill] sm:$0xff]  ;;  %v11162_v4 = vld [vmem:[#allocation60_spill] sm:$0xff] }
 0x3a5   :  { %v1918_v39 = vunpack.c.l.b16 %v1902_v7  ;;  %v1924_v61 = vsel %vm944_vm5, %v1923_v23, %v1922_v31  ;;  %v1927_v24 = vrot.slane %v1916_v57, 4  ;;  %v11163_v26 = vld [vmem:[#allocation61_spill] sm:$0xff]  ;;  %v11164_v54 = vld [vmem:[#allocation62_spill] sm:$0xff]  ;;  %v11165_v56 = vld [vmem:[#allocation63_spill] sm:$0xff] }
 0x3a6   :  { %v1926_v33 = vsel %vm947_vm6, %v1925_v1, %v1924_v61  ;;  %v1929_v37 = vrot.slane %v1917_v29, 3  ;;  %v11166_v27 = vld [vmem:[#allocation64_spill] sm:$0xff]  ;;  %v11167_v7 = vld [vmem:[#allocation65_spill] sm:$0xff]  ;;  %v11168_v57 = vld [vmem:[#allocation66_spill] sm:$0xff] }
 0x3a7   :  { %v1928_v46 = vsel %vm950_vm7, %v1927_v24, %v1926_v33  ;;  %v1931_v42 = vrot.slane %v1918_v39, 2  ;;  %v11169_v23 = vld [vmem:[#allocation67_spill] sm:$0xff]  ;;  %v11170_v29 = vld [vmem:[#allocation68_spill] sm:$0xff]  ;;  %v11171_v31 = vld [vmem:[#allocation69_spill] sm:$0xff] }
 0x3a8   :  { %v1930_v50 = vsel %vm953_vm8, %v1929_v37, %v1928_v46  ;;  %v11172_v1 = vld [vmem:[#allocation70_spill] sm:$0xff]  ;;  %v11173_v39 = vld [vmem:[#allocation137_spill] sm:$0xff]  ;;  %v11174_v37 = vld [vmem:[#allocation71_spill] sm:$0xff] }
 0x3a9   :  { %v1932_v0 = vsel %vm956_vm9, %v1931_v42, %v1930_v50  ;;  %v1454_v61 = vadd.f32 %v11173_v39, %v11172_v1  ;;  %v11175_v46 = vld [vmem:[#allocation139_spill] sm:$0xff] }
 0x3aa   :  { %v8774_v48 = vpack.c.b16 %v1932_v0, %v1932_v0  ;;  %v1456_v42 = vadd.f32 %v11175_v46, %v11174_v37 }
 0x3ac   :  { %1968 = vmatmul.mubr.bf16.vlgmr.msra.gmra.mxu0 %v8774_v48  ;;  %2009 = vmatmul.mubr.bf16.vlgmr.msra.gmra.mxu1 %v8774_v48 }
 0x3ad   :  { %2043 = vmatpush1.bf16.msra.mxu0 %v8309_v6  ;;  %2084 = vmatpush1.bf16.msra.mxu1 %v8311_v47  ;;  %v11149_v6 = vld [vmem:[#allocation47_spill] sm:$0xff]  ;;  %v11150_v47 = vld [vmem:[#allocation48_spill] sm:$0xff] }
 0x3ae   :  { %2044 = vmatprep.subr.bf16.mxu0 %v8317_v59  ;;  %2085 = vmatprep.subr.bf16.mxu1 %v8319_v52  ;;  %v11151_v59 = vld [vmem:[#allocation49_spill] sm:$0xff]  ;;  %v11152_v52 = vld [vmem:[#allocation50_spill] sm:$0xff] }
 0x3af   :  { %2074 = vmatprep.mubr.bf16.mxu0 %v11036_v58  ;;  %2115 = vmatprep.mubr.bf16.mxu1 %v11036_v58 }
 0x3b1   :  { %2045 = vmatpush1.bf16.msra.mxu0 %v11144_v5  ;;  %2086 = vmatpush1.bf16.msra.mxu1 %v11145_v18 }
 0x3b2   :  { %2046 = vmatprep.subr.bf16.mxu0 %v11146_v3  ;;  %2087 = vmatprep.subr.bf16.mxu1 %v11147_v32 }
 0x3b5   :  { %2047 = vmatpush1.bf16.msra.mxu0 %v11148_v21  ;;  %2088 = vmatpush1.bf16.msra.mxu1 %v11149_v6 }
 0x3b6   :  { %2048 = vmatprep.subr.bf16.mxu0 %v11150_v47  ;;  %2089 = vmatprep.subr.bf16.mxu1 %v11151_v59 }
 0x3b9   :  { %2049 = vmatpush1.bf16.msra.mxu0 %v11152_v52  ;;  %2090 = vmatpush1.bf16.msra.mxu1 %v11153_v43  ;;  %v11176_v52 = vld [vmem:[#allocation72_spill] sm:$0xff] }
 0x3ba   :  { %2050 = vmatprep.subr.bf16.mxu0 %v11154_v40  ;;  %2091 = vmatprep.subr.bf16.mxu1 %v11155_v38  ;;  %v11177_v43 = vld [vmem:[#allocation140_spill] sm:$0xff] }
 0x3bb   :  { %v1497_v40 = vadd.f32 %v11177_v43, %v11176_v52  ;;  %v11191_v43 = vld [vmem:[#allocation85_spill] sm:$0xff] }
 0x3bd   :  { %2051 = vmatpush1.bf16.msra.mxu0 %v11156_v28  ;;  %2092 = vmatpush1.bf16.msra.mxu1 %v11157_v9  ;;  %v11178_v28 = vld [vmem:[#allocation73_spill] sm:$0xff]  ;;  %v11179_v9 = vld [vmem:[#allocation138_spill] sm:$0xff] }
 0x3be   :  { %2052 = vmatprep.subr.bf16.mxu0 %v11158_v49  ;;  %2093 = vmatprep.subr.bf16.mxu1 %v11159_v8  ;;  %v1495_v49 = vadd.f32 %v11179_v9, %v11178_v28  ;;  %v11194_v9 = vld [vmem:[#allocation88_spill] sm:$0xff] }
 0x3c1   :  { %2053 = vmatpush1.bf16.msra.mxu0 %v11160_v53  ;;  %2094 = vmatpush1.bf16.msra.mxu1 %v11161_v51 }
 0x3c2   :  { %2054 = vmatprep.subr.bf16.mxu0 %v11162_v4  ;;  %2095 = vmatprep.subr.bf16.mxu1 %v11163_v26 }
 0x3c5   :  { %2055 = vmatpush1.bf16.msra.mxu0 %v11164_v54  ;;  %2096 = vmatpush1.bf16.msra.mxu1 %v11165_v56 }
 0x3c6   :  { %2056 = vmatprep.subr.bf16.mxu0 %v11166_v27  ;;  %2097 = vmatprep.subr.bf16.mxu1 %v11167_v7 }
 0x3c9   :  { %2057 = vmatpush1.bf16.msra.mxu0 %v11168_v57  ;;  %2098 = vmatpush1.bf16.msra.mxu1 %v11169_v23 }
 0x3ca   :  { %2124 = vmatprep.subr.bf16.mxu0 %v11170_v29  ;;  %2165 = vmatprep.subr.bf16.mxu1 %v11171_v31  ;;  %v11180_v31 = vld [vmem:[#allocation74_spill] sm:$0xff] }
 0x46c   :  { %v1969_v24 = vpop.f32.mrf.mxu0  ;;  %v2010_v33 = vpop.f32.mrf.mxu1 }
 0x46d   :  { %v1970_v50 = vadd.f32 %v1969_v24, %v1454_v61  ;;  %v2011_v8 = vadd.f32 %v2010_v33, %v1495_v49  ;;  %v11195_v49 = vld [vmem:[#allocation89_spill] sm:$0xff] }
 0x46e   :  { %v1971_v0 = vpop.f32.mrf.mxu0  ;;  %v2012_v5 = vpop.f32.mrf.mxu1 }
 0x46f   :  { %v5964_v18 = vmul.f32 -1.442695, %v1970_v50  ;;  %v1972_v3 = vadd.f32 %v1971_v0, %v1456_v42  ;;  %v2013_v38 = vadd.f32 %v2012_v5, %v1497_v40  ;;  %v11181_v50 = vld [vmem:[#allocation75_spill] sm:$0xff]  ;;  %v11182_v0 = vld [vmem:[#allocation76_spill] sm:$0xff]  ;;  %v11183_v5 = vld [vmem:[#allocation77_spill] sm:$0xff] }
 0x470   :  { %v1973_v32 = vpop.f32.mrf.mxu0  ;;  %v2014_v21 = vpop.f32.mrf.mxu1  ;;  %v11192_v40 = vld [vmem:[#allocation86_spill] sm:$0xff] }
 0x471   :  { %6558 = vpow2.f32 %v5964_v18  ;;  %v5965_v6 = vmul.f32 -1.442695, %v1972_v3  ;;  %v5966_v53 = vmul.f32 -1.442695, %v2013_v38  ;;  %v11184_v18 = vld [vmem:[#allocation78_spill] sm:$0xff]  ;;  %v11185_v3 = vld [vmem:[#allocation79_spill] sm:$0xff] }
 0x472   :  { %v1974_v47 = vpop.f32.mrf.mxu0  ;;  %v2015_v59 = vpop.f32.mrf.mxu1  ;;  %v11186_v32 = vld [vmem:[#allocation80_spill] sm:$0xff]  ;;  %v11187_v21 = vld [vmem:[#allocation81_spill] sm:$0xff]  ;;  %v11193_v38 = vld [vmem:[#allocation87_spill] sm:$0xff] }
 0x473   :  { %6560 = vpow2.f32 %v5965_v6  ;;  %v11188_v6 = vld [vmem:[#allocation82_spill] sm:$0xff]  ;;  %v11189_v47 = vld [vmem:[#allocation83_spill] sm:$0xff]  ;;  %v11190_v59 = vld [vmem:[#allocation84_spill] sm:$0xff] }
 0x474   :  { %6562 = vtanh.f32 %v2011_v8  ;;  %v11196_v8 = vld [vmem:[#allocation90_spill] sm:$0xff] }
 0x475   :  { %6564 = vpow2.f32 %v5966_v53  ;;  %v11197_v53 = vld [vmem:[#allocation91_spill] sm:$0xff] }
 0x47e   :  { %v6559_v51 = vpop.eup %6558 }
 0x47f   :  { %v2023_v4 = vadd.f32 1.0, %v6559_v51  ;;  %v11198_v51 = vld [vmem:[#allocation92_spill] sm:$0xff] }
 0x480   :  { %v6561_v26 = vpop.eup %6560 }
 0x481   :  { %6566 = vrcp.f32 %v2023_v4  ;;  %v2024_v54 = vadd.f32 1.0, %v6561_v26  ;;  %v6563_v56 = vpop.eup %6562  ;;  %v11199_v4 = vld [vmem:[#allocation93_spill] sm:$0xff]  ;;  %v11200_v26 = vld [vmem:[#allocation94_spill] sm:$0xff] }
 0x482   :  { %v6565_v27 = vpop.eup %6564 }
 0x483   :  { %6568 = vrcp.f32 %v2024_v54  ;;  %v2033_v29 = vadd.f32 1.0, %v6565_v27  ;;  %v11201_v54 = vld [vmem:[#allocation95_spill] sm:$0xff]  ;;  %v11203_v27 = vld [vmem:[#allocation97_spill] sm:$0xff] }
 0x485   :  { %6570 = vrcp.f32 %v2033_v29  ;;  %v11207_v29 = vld [vmem:[#allocation101_spill] sm:$0xff] }
 0x48e   :  { %v6567_v7 = vpop.eup %6566 }
 0x48f   :  { %v2037_v57 = vmul.f32 %v6567_v7, %v6563_v56  ;;  %v11202_v56 = vld [vmem:[#allocation96_spill] sm:$0xff]  ;;  %v11204_v7 = vld [vmem:[#allocation98_spill] sm:$0xff] }
 0x490   :  { %v6569_v23 = vpop.eup %6568 }
 0x491   :  { %v2036_v39 = vmul.f32 %v6569_v23, %v11180_v31  ;;  %v11206_v23 = vld [vmem:[#allocation100_spill] sm:$0xff]  ;;  %v11208_v31 = vld [vmem:[#allocation102_spill] sm:$0xff] }
 0x492   :  { %v6571_v24 = vpop.eup %6570 }
 0x493   :  { %v8821_v61 = vadd.f32 %v2037_v57, %v2036_v39  ;;  %v11205_v57 = vld [vmem:[#allocation99_spill] sm:$0xff] }
 0x494   :  { %v11209_v39 = vld [vmem:[#allocation103_spill] sm:$0xff] }
 0x495   :  { %6572 = vtanh.f32 %v8821_v61 }
 0x4a2   :  { %v6573_v33 = vpop.eup %6572 }
 0x4a3   :  { %v2040_v46 = vmul.f32 %v6573_v33, %v6571_v24  ;;  %v11210_v24 = vld [vmem:[#allocation104_spill] sm:$0xff]  ;;  %v11211_v33 = vld [vmem:[#allocation105_spill] sm:$0xff] }
 0x4a5   :  { %v2041_v42 = vpack.c.bf16 %v2040_v46, %v2040_v46  ;;  %v11212_v46 = vld [vmem:[#allocation106_spill] sm:$0xff] }
 0x4a7   :  { %2075 = vmatmul.mubr.bf16.vlgmr.msra.gmra.mxu0 %v2041_v42  ;;  %2116 = vmatmul.mubr.bf16.vlgmr.msra.gmra.mxu1 %v2041_v42  ;;  %v11213_v42 = vld [vmem:[#allocation107_spill] sm:$0xff] }
 0x4a8   :  { %2125 = vmatpush1.bf16.msra.mxu0 %v11181_v50  ;;  %2166 = vmatpush1.bf16.msra.mxu1 %v11182_v0  ;;  %v11214_v50 = vld [vmem:[#allocation108_spill] sm:$0xff]  ;;  %v11215_v0 = vld [vmem:[#allocation109_spill] sm:$0xff] }
 0x4a9   :  { %2126 = vmatprep.subr.bf16.mxu0 %v11183_v5  ;;  %2167 = vmatprep.subr.bf16.mxu1 %v11184_v18  ;;  %v11216_v5 = vld [vmem:[#allocation110_spill] sm:$0xff]  ;;  %v11217_v18 = vld [vmem:[#allocation111_spill] sm:$0xff] }
 0x4aa   :  { %2156 = vmatprep.mubr.bf16.mxu0 %v11036_v58  ;;  %2197 = vmatprep.mubr.bf16.mxu1 %v11036_v58 }
 0x4ac   :  { %2127 = vmatpush1.bf16.msra.mxu0 %v11185_v3  ;;  %2168 = vmatpush1.bf16.msra.mxu1 %v11186_v32  ;;  %v11218_v3 = vld [vmem:[#allocation112_spill] sm:$0xff]  ;;  %v11219_v32 = vld [vmem:[#allocation113_spill] sm:$0xff] }
 0x4ad   :  { %2128 = vmatprep.subr.bf16.mxu0 %v11187_v21  ;;  %2169 = vmatprep.subr.bf16.mxu1 %v11188_v6  ;;  %v11220_v21 = vld [vmem:[#allocation114_spill] sm:$0xff]  ;;  %v11222_v6 = vld [vmem:[#allocation116_spill] sm:$0xff] }
 0x4b0   :  { %2129 = vmatpush1.bf16.msra.mxu0 %v11189_v47  ;;  %2170 = vmatpush1.bf16.msra.mxu1 %v11190_v59  ;;  %v11223_v47 = vld [vmem:[#allocation117_spill] sm:$0xff]  ;;  %v11224_v59 = vld [vmem:[#allocation118_spill] sm:$0xff] }
 0x4b1   :  { %2130 = vmatprep.subr.bf16.mxu0 %v11191_v43  ;;  %2171 = vmatprep.subr.bf16.mxu1 %v11192_v40  ;;  %v11225_v43 = vld [vmem:[#allocation119_spill] sm:$0xff]  ;;  %v11226_v40 = vld [vmem:[#allocation120_spill] sm:$0xff] }
 0x4b4   :  { %2131 = vmatpush1.bf16.msra.mxu0 %v11193_v38  ;;  %2172 = vmatpush1.bf16.msra.mxu1 %v11194_v9  ;;  %v11227_v38 = vld [vmem:[#allocation121_spill] sm:$0xff]  ;;  %v11228_v9 = vld [vmem:[#allocation122_spill] sm:$0xff] }
 0x4b5   :  { %2132 = vmatprep.subr.bf16.mxu0 %v11195_v49  ;;  %2173 = vmatprep.subr.bf16.mxu1 %v11196_v8  ;;  %v11229_v49 = vld [vmem:[#allocation123_spill] sm:$0xff]  ;;  %v11230_v8 = vld [vmem:[#allocation124_spill] sm:$0xff] }
 0x4b8   :  { %2133 = vmatpush1.bf16.msra.mxu0 %v11197_v53  ;;  %2174 = vmatpush1.bf16.msra.mxu1 %v11198_v51  ;;  %v11231_v53 = vld [vmem:[#allocation125_spill] sm:$0xff]  ;;  %v11232_v51 = vld [vmem:[#allocation126_spill] sm:$0xff] }
 0x4b9   :  { %2134 = vmatprep.subr.bf16.mxu0 %v11199_v4  ;;  %2175 = vmatprep.subr.bf16.mxu1 %v11200_v26  ;;  %v11233_v4 = vld [vmem:[#allocation127_spill] sm:$0xff]  ;;  %v11234_v26 = vld [vmem:[#allocation128_spill] sm:$0xff] }
 0x4bc   :  { %2135 = vmatpush1.bf16.msra.mxu0 %v11201_v54  ;;  %2176 = vmatpush1.bf16.msra.mxu1 %v11202_v56  ;;  %v11235_v54 = vld [vmem:[#allocation129_spill] sm:$0xff]  ;;  %v11236_v56 = vld [vmem:[#allocation130_spill] sm:$0xff] }
 0x4bd   :  { %2136 = vmatprep.subr.bf16.mxu0 %v11203_v27  ;;  %2177 = vmatprep.subr.bf16.mxu1 %v11204_v7  ;;  %v11237_v27 = vld [vmem:[#allocation131_spill] sm:$0xff]  ;;  %v11238_v7 = vld [vmem:[#allocation132_spill] sm:$0xff] }
 0x4c0   :  { %2137 = vmatpush1.bf16.msra.mxu0 %v11205_v57  ;;  %2178 = vmatpush1.bf16.msra.mxu1 %v11206_v23  ;;  %v11239_v57 = vld [vmem:[#allocation133_spill] sm:$0xff]  ;;  %v11240_v23 = vld [vmem:[#allocation134_spill] sm:$0xff] }
 0x4c1   :  { %2138 = vmatprep.subr.bf16.mxu0 %v11207_v29  ;;  %2179 = vmatprep.subr.bf16.mxu1 %v11208_v31  ;;  %v11241_v29 = vld [vmem:[#allocation135_spill] sm:$0xff]  ;;  %v11242_v31 = vld [vmem:[#allocation136_spill] sm:$0xff] }
 0x4c4   :  { %2139 = vmatpush1.bf16.msra.mxu0 %v11209_v39  ;;  %2180 = vmatpush1.bf16.msra.mxu1 %v11210_v24  ;;  %v8892_v39 = vld [vmem:[#allocation7 + $0xe4] ss:$16 sps:$4 sm:$0xff]   ;;  %v8895_v24 = vld [vmem:[#allocation7 + $0xec] ss:$16 sps:$4 sm:$0xff]  }
 0x4c5   :  { %2558 = vmatprep.subr.bf16.mxu0 %v11211_v33  ;;  %2599 = vmatprep.subr.bf16.mxu1 %v11212_v46 }
 0x4c7   :  { %2157 = vmatmul.mubr.bf16.vlgmr.msra.gmra.mxu0 %v8774_v48  ;;  %2198 = vmatmul.mubr.bf16.vlgmr.msra.gmra.mxu1 %v8774_v48  ;;  %v11221_v48 = vld [vmem:[#allocation115_spill] sm:$0xff] }
 0x4c8   :  { %2559 = vmatpush1.bf16.msra.mxu0 %v11213_v42  ;;  %2600 = vmatpush1.bf16.msra.mxu1 %v11214_v50 }
 0x4c9   :  { %2560 = vmatprep.subr.bf16.mxu0 %v11215_v0  ;;  %2601 = vmatprep.subr.bf16.mxu1 %v11216_v5 }
 0x4ca   :  { %2590 = vmatprep.mubr.bf16.mxu0 %v11036_v58  ;;  %2631 = vmatprep.mubr.bf16.mxu1 %v11036_v58 }
 0x4cc   :  { %2561 = vmatpush1.bf16.msra.mxu0 %v11217_v18  ;;  %2602 = vmatpush1.bf16.msra.mxu1 %v11218_v3 }
 0x4cd   :  { %2562 = vmatprep.subr.bf16.mxu0 %v11219_v32  ;;  %2603 = vmatprep.subr.bf16.mxu1 %v11220_v21 }
 0x4d0   :  { %2563 = vmatpush1.bf16.msra.mxu0 %v11221_v48  ;;  %2604 = vmatpush1.bf16.msra.mxu1 %v11222_v6 }
 0x4d1   :  { %2564 = vmatprep.subr.bf16.mxu0 %v11223_v47  ;;  %2605 = vmatprep.subr.bf16.mxu1 %v11224_v59 }
 0x4d4   :  { %2565 = vmatpush1.bf16.msra.mxu0 %v11225_v43  ;;  %2606 = vmatpush1.bf16.msra.mxu1 %v11226_v40 }
 0x4d5   :  { %2566 = vmatprep.subr.bf16.mxu0 %v11227_v38  ;;  %2607 = vmatprep.subr.bf16.mxu1 %v11228_v9 }
 0x4d8   :  { %2567 = vmatpush1.bf16.msra.mxu0 %v11229_v49  ;;  %2608 = vmatpush1.bf16.msra.mxu1 %v11230_v8 }
 0x4d9   :  { %2568 = vmatprep.subr.bf16.mxu0 %v11231_v53  ;;  %2609 = vmatprep.subr.bf16.mxu1 %v11232_v51  ;;  %v11243_v53 = vld [vmem:[#allocation10_spill] sm:$0xff] }
 0x4dc   :  { %2569 = vmatpush1.bf16.msra.mxu0 %v11233_v4  ;;  %2610 = vmatpush1.bf16.msra.mxu1 %v11234_v26  ;;  %v11244_v4 = vld [vmem:[#allocation11_spill] sm:$0xff] }
 0x4dd   :  { %2570 = vmatprep.subr.bf16.mxu0 %v11235_v54  ;;  %2611 = vmatprep.subr.bf16.mxu1 %v11236_v56  ;;  %v11245_v54 = vld [vmem:[#allocation13_spill] sm:$0xff] }
 0x4e0   :  { %2571 = vmatpush1.bf16.msra.mxu0 %v11237_v27  ;;  %2612 = vmatpush1.bf16.msra.mxu1 %v11238_v7 }
 0x4e1   :  { %2572 = vmatprep.subr.bf16.mxu0 %v11239_v57  ;;  %2613 = vmatprep.subr.bf16.mxu1 %v11240_v23 }
 0x4e4   :  { %2573 = vmatpush1.bf16.msra.mxu0 %v11241_v29  ;;  %2614 = vmatpush1.bf16.msra.mxu1 %v11242_v31 }
 0x4e5   :  { %2665 = vmatprep.subr.bf16.mxu0 %v8892_v39  ;;  %2706 = vmatprep.subr.bf16.mxu1 %v8895_v24 }
 0x567   :  { %v8898_v33 = vpop.f32.mrf.mxu0  ;;  %v8900_v46 = vpop.f32.mrf.mxu1 }
 0x569   :  { %v8902_v42 = vpop.f32.mrf.mxu0  ;;  %v8904_v50 = vpop.f32.mrf.mxu1 }
 0x56b   :  { %v2080_v0 = vpop.f32.mrf.mxu0  ;;  %v2121_v5 = vpop.f32.mrf.mxu1 }
 0x56d   :  { %v2081_v18 = vpop.f32.mrf.mxu0  ;;  %v2122_v3 = vpop.f32.mrf.mxu1 }
 0x587   :  { %v2158_v32 = vpop.f32.mrf.mxu0  ;;  %v2199_v21 = vpop.f32.mrf.mxu1 }
 0x588   :  { %v2210_v48 = vrot.slane %v2158_v32, 6  ;;  %v2214_v6 = vrot.slane %v2158_v32, 7  ;;  %v2218_v47 = vrot.slane %v2158_v32, 1  ;;  %v2222_v59 = vrot.slane %v2158_v32, 2 }
 0x589   :  { %v2226_v43 = vrot.slane %v2158_v32, 3  ;;  %v2230_v40 = vrot.slane %v2158_v32, 4  ;;  %v2234_v38 = vrot.slane %v2158_v32, 5  ;;  %v2278_v9 = vadd.f32 %v2158_v32, %v8050_v10  ;;  %v8907_v49 = vpop.f32.mrf.mxu0  ;;  %v8909_v8 = vpop.f32.mrf.mxu1 }
 0x58a   :  { %v2270_v51 = vadd.f32 %v2210_v48, %v11243_v53  ;;  %v2274_v26 = vadd.f32 %v2214_v6, %v11244_v4  ;;  %v2282_v56 = vadd.f32 %v2218_v47, %v11245_v54  ;;  %v2286_v27 = vadd.f32 %v2222_v59, %v8054_v12 }
 0x58b   :  { %v2290_v7 = vadd.f32 %v2226_v43, %v8056_v13  ;;  %v2294_v57 = vadd.f32 %v2230_v40, %v8058_v14  ;;  %v5971_v23 = vmul.f32 -1.442695, %v2278_v9  ;;  %v2162_v29 = vpop.f32.mrf.mxu0  ;;  %v2203_v31 = vpop.f32.mrf.mxu1  ;;  %v2298_v0 = vadd.f32 %v2234_v38, %v8060_v15 }
 0x58c   :  { %v5967_v5 = vmul.f32 -1.442695, %v2270_v51  ;;  %v5969_v18 = vmul.f32 -1.442695, %v2274_v26  ;;  %v5973_v3 = vmul.f32 -1.442695, %v2282_v56 }
 0x58d   :  { %6574 = vpow2.f32 %v5971_v23  ;;  %v5975_v32 = vmul.f32 -1.442695, %v2286_v27  ;;  %v2163_v48 = vpop.f32.mrf.mxu0  ;;  %v2204_v6 = vpop.f32.mrf.mxu1  ;;  %v5977_v47 = vmul.f32 -1.442695, %v2290_v7  ;;  %v2212_v10 = vrot.slane %v2199_v21, 6 }
 0x58e   :  { %6576 = vpow2.f32 %v5967_v5  ;;  %v2216_v59 = vrot.slane %v2199_v21, 7  ;;  %v5979_v43 = vmul.f32 -1.442695, %v2294_v57  ;;  %v5981_v40 = vmul.f32 -1.442695, %v2298_v0 }
 0x58f   :  { %6578 = vpow2.f32 %v5969_v18  ;;  %v2220_v9 = vrot.slane %v2199_v21, 1  ;;  %v2224_v29 = vrot.slane %v2199_v21, 2  ;;  %v2272_v38 = vadd.f32 %v2212_v10, %v8075_v44 }
 0x590   :  { %6580 = vpow2.f32 %v5973_v3  ;;  %v2228_v51 = vrot.slane %v2199_v21, 3  ;;  %v2276_v26 = vadd.f32 %v2216_v59, %v8090_v25  ;;  %v2232_v56 = vrot.slane %v2199_v21, 4 }
 0x591   :  { %6582 = vpow2.f32 %v5975_v32  ;;  %v2280_v27 = vadd.f32 %v2199_v21, %v8095_v30  ;;  %v2236_v7 = vrot.slane %v2199_v21, 5  ;;  %v2284_v23 = vadd.f32 %v2220_v9, %v8100_v36 }
 0x592   :  { %6584 = vpow2.f32 %v5977_v47  ;;  %v2288_v57 = vadd.f32 %v2224_v29, %v8105_v45  ;;  %v2292_v31 = vadd.f32 %v2228_v51, %v8112_v55  ;;  %v2296_v10 = vadd.f32 %v2232_v56, %v8118_v63  ;;  %v11256_v63 = vld [vmem:[#allocation37_spill] sm:$0xff] }
 0x593   :  { %6586 = vpow2.f32 %v5979_v43  ;;  %v2300_v0 = vadd.f32 %v2236_v7, %v8124_v16  ;;  %v2211_v5 = vrot.slane %v8907_v49, 6  ;;  %v2215_v21 = vrot.slane %v8907_v49, 7 }
 0x594   :  { %6588 = vpow2.f32 %v5981_v40  ;;  %v2219_v48 = vrot.slane %v8907_v49, 1  ;;  %v2223_v59 = vrot.slane %v8907_v49, 2  ;;  %v2227_v43 = vrot.slane %v8907_v49, 3 }
 0x595   :  { %6590 = vtanh.f32 %v2272_v38  ;;  %v2231_v29 = vrot.slane %v8907_v49, 4  ;;  %v2271_v38 = vadd.f32 %v2211_v5, %v8082_v20  ;;  %v2235_v56 = vrot.slane %v8907_v49, 5 }
 0x596   :  { %6592 = vtanh.f32 %v2276_v26 }
 0x597   :  { %6594 = vtanh.f32 %v2280_v27  ;;  %v2275_v27 = vadd.f32 %v2215_v21, %v8130_v19  ;;  %v5968_v20 = vmul.f32 -1.442695, %v2271_v38  ;;  %v2213_v21 = vrot.slane %v8909_v8, 6 }
 0x598   :  { %6596 = vtanh.f32 %v2284_v23 }
 0x599   :  { %6598 = vtanh.f32 %v2288_v57  ;;  %v2279_v57 = vadd.f32 %v8907_v49, %v8139_v2  ;;  %v5970_v49 = vmul.f32 -1.442695, %v2275_v27 }
 0x59a   :  { %v6575_v18 = vpop.eup %6574  ;;  %6600 = vtanh.f32 %v2292_v31  ;;  %v11246_v31 = vld [vmem:[#allocation32_spill] sm:$0xff] }
 0x59b   :  { %v6577_v3 = vpop.eup %6576  ;;  %v2354_v32 = vadd.f32 1.0, %v6575_v18  ;;  %6602 = vtanh.f32 %v2296_v10  ;;  %v2283_v10 = vadd.f32 %v2219_v48, %v11246_v31  ;;  %v2217_v48 = vrot.slane %v8909_v8, 7 }
 0x59c   :  { %v6579_v6 = vpop.eup %6578  ;;  %v2350_v47 = vadd.f32 1.0, %v6577_v3  ;;  %6604 = vtanh.f32 %v2300_v0  ;;  %v11247_v3 = vld [vmem:[#allocation34_spill] sm:$0xff] }
 0x59d   :  { %v6581_v40 = vpop.eup %6580  ;;  %v2352_v9 = vadd.f32 1.0, %v6579_v6  ;;  %6606 = vrcp.f32 %v2354_v32  ;;  %v2287_v5 = vadd.f32 %v2223_v59, %v11247_v3  ;;  %v11248_v32 = vld [vmem:[#allocation36_spill] sm:$0xff] }
 0x59e   :  { %v6583_v51 = vpop.eup %6582  ;;  %v2356_v26 = vadd.f32 1.0, %v6581_v40  ;;  %6608 = vrcp.f32 %v2350_v47  ;;  %v2291_v6 = vadd.f32 %v2227_v43, %v11248_v32  ;;  %v2221_v32 = vrot.slane %v8909_v8, 1 }
 0x59f   :  { %v6585_v7 = vpop.eup %6584  ;;  %v2358_v23 = vadd.f32 1.0, %v6583_v51  ;;  %6610 = vrcp.f32 %v2352_v9  ;;  %v5976_v27 = vmul.f32 -1.442695, %v2287_v5 }
 0x5a0   :  { %v6587_v0 = vpop.eup %6586  ;;  %v2360_v18 = vadd.f32 1.0, %v6585_v7  ;;  %6612 = vrcp.f32 %v2356_v26  ;;  %v11249_v26 = vld [vmem:[#allocation38_spill] sm:$0xff]  ;;  %v5972_v7 = vmul.f32 -1.442695, %v2279_v57  ;;  %v2229_v57 = vrot.slane %v8909_v8, 3 }
 0x5a1   :  { %v6589_v47 = vpop.eup %6588  ;;  %v2362_v40 = vadd.f32 1.0, %v6587_v0  ;;  %6614 = vrcp.f32 %v2358_v23  ;;  %v2295_v59 = vadd.f32 %v2231_v29, %v11249_v26  ;;  %v11250_v23 = vld [vmem:[#allocation40_spill] sm:$0xff]  ;;  %v5974_v0 = vmul.f32 -1.442695, %v2283_v10 }
 0x5a2   :  { %v8941_v51 = vpop.eup %6590  ;;  %v2364_v9 = vadd.f32 1.0, %v6589_v47  ;;  %6616 = vrcp.f32 %v2360_v18  ;;  %v2299_v38 = vadd.f32 %v2235_v56, %v11250_v23  ;;  %v2225_v18 = vrot.slane %v8909_v8, 2  ;;  %v11251_v47 = vld [vmem:[#allocation20_spill] sm:$0xff] }
 0x5a3   :  { %v8944_v31 = vpop.eup %6592  ;;  %6618 = vrcp.f32 %v2362_v40  ;;  %v2273_v2 = vadd.f32 %v2213_v21, %v11251_v47  ;;  %v5978_v29 = vmul.f32 -1.442695, %v2291_v6  ;;  %v5980_v10 = vmul.f32 -1.442695, %v2295_v59  ;;  %v11254_v6 = vld [vmem:[#allocation33_spill] sm:$0xff] }
 0x5a4   :  { %v8947_v43 = vpop.eup %6594  ;;  %6620 = vrcp.f32 %v2364_v9  ;;  %v11252_v9 = vld [vmem:[#allocation29_spill] sm:$0xff]  ;;  %v2233_v23 = vrot.slane %v8909_v8, 4  ;;  %v5982_v21 = vmul.f32 -1.442695, %v2299_v38  ;;  %v2285_v47 = vadd.f32 %v2221_v32, %v11254_v6  ;;  %v11257_v38 = vld [vmem:[#allocation39_spill] sm:$0xff] }
 0x5a5   :  { %v8951_v3 = vpop.eup %6596  ;;  %6622 = vpow2.f32 %v5968_v20  ;;  %v2277_v26 = vadd.f32 %v2217_v48, %v11252_v9  ;;  %v11253_v20 = vld [vmem:[#allocation31_spill] sm:$0xff]  ;;  %v2293_v55 = vadd.f32 %v2229_v57, %v11256_v63  ;;  %v11258_v32 = vld [vmem:[#allocation41_spill] sm:$0xff] }
 0x5a6   :  { %v8955_v40 = vpop.eup %6598  ;;  %6624 = vpow2.f32 %v5970_v49  ;;  %v2281_v5 = vadd.f32 %v8909_v8, %v11253_v20  ;;  %v2237_v49 = vrot.slane %v8909_v8, 5  ;;  %v11255_v48 = vld [vmem:[#allocation35_spill] sm:$0xff]  ;;  %v5986_v6 = vmul.f32 -1.442695, %v2285_v47 }
 0x5a7   :  { %v8959_v56 = vpop.eup %6600  ;;  %6626 = vpow2.f32 %v5972_v7  ;;  %v2289_v9 = vadd.f32 %v2225_v18, %v11255_v48  ;;  %v5983_v7 = vmul.f32 -1.442695, %v2273_v2  ;;  %v5984_v20 = vmul.f32 -1.442695, %v2277_v26 }
 0x5a8   :  { %v8964_v19 = vpop.eup %6602  ;;  %6628 = vpow2.f32 %v5974_v0  ;;  %v2297_v0 = vadd.f32 %v2233_v23, %v11257_v38  ;;  %v5985_v8 = vmul.f32 -1.442695, %v2281_v5  ;;  %v5988_v26 = vmul.f32 -1.442695, %v2293_v55 }
 0x5a9   :  { %v8968_v16 = vpop.eup %6604  ;;  %6630 = vpow2.f32 %v5976_v27  ;;  %v2301_v27 = vadd.f32 %v2237_v49, %v11258_v32  ;;  %v5987_v2 = vmul.f32 -1.442695, %v2289_v9 }
 0x5aa   :  { %v8971_v59 = vpop.eup %6606  ;;  %6632 = vpow2.f32 %v5978_v29 }
 0x5ab   :  { %v8974_v45 = vpop.eup %6608  ;;  %6634 = vpow2.f32 %v5980_v10  ;;  %v5989_v10 = vmul.f32 -1.442695, %v2297_v0  ;;  %v5990_v5 = vmul.f32 -1.442695, %v2301_v27 }
 0x5ac   :  { %v8977_v36 = vpop.eup %6610  ;;  %6636 = vpow2.f32 %v5982_v21 }
 0x5ad   :  { %v8980_v18 = vpop.eup %6612  ;;  %6638 = vpow2.f32 %v5983_v7 }
 0x5ae   :  { %v8982_v29 = vpop.eup %6614  ;;  %6640 = vpow2.f32 %v5984_v20 }
 0x5af   :  { %v8984_v57 = vpop.eup %6616  ;;  %6642 = vpow2.f32 %v5985_v8 }
 0x5b0   :  { %v8986_v23 = vpop.eup %6618  ;;  %6644 = vpow2.f32 %v5986_v6 }
 0x5b1   :  { %v8988_v21 = vpop.eup %6620  ;;  %6646 = vpow2.f32 %v5987_v2 }
 0x5b2   :  { %v6623_v47 = vpop.eup %6622  ;;  %6648 = vpow2.f32 %v5988_v26 }
 0x5b3   :  { %v6625_v49 = vpop.eup %6624  ;;  %v2351_v7 = vadd.f32 1.0, %v6623_v47  ;;  %6650 = vpow2.f32 %v5989_v10 }
 0x5b4   :  { %v6627_v9 = vpop.eup %6626  ;;  %v2353_v32 = vadd.f32 1.0, %v6625_v49  ;;  %6652 = vpow2.f32 %v5990_v5 }
 0x5b5   :  { %v6629_v55 = vpop.eup %6628  ;;  %v2355_v20 = vadd.f32 1.0, %v6627_v9  ;;  %6654 = vrcp.f32 %v2351_v7 }
 0x5b6   :  { %v6631_v8 = vpop.eup %6630  ;;  %v2357_v0 = vadd.f32 1.0, %v6629_v55  ;;  %6656 = vrcp.f32 %v2353_v32 }
 0x5b7   :  { %v6633_v38 = vpop.eup %6632  ;;  %v2359_v6 = vadd.f32 1.0, %v6631_v8  ;;  %6658 = vrcp.f32 %v2355_v20 }
 0x5b8   :  { %v6635_v27 = vpop.eup %6634  ;;  %v2361_v63 = vadd.f32 1.0, %v6633_v38  ;;  %6660 = vrcp.f32 %v2357_v0  ;;  %v2462_v0 = vrot.slane %v8733_v60, 7  ;;  %v2468_v60 = vrot.slane %v8759_v62, 7 }
 0x5b9   :  { %v6637_v2 = vpop.eup %6636  ;;  %v2363_v26 = vadd.f32 1.0, %v6635_v27  ;;  %6662 = vrcp.f32 %v2359_v6  ;;  %v2463_v6 = vrot.slane %v8737_v34, 7  ;;  %v2486_v34 = vmul.f32 %v8974_v45, %v8941_v51 }
 0x5ba   :  { %v6639_v47 = vpop.eup %6638  ;;  %v2365_v10 = vadd.f32 1.0, %v6637_v2  ;;  %6664 = vrcp.f32 %v2361_v63  ;;  %v2465_v2 = vrot.slane %v8746_v35, 7 }
 0x5bb   :  { %v6641_v49 = vpop.eup %6640  ;;  %6666 = vrcp.f32 %v2363_v26  ;;  %v2430_v5 = vadd.f32 1.0, %v6639_v47  ;;  %v2464_v26 = vrot.slane %v8741_v17, 7  ;;  %v2469_v17 = vrot.slane %v8762_v41, 7 }
 0x5bc   :  { %v6643_v9 = vpop.eup %6642  ;;  %6668 = vrcp.f32 %v2365_v10  ;;  %v2431_v7 = vadd.f32 1.0, %v6641_v49  ;;  %v2466_v49 = vrot.slane %v8751_v22, 7 }
 0x5bd   :  { %v6645_v55 = vpop.eup %6644  ;;  %v2432_v32 = vadd.f32 1.0, %v6643_v9  ;;  %6670 = vrcp.f32 %v2430_v5 }
 0x5be   :  { %v6647_v48 = vpop.eup %6646  ;;  %v2433_v8 = vadd.f32 1.0, %v6645_v55  ;;  %6672 = vrcp.f32 %v2431_v7  ;;  %v2487_v55 = vmul.f32 %v8977_v36, %v8944_v31  ;;  %v2490_v36 = vmul.f32 %v8982_v29, %v8955_v40 }
 0x5bf   :  { %v6649_v20 = vpop.eup %6648  ;;  %v2434_v30 = vadd.f32 1.0, %v6647_v48  ;;  %6674 = vrcp.f32 %v2432_v32  ;;  %v2467_v48 = vrot.slane %v8756_v11, 7  ;;  %v2488_v11 = vmul.f32 %v8971_v59, %v8947_v43 }
 0x5c0   :  { %v6651_v38 = vpop.eup %6650  ;;  %v2435_v27 = vadd.f32 1.0, %v6649_v20  ;;  %6676 = vrcp.f32 %v2433_v8 }
 0x5c1   :  { %v6653_v63 = vpop.eup %6652  ;;  %v2436_v47 = vadd.f32 1.0, %v6651_v38  ;;  %6678 = vrcp.f32 %v2434_v30  ;;  %v2489_v30 = vmul.f32 %v8980_v18, %v8951_v3 }
 0x5c2   :  { %v6655_v10 = vpop.eup %6654  ;;  %v2437_v5 = vadd.f32 1.0, %v6653_v63  ;;  %6680 = vrcp.f32 %v2435_v27  ;;  %v2492_v27 = vmul.f32 %v8986_v23, %v8964_v19  ;;  %v2493_v63 = vmul.f32 %v8988_v21, %v8968_v16 }
 0x5c3   :  { %v6657_v9 = vpop.eup %6656  ;;  %v2478_v7 = vmul.f32 %v6655_v10, %v2462_v0  ;;  %6682 = vrcp.f32 %v2436_v47  ;;  %v2491_v0 = vmul.f32 %v8984_v57, %v8959_v56 }
 0x5c4   :  { %v6659_v35 = vpop.eup %6658  ;;  %v2479_v32 = vmul.f32 %v6657_v9, %v2463_v6  ;;  %6684 = vrcp.f32 %v2437_v5 }
 0x5c5   :  { %v6661_v22 = vpop.eup %6660  ;;  %v2480_v8 = vmul.f32 %v6659_v35, %v2464_v26  ;;  %v9004_v20 = vadd.f32 %v2486_v34, %v2478_v7 }
 0x5c6   :  { %v6663_v62 = vpop.eup %6662  ;;  %v9008_v45 = vadd.f32 %v2487_v55, %v2479_v32  ;;  %v2481_v41 = vmul.f32 %v6661_v22, %v2465_v2 }
 0x5c7   :  { %v6665_v51 = vpop.eup %6664  ;;  %v2482_v31 = vmul.f32 %v6663_v62, %v2466_v49  ;;  %v9012_v38 = vadd.f32 %v2488_v11, %v2480_v8  ;;  %6686 = vtanh.f32 %v9004_v20 }
 0x5c8   :  { %v6667_v43 = vpop.eup %6666  ;;  %v2483_v59 = vmul.f32 %v6665_v51, %v2467_v48  ;;  %v9017_v6 = vadd.f32 %v2489_v30, %v2481_v41  ;;  %6688 = vtanh.f32 %v9008_v45 }
 0x5c9   :  { %v6669_v3 = vpop.eup %6668  ;;  %v2484_v18 = vmul.f32 %v6667_v43, %v2468_v60  ;;  %v9022_v40 = vadd.f32 %v2490_v36, %v2482_v31  ;;  %6690 = vtanh.f32 %v9012_v38 }
 0x5ca   :  { %v2485_v29 = vmul.f32 %v6669_v3, %v2469_v17  ;;  %v9027_v2 = vadd.f32 %v2491_v0, %v2483_v59  ;;  %6692 = vtanh.f32 %v9017_v6  ;;  %v6671_v57 = vpop.eup %6670 }
 0x5cb   :  { %v9030_v56 = vadd.f32 %v2492_v27, %v2484_v18  ;;  %6694 = vtanh.f32 %v9022_v40  ;;  %v6673_v19 = vpop.eup %6672 }
 0x5cc   :  { %v9033_v26 = vadd.f32 %v2493_v63, %v2485_v29  ;;  %6696 = vtanh.f32 %v9027_v2  ;;  %v6675_v23 = vpop.eup %6674 }
 0x5cd   :  { %6698 = vtanh.f32 %v9030_v56  ;;  %v6677_v16 = vpop.eup %6676 }
 0x5ce   :  { %6700 = vtanh.f32 %v9033_v26  ;;  %v6679_v21 = vpop.eup %6678 }
 0x5cf   :  { %v6681_v47 = vpop.eup %6680 }
 0x5d0   :  { %v6683_v10 = vpop.eup %6682 }
 0x5d1   :  { %v6685_v49 = vpop.eup %6684 }
 0x5d4   :  { %v6687_v48 = vpop.eup %6686 }
 0x5d5   :  { %v6689_v5 = vpop.eup %6688  ;;  %v2510_v9 = vmul.f32 %v6687_v48, %v6671_v57 }
 0x5d6   :  { %v6691_v60 = vpop.eup %6690  ;;  %v2511_v34 = vmul.f32 %v6689_v5, %v6673_v19 }
 0x5d7   :  { %v6693_v7 = vpop.eup %6692  ;;  %v2512_v35 = vmul.f32 %v6691_v60, %v6675_v23  ;;  %v2518_v17 = vpack.c.bf16 %v2510_v9, %v2510_v9 }
 0x5d8   :  { %v6695_v55 = vpop.eup %6694  ;;  %v2513_v32 = vmul.f32 %v6693_v7, %v6677_v16  ;;  %v2519_v22 = vpack.c.bf16 %v2511_v34, %v2511_v34 }
 0x5d9   :  { %v6697_v11 = vpop.eup %6696  ;;  %v2514_v8 = vmul.f32 %v6695_v55, %v6679_v21  ;;  %v2520_v62 = vpack.c.bf16 %v2512_v35, %v2512_v35  ;;  %v2534_v30 = vunpack.c.l.b16 %v2518_v17 }
 0x5da   :  { %v6699_v41 = vpop.eup %6698  ;;  %v2515_v51 = vmul.f32 %v6697_v11, %v6681_v47  ;;  %v2521_v36 = vpack.c.bf16 %v2513_v32, %v2513_v32  ;;  %v2535_v31 = vunpack.c.l.b16 %v2519_v22 }
 0x5db   :  { %v6701_v43 = vpop.eup %6700  ;;  %v2516_v59 = vmul.f32 %v6699_v41, %v6683_v10  ;;  %v2522_v0 = vpack.c.bf16 %v2514_v8, %v2514_v8  ;;  %v2542_v3 = vrot.slane %v2534_v30, 2  ;;  %v2536_v19 = vunpack.c.l.b16 %v2520_v62  ;;  %v9049_v8 = vld [vmem:[#allocation7 + $0xe0] ss:$16 sps:$4 sm:$0xff]   ;;  %v9052_v62 = vld [vmem:[#allocation7 + $0xe8] ss:$16 sps:$4 sm:$0xff]  }
 0x5dc   :  { %v2517_v18 = vmul.f32 %v6701_v43, %v6685_v49  ;;  %v2523_v27 = vpack.c.bf16 %v2515_v51, %v2515_v51  ;;  %v2537_v29 = vunpack.c.l.b16 %v2521_v36  ;;  %v2543_v63 = vrot.slane %v2535_v31, 1  ;;  %v9055_v30 = vld [vmem:[#allocation7 + $0xc4] ss:$16 sps:$4 sm:$0xff]   ;;  %v9058_v41 = vld [vmem:[#allocation7 + $0xcc] ss:$16 sps:$4 sm:$0xff]  }
 0x5dd   :  { %v2524_v57 = vpack.c.bf16 %v2516_v59, %v2516_v59  ;;  %v2538_v23 = vunpack.c.l.b16 %v2522_v0  ;;  %v9063_v51 = vld [vmem:[#allocation7 + $0xc0] ss:$16 sps:$4 sm:$0xff]   ;;  %v9066_v36 = vld [vmem:[#allocation7 + $0xc8] ss:$16 sps:$4 sm:$0xff]   ;;  %v9069_v31 = vld [vmem:[#allocation7 + $0xa4] ss:$16 sps:$4 sm:$0xff]  }
 0x5de   :  { %v2525_v16 = vpack.c.bf16 %v2517_v18, %v2517_v18  ;;  %v2539_v48 = vunpack.c.l.b16 %v2523_v27  ;;  %v2544_v21 = vsel %vm938_vm3, %v2543_v63, %v2542_v3  ;;  %v2546_v5 = vrot.slane %v2537_v29, 7  ;;  %v9072_v43 = vld [vmem:[#allocation7 + $0xac] ss:$16 sps:$4 sm:$0xff]   ;;  %v9075_v59 = vld [vmem:[#allocation7 + $0xa0] ss:$16 sps:$4 sm:$0xff]  }
 0x5df   :  { %v2540_v9 = vunpack.c.l.b16 %v2524_v57  ;;  %v2545_v47 = vsel %vm941_vm4, %v2536_v19, %v2544_v21  ;;  %v2548_v60 = vrot.slane %v2538_v23, 6  ;;  %v9078_v0 = vld [vmem:[#allocation7 + $0xa8] ss:$16 sps:$4 sm:$0xff]   ;;  %v9081_v3 = vld [vmem:[#allocation7 + $0x84] ss:$16 sps:$4 sm:$0xff]  }
 0x5e0   :  { %v2541_v34 = vunpack.c.l.b16 %v2525_v16  ;;  %v2547_v10 = vsel %vm944_vm5, %v2546_v5, %v2545_v47  ;;  %v2550_v7 = vrot.slane %v2539_v48, 5  ;;  %v9084_v18 = vld [vmem:[#allocation7 + $0x8c] ss:$16 sps:$4 sm:$0xff]   ;;  %v9087_v27 = vld [vmem:[#allocation7 + $0x80] ss:$16 sps:$4 sm:$0xff]  }
 0x5e1   :  { %v2549_v49 = vsel %vm947_vm6, %v2548_v60, %v2547_v10  ;;  %v2552_v35 = vrot.slane %v2540_v9, 4  ;;  %v9090_v29 = vld [vmem:[#allocation7 + $0x88] ss:$16 sps:$4 sm:$0xff]   ;;  %v9093_v63 = vld [vmem:[#allocation7 + $0x64] ss:$16 sps:$4 sm:$0xff]  }
 0x5e2   :  { %v2551_v17 = vsel %vm950_vm7, %v2550_v7, %v2549_v49  ;;  %v2554_v55 = vrot.slane %v2541_v34, 3  ;;  %v9096_v57 = vld [vmem:[#allocation7 + $0x6c] ss:$16 sps:$4 sm:$0xff]   ;;  %v9099_v19 = vld [vmem:[#allocation7 + $0x60] ss:$16 sps:$4 sm:$0xff]  }
 0x5e3   :  { %v2553_v32 = vsel %vm953_vm8, %v2552_v35, %v2551_v17  ;;  %v9102_v23 = vld [vmem:[#allocation7 + $0x68] ss:$16 sps:$4 sm:$0xff]   ;;  %v9105_v16 = vld [vmem:[#allocation7 + $0x44] ss:$16 sps:$4 sm:$0xff]   ;;  %v9108_v48 = vld [vmem:[#allocation7 + $0x4c] ss:$16 sps:$4 sm:$0xff]  }
 0x5e4   :  { %v2555_v22 = vsel %vm956_vm9, %v2554_v55, %v2553_v32  ;;  %11259 = vst [vmem:[#allocation42_spill] sm:$0xff] %v9108_v48  ;;  %v9111_v21 = vld [vmem:[#allocation7 + $0x40] ss:$16 sps:$4 sm:$0xff]   ;;  %v9114_v5 = vld [vmem:[#allocation7 + $0x48] ss:$16 sps:$4 sm:$0xff]   ;;  %v2077_v32 = vadd.f32 %v8898_v33, %v11172_v1  ;;  %v2120_v33 = vadd.f32 %v8904_v50, %v11176_v52 }
 0x5e5   :  { %v9045_v11 = vpack.c.b16 %v2555_v22, %v2555_v22  ;;  %11260 = vst [vmem:[#allocation43_spill] sm:$0xff] %v9111_v21  ;;  %11261 = vst [vmem:[#allocation44_spill] sm:$0xff] %v9114_v5  ;;  %v9117_v9 = vld [vmem:[#allocation7 + $0x24] ss:$16 sps:$4 sm:$0xff]   ;;  %v9120_v47 = vld [vmem:[#allocation7 + $0x2c] ss:$16 sps:$4 sm:$0xff]  }
 0x5e6   :  { %11262 = vst [vmem:[#allocation45_spill] sm:$0xff] %v9117_v9  ;;  %11263 = vst [vmem:[#allocation46_spill] sm:$0xff] %v9120_v47  ;;  %v9123_v60 = vld [vmem:[#allocation7 + $0x20] ss:$16 sps:$4 sm:$0xff]   ;;  %v9126_v34 = vld [vmem:[#allocation7 + $0x28] ss:$16 sps:$4 sm:$0xff]  }
 0x5e7   :  { %2591 = vmatmul.mubr.bf16.vlgmr.msra.gmra.mxu0 %v9045_v11  ;;  %2632 = vmatmul.mubr.bf16.vlgmr.msra.gmra.mxu1 %v9045_v11  ;;  %11264 = vst [vmem:[#allocation47_spill] sm:$0xff] %v9123_v60  ;;  %11265 = vst [vmem:[#allocation48_spill] sm:$0xff] %v9126_v34  ;;  %v9129_v10 = vld [vmem:[#allocation7 + $0x4] ss:$16 sps:$4 sm:$0xff]   ;;  %v9132_v7 = vld [vmem:[#allocation7 + $0xc] ss:$16 sps:$4 sm:$0xff]  }
 0x5e8   :  { %2666 = vmatpush1.bf16.msra.mxu0 %v9049_v8  ;;  %2707 = vmatpush1.bf16.msra.mxu1 %v9052_v62  ;;  %11266 = vst [vmem:[#allocation49_spill] sm:$0xff] %v9129_v10  ;;  %11267 = vst [vmem:[#allocation50_spill] sm:$0xff] %v9132_v7  ;;  %v9135_v49 = vld [vmem:[#allocation7] ss:$16 sps:$4 sm:$0xff]   ;;  %v9138_v35 = vld [vmem:[#allocation7 + $0x8] ss:$16 sps:$4 sm:$0xff]  }
 0x5e9   :  { %2667 = vmatprep.subr.bf16.mxu0 %v9055_v30  ;;  %2708 = vmatprep.subr.bf16.mxu1 %v9058_v41  ;;  %11268 = vst [vmem:[#allocation51_spill] sm:$0xff] %v9135_v49  ;;  %11269 = vst [vmem:[#allocation52_spill] sm:$0xff] %v9138_v35  ;;  %v9141_v17 = vld [vmem:[#allocation3 + $0xe4] ss:$16 sps:$4 sm:$0xff]   ;;  %v9144_v55 = vld [vmem:[#allocation3 + $0xec] ss:$16 sps:$4 sm:$0xff]  }
 0x5ea   :  { %2697 = vmatprep.mubr.bf16.mxu0 %v11036_v58  ;;  %2738 = vmatprep.mubr.bf16.mxu1 %v11036_v58  ;;  %11270 = vst [vmem:[#allocation53_spill] sm:$0xff] %v9141_v17  ;;  %11271 = vst [vmem:[#allocation54_spill] sm:$0xff] %v9144_v55 }
 0x5ec   :  { %2668 = vmatpush1.bf16.msra.mxu0 %v9063_v51  ;;  %2709 = vmatpush1.bf16.msra.mxu1 %v9066_v36 }
 0x5ed   :  { %2669 = vmatprep.subr.bf16.mxu0 %v9069_v31  ;;  %2710 = vmatprep.subr.bf16.mxu1 %v9072_v43 }
 0x5f0   :  { %2670 = vmatpush1.bf16.msra.mxu0 %v9075_v59  ;;  %2711 = vmatpush1.bf16.msra.mxu1 %v9078_v0 }
 0x5f1   :  { %2671 = vmatprep.subr.bf16.mxu0 %v9081_v3  ;;  %2712 = vmatprep.subr.bf16.mxu1 %v9084_v18 }
 0x5f4   :  { %2672 = vmatpush1.bf16.msra.mxu0 %v9087_v27  ;;  %2713 = vmatpush1.bf16.msra.mxu1 %v9090_v29 }
 0x5f5   :  { %2673 = vmatprep.subr.bf16.mxu0 %v9093_v63  ;;  %2714 = vmatprep.subr.bf16.mxu1 %v9096_v57 }
 0x5f8   :  { %2674 = vmatpush1.bf16.msra.mxu0 %v9099_v19  ;;  %2715 = vmatpush1.bf16.msra.mxu1 %v9102_v23 }
 0x5f9   :  { %2675 = vmatprep.subr.bf16.mxu0 %v9105_v16  ;;  %2716 = vmatprep.subr.bf16.mxu1 %v9108_v48 }
 0x5fc   :  { %2676 = vmatpush1.bf16.msra.mxu0 %v9111_v21  ;;  %2717 = vmatpush1.bf16.msra.mxu1 %v9114_v5 }
 0x5fd   :  { %2677 = vmatprep.subr.bf16.mxu0 %v9117_v9  ;;  %2718 = vmatprep.subr.bf16.mxu1 %v9120_v47 }
 0x600   :  { %2678 = vmatpush1.bf16.msra.mxu0 %v9123_v60  ;;  %2719 = vmatpush1.bf16.msra.mxu1 %v9126_v34 }
 0x601   :  { %2679 = vmatprep.subr.bf16.mxu0 %v9129_v10  ;;  %2720 = vmatprep.subr.bf16.mxu1 %v9132_v7 }
 0x604   :  { %2680 = vmatpush1.bf16.msra.mxu0 %v9135_v49  ;;  %2721 = vmatpush1.bf16.msra.mxu1 %v9138_v35  ;;  %v2079_v49 = vadd.f32 %v8902_v42, %v11174_v37 }
 0x605   :  { %2747 = vmatprep.subr.bf16.mxu0 %v9141_v17  ;;  %2788 = vmatprep.subr.bf16.mxu1 %v9144_v55  ;;  %v2118_v55 = vadd.f32 %v8900_v46, %v11178_v28 }
 0x6a7   :  { %v2592_v22 = vpop.f32.mrf.mxu0  ;;  %v2633_v7 = vpop.f32.mrf.mxu1 }
 0x6a8   :  { %v2593_v10 = vadd.f32 %v2592_v22, %v2077_v32  ;;  %v2634_v42 = vadd.f32 %v2633_v7, %v2118_v55  ;;  %v9168_v55 = vld [vmem:[#allocation3 + $0xcc] ss:$16 sps:$4 sm:$0xff]  }
 0x6a9   :  { %v2594_v34 = vpop.f32.mrf.mxu0  ;;  %v2635_v60 = vpop.f32.mrf.mxu1  ;;  %11276 = vst [vmem:[#allocation59_spill] sm:$0xff] %v9168_v55 }
 0x6aa   :  { %v5991_v35 = vmul.f32 -1.442695, %v2593_v10  ;;  %v2595_v47 = vadd.f32 %v2594_v34, %v2079_v49  ;;  %v2636_v1 = vadd.f32 %v2635_v60, %v2120_v33  ;;  %v9173_v33 = vld [vmem:[#allocation3 + $0xc0] ss:$16 sps:$4 sm:$0xff]  }
 0x6ab   :  { %v2596_v9 = vpop.f32.mrf.mxu0  ;;  %v2637_v5 = vpop.f32.mrf.mxu1  ;;  %11277 = vst [vmem:[#allocation60_spill] sm:$0xff] %v9173_v33 }
 0x6ac   :  { %6702 = vpow2.f32 %v5991_v35  ;;  %v5992_v17 = vmul.f32 -1.442695, %v2595_v47  ;;  %v5993_v32 = vmul.f32 -1.442695, %v2636_v1 }
 0x6ad   :  { %v2597_v21 = vpop.f32.mrf.mxu0  ;;  %v2638_v48 = vpop.f32.mrf.mxu1 }
 0x6ae   :  { %6704 = vpow2.f32 %v5992_v17  ;;  %v9162_v17 = vld [vmem:[#allocation3 + $0xe8] ss:$16 sps:$4 sm:$0xff]  }
 0x6af   :  { %6706 = vtanh.f32 %v2634_v42  ;;  %11274 = vst [vmem:[#allocation57_spill] sm:$0xff] %v9162_v17  ;;  %v9176_v42 = vld [vmem:[#allocation3 + $0xc8] ss:$16 sps:$4 sm:$0xff]  }
 0x6b0   :  { %6708 = vpow2.f32 %v5993_v32  ;;  %11278 = vst [vmem:[#allocation61_spill] sm:$0xff] %v9176_v42  ;;  %v9179_v32 = vld [vmem:[#allocation3 + $0xa4] ss:$16 sps:$4 sm:$0xff]  }
 0x6b1   :  { %11279 = vst [vmem:[#allocation62_spill] sm:$0xff] %v9179_v32 }
 0x6b9   :  { %v6703_v22 = vpop.eup %6702 }
 0x6ba   :  { %v2646_v37 = vadd.f32 1.0, %v6703_v22  ;;  %v9182_v22 = vld [vmem:[#allocation3 + $0xac] ss:$16 sps:$4 sm:$0xff]  }
 0x6bb   :  { %v6705_v34 = vpop.eup %6704  ;;  %11280 = vst [vmem:[#allocation63_spill] sm:$0xff] %v9182_v22 }
 0x6bc   :  { %6710 = vrcp.f32 %v2646_v37  ;;  %v2647_v5 = vadd.f32 1.0, %v6705_v34  ;;  %v6707_v21 = vpop.eup %6706  ;;  %v9159_v37 = vld [vmem:[#allocation3 + $0xe0] ss:$16 sps:$4 sm:$0xff]  }
 0x6bd   :  { %v6709_v48 = vpop.eup %6708  ;;  %11273 = vst [vmem:[#allocation56_spill] sm:$0xff] %v9159_v37  ;;  %v9185_v34 = vld [vmem:[#allocation3 + $0xa0] ss:$16 sps:$4 sm:$0xff]  }
 0x6be   :  { %6712 = vrcp.f32 %v2647_v5  ;;  %v2656_v50 = vadd.f32 1.0, %v6709_v48  ;;  %11281 = vst [vmem:[#allocation64_spill] sm:$0xff] %v9185_v34  ;;  %v9188_v5 = vld [vmem:[#allocation3 + $0xa8] ss:$16 sps:$4 sm:$0xff]   ;;  %v9194_v48 = vld [vmem:[#allocation3 + $0x8c] ss:$16 sps:$4 sm:$0xff]  }
 0x6bf   :  { %11282 = vst [vmem:[#allocation65_spill] sm:$0xff] %v9188_v5  ;;  %11284 = vst [vmem:[#allocation67_spill] sm:$0xff] %v9194_v48 }
 0x6c0   :  { %6714 = vrcp.f32 %v2656_v50  ;;  %v9206_v50 = vld [vmem:[#allocation3 + $0x6c] ss:$16 sps:$4 sm:$0xff]  }
 0x6c1   :  { %11288 = vst [vmem:[#allocation139_spill] sm:$0xff] %v9206_v50 }
 0x6c9   :  { %v6711_v9 = vpop.eup %6710 }
 0x6ca   :  { %v2660_v47 = vmul.f32 %v6711_v9, %v6707_v21  ;;  %v9191_v21 = vld [vmem:[#allocation3 + $0x84] ss:$16 sps:$4 sm:$0xff]   ;;  %v9197_v9 = vld [vmem:[#allocation3 + $0x80] ss:$16 sps:$4 sm:$0xff]  }
 0x6cb   :  { %v6713_v10 = vpop.eup %6712  ;;  %11283 = vst [vmem:[#allocation66_spill] sm:$0xff] %v9191_v21  ;;  %11285 = vst [vmem:[#allocation68_spill] sm:$0xff] %v9197_v9 }
 0x6cc   :  { %v2659_v60 = vmul.f32 %v6713_v10, %v8821_v61  ;;  %v9165_v61 = vld [vmem:[#allocation3 + $0xc4] ss:$16 sps:$4 sm:$0xff]  }
 0x6cd   :  { %v6715_v1 = vpop.eup %6714  ;;  %11275 = vst [vmem:[#allocation58_spill] sm:$0xff] %v9165_v61  ;;  %v9203_v10 = vld [vmem:[#allocation3 + $0x64] ss:$16 sps:$4 sm:$0xff]  }
 0x6ce   :  { %v9156_v49 = vadd.f32 %v2660_v47, %v2659_v60  ;;  %v9200_v47 = vld [vmem:[#allocation3 + $0x88] ss:$16 sps:$4 sm:$0xff]   ;;  %11287 = vst [vmem:[#allocation137_spill] sm:$0xff] %v9203_v10  ;;  %v9209_v60 = vld [vmem:[#allocation3 + $0x60] ss:$16 sps:$4 sm:$0xff]  }
 0x6cf   :  { %11286 = vst [vmem:[#allocation69_spill] sm:$0xff] %v9200_v47  ;;  %11289 = vst [vmem:[#allocation140_spill] sm:$0xff] %v9209_v60 }
 0x6d0   :  { %11272 = vst [vmem:[#allocation55_spill] sm:$0xff] %v9156_v49  ;;  %6716 = vtanh.f32 %v9156_v49 }
 0x6dd   :  { %v6717_v46 = vpop.eup %6716 }
 0x6de   :  { %v2663_v7 = vmul.f32 %v6717_v46, %v6715_v1  ;;  %v9212_v1 = vld [vmem:[#allocation3 + $0x68] ss:$16 sps:$4 sm:$0xff]   ;;  %v9215_v46 = vld [vmem:[#allocation3 + $0x44] ss:$16 sps:$4 sm:$0xff]  }
 0x6df   :  { %11290 = vst [vmem:[#allocation138_spill] sm:$0xff] %v9212_v1  ;;  %11291 = vst [vmem:[#allocation74_spill] sm:$0xff] %v9215_v46 }
 0x6e0   :  { %v2664_v35 = vpack.c.bf16 %v2663_v7, %v2663_v7  ;;  %v9218_v7 = vld [vmem:[#allocation3 + $0x4c] ss:$16 sps:$4 sm:$0xff]  }
 0x6e1   :  { %11292 = vst [vmem:[#allocation75_spill] sm:$0xff] %v9218_v7 }
 0x6e2   :  { %2698 = vmatmul.mubr.bf16.vlgmr.msra.gmra.mxu0 %v2664_v35  ;;  %2739 = vmatmul.mubr.bf16.vlgmr.msra.gmra.mxu1 %v2664_v35  ;;  %v9221_v35 = vld [vmem:[#allocation3 + $0x40] ss:$16 sps:$4 sm:$0xff]  }
 0x6e3   :  { %2748 = vmatpush1.bf16.msra.mxu0 %v9159_v37  ;;  %2789 = vmatpush1.bf16.msra.mxu1 %v9162_v17  ;;  %11293 = vst [vmem:[#allocation76_spill] sm:$0xff] %v9221_v35 }
 0x6e4   :  { %2749 = vmatprep.subr.bf16.mxu0 %v9165_v61  ;;  %2790 = vmatprep.subr.bf16.mxu1 %v9168_v55 }
 0x6e5   :  { %2779 = vmatprep.mubr.bf16.mxu0 %v11036_v58  ;;  %2820 = vmatprep.mubr.bf16.mxu1 %v11036_v58 }
 0x6e7   :  { %2750 = vmatpush1.bf16.msra.mxu0 %v9173_v33  ;;  %2791 = vmatpush1.bf16.msra.mxu1 %v9176_v42 }
 0x6e8   :  { %2751 = vmatprep.subr.bf16.mxu0 %v9179_v32  ;;  %2792 = vmatprep.subr.bf16.mxu1 %v9182_v22 }
 0x6eb   :  { %2752 = vmatpush1.bf16.msra.mxu0 %v9185_v34  ;;  %2793 = vmatpush1.bf16.msra.mxu1 %v9188_v5 }
 0x6ec   :  { %2753 = vmatprep.subr.bf16.mxu0 %v9191_v21  ;;  %2794 = vmatprep.subr.bf16.mxu1 %v9194_v48 }
 0x6ef   :  { %2754 = vmatpush1.bf16.msra.mxu0 %v9197_v9  ;;  %2795 = vmatpush1.bf16.msra.mxu1 %v9200_v47 }
 0x6f0   :  { %2755 = vmatprep.subr.bf16.mxu0 %v9203_v10  ;;  %2796 = vmatprep.subr.bf16.mxu1 %v9206_v50  ;;  %v9224_v50 = vld [vmem:[#allocation3 + $0x48] ss:$16 sps:$4 sm:$0xff]  }
 0x6f1   :  { %11294 = vst [vmem:[#allocation77_spill] sm:$0xff] %v9224_v50 }
 0x6f3   :  { %2756 = vmatpush1.bf16.msra.mxu0 %v9209_v60  ;;  %2797 = vmatpush1.bf16.msra.mxu1 %v9212_v1  ;;  %v9227_v60 = vld [vmem:[#allocation3 + $0x24] ss:$16 sps:$4 sm:$0xff]   ;;  %v9230_v1 = vld [vmem:[#allocation3 + $0x2c] ss:$16 sps:$4 sm:$0xff]  }
 0x6f4   :  { %2757 = vmatprep.subr.bf16.mxu0 %v9215_v46  ;;  %2798 = vmatprep.subr.bf16.mxu1 %v9218_v7  ;;  %11295 = vst [vmem:[#allocation78_spill] sm:$0xff] %v9227_v60  ;;  %11296 = vst [vmem:[#allocation79_spill] sm:$0xff] %v9230_v1  ;;  %v9233_v46 = vld [vmem:[#allocation3 + $0x20] ss:$16 sps:$4 sm:$0xff]   ;;  %v9236_v7 = vld [vmem:[#allocation3 + $0x28] ss:$16 sps:$4 sm:$0xff]  }
 0x6f5   :  { %11297 = vst [vmem:[#allocation80_spill] sm:$0xff] %v9233_v46  ;;  %11298 = vst [vmem:[#allocation81_spill] sm:$0xff] %v9236_v7 }
 0x6f7   :  { %2758 = vmatpush1.bf16.msra.mxu0 %v9221_v35  ;;  %2799 = vmatpush1.bf16.msra.mxu1 %v9224_v50  ;;  %v9239_v35 = vld [vmem:[#allocation3 + $0x4] ss:$16 sps:$4 sm:$0xff]   ;;  %v9242_v50 = vld [vmem:[#allocation3 + $0xc] ss:$16 sps:$4 sm:$0xff]  }
 0x6f8   :  { %2759 = vmatprep.subr.bf16.mxu0 %v9227_v60  ;;  %2800 = vmatprep.subr.bf16.mxu1 %v9230_v1  ;;  %11299 = vst [vmem:[#allocation82_spill] sm:$0xff] %v9239_v35  ;;  %11300 = vst [vmem:[#allocation83_spill] sm:$0xff] %v9242_v50  ;;  %v9245_v60 = vld [vmem:[#allocation3] ss:$16 sps:$4 sm:$0xff]   ;;  %v9248_v1 = vld [vmem:[#allocation3 + $0x8] ss:$16 sps:$4 sm:$0xff]  }
 0x6f9   :  { %11301 = vst [vmem:[#allocation84_spill] sm:$0xff] %v9245_v60  ;;  %11302 = vst [vmem:[#allocation85_spill] sm:$0xff] %v9248_v1 }
 0x6fb   :  { %2760 = vmatpush1.bf16.msra.mxu0 %v9233_v46  ;;  %2801 = vmatpush1.bf16.msra.mxu1 %v9236_v7  ;;  %v9251_v46 = vld [vmem:[#allocation5 + $0xe4] ss:$16 sps:$4 sm:$0xff]   ;;  %v9254_v7 = vld [vmem:[#allocation5 + $0xec] ss:$16 sps:$4 sm:$0xff]  }
 0x6fc   :  { %2761 = vmatprep.subr.bf16.mxu0 %v9239_v35  ;;  %2802 = vmatprep.subr.bf16.mxu1 %v9242_v50  ;;  %11303 = vst [vmem:[#allocation86_spill] sm:$0xff] %v9251_v46  ;;  %11304 = vst [vmem:[#allocation87_spill] sm:$0xff] %v9254_v7  ;;  %v9259_v50 = vld [vmem:[#allocation5 + $0xe0] ss:$16 sps:$4 sm:$0xff]  }
 0x6fd   :  { %11305 = vst [vmem:[#allocation88_spill] sm:$0xff] %v9259_v50 }
 0x6ff   :  { %2762 = vmatpush1.bf16.msra.mxu0 %v9245_v60  ;;  %2803 = vmatpush1.bf16.msra.mxu1 %v9248_v1  ;;  %v9262_v60 = vld [vmem:[#allocation5 + $0xe8] ss:$16 sps:$4 sm:$0xff]   ;;  %v9265_v1 = vld [vmem:[#allocation5 + $0xc4] ss:$16 sps:$4 sm:$0xff]  }
 0x700   :  { %3181 = vmatprep.subr.bf16.mxu0 %v9251_v46  ;;  %3222 = vmatprep.subr.bf16.mxu1 %v9254_v7  ;;  %11306 = vst [vmem:[#allocation89_spill] sm:$0xff] %v9262_v60  ;;  %11307 = vst [vmem:[#allocation90_spill] sm:$0xff] %v9265_v1  ;;  %v9268_v46 = vld [vmem:[#allocation5 + $0xcc] ss:$16 sps:$4 sm:$0xff]   ;;  %v9288_v7 = vld [vmem:[#allocation5 + $0xa8] ss:$16 sps:$4 sm:$0xff]  }
 0x701   :  { %11308 = vst [vmem:[#allocation91_spill] sm:$0xff] %v9268_v46  ;;  %11314 = vst [vmem:[#allocation97_spill] sm:$0xff] %v9288_v7 }
 0x702   :  { %2780 = vmatmul.mubr.bf16.vlgmr.msra.gmra.mxu0 %v9045_v11  ;;  %2821 = vmatmul.mubr.bf16.vlgmr.msra.gmra.mxu1 %v9045_v11  ;;  %v9273_v11 = vld [vmem:[#allocation5 + $0xc0] ss:$16 sps:$4 sm:$0xff]  }
 0x703   :  { %3182 = vmatpush1.bf16.msra.mxu0 %v9259_v50  ;;  %3223 = vmatpush1.bf16.msra.mxu1 %v9262_v60  ;;  %11309 = vst [vmem:[#allocation92_spill] sm:$0xff] %v9273_v11  ;;  %v9276_v50 = vld [vmem:[#allocation5 + $0xc8] ss:$16 sps:$4 sm:$0xff]   ;;  %v9279_v60 = vld [vmem:[#allocation5 + $0xa4] ss:$16 sps:$4 sm:$0xff]  }
 0x704   :  { %3183 = vmatprep.subr.bf16.mxu0 %v9265_v1  ;;  %3224 = vmatprep.subr.bf16.mxu1 %v9268_v46  ;;  %11310 = vst [vmem:[#allocation93_spill] sm:$0xff] %v9276_v50  ;;  %11311 = vst [vmem:[#allocation94_spill] sm:$0xff] %v9279_v60  ;;  %v9282_v1 = vld [vmem:[#allocation5 + $0xac] ss:$16 sps:$4 sm:$0xff]   ;;  %v9285_v46 = vld [vmem:[#allocation5 + $0xa0] ss:$16 sps:$4 sm:$0xff]  }
 0x705   :  { %3213 = vmatprep.mubr.bf16.mxu0 %v11036_v58  ;;  %3254 = vmatprep.mubr.bf16.mxu1 %v11036_v58  ;;  %11312 = vst [vmem:[#allocation95_spill] sm:$0xff] %v9282_v1  ;;  %11313 = vst [vmem:[#allocation96_spill] sm:$0xff] %v9285_v46 }
 0x707   :  { %3184 = vmatpush1.bf16.msra.mxu0 %v9273_v11  ;;  %3225 = vmatpush1.bf16.msra.mxu1 %v9276_v50  ;;  %v9291_v11 = vld [vmem:[#allocation5 + $0x84] ss:$16 sps:$4 sm:$0xff]   ;;  %v9294_v50 = vld [vmem:[#allocation5 + $0x8c] ss:$16 sps:$4 sm:$0xff]  }
 0x708   :  { %3185 = vmatprep.subr.bf16.mxu0 %v9279_v60  ;;  %3226 = vmatprep.subr.bf16.mxu1 %v9282_v1  ;;  %11315 = vst [vmem:[#allocation98_spill] sm:$0xff] %v9291_v11  ;;  %11316 = vst [vmem:[#allocation99_spill] sm:$0xff] %v9294_v50  ;;  %v9297_v60 = vld [vmem:[#allocation5 + $0x80] ss:$16 sps:$4 sm:$0xff]   ;;  %v9300_v1 = vld [vmem:[#allocation5 + $0x88] ss:$16 sps:$4 sm:$0xff]  }
 0x709   :  { %11317 = vst [vmem:[#allocation100_spill] sm:$0xff] %v9297_v60  ;;  %11318 = vst [vmem:[#allocation101_spill] sm:$0xff] %v9300_v1 }
 0x70b   :  { %3186 = vmatpush1.bf16.msra.mxu0 %v9285_v46  ;;  %3227 = vmatpush1.bf16.msra.mxu1 %v9288_v7  ;;  %v9303_v46 = vld [vmem:[#allocation5 + $0x64] ss:$16 sps:$4 sm:$0xff]   ;;  %v9306_v7 = vld [vmem:[#allocation5 + $0x6c] ss:$16 sps:$4 sm:$0xff]  }
 0x70c   :  { %3187 = vmatprep.subr.bf16.mxu0 %v9291_v11  ;;  %3228 = vmatprep.subr.bf16.mxu1 %v9294_v50  ;;  %11319 = vst [vmem:[#allocation102_spill] sm:$0xff] %v9303_v46  ;;  %11320 = vst [vmem:[#allocation103_spill] sm:$0xff] %v9306_v7  ;;  %v9309_v11 = vld [vmem:[#allocation5 + $0x60] ss:$16 sps:$4 sm:$0xff]   ;;  %v9312_v50 = vld [vmem:[#allocation5 + $0x68] ss:$16 sps:$4 sm:$0xff]  }
 0x70d   :  { %11321 = vst [vmem:[#allocation104_spill] sm:$0xff] %v9309_v11  ;;  %11322 = vst [vmem:[#allocation105_spill] sm:$0xff] %v9312_v50 }
 0x70f   :  { %3188 = vmatpush1.bf16.msra.mxu0 %v9297_v60  ;;  %3229 = vmatpush1.bf16.msra.mxu1 %v9300_v1  ;;  %v9315_v60 = vld [vmem:[#allocation5 + $0x44] ss:$16 sps:$4 sm:$0xff]   ;;  %v9318_v1 = vld [vmem:[#allocation5 + $0x4c] ss:$16 sps:$4 sm:$0xff]  }
 0x710   :  { %3189 = vmatprep.subr.bf16.mxu0 %v9303_v46  ;;  %3230 = vmatprep.subr.bf16.mxu1 %v9306_v7  ;;  %11323 = vst [vmem:[#allocation106_spill] sm:$0xff] %v9315_v60  ;;  %11324 = vst [vmem:[#allocation107_spill] sm:$0xff] %v9318_v1  ;;  %v9321_v46 = vld [vmem:[#allocation5 + $0x40] ss:$16 sps:$4 sm:$0xff]   ;;  %v9324_v7 = vld [vmem:[#allocation5 + $0x48] ss:$16 sps:$4 sm:$0xff]  }
 0x711   :  { %11325 = vst [vmem:[#allocation108_spill] sm:$0xff] %v9321_v46  ;;  %11326 = vst [vmem:[#allocation109_spill] sm:$0xff] %v9324_v7 }
 0x713   :  { %3190 = vmatpush1.bf16.msra.mxu0 %v9309_v11  ;;  %3231 = vmatpush1.bf16.msra.mxu1 %v9312_v50  ;;  %v9327_v11 = vld [vmem:[#allocation5 + $0x24] ss:$16 sps:$4 sm:$0xff]   ;;  %v9330_v50 = vld [vmem:[#allocation5 + $0x2c] ss:$16 sps:$4 sm:$0xff]  }
 0x714   :  { %3191 = vmatprep.subr.bf16.mxu0 %v9315_v60  ;;  %3232 = vmatprep.subr.bf16.mxu1 %v9318_v1  ;;  %11327 = vst [vmem:[#allocation110_spill] sm:$0xff] %v9327_v11  ;;  %11328 = vst [vmem:[#allocation111_spill] sm:$0xff] %v9330_v50  ;;  %v9333_v60 = vld [vmem:[#allocation5 + $0x20] ss:$16 sps:$4 sm:$0xff]   ;;  %v9336_v1 = vld [vmem:[#allocation5 + $0x28] ss:$16 sps:$4 sm:$0xff]  }
 0x715   :  { %11329 = vst [vmem:[#allocation112_spill] sm:$0xff] %v9333_v60  ;;  %11330 = vst [vmem:[#allocation113_spill] sm:$0xff] %v9336_v1 }
 0x717   :  { %3192 = vmatpush1.bf16.msra.mxu0 %v9321_v46  ;;  %3233 = vmatpush1.bf16.msra.mxu1 %v9324_v7  ;;  %v9339_v46 = vld [vmem:[#allocation5 + $0x4] ss:$16 sps:$4 sm:$0xff]   ;;  %v9342_v7 = vld [vmem:[#allocation5 + $0xc] ss:$16 sps:$4 sm:$0xff]  }
 0x718   :  { %3193 = vmatprep.subr.bf16.mxu0 %v9327_v11  ;;  %3234 = vmatprep.subr.bf16.mxu1 %v9330_v50  ;;  %11331 = vst [vmem:[#allocation114_spill] sm:$0xff] %v9339_v46  ;;  %11332 = vst [vmem:[#allocation115_spill] sm:$0xff] %v9342_v7  ;;  %v9345_v11 = vld [vmem:[#allocation5] ss:$16 sps:$4 sm:$0xff]   ;;  %v9348_v50 = vld [vmem:[#allocation5 + $0x8] ss:$16 sps:$4 sm:$0xff]  }
 0x719   :  { %11333 = vst [vmem:[#allocation116_spill] sm:$0xff] %v9345_v11  ;;  %11334 = vst [vmem:[#allocation117_spill] sm:$0xff] %v9348_v50 }
 0x71b   :  { %3194 = vmatpush1.bf16.msra.mxu0 %v9333_v60  ;;  %3235 = vmatpush1.bf16.msra.mxu1 %v9336_v1 }
 0x71c   :  { %3195 = vmatprep.subr.bf16.mxu0 %v9339_v46  ;;  %3236 = vmatprep.subr.bf16.mxu1 %v9342_v7 }
 0x71f   :  { %3196 = vmatpush1.bf16.msra.mxu0 %v9345_v11  ;;  %3237 = vmatpush1.bf16.msra.mxu1 %v9348_v50 }
 0x720   :  { %3288 = vmatprep.subr.bf16.mxu0 %v8892_v39  ;;  %3329 = vmatprep.subr.bf16.mxu1 %v8895_v24 }
 0x7a2   :  { %v9353_v1 = vpop.f32.mrf.mxu0  ;;  %v9355_v60 = vpop.f32.mrf.mxu1 }
 0x7a3   :  { %11335 = vst [vmem:[#allocation118_spill] sm:$0xff] %v9355_v60 }
 0x7a4   :  { %v9357_v46 = vpop.f32.mrf.mxu0  ;;  %v9359_v35 = vpop.f32.mrf.mxu1 }
 0x7a5   :  { %11336 = vst [vmem:[#allocation119_spill] sm:$0xff] %v9357_v46  ;;  %11337 = vst [vmem:[#allocation120_spill] sm:$0xff] %v9359_v35 }
 0x7a6   :  { %v2703_v7 = vpop.f32.mrf.mxu0  ;;  %v2744_v10 = vpop.f32.mrf.mxu1 }
 0x7a7   :  { %v11338_v10 = vld [vmem:[#allocation12_spill] sm:$0xff] }
 0x7a8   :  { %v2704_v47 = vpop.f32.mrf.mxu0  ;;  %v2745_v11 = vpop.f32.mrf.mxu1 }
 0x7c2   :  { %v2781_v9 = vpop.f32.mrf.mxu0  ;;  %v2822_v48 = vpop.f32.mrf.mxu1 }
 0x7c3   :  { %v2833_v21 = vrot.slane %v2781_v9, 5  ;;  %v2837_v50 = vrot.slane %v2781_v9, 6  ;;  %v2841_v5 = vrot.slane %v2781_v9, 7  ;;  %v2845_v39 = vrot.slane %v2781_v9, 1 }
 0x7c4   :  { %v2849_v34 = vrot.slane %v2781_v9, 2  ;;  %v2853_v24 = vrot.slane %v2781_v9, 3  ;;  %v2857_v22 = vrot.slane %v2781_v9, 4  ;;  %v2905_v32 = vadd.f32 %v2781_v9, %v11245_v54  ;;  %v9362_v42 = vpop.f32.mrf.mxu0  ;;  %v9364_v33 = vpop.f32.mrf.mxu1 }
 0x7c5   :  { %v2893_v7 = vadd.f32 %v2833_v21, %v11243_v53  ;;  %v2897_v47 = vadd.f32 %v2837_v50, %v11244_v4  ;;  %v2901_v11 = vadd.f32 %v2841_v5, %v11338_v10  ;;  %v2909_v55 = vadd.f32 %v2845_v39, %v8054_v12 }
 0x7c6   :  { %v2913_v61 = vadd.f32 %v2849_v34, %v8056_v13  ;;  %v2917_v17 = vadd.f32 %v2853_v24, %v8058_v14  ;;  %v6000_v37 = vmul.f32 -1.442695, %v2905_v32  ;;  %v2785_v49 = vpop.f32.mrf.mxu0  ;;  %v2826_v60 = vpop.f32.mrf.mxu1  ;;  %v2921_v9 = vadd.f32 %v2857_v22, %v8060_v15  ;;  %v11340_v24 = vld [vmem:[#allocation23_spill] sm:$0xff]  ;;  %v11358_v14 = vld [vmem:[#allocation37_spill] sm:$0xff] }
 0x7c7   :  { %v5994_v54 = vmul.f32 -1.442695, %v2893_v7  ;;  %v5996_v28 = vmul.f32 -1.442695, %v2897_v47  ;;  %v5998_v35 = vmul.f32 -1.442695, %v2901_v11 }
 0x7c8   :  { %6718 = vpow2.f32 %v6000_v37  ;;  %v6002_v21 = vmul.f32 -1.442695, %v2909_v55  ;;  %v2786_v53 = vpop.f32.mrf.mxu0  ;;  %v2827_v50 = vpop.f32.mrf.mxu1  ;;  %v6004_v5 = vmul.f32 -1.442695, %v2913_v61  ;;  %v2835_v10 = vrot.slane %v2822_v48, 5  ;;  %v11339_v55 = vld [vmem:[#allocation22_spill] sm:$0xff] }
 0x7c9   :  { %6720 = vpow2.f32 %v5994_v54  ;;  %v2839_v39 = vrot.slane %v2822_v48, 6  ;;  %v6006_v34 = vmul.f32 -1.442695, %v2917_v17  ;;  %v2843_v13 = vrot.slane %v2822_v48, 7  ;;  %v11341_v17 = vld [vmem:[#allocation24_spill] sm:$0xff]  ;;  %v11343_v11 = vld [vmem:[#allocation26_spill] sm:$0xff] }
 0x7ca   :  { %6722 = vpow2.f32 %v5996_v28  ;;  %v6008_v32 = vmul.f32 -1.442695, %v2921_v9  ;;  %v2847_v49 = vrot.slane %v2822_v48, 1  ;;  %v2895_v22 = vadd.f32 %v2835_v10, %v8075_v44  ;;  %v11344_v9 = vld [vmem:[#allocation27_spill] sm:$0xff] }
 0x7cb   :  { %6724 = vpow2.f32 %v5998_v35  ;;  %v2851_v60 = vrot.slane %v2822_v48, 2  ;;  %v2899_v37 = vadd.f32 %v2839_v39, %v8090_v25  ;;  %v2855_v53 = vrot.slane %v2822_v48, 3  ;;  %v11342_v35 = vld [vmem:[#allocation25_spill] sm:$0xff] }
 0x7cc   :  { %6726 = vpow2.f32 %v6002_v21  ;;  %v2903_v54 = vadd.f32 %v2843_v13, %v11339_v55  ;;  %v2859_v61 = vrot.slane %v2822_v48, 4  ;;  %v2907_v28 = vadd.f32 %v2822_v48, %v11340_v24  ;;  %v11349_v55 = vld [vmem:[#allocation34_spill] sm:$0xff] }
 0x7cd   :  { %6728 = vpow2.f32 %v6004_v5  ;;  %v2911_v7 = vadd.f32 %v2847_v49, %v11341_v17  ;;  %v2915_v47 = vadd.f32 %v2851_v60, %v11342_v35  ;;  %v2919_v10 = vadd.f32 %v2855_v53, %v11343_v11  ;;  %v11347_v11 = vld [vmem:[#allocation30_spill] sm:$0xff]  ;;  %v11348_v17 = vld [vmem:[#allocation32_spill] sm:$0xff] }
 0x7ce   :  { %6730 = vpow2.f32 %v6006_v34  ;;  %v2923_v21 = vadd.f32 %v2859_v61, %v11344_v9  ;;  %v2834_v50 = vrot.slane %v9362_v42, 5  ;;  %v2838_v5 = vrot.slane %v9362_v42, 6  ;;  %v11345_v61 = vld [vmem:[#allocation19_spill] sm:$0xff] }
 0x7cf   :  { %6732 = vpow2.f32 %v6008_v32  ;;  %v2842_v34 = vrot.slane %v9362_v42, 7  ;;  %v2850_v60 = vrot.slane %v9362_v42, 2 }
 0x7d0   :  { %6734 = vtanh.f32 %v2895_v22  ;;  %v2846_v22 = vrot.slane %v9362_v42, 1 }
 0x7d1   :  { %6736 = vtanh.f32 %v2899_v37  ;;  %v2902_v35 = vadd.f32 %v2842_v34, %v11347_v11 }
 0x7d2   :  { %6738 = vtanh.f32 %v2903_v54  ;;  %v2854_v54 = vrot.slane %v9362_v42, 3 }
 0x7d3   :  { %6740 = vtanh.f32 %v2907_v28  ;;  %v2894_v28 = vadd.f32 %v2834_v50, %v11345_v61  ;;  %v2910_v50 = vadd.f32 %v2846_v22, %v11349_v55  ;;  %v11350_v61 = vld [vmem:[#allocation36_spill] sm:$0xff] }
 0x7d4   :  { %6742 = vtanh.f32 %v2911_v7 }
 0x7d5   :  { %v6719_v13 = vpop.eup %6718  ;;  %6744 = vtanh.f32 %v2915_v47  ;;  %v5995_v44 = vmul.f32 -1.442695, %v2894_v28  ;;  %v11352_v28 = vld [vmem:[#allocation40_spill] sm:$0xff] }
 0x7d6   :  { %v6721_v48 = vpop.eup %6720  ;;  %v2979_v39 = vadd.f32 1.0, %v6719_v13  ;;  %6746 = vtanh.f32 %v2919_v10  ;;  %v2858_v10 = vrot.slane %v9362_v42, 4  ;;  %v11346_v13 = vld [vmem:[#allocation28_spill] sm:$0xff] }
 0x7d7   :  { %v6723_v32 = vpop.eup %6722  ;;  %v2973_v49 = vadd.f32 1.0, %v6721_v48  ;;  %6748 = vtanh.f32 %v2923_v21  ;;  %v2898_v9 = vadd.f32 %v2838_v5, %v11346_v13  ;;  %v2836_v5 = vrot.slane %v9364_v33, 5 }
 0x7d8   :  { %v6725_v37 = vpop.eup %6724  ;;  %v2975_v53 = vadd.f32 1.0, %v6723_v32  ;;  %6750 = vrcp.f32 %v2979_v39  ;;  %v2906_v32 = vadd.f32 %v9362_v42, %v11348_v17  ;;  %v2840_v42 = vrot.slane %v9364_v33, 6 }
 0x7d9   :  { %v6727_v7 = vpop.eup %6726  ;;  %v2977_v47 = vadd.f32 1.0, %v6725_v37  ;;  %6752 = vrcp.f32 %v2973_v49  ;;  %v2914_v37 = vadd.f32 %v2850_v60, %v11350_v61  ;;  %v5997_v34 = vmul.f32 -1.442695, %v2898_v9 }
 0x7da   :  { %v6729_v48 = vpop.eup %6728  ;;  %v2981_v21 = vadd.f32 1.0, %v6727_v7  ;;  %6754 = vrcp.f32 %v2975_v53  ;;  %v2844_v60 = vrot.slane %v9364_v33, 7  ;;  %v6001_v61 = vmul.f32 -1.442695, %v2906_v32 }
 0x7db   :  { %v6731_v39 = vpop.eup %6730  ;;  %v2983_v24 = vadd.f32 1.0, %v6729_v48  ;;  %6756 = vrcp.f32 %v2977_v47  ;;  %v11351_v47 = vld [vmem:[#allocation38_spill] sm:$0xff]  ;;  %v5999_v48 = vmul.f32 -1.442695, %v2902_v35  ;;  %v2848_v9 = vrot.slane %v9364_v33, 1 }
 0x7dc   :  { %v6733_v49 = vpop.eup %6732  ;;  %v2985_v25 = vadd.f32 1.0, %v6731_v39  ;;  %6758 = vrcp.f32 %v2981_v21  ;;  %v2918_v22 = vadd.f32 %v2854_v54, %v11351_v47  ;;  %v2922_v21 = vadd.f32 %v2858_v10, %v11352_v28  ;;  %v11354_v47 = vld [vmem:[#allocation29_spill] sm:$0xff] }
 0x7dd   :  { %v9396_v7 = vpop.eup %6734  ;;  %v2987_v53 = vadd.f32 1.0, %v6733_v49  ;;  %6760 = vrcp.f32 %v2983_v24  ;;  %v6003_v24 = vmul.f32 -1.442695, %v2910_v50  ;;  %v11353_v49 = vld [vmem:[#allocation20_spill] sm:$0xff]  ;;  %v6005_v35 = vmul.f32 -1.442695, %v2914_v37 }
 0x7de   :  { %v9399_v17 = vpop.eup %6736  ;;  %6762 = vrcp.f32 %v2985_v25  ;;  %v2896_v11 = vadd.f32 %v2836_v5, %v11353_v49  ;;  %v2852_v54 = vrot.slane %v9364_v33, 2  ;;  %v2900_v13 = vadd.f32 %v2840_v42, %v11354_v47  ;;  %v11357_v42 = vld [vmem:[#allocation35_spill] sm:$0xff] }
 0x7df   :  { %v9403_v39 = vpop.eup %6738  ;;  %6764 = vrcp.f32 %v2987_v53  ;;  %v6007_v10 = vmul.f32 -1.442695, %v2918_v22  ;;  %v2856_v32 = vrot.slane %v9364_v33, 3  ;;  %v6009_v5 = vmul.f32 -1.442695, %v2922_v21 }
 0x7e0   :  { %v9406_v55 = vpop.eup %6740  ;;  %6766 = vpow2.f32 %v5995_v44  ;;  %v11355_v44 = vld [vmem:[#allocation31_spill] sm:$0xff]  ;;  %v2860_v49 = vrot.slane %v9364_v33, 4  ;;  %v2912_v47 = vadd.f32 %v2848_v9, %v11357_v42 }
 0x7e1   :  { %v9410_v25 = vpop.eup %6742  ;;  %6768 = vpow2.f32 %v5997_v34  ;;  %v2904_v50 = vadd.f32 %v2844_v60, %v11355_v44  ;;  %v11356_v34 = vld [vmem:[#allocation33_spill] sm:$0xff]  ;;  %v2916_v60 = vadd.f32 %v2852_v54, %v11358_v14  ;;  %v6011_v44 = vmul.f32 -1.442695, %v2900_v13 }
 0x7e2   :  { %v9414_v53 = vpop.eup %6744  ;;  %6770 = vpow2.f32 %v5999_v48  ;;  %v2908_v37 = vadd.f32 %v9364_v33, %v11356_v34  ;;  %v6010_v48 = vmul.f32 -1.442695, %v2896_v11  ;;  %v11360_v33 = vld [vmem:[#allocation41_spill] sm:$0xff]  ;;  %v6014_v11 = vmul.f32 -1.442695, %v2912_v47 }
 0x7e3   :  { %v9418_v28 = vpop.eup %6746  ;;  %6772 = vpow2.f32 %v6001_v61  ;;  %v11359_v61 = vld [vmem:[#allocation39_spill] sm:$0xff]  ;;  %v6012_v12 = vmul.f32 -1.442695, %v2904_v50  ;;  %v6015_v13 = vmul.f32 -1.442695, %v2916_v60 }
 0x7e4   :  { %v9423_v15 = vpop.eup %6748  ;;  %6774 = vpow2.f32 %v6003_v24  ;;  %v2920_v21 = vadd.f32 %v2856_v32, %v11359_v61  ;;  %v2924_v24 = vadd.f32 %v2860_v49, %v11360_v33  ;;  %v6013_v34 = vmul.f32 -1.442695, %v2908_v37 }
 0x7e5   :  { %v9426_v22 = vpop.eup %6750  ;;  %6776 = vpow2.f32 %v6005_v35 }
 0x7e6   :  { %v9429_v4 = vpop.eup %6752  ;;  %6778 = vpow2.f32 %v6007_v10  ;;  %v6016_v10 = vmul.f32 -1.442695, %v2920_v21  ;;  %v6017_v50 = vmul.f32 -1.442695, %v2924_v24 }
 0x7e7   :  { %v9432_v52 = vpop.eup %6754  ;;  %6780 = vpow2.f32 %v6009_v5 }
 0x7e8   :  { %v9435_v9 = vpop.eup %6756  ;;  %6782 = vpow2.f32 %v6010_v48 }
 0x7e9   :  { %v9437_v35 = vpop.eup %6758  ;;  %6784 = vpow2.f32 %v6011_v44 }
 0x7ea   :  { %v9439_v54 = vpop.eup %6760  ;;  %6786 = vpow2.f32 %v6012_v12 }
 0x7eb   :  { %v9441_v32 = vpop.eup %6762  ;;  %6788 = vpow2.f32 %v6013_v34 }
 0x7ec   :  { %v9443_v5 = vpop.eup %6764  ;;  %6790 = vpow2.f32 %v6014_v11 }
 0x7ed   :  { %v6767_v49 = vpop.eup %6766  ;;  %6792 = vpow2.f32 %v6015_v13 }
 0x7ee   :  { %v6769_v37 = vpop.eup %6768  ;;  %v2974_v48 = vadd.f32 1.0, %v6767_v49  ;;  %6794 = vpow2.f32 %v6016_v10 }
 0x7ef   :  { %v6771_v47 = vpop.eup %6770  ;;  %v2976_v33 = vadd.f32 1.0, %v6769_v37  ;;  %6796 = vpow2.f32 %v6017_v50 }
 0x7f0   :  { %v6773_v44 = vpop.eup %6772  ;;  %v2978_v60 = vadd.f32 1.0, %v6771_v47  ;;  %6798 = vrcp.f32 %v2974_v48 }
 0x7f1   :  { %v6775_v12 = vpop.eup %6774  ;;  %v2980_v21 = vadd.f32 1.0, %v6773_v44  ;;  %6800 = vrcp.f32 %v2976_v33 }
 0x7f2   :  { %v6777_v61 = vpop.eup %6776  ;;  %v2982_v34 = vadd.f32 1.0, %v6775_v12  ;;  %6802 = vrcp.f32 %v2978_v60 }
 0x7f3   :  { %v6779_v24 = vpop.eup %6778  ;;  %v2984_v14 = vadd.f32 1.0, %v6777_v61  ;;  %6804 = vrcp.f32 %v2980_v21  ;;  %v3085_v21 = vrot.slane %v9004_v20, 7  ;;  %v3091_v20 = vrot.slane %v9030_v56, 7 }
 0x7f4   :  { %v6781_v11 = vpop.eup %6780  ;;  %v2986_v13 = vadd.f32 1.0, %v6779_v24  ;;  %6806 = vrcp.f32 %v2982_v34  ;;  %v3086_v34 = vrot.slane %v9008_v45, 7  ;;  %v3109_v45 = vmul.f32 %v9429_v4, %v9396_v7 }
 0x7f5   :  { %v6783_v49 = vpop.eup %6782  ;;  %v2988_v10 = vadd.f32 1.0, %v6781_v11  ;;  %6808 = vrcp.f32 %v2984_v14  ;;  %v3087_v11 = vrot.slane %v9012_v38, 7  ;;  %v3112_v4 = vmul.f32 %v9426_v22, %v9406_v55 }
 0x7f6   :  { %v6785_v37 = vpop.eup %6784  ;;  %6810 = vrcp.f32 %v2986_v13  ;;  %v3053_v50 = vadd.f32 1.0, %v6783_v49  ;;  %v3088_v13 = vrot.slane %v9017_v6, 7  ;;  %v3092_v6 = vrot.slane %v9033_v26, 7 }
 0x7f7   :  { %v6787_v47 = vpop.eup %6786  ;;  %6812 = vrcp.f32 %v2988_v10  ;;  %v3054_v48 = vadd.f32 1.0, %v6785_v37  ;;  %v3089_v37 = vrot.slane %v9022_v40, 7 }
 0x7f8   :  { %v6789_v44 = vpop.eup %6788  ;;  %v3055_v33 = vadd.f32 1.0, %v6787_v47  ;;  %6814 = vrcp.f32 %v3053_v50 }
 0x7f9   :  { %v6791_v42 = vpop.eup %6790  ;;  %v3056_v12 = vadd.f32 1.0, %v6789_v44  ;;  %6816 = vrcp.f32 %v3054_v48  ;;  %v3110_v44 = vmul.f32 %v9432_v52, %v9399_v17  ;;  %v3113_v52 = vmul.f32 %v9437_v35, %v9410_v25 }
 0x7fa   :  { %v6793_v60 = vpop.eup %6792  ;;  %v3057_v46 = vadd.f32 1.0, %v6791_v42  ;;  %6818 = vrcp.f32 %v3055_v33  ;;  %v3090_v42 = vrot.slane %v9027_v2, 7  ;;  %v3111_v2 = vmul.f32 %v9435_v9, %v9403_v39 }
 0x7fb   :  { %v6795_v61 = vpop.eup %6794  ;;  %v3058_v24 = vadd.f32 1.0, %v6793_v60  ;;  %6820 = vrcp.f32 %v3056_v12 }
 0x7fc   :  { %v6797_v14 = vpop.eup %6796  ;;  %v3059_v49 = vadd.f32 1.0, %v6795_v61  ;;  %6822 = vrcp.f32 %v3057_v46 }
 0x7fd   :  { %v6799_v10 = vpop.eup %6798  ;;  %v3060_v50 = vadd.f32 1.0, %v6797_v14  ;;  %6824 = vrcp.f32 %v3058_v24  ;;  %v3115_v24 = vmul.f32 %v9441_v32, %v9418_v28  ;;  %v3116_v14 = vmul.f32 %v9443_v5, %v9423_v15 }
 0x7fe   :  { %v6801_v47 = vpop.eup %6800  ;;  %v3101_v48 = vmul.f32 %v6799_v10, %v3085_v21  ;;  %6826 = vrcp.f32 %v3059_v49  ;;  %v3114_v21 = vmul.f32 %v9439_v54, %v9414_v53 }
 0x7ff   :  { %v6803_v38 = vpop.eup %6802  ;;  %v3102_v33 = vmul.f32 %v6801_v47, %v3086_v34  ;;  %6828 = vrcp.f32 %v3060_v50 }
 0x800   :  { %v6805_v40 = vpop.eup %6804  ;;  %v3103_v12 = vmul.f32 %v6803_v38, %v3087_v11  ;;  %v9459_v60 = vadd.f32 %v3109_v45, %v3101_v48 }
 0x801   :  { %v6807_v56 = vpop.eup %6806  ;;  %v3104_v46 = vmul.f32 %v6805_v40, %v3088_v13  ;;  %v9463_v7 = vadd.f32 %v3110_v44, %v3102_v33 }
 0x802   :  { %v6809_v26 = vpop.eup %6808  ;;  %v3105_v17 = vmul.f32 %v6807_v56, %v3089_v37  ;;  %v9467_v61 = vadd.f32 %v3111_v2, %v3103_v12  ;;  %6830 = vtanh.f32 %v9459_v60 }
 0x803   :  { %v6811_v39 = vpop.eup %6810  ;;  %v3106_v9 = vmul.f32 %v6809_v26, %v3090_v42  ;;  %v9472_v34 = vadd.f32 %v3112_v4, %v3104_v46  ;;  %6832 = vtanh.f32 %v9463_v7 }
 0x804   :  { %v6813_v55 = vpop.eup %6812  ;;  %v3107_v22 = vmul.f32 %v6811_v39, %v3091_v20  ;;  %v9477_v25 = vadd.f32 %v3113_v52, %v3105_v17  ;;  %6834 = vtanh.f32 %v9467_v61 }
 0x805   :  { %v3108_v35 = vmul.f32 %v6813_v55, %v3092_v6  ;;  %v9482_v11 = vadd.f32 %v3114_v21, %v3106_v9  ;;  %6836 = vtanh.f32 %v9472_v34  ;;  %v6815_v54 = vpop.eup %6814 }
 0x806   :  { %v9485_v53 = vadd.f32 %v3115_v24, %v3107_v22  ;;  %6838 = vtanh.f32 %v9477_v25  ;;  %v6817_v28 = vpop.eup %6816 }
 0x807   :  { %v9488_v13 = vadd.f32 %v3116_v14, %v3108_v35  ;;  %6840 = vtanh.f32 %v9482_v11  ;;  %v6819_v32 = vpop.eup %6818 }
 0x808   :  { %6842 = vtanh.f32 %v9485_v53  ;;  %v6821_v15 = vpop.eup %6820 }
 0x809   :  { %6844 = vtanh.f32 %v9488_v13  ;;  %v6823_v5 = vpop.eup %6822 }
 0x80a   :  { %v6825_v49 = vpop.eup %6824 }
 0x80b   :  { %v6827_v10 = vpop.eup %6826 }
 0x80c   :  { %v6829_v37 = vpop.eup %6828 }
 0x80f   :  { %v6831_v42 = vpop.eup %6830 }
 0x810   :  { %v6833_v50 = vpop.eup %6832  ;;  %v3133_v47 = vmul.f32 %v6831_v42, %v6815_v54 }
 0x811   :  { %v6835_v20 = vpop.eup %6834  ;;  %v3134_v45 = vmul.f32 %v6833_v50, %v6817_v28 }
 0x812   :  { %v6837_v48 = vpop.eup %6836  ;;  %v3135_v38 = vmul.f32 %v6835_v20, %v6819_v32  ;;  %v3141_v6 = vpack.c.bf16 %v3133_v47, %v3133_v47 }
 0x813   :  { %v6839_v44 = vpop.eup %6838  ;;  %v3136_v33 = vmul.f32 %v6837_v48, %v6821_v15  ;;  %v3142_v40 = vpack.c.bf16 %v3134_v45, %v3134_v45 }
 0x814   :  { %v6841_v2 = vpop.eup %6840  ;;  %v3137_v12 = vmul.f32 %v6839_v44, %v6823_v5  ;;  %v3143_v56 = vpack.c.bf16 %v3135_v38, %v3135_v38  ;;  %v3157_v4 = vunpack.c.l.b16 %v3141_v6 }
 0x815   :  { %v6843_v46 = vpop.eup %6842  ;;  %v3138_v26 = vmul.f32 %v6841_v2, %v6825_v49  ;;  %v3144_v52 = vpack.c.bf16 %v3136_v33, %v3136_v33  ;;  %v3158_v17 = vunpack.c.l.b16 %v3142_v40 }
 0x816   :  { %v6845_v39 = vpop.eup %6844  ;;  %v3139_v9 = vmul.f32 %v6843_v46, %v6827_v10  ;;  %v3145_v21 = vpack.c.bf16 %v3137_v12, %v3137_v12  ;;  %v3159_v55 = vunpack.c.l.b16 %v3143_v56  ;;  %v3165_v22 = vrot.slane %v3157_v4, 3 }
 0x817   :  { %v3140_v24 = vmul.f32 %v6845_v39, %v6829_v37  ;;  %v3146_v35 = vpack.c.bf16 %v3138_v26, %v3138_v26  ;;  %v3166_v14 = vrot.slane %v3158_v17, 2  ;;  %v3160_v42 = vunpack.c.l.b16 %v3144_v52 }
 0x818   :  { %v3147_v54 = vpack.c.bf16 %v3139_v9, %v3139_v9  ;;  %v3161_v28 = vunpack.c.l.b16 %v3145_v21  ;;  %v3168_v32 = vrot.slane %v3159_v55, 1 }
 0x819   :  { %v3148_v15 = vpack.c.bf16 %v3140_v24, %v3140_v24  ;;  %v3162_v5 = vunpack.c.l.b16 %v3146_v35  ;;  %v3167_v50 = vsel %vm938_vm3, %v3166_v14, %v3165_v22  ;;  %v11377_v22 = vld [vmem:[#allocation72_spill] sm:$0xff]  ;;  %v11379_v14 = vld [vmem:[#allocation73_spill] sm:$0xff] }
 0x81a   :  { %v3163_v47 = vunpack.c.l.b16 %v3147_v54  ;;  %v3169_v49 = vsel %vm941_vm4, %v3168_v32, %v3167_v50  ;;  %v3171_v20 = vrot.slane %v3161_v28, 7  ;;  %v11378_v24 = vld [vmem:[#allocation120_spill] sm:$0xff]  ;;  %v11380_v54 = vld [vmem:[#allocation118_spill] sm:$0xff] }
 0x81b   :  { %v3164_v45 = vunpack.c.l.b16 %v3148_v15  ;;  %v3170_v10 = vsel %vm944_vm5, %v3160_v42, %v3169_v49  ;;  %v3173_v48 = vrot.slane %v3162_v5, 6  ;;  %v2741_v28 = vadd.f32 %v11380_v54, %v11379_v14  ;;  %v11411_v54 = vld [vmem:[#allocation85_spill] sm:$0xff] }
 0x81c   :  { %v3172_v37 = vsel %vm947_vm6, %v3171_v20, %v3170_v10  ;;  %v3175_v38 = vrot.slane %v3163_v47, 5 }
 0x81d   :  { %v3174_v6 = vsel %vm950_vm7, %v3173_v48, %v3172_v37  ;;  %v3177_v44 = vrot.slane %v3164_v45, 4 }
 0x81e   :  { %v3176_v33 = vsel %vm953_vm8, %v3175_v38, %v3174_v6  ;;  %v11381_v38 = vld [vmem:[#allocation55_spill] sm:$0xff] }
 0x81f   :  { %v3178_v40 = vsel %vm956_vm9, %v3177_v44, %v3176_v33 }
 0x820   :  { %v9500_v2 = vpack.c.b16 %v3178_v40, %v3178_v40 }
 0x822   :  { %3214 = vmatmul.mubr.bf16.vlgmr.msra.gmra.mxu0 %v9500_v2  ;;  %3255 = vmatmul.mubr.bf16.vlgmr.msra.gmra.mxu1 %v9500_v2 }
 0x823   :  { %3289 = vmatpush1.bf16.msra.mxu0 %v9049_v8  ;;  %3330 = vmatpush1.bf16.msra.mxu1 %v9052_v62  ;;  %v11361_v8 = vld [vmem:[#allocation42_spill] sm:$0xff]  ;;  %v11362_v62 = vld [vmem:[#allocation43_spill] sm:$0xff] }
 0x824   :  { %3290 = vmatprep.subr.bf16.mxu0 %v9055_v30  ;;  %3331 = vmatprep.subr.bf16.mxu1 %v9058_v41  ;;  %v11363_v30 = vld [vmem:[#allocation44_spill] sm:$0xff]  ;;  %v11364_v41 = vld [vmem:[#allocation45_spill] sm:$0xff] }
 0x825   :  { %3320 = vmatprep.mubr.bf16.mxu0 %v11036_v58  ;;  %3361 = vmatprep.mubr.bf16.mxu1 %v11036_v58 }
 0x827   :  { %3291 = vmatpush1.bf16.msra.mxu0 %v9063_v51  ;;  %3332 = vmatpush1.bf16.msra.mxu1 %v9066_v36  ;;  %v11365_v51 = vld [vmem:[#allocation46_spill] sm:$0xff]  ;;  %v11366_v36 = vld [vmem:[#allocation47_spill] sm:$0xff] }
 0x828   :  { %3292 = vmatprep.subr.bf16.mxu0 %v9069_v31  ;;  %3333 = vmatprep.subr.bf16.mxu1 %v9072_v43  ;;  %v11367_v31 = vld [vmem:[#allocation48_spill] sm:$0xff]  ;;  %v11368_v43 = vld [vmem:[#allocation49_spill] sm:$0xff] }
 0x82b   :  { %3293 = vmatpush1.bf16.msra.mxu0 %v9075_v59  ;;  %3334 = vmatpush1.bf16.msra.mxu1 %v9078_v0  ;;  %v11369_v59 = vld [vmem:[#allocation50_spill] sm:$0xff]  ;;  %v11370_v0 = vld [vmem:[#allocation51_spill] sm:$0xff] }
 0x82c   :  { %3294 = vmatprep.subr.bf16.mxu0 %v9081_v3  ;;  %3335 = vmatprep.subr.bf16.mxu1 %v9084_v18  ;;  %v11371_v3 = vld [vmem:[#allocation52_spill] sm:$0xff]  ;;  %v11372_v18 = vld [vmem:[#allocation53_spill] sm:$0xff] }
 0x82f   :  { %3295 = vmatpush1.bf16.msra.mxu0 %v9087_v27  ;;  %3336 = vmatpush1.bf16.msra.mxu1 %v9090_v29  ;;  %v11373_v27 = vld [vmem:[#allocation54_spill] sm:$0xff] }
 0x830   :  { %3296 = vmatprep.subr.bf16.mxu0 %v9093_v63  ;;  %3337 = vmatprep.subr.bf16.mxu1 %v9096_v57  ;;  %v11374_v29 = vld [vmem:[#allocation70_spill] sm:$0xff] }
 0x831   :  { %v2700_v63 = vadd.f32 %v9353_v1, %v11374_v29  ;;  %v2743_v1 = vadd.f32 %v11378_v24, %v11377_v22  ;;  %v11408_v24 = vld [vmem:[#allocation82_spill] sm:$0xff] }
 0x833   :  { %3297 = vmatpush1.bf16.msra.mxu0 %v9099_v19  ;;  %3338 = vmatpush1.bf16.msra.mxu1 %v9102_v23  ;;  %v11375_v23 = vld [vmem:[#allocation71_spill] sm:$0xff] }
 0x834   :  { %3298 = vmatprep.subr.bf16.mxu0 %v9105_v16  ;;  %3339 = vmatprep.subr.bf16.mxu1 %v11361_v8  ;;  %v11376_v16 = vld [vmem:[#allocation119_spill] sm:$0xff] }
 0x835   :  { %v2702_v12 = vadd.f32 %v11376_v16, %v11375_v23  ;;  %v11396_v16 = vld [vmem:[#allocation137_spill] sm:$0xff] }
 0x837   :  { %3299 = vmatpush1.bf16.msra.mxu0 %v11362_v62  ;;  %3340 = vmatpush1.bf16.msra.mxu1 %v11363_v30  ;;  %v11382_v30 = vld [vmem:[#allocation56_spill] sm:$0xff] }
 0x838   :  { %3300 = vmatprep.subr.bf16.mxu0 %v11364_v41  ;;  %3341 = vmatprep.subr.bf16.mxu1 %v11365_v51  ;;  %v11383_v41 = vld [vmem:[#allocation57_spill] sm:$0xff]  ;;  %v11384_v51 = vld [vmem:[#allocation58_spill] sm:$0xff] }
 0x83b   :  { %3301 = vmatpush1.bf16.msra.mxu0 %v11366_v36  ;;  %3342 = vmatpush1.bf16.msra.mxu1 %v11367_v31  ;;  %v11385_v36 = vld [vmem:[#allocation59_spill] sm:$0xff]  ;;  %v11386_v31 = vld [vmem:[#allocation60_spill] sm:$0xff] }
 0x83c   :  { %3302 = vmatprep.subr.bf16.mxu0 %v11368_v43  ;;  %3343 = vmatprep.subr.bf16.mxu1 %v11369_v59  ;;  %v11387_v43 = vld [vmem:[#allocation61_spill] sm:$0xff]  ;;  %v11388_v59 = vld [vmem:[#allocation62_spill] sm:$0xff] }
 0x83f   :  { %3303 = vmatpush1.bf16.msra.mxu0 %v11370_v0  ;;  %3344 = vmatpush1.bf16.msra.mxu1 %v11371_v3  ;;  %v11389_v0 = vld [vmem:[#allocation63_spill] sm:$0xff]  ;;  %v11390_v3 = vld [vmem:[#allocation64_spill] sm:$0xff] }
 0x840   :  { %3370 = vmatprep.subr.bf16.mxu0 %v11372_v18  ;;  %3411 = vmatprep.subr.bf16.mxu1 %v11373_v27  ;;  %v11391_v18 = vld [vmem:[#allocation65_spill] sm:$0xff]  ;;  %v11392_v27 = vld [vmem:[#allocation66_spill] sm:$0xff] }
 0x8e2   :  { %v3215_v57 = vpop.f32.mrf.mxu0  ;;  %v3256_v19 = vpop.f32.mrf.mxu1 }
 0x8e3   :  { %v3216_v56 = vadd.f32 %v3215_v57, %v2700_v63  ;;  %v3257_v32 = vadd.f32 %v3256_v19, %v2741_v28  ;;  %v11393_v63 = vld [vmem:[#allocation67_spill] sm:$0xff]  ;;  %v11394_v57 = vld [vmem:[#allocation68_spill] sm:$0xff]  ;;  %v11395_v19 = vld [vmem:[#allocation69_spill] sm:$0xff] }
 0x8e4   :  { %v3217_v4 = vpop.f32.mrf.mxu0  ;;  %v3258_v46 = vpop.f32.mrf.mxu1  ;;  %v11412_v28 = vld [vmem:[#allocation86_spill] sm:$0xff] }
 0x8e5   :  { %v6018_v26 = vmul.f32 -1.442695, %v3216_v56  ;;  %v3218_v52 = vadd.f32 %v3217_v4, %v2702_v12  ;;  %v3259_v35 = vadd.f32 %v3258_v46, %v2743_v1  ;;  %v11397_v12 = vld [vmem:[#allocation139_spill] sm:$0xff]  ;;  %v11398_v56 = vld [vmem:[#allocation140_spill] sm:$0xff]  ;;  %v11399_v4 = vld [vmem:[#allocation138_spill] sm:$0xff] }
 0x8e6   :  { %v3219_v17 = vpop.f32.mrf.mxu0  ;;  %v3260_v39 = vpop.f32.mrf.mxu1  ;;  %v11400_v46 = vld [vmem:[#allocation74_spill] sm:$0xff]  ;;  %v11409_v1 = vld [vmem:[#allocation83_spill] sm:$0xff] }
 0x8e7   :  { %6846 = vpow2.f32 %v6018_v26  ;;  %v6019_v9 = vmul.f32 -1.442695, %v3218_v52  ;;  %v6020_v15 = vmul.f32 -1.442695, %v3259_v35  ;;  %v11401_v26 = vld [vmem:[#allocation75_spill] sm:$0xff]  ;;  %v11402_v52 = vld [vmem:[#allocation76_spill] sm:$0xff] }
 0x8e8   :  { %v3220_v21 = vpop.f32.mrf.mxu0  ;;  %v3261_v55 = vpop.f32.mrf.mxu1  ;;  %v11403_v17 = vld [vmem:[#allocation77_spill] sm:$0xff]  ;;  %v11404_v39 = vld [vmem:[#allocation78_spill] sm:$0xff]  ;;  %v11410_v35 = vld [vmem:[#allocation84_spill] sm:$0xff] }
 0x8e9   :  { %6848 = vpow2.f32 %v6019_v9  ;;  %v11405_v9 = vld [vmem:[#allocation79_spill] sm:$0xff]  ;;  %v11406_v21 = vld [vmem:[#allocation80_spill] sm:$0xff]  ;;  %v11407_v55 = vld [vmem:[#allocation81_spill] sm:$0xff] }
 0x8ea   :  { %6850 = vtanh.f32 %v3257_v32  ;;  %v11413_v32 = vld [vmem:[#allocation87_spill] sm:$0xff] }
 0x8eb   :  { %6852 = vpow2.f32 %v6020_v15  ;;  %v11414_v15 = vld [vmem:[#allocation88_spill] sm:$0xff] }
 0x8f4   :  { %v6847_v42 = vpop.eup %6846 }
 0x8f5   :  { %v3269_v5 = vadd.f32 1.0, %v6847_v42  ;;  %v11415_v42 = vld [vmem:[#allocation89_spill] sm:$0xff] }
 0x8f6   :  { %v6849_v50 = vpop.eup %6848 }
 0x8f7   :  { %6854 = vrcp.f32 %v3269_v5  ;;  %v3270_v47 = vadd.f32 1.0, %v6849_v50  ;;  %v6851_v49 = vpop.eup %6850  ;;  %v11416_v5 = vld [vmem:[#allocation90_spill] sm:$0xff]  ;;  %v11417_v50 = vld [vmem:[#allocation91_spill] sm:$0xff] }
 0x8f8   :  { %v6853_v20 = vpop.eup %6852 }
 0x8f9   :  { %6856 = vrcp.f32 %v3270_v47  ;;  %v3279_v37 = vadd.f32 1.0, %v6853_v20  ;;  %v11418_v47 = vld [vmem:[#allocation92_spill] sm:$0xff]  ;;  %v11420_v20 = vld [vmem:[#allocation94_spill] sm:$0xff] }
 0x8fb   :  { %6858 = vrcp.f32 %v3279_v37  ;;  %v11425_v37 = vld [vmem:[#allocation99_spill] sm:$0xff] }
 0x904   :  { %v6855_v45 = vpop.eup %6854 }
 0x905   :  { %v3283_v10 = vmul.f32 %v6855_v45, %v6851_v49  ;;  %v11419_v49 = vld [vmem:[#allocation93_spill] sm:$0xff]  ;;  %v11421_v45 = vld [vmem:[#allocation95_spill] sm:$0xff] }
 0x906   :  { %v6857_v48 = vpop.eup %6856 }
 0x907   :  { %v3282_v6 = vmul.f32 %v6857_v48, %v11381_v38  ;;  %v11424_v48 = vld [vmem:[#allocation98_spill] sm:$0xff]  ;;  %v11426_v38 = vld [vmem:[#allocation100_spill] sm:$0xff] }
 0x908   :  { %v6859_v33 = vpop.eup %6858 }
 0x909   :  { %v9547_v44 = vadd.f32 %v3283_v10, %v3282_v6  ;;  %v11423_v10 = vld [vmem:[#allocation97_spill] sm:$0xff] }
 0x90a   :  { %v11427_v6 = vld [vmem:[#allocation101_spill] sm:$0xff] }
 0x90b   :  { %6860 = vtanh.f32 %v9547_v44 }
 0x918   :  { %v6861_v40 = vpop.eup %6860 }
 0x919   :  { %v3286_v8 = vmul.f32 %v6861_v40, %v6859_v33  ;;  %v11428_v33 = vld [vmem:[#allocation102_spill] sm:$0xff]  ;;  %v11429_v40 = vld [vmem:[#allocation103_spill] sm:$0xff] }
 0x91b   :  { %v3287_v62 = vpack.c.bf16 %v3286_v8, %v3286_v8  ;;  %v11430_v8 = vld [vmem:[#allocation104_spill] sm:$0xff] }
 0x91d   :  { %3321 = vmatmul.mubr.bf16.vlgmr.msra.gmra.mxu0 %v3287_v62  ;;  %3362 = vmatmul.mubr.bf16.vlgmr.msra.gmra.mxu1 %v3287_v62  ;;  %v11431_v62 = vld [vmem:[#allocation105_spill] sm:$0xff] }
 0x91e   :  { %3371 = vmatpush1.bf16.msra.mxu0 %v11382_v30  ;;  %3412 = vmatpush1.bf16.msra.mxu1 %v11383_v41  ;;  %v11432_v30 = vld [vmem:[#allocation106_spill] sm:$0xff]  ;;  %v11433_v41 = vld [vmem:[#allocation107_spill] sm:$0xff] }
 0x91f   :  { %3372 = vmatprep.subr.bf16.mxu0 %v11384_v51  ;;  %3413 = vmatprep.subr.bf16.mxu1 %v11385_v36  ;;  %v11434_v51 = vld [vmem:[#allocation108_spill] sm:$0xff]  ;;  %v11435_v36 = vld [vmem:[#allocation109_spill] sm:$0xff] }
 0x920   :  { %3402 = vmatprep.mubr.bf16.mxu0 %v11036_v58  ;;  %3443 = vmatprep.mubr.bf16.mxu1 %v11036_v58 }
 0x922   :  { %3373 = vmatpush1.bf16.msra.mxu0 %v11386_v31  ;;  %3414 = vmatpush1.bf16.msra.mxu1 %v11387_v43  ;;  %v11436_v31 = vld [vmem:[#allocation110_spill] sm:$0xff]  ;;  %v11437_v43 = vld [vmem:[#allocation111_spill] sm:$0xff] }
 0x923   :  { %3374 = vmatprep.subr.bf16.mxu0 %v11388_v59  ;;  %3415 = vmatprep.subr.bf16.mxu1 %v11389_v0  ;;  %v11438_v59 = vld [vmem:[#allocation112_spill] sm:$0xff]  ;;  %v11439_v0 = vld [vmem:[#allocation113_spill] sm:$0xff] }
 0x926   :  { %3375 = vmatpush1.bf16.msra.mxu0 %v11390_v3  ;;  %3416 = vmatpush1.bf16.msra.mxu1 %v11391_v18  ;;  %v11440_v3 = vld [vmem:[#allocation114_spill] sm:$0xff]  ;;  %v11441_v18 = vld [vmem:[#allocation115_spill] sm:$0xff] }
 0x927   :  { %3376 = vmatprep.subr.bf16.mxu0 %v11392_v27  ;;  %3417 = vmatprep.subr.bf16.mxu1 %v11393_v63  ;;  %v11442_v27 = vld [vmem:[#allocation116_spill] sm:$0xff]  ;;  %v11443_v63 = vld [vmem:[#allocation117_spill] sm:$0xff] }
 0x92a   :  { %3377 = vmatpush1.bf16.msra.mxu0 %v11394_v57  ;;  %3418 = vmatpush1.bf16.msra.mxu1 %v11395_v19  ;;  %v9618_v57 = vld [vmem:[#allocation7 + $0xe4] ss:$16 sps:$4 sm:$0xff]   ;;  %v9621_v19 = vld [vmem:[#allocation7 + $0xec] ss:$16 sps:$4 sm:$0xff]  }
 0x92b   :  { %3378 = vmatprep.subr.bf16.mxu0 %v11396_v16  ;;  %3419 = vmatprep.subr.bf16.mxu1 %v11397_v12 }
 0x92e   :  { %3379 = vmatpush1.bf16.msra.mxu0 %v11398_v56  ;;  %3420 = vmatpush1.bf16.msra.mxu1 %v11399_v4 }
 0x92f   :  { %3380 = vmatprep.subr.bf16.mxu0 %v11400_v46  ;;  %3421 = vmatprep.subr.bf16.mxu1 %v11401_v26 }
 0x932   :  { %3381 = vmatpush1.bf16.msra.mxu0 %v11402_v52  ;;  %3422 = vmatpush1.bf16.msra.mxu1 %v11403_v17 }
 0x933   :  { %3382 = vmatprep.subr.bf16.mxu0 %v11404_v39  ;;  %3423 = vmatprep.subr.bf16.mxu1 %v11405_v9 }
 0x936   :  { %3383 = vmatpush1.bf16.msra.mxu0 %v11406_v21  ;;  %3424 = vmatpush1.bf16.msra.mxu1 %v11407_v55 }
 0x937   :  { %3384 = vmatprep.subr.bf16.mxu0 %v11408_v24  ;;  %3425 = vmatprep.subr.bf16.mxu1 %v11409_v1 }
 0x93a   :  { %3385 = vmatpush1.bf16.msra.mxu0 %v11410_v35  ;;  %3426 = vmatpush1.bf16.msra.mxu1 %v11411_v54 }
 0x93b   :  { %3804 = vmatprep.subr.bf16.mxu0 %v11412_v28  ;;  %3845 = vmatprep.subr.bf16.mxu1 %v11413_v32  ;;  %v11444_v32 = vld [vmem:[#allocation14_spill] sm:$0xff] }
 0x93d   :  { %3403 = vmatmul.mubr.bf16.vlgmr.msra.gmra.mxu0 %v9500_v2  ;;  %3444 = vmatmul.mubr.bf16.vlgmr.msra.gmra.mxu1 %v9500_v2  ;;  %v11422_v2 = vld [vmem:[#allocation96_spill] sm:$0xff] }
 0x93e   :  { %3805 = vmatpush1.bf16.msra.mxu0 %v11414_v15  ;;  %3846 = vmatpush1.bf16.msra.mxu1 %v11415_v42 }
 0x93f   :  { %3806 = vmatprep.subr.bf16.mxu0 %v11416_v5  ;;  %3847 = vmatprep.subr.bf16.mxu1 %v11417_v50  ;;  %v11445_v50 = vld [vmem:[#allocation10_spill] sm:$0xff] }
 0x940   :  { %3836 = vmatprep.mubr.bf16.mxu0 %v11036_v58  ;;  %3877 = vmatprep.mubr.bf16.mxu1 %v11036_v58 }
 0x942   :  { %3807 = vmatpush1.bf16.msra.mxu0 %v11418_v47  ;;  %3848 = vmatpush1.bf16.msra.mxu1 %v11419_v49  ;;  %v11446_v49 = vld [vmem:[#allocation11_spill] sm:$0xff] }
 0x943   :  { %3808 = vmatprep.subr.bf16.mxu0 %v11420_v20  ;;  %3849 = vmatprep.subr.bf16.mxu1 %v11421_v45  ;;  %v11447_v45 = vld [vmem:[#allocation12_spill] sm:$0xff] }
 0x946   :  { %3809 = vmatpush1.bf16.msra.mxu0 %v11422_v2  ;;  %3850 = vmatpush1.bf16.msra.mxu1 %v11423_v10  ;;  %v11448_v10 = vld [vmem:[#allocation13_spill] sm:$0xff] }
 0x947   :  { %3810 = vmatprep.subr.bf16.mxu0 %v11424_v48  ;;  %3851 = vmatprep.subr.bf16.mxu1 %v11425_v37  ;;  %v11449_v37 = vld [vmem:[#allocation15_spill] sm:$0xff] }
 0x94a   :  { %3811 = vmatpush1.bf16.msra.mxu0 %v11426_v38  ;;  %3852 = vmatpush1.bf16.msra.mxu1 %v11427_v6  ;;  %v11450_v6 = vld [vmem:[#allocation16_spill] sm:$0xff] }
 0x94b   :  { %3812 = vmatprep.subr.bf16.mxu0 %v11428_v33  ;;  %3853 = vmatprep.subr.bf16.mxu1 %v11429_v40 }
 0x94e   :  { %3813 = vmatpush1.bf16.msra.mxu0 %v11430_v8  ;;  %3854 = vmatpush1.bf16.msra.mxu1 %v11431_v62 }
 0x94f   :  { %3814 = vmatprep.subr.bf16.mxu0 %v11432_v30  ;;  %3855 = vmatprep.subr.bf16.mxu1 %v11433_v41  ;;  %v11451_v30 = vld [vmem:[#allocation17_spill] sm:$0xff] }
 0x952   :  { %3815 = vmatpush1.bf16.msra.mxu0 %v11434_v51  ;;  %3856 = vmatpush1.bf16.msra.mxu1 %v11435_v36 }
 0x953   :  { %3816 = vmatprep.subr.bf16.mxu0 %v11436_v31  ;;  %3857 = vmatprep.subr.bf16.mxu1 %v11437_v43 }
 0x956   :  { %3817 = vmatpush1.bf16.msra.mxu0 %v11438_v59  ;;  %3858 = vmatpush1.bf16.msra.mxu1 %v11439_v0 }
 0x957   :  { %3818 = vmatprep.subr.bf16.mxu0 %v11440_v3  ;;  %3859 = vmatprep.subr.bf16.mxu1 %v11441_v18 }
 0x95a   :  { %3819 = vmatpush1.bf16.msra.mxu0 %v11442_v27  ;;  %3860 = vmatpush1.bf16.msra.mxu1 %v11443_v63 }
 0x95b   :  { %3911 = vmatprep.subr.bf16.mxu0 %v9618_v57  ;;  %3952 = vmatprep.subr.bf16.mxu1 %v9621_v19 }
 0x9dd   :  { %v9624_v16 = vpop.f32.mrf.mxu0  ;;  %v9626_v12 = vpop.f32.mrf.mxu1 }
 0x9df   :  { %v9628_v56 = vpop.f32.mrf.mxu0  ;;  %v9630_v4 = vpop.f32.mrf.mxu1 }
 0x9e1   :  { %v3326_v46 = vpop.f32.mrf.mxu0  ;;  %v3367_v26 = vpop.f32.mrf.mxu1 }
 0x9e3   :  { %v3327_v52 = vpop.f32.mrf.mxu0  ;;  %v3368_v17 = vpop.f32.mrf.mxu1 }
 0x9e4   :  { %v11452_v17 = vld [vmem:[#allocation18_spill] sm:$0xff] }
 0x9fd   :  { %v3404_v39 = vpop.f32.mrf.mxu0  ;;  %v3445_v9 = vpop.f32.mrf.mxu1 }
 0x9fe   :  { %v3456_v21 = vrot.slane %v3404_v39, 4  ;;  %v3460_v55 = vrot.slane %v3404_v39, 5  ;;  %v3464_v24 = vrot.slane %v3404_v39, 6  ;;  %v3468_v1 = vrot.slane %v3404_v39, 7 }
 0x9ff   :  { %v3472_v35 = vrot.slane %v3404_v39, 1  ;;  %v3476_v54 = vrot.slane %v3404_v39, 2  ;;  %v3480_v28 = vrot.slane %v3404_v39, 3  ;;  %v3532_v15 = vadd.f32 %v3404_v39, %v11444_v32  ;;  %v9633_v42 = vpop.f32.mrf.mxu0  ;;  %v9635_v5 = vpop.f32.mrf.mxu1 }
 0xa00   :  { %v3516_v47 = vadd.f32 %v3456_v21, %v11445_v50  ;;  %v3520_v20 = vadd.f32 %v3460_v55, %v11446_v49  ;;  %v3524_v2 = vadd.f32 %v3464_v24, %v11447_v45  ;;  %v3528_v48 = vadd.f32 %v3468_v1, %v11448_v10  ;;  %v11453_v55 = vld [vmem:[#allocation21_spill] sm:$0xff] }
 0xa01   :  { %v3536_v38 = vadd.f32 %v3472_v35, %v11449_v37  ;;  %v3540_v33 = vadd.f32 %v3476_v54, %v11450_v6  ;;  %v6029_v40 = vmul.f32 -1.442695, %v3532_v15  ;;  %v3408_v8 = vpop.f32.mrf.mxu0  ;;  %v3449_v62 = vpop.f32.mrf.mxu1  ;;  %v3544_v41 = vadd.f32 %v3480_v28, %v11451_v30  ;;  %v11454_v35 = vld [vmem:[#allocation22_spill] sm:$0xff]  ;;  %v11455_v15 = vld [vmem:[#allocation23_spill] sm:$0xff] }
 0xa02   :  { %v6021_v51 = vmul.f32 -1.442695, %v3516_v47  ;;  %v6023_v36 = vmul.f32 -1.442695, %v3520_v20  ;;  %v6025_v31 = vmul.f32 -1.442695, %v3524_v2 }
 0xa03   :  { %v6027_v43 = vmul.f32 -1.442695, %v3528_v48  ;;  %6862 = vpow2.f32 %v6029_v40  ;;  %v3409_v59 = vpop.f32.mrf.mxu0  ;;  %v3450_v0 = vpop.f32.mrf.mxu1  ;;  %v6031_v3 = vmul.f32 -1.442695, %v3536_v38  ;;  %v3458_v18 = vrot.slane %v3445_v9, 4  ;;  %v11456_v20 = vld [vmem:[#allocation24_spill] sm:$0xff] }
 0xa04   :  { %6864 = vpow2.f32 %v6021_v51  ;;  %v3462_v27 = vrot.slane %v3445_v9, 5  ;;  %v6033_v63 = vmul.f32 -1.442695, %v3540_v33  ;;  %v3466_v46 = vrot.slane %v3445_v9, 6  ;;  %v11457_v48 = vld [vmem:[#allocation25_spill] sm:$0xff]  ;;  %v11458_v33 = vld [vmem:[#allocation26_spill] sm:$0xff] }
 0xa05   :  { %6866 = vpow2.f32 %v6023_v36  ;;  %v6035_v26 = vmul.f32 -1.442695, %v3544_v41  ;;  %v3470_v52 = vrot.slane %v3445_v9, 7  ;;  %v3518_v39 = vadd.f32 %v3458_v18, %v11452_v17  ;;  %v11459_v8 = vld [vmem:[#allocation27_spill] sm:$0xff] }
 0xa06   :  { %6868 = vpow2.f32 %v6025_v31  ;;  %v3474_v21 = vrot.slane %v3445_v9, 1  ;;  %v3522_v24 = vadd.f32 %v3462_v27, %v11453_v55  ;;  %v3478_v1 = vrot.slane %v3445_v9, 2 }
 0xa07   :  { %6870 = vpow2.f32 %v6027_v43  ;;  %v3526_v54 = vadd.f32 %v3466_v46, %v11454_v35  ;;  %v3482_v28 = vrot.slane %v3445_v9, 3  ;;  %v3530_v47 = vadd.f32 %v3470_v52, %v11455_v15 }
 0xa08   :  { %6872 = vpow2.f32 %v6031_v3  ;;  %v3534_v2 = vadd.f32 %v3445_v9, %v11456_v20  ;;  %v3538_v38 = vadd.f32 %v3474_v21, %v11457_v48  ;;  %v3542_v40 = vadd.f32 %v3478_v1, %v11458_v33  ;;  %v11461_v1 = vld [vmem:[#allocation28_spill] sm:$0xff]  ;;  %v11473_v48 = vld [vmem:[#allocation37_spill] sm:$0xff] }
 0xa09   :  { %6874 = vpow2.f32 %v6033_v63  ;;  %v3546_v62 = vadd.f32 %v3482_v28, %v11459_v8  ;;  %v3457_v41 = vrot.slane %v9633_v42, 4  ;;  %v3461_v36 = vrot.slane %v9633_v42, 5 }
 0xa0a   :  { %6876 = vpow2.f32 %v6035_v26  ;;  %v3465_v9 = vrot.slane %v9633_v42, 6  ;;  %v3469_v59 = vrot.slane %v9633_v42, 7  ;;  %v3473_v18 = vrot.slane %v9633_v42, 1  ;;  %v11460_v26 = vld [vmem:[#allocation19_spill] sm:$0xff] }
 0xa0b   :  { %6878 = vtanh.f32 %v3518_v39  ;;  %v3477_v46 = vrot.slane %v9633_v42, 2  ;;  %v3517_v52 = vadd.f32 %v3457_v41, %v11460_v26 }
 0xa0c   :  { %6880 = vtanh.f32 %v3522_v24  ;;  %v3481_v24 = vrot.slane %v9633_v42, 3 }
 0xa0d   :  { %6882 = vtanh.f32 %v3526_v54  ;;  %v3521_v54 = vadd.f32 %v3461_v36, %v11461_v1  ;;  %v6022_v8 = vmul.f32 -1.442695, %v3517_v52  ;;  %v3459_v36 = vrot.slane %v9635_v5, 4  ;;  %v11467_v52 = vld [vmem:[#allocation40_spill] sm:$0xff] }
 0xa0e   :  { %6884 = vtanh.f32 %v3530_v47 }
 0xa0f   :  { %6886 = vtanh.f32 %v3534_v2  ;;  %v11462_v2 = vld [vmem:[#allocation30_spill] sm:$0xff] }
 0xa10   :  { %v6863_v51 = vpop.eup %6862  ;;  %6888 = vtanh.f32 %v3538_v38  ;;  %v3525_v38 = vadd.f32 %v3465_v9, %v11462_v2  ;;  %v6024_v9 = vmul.f32 -1.442695, %v3521_v54 }
 0xa11   :  { %v6865_v31 = vpop.eup %6864  ;;  %v3604_v43 = vadd.f32 1.0, %v6863_v51  ;;  %6890 = vtanh.f32 %v3542_v40  ;;  %v11463_v40 = vld [vmem:[#allocation32_spill] sm:$0xff] }
 0xa12   :  { %v6867_v0 = vpop.eup %6866  ;;  %v3596_v3 = vadd.f32 1.0, %v6865_v31  ;;  %6892 = vtanh.f32 %v3546_v62  ;;  %v3529_v62 = vadd.f32 %v3469_v59, %v11463_v40  ;;  %v3463_v59 = vrot.slane %v9635_v5, 5  ;;  %v11468_v40 = vld [vmem:[#allocation20_spill] sm:$0xff] }
 0xa13   :  { %v6869_v27 = vpop.eup %6868  ;;  %v3598_v63 = vadd.f32 1.0, %v6867_v0  ;;  %6894 = vrcp.f32 %v3604_v43  ;;  %v11464_v43 = vld [vmem:[#allocation34_spill] sm:$0xff]  ;;  %v11465_v0 = vld [vmem:[#allocation36_spill] sm:$0xff]  ;;  %v3519_v2 = vadd.f32 %v3459_v36, %v11468_v40  ;;  %v3483_v36 = vrot.slane %v9635_v5, 3 }
 0xa14   :  { %v6871_v39 = vpop.eup %6870  ;;  %v3600_v21 = vadd.f32 1.0, %v6869_v27  ;;  %6896 = vrcp.f32 %v3596_v3  ;;  %v3533_v41 = vadd.f32 %v9633_v42, %v11464_v43  ;;  %v3537_v27 = vadd.f32 %v3473_v18, %v11465_v0 }
 0xa15   :  { %v6873_v28 = vpop.eup %6872  ;;  %v3602_v47 = vadd.f32 1.0, %v6871_v39  ;;  %6898 = vrcp.f32 %v3598_v63  ;;  %v6026_v43 = vmul.f32 -1.442695, %v3525_v38  ;;  %v3467_v18 = vrot.slane %v9635_v5, 6 }
 0xa16   :  { %v6875_v51 = vpop.eup %6874  ;;  %v3606_v31 = vadd.f32 1.0, %v6873_v28  ;;  %6900 = vrcp.f32 %v3600_v21  ;;  %v11466_v21 = vld [vmem:[#allocation38_spill] sm:$0xff]  ;;  %v6028_v0 = vmul.f32 -1.442695, %v3529_v62  ;;  %v6030_v54 = vmul.f32 -1.442695, %v3533_v41 }
 0xa17   :  { %v6877_v3 = vpop.eup %6876  ;;  %v3608_v26 = vadd.f32 1.0, %v6875_v51  ;;  %6902 = vrcp.f32 %v3602_v47  ;;  %v3541_v42 = vadd.f32 %v3477_v46, %v11466_v21  ;;  %v3545_v47 = vadd.f32 %v3481_v24, %v11467_v52  ;;  %v11469_v21 = vld [vmem:[#allocation29_spill] sm:$0xff]  ;;  %v11470_v52 = vld [vmem:[#allocation31_spill] sm:$0xff] }
 0xa18   :  { %v9667_v39 = vpop.eup %6878  ;;  %v3610_v63 = vadd.f32 1.0, %v6877_v3  ;;  %6904 = vrcp.f32 %v3606_v31  ;;  %v3471_v3 = vrot.slane %v9635_v5, 7  ;;  %v6032_v46 = vmul.f32 -1.442695, %v3537_v27 }
 0xa19   :  { %v9670_v28 = vpop.eup %6880  ;;  %6906 = vrcp.f32 %v3608_v26  ;;  %v3475_v38 = vrot.slane %v9635_v5, 1  ;;  %v3523_v1 = vadd.f32 %v3463_v59, %v11469_v21  ;;  %v6034_v24 = vmul.f32 -1.442695, %v3541_v42  ;;  %v11472_v59 = vld [vmem:[#allocation35_spill] sm:$0xff] }
 0xa1a   :  { %v9674_v51 = vpop.eup %6882  ;;  %6908 = vrcp.f32 %v3610_v63  ;;  %v3479_v62 = vrot.slane %v9635_v5, 2  ;;  %v3527_v33 = vadd.f32 %v3467_v18, %v11470_v52  ;;  %v6036_v41 = vmul.f32 -1.442695, %v3545_v47 }
 0xa1b   :  { %v9678_v31 = vpop.eup %6884  ;;  %6910 = vpow2.f32 %v6022_v8  ;;  %v3535_v21 = vadd.f32 %v9635_v5, %v11472_v59  ;;  %v3539_v18 = vadd.f32 %v3475_v38, %v11473_v48  ;;  %v6038_v52 = vmul.f32 -1.442695, %v3523_v1 }
 0xa1c   :  { %v9681_v26 = vpop.eup %6886  ;;  %6912 = vpow2.f32 %v6024_v9  ;;  %v11471_v9 = vld [vmem:[#allocation33_spill] sm:$0xff]  ;;  %v6039_v15 = vmul.f32 -1.442695, %v3527_v33 }
 0xa1d   :  { %v9685_v63 = vpop.eup %6888  ;;  %6914 = vpow2.f32 %v6026_v43  ;;  %v3531_v27 = vadd.f32 %v3471_v3, %v11471_v9  ;;  %v6037_v43 = vmul.f32 -1.442695, %v3519_v2  ;;  %v6041_v2 = vmul.f32 -1.442695, %v3535_v21 }
 0xa1e   :  { %v9689_v8 = vpop.eup %6890  ;;  %6916 = vpow2.f32 %v6028_v0  ;;  %v11474_v0 = vld [vmem:[#allocation39_spill] sm:$0xff]  ;;  %v6042_v1 = vmul.f32 -1.442695, %v3539_v18 }
 0xa1f   :  { %v9693_v40 = vpop.eup %6892  ;;  %6918 = vpow2.f32 %v6030_v54  ;;  %v3543_v47 = vadd.f32 %v3479_v62, %v11474_v0  ;;  %v11475_v54 = vld [vmem:[#allocation41_spill] sm:$0xff]  ;;  %v6040_v35 = vmul.f32 -1.442695, %v3531_v27 }
 0xa20   :  { %v9697_v42 = vpop.eup %6894  ;;  %6920 = vpow2.f32 %v6032_v46  ;;  %v3547_v9 = vadd.f32 %v3483_v36, %v11475_v54 }
 0xa21   :  { %v9700_v20 = vpop.eup %6896  ;;  %6922 = vpow2.f32 %v6034_v24  ;;  %v6043_v24 = vmul.f32 -1.442695, %v3543_v47 }
 0xa22   :  { %v9703_v3 = vpop.eup %6898  ;;  %6924 = vpow2.f32 %v6036_v41  ;;  %v6044_v33 = vmul.f32 -1.442695, %v3547_v9 }
 0xa23   :  { %v9706_v5 = vpop.eup %6900  ;;  %6926 = vpow2.f32 %v6037_v43 }
 0xa24   :  { %v9708_v46 = vpop.eup %6902  ;;  %6928 = vpow2.f32 %v6038_v52 }
 0xa25   :  { %v9710_v38 = vpop.eup %6904  ;;  %6930 = vpow2.f32 %v6039_v15 }
 0xa26   :  { %v9712_v62 = vpop.eup %6906  ;;  %6932 = vpow2.f32 %v6040_v35 }
 0xa27   :  { %v9714_v41 = vpop.eup %6908  ;;  %6934 = vpow2.f32 %v6041_v2 }
 0xa28   :  { %v6911_v36 = vpop.eup %6910  ;;  %6936 = vpow2.f32 %v6042_v1 }
 0xa29   :  { %v6913_v27 = vpop.eup %6912  ;;  %v3597_v43 = vadd.f32 1.0, %v6911_v36  ;;  %6938 = vpow2.f32 %v6043_v24 }
 0xa2a   :  { %v6915_v21 = vpop.eup %6914  ;;  %v3599_v54 = vadd.f32 1.0, %v6913_v27  ;;  %6940 = vpow2.f32 %v6044_v33 }
 0xa2b   :  { %v6917_v52 = vpop.eup %6916  ;;  %v3601_v18 = vadd.f32 1.0, %v6915_v21  ;;  %6942 = vrcp.f32 %v3597_v43 }
 0xa2c   :  { %v6919_v15 = vpop.eup %6918  ;;  %v3603_v47 = vadd.f32 1.0, %v6917_v52  ;;  %6944 = vrcp.f32 %v3599_v54 }
 0xa2d   :  { %v6921_v0 = vpop.eup %6920  ;;  %v3605_v35 = vadd.f32 1.0, %v6919_v15  ;;  %6946 = vrcp.f32 %v3601_v18 }
 0xa2e   :  { %v6923_v9 = vpop.eup %6922  ;;  %v3607_v48 = vadd.f32 1.0, %v6921_v0  ;;  %6948 = vrcp.f32 %v3603_v47  ;;  %v3708_v47 = vrot.slane %v9459_v60, 7  ;;  %v3714_v60 = vrot.slane %v9485_v53, 7 }
 0xa2f   :  { %v6925_v2 = vpop.eup %6924  ;;  %v3609_v1 = vadd.f32 1.0, %v6923_v9  ;;  %6950 = vrcp.f32 %v3605_v35  ;;  %v3709_v35 = vrot.slane %v9463_v7, 7  ;;  %v3732_v7 = vmul.f32 %v9700_v20, %v9667_v39 }
 0xa30   :  { %v6927_v36 = vpop.eup %6926  ;;  %v3611_v24 = vadd.f32 1.0, %v6925_v2  ;;  %6952 = vrcp.f32 %v3607_v48  ;;  %v3711_v2 = vrot.slane %v9472_v34, 7 }
 0xa31   :  { %v6929_v27 = vpop.eup %6928  ;;  %6954 = vrcp.f32 %v3609_v1  ;;  %v3676_v33 = vadd.f32 1.0, %v6927_v36  ;;  %v3710_v1 = vrot.slane %v9467_v61, 7  ;;  %v3715_v61 = vrot.slane %v9488_v13, 7 }
 0xa32   :  { %v6931_v21 = vpop.eup %6930  ;;  %6956 = vrcp.f32 %v3611_v24  ;;  %v3677_v43 = vadd.f32 1.0, %v6929_v27  ;;  %v3712_v27 = vrot.slane %v9477_v25, 7 }
 0xa33   :  { %v6933_v52 = vpop.eup %6932  ;;  %v3678_v54 = vadd.f32 1.0, %v6931_v21  ;;  %6958 = vrcp.f32 %v3676_v33 }
 0xa34   :  { %v6935_v59 = vpop.eup %6934  ;;  %v3679_v15 = vadd.f32 1.0, %v6933_v52  ;;  %6960 = vrcp.f32 %v3677_v43  ;;  %v3733_v52 = vmul.f32 %v9703_v3, %v9670_v28  ;;  %v3736_v28 = vmul.f32 %v9697_v42, %v9681_v26 }
 0xa35   :  { %v6937_v18 = vpop.eup %6936  ;;  %v3680_v55 = vadd.f32 1.0, %v6935_v59  ;;  %6962 = vrcp.f32 %v3678_v54  ;;  %v3713_v59 = vrot.slane %v9482_v11, 7  ;;  %v3734_v11 = vmul.f32 %v9706_v5, %v9674_v51 }
 0xa36   :  { %v6939_v0 = vpop.eup %6938  ;;  %v3681_v9 = vadd.f32 1.0, %v6937_v18  ;;  %6964 = vrcp.f32 %v3679_v15 }
 0xa37   :  { %v6941_v48 = vpop.eup %6940  ;;  %v3682_v36 = vadd.f32 1.0, %v6939_v0  ;;  %6966 = vrcp.f32 %v3680_v55  ;;  %v3735_v55 = vmul.f32 %v9708_v46, %v9678_v31 }
 0xa38   :  { %v6943_v24 = vpop.eup %6942  ;;  %v3683_v33 = vadd.f32 1.0, %v6941_v48  ;;  %6968 = vrcp.f32 %v3681_v9  ;;  %v3738_v9 = vmul.f32 %v9712_v62, %v9689_v8  ;;  %v3739_v48 = vmul.f32 %v9714_v41, %v9693_v40 }
 0xa39   :  { %v6945_v21 = vpop.eup %6944  ;;  %v3724_v43 = vmul.f32 %v6943_v24, %v3708_v47  ;;  %6970 = vrcp.f32 %v3682_v36  ;;  %v3737_v47 = vmul.f32 %v9710_v38, %v9685_v63 }
 0xa3a   :  { %v6947_v34 = vpop.eup %6946  ;;  %v3725_v54 = vmul.f32 %v6945_v21, %v3709_v35  ;;  %6972 = vrcp.f32 %v3683_v33 }
 0xa3b   :  { %v6949_v25 = vpop.eup %6948  ;;  %v3726_v15 = vmul.f32 %v6947_v34, %v3710_v1  ;;  %v9730_v18 = vadd.f32 %v3732_v7, %v3724_v43 }
 0xa3c   :  { %v6951_v53 = vpop.eup %6950  ;;  %v9734_v20 = vadd.f32 %v3733_v52, %v3725_v54  ;;  %v3727_v13 = vmul.f32 %v6949_v25, %v3711_v2 }
 0xa3d   :  { %v6953_v39 = vpop.eup %6952  ;;  %v3728_v3 = vmul.f32 %v6951_v53, %v3712_v27  ;;  %v9738_v0 = vadd.f32 %v3734_v11, %v3726_v15  ;;  %6974 = vtanh.f32 %v9730_v18 }
 0xa3e   :  { %v6955_v51 = vpop.eup %6954  ;;  %v3729_v5 = vmul.f32 %v6953_v39, %v3713_v59  ;;  %v9743_v35 = vadd.f32 %v3735_v55, %v3727_v13  ;;  %6976 = vtanh.f32 %v9734_v20 }
 0xa3f   :  { %v6957_v31 = vpop.eup %6956  ;;  %v3730_v46 = vmul.f32 %v6955_v51, %v3714_v60  ;;  %v9748_v26 = vadd.f32 %v3736_v28, %v3728_v3  ;;  %6978 = vtanh.f32 %v9738_v0 }
 0xa40   :  { %v3731_v42 = vmul.f32 %v6957_v31, %v3715_v61  ;;  %v9753_v2 = vadd.f32 %v3737_v47, %v3729_v5  ;;  %6980 = vtanh.f32 %v9743_v35  ;;  %v6959_v38 = vpop.eup %6958 }
 0xa41   :  { %v9756_v63 = vadd.f32 %v3738_v9, %v3730_v46  ;;  %6982 = vtanh.f32 %v9748_v26  ;;  %v6961_v8 = vpop.eup %6960 }
 0xa42   :  { %v9759_v1 = vadd.f32 %v3739_v48, %v3731_v42  ;;  %6984 = vtanh.f32 %v9753_v2  ;;  %v6963_v62 = vpop.eup %6962 }
 0xa43   :  { %6986 = vtanh.f32 %v9756_v63  ;;  %v6965_v40 = vpop.eup %6964 }
 0xa44   :  { %6988 = vtanh.f32 %v9759_v1  ;;  %v6967_v41 = vpop.eup %6966 }
 0xa45   :  { %v6969_v36 = vpop.eup %6968 }
 0xa46   :  { %v6971_v24 = vpop.eup %6970 }
 0xa47   :  { %v6973_v27 = vpop.eup %6972 }
 0xa4a   :  { %v6975_v59 = vpop.eup %6974 }
 0xa4b   :  { %v6977_v33 = vpop.eup %6976  ;;  %v3756_v21 = vmul.f32 %v6975_v59, %v6959_v38 }
 0xa4c   :  { %v6979_v60 = vpop.eup %6978  ;;  %v3757_v7 = vmul.f32 %v6977_v33, %v6961_v8 }
 0xa4d   :  { %v6981_v43 = vpop.eup %6980  ;;  %v3758_v34 = vmul.f32 %v6979_v60, %v6963_v62  ;;  %v3764_v61 = vpack.c.bf16 %v3756_v21, %v3756_v21 }
 0xa4e   :  { %v6983_v52 = vpop.eup %6982  ;;  %v3759_v54 = vmul.f32 %v6981_v43, %v6965_v40  ;;  %v3765_v25 = vpack.c.bf16 %v3757_v7, %v3757_v7 }
 0xa4f   :  { %v6985_v11 = vpop.eup %6984  ;;  %v3760_v15 = vmul.f32 %v6983_v52, %v6967_v41  ;;  %v3766_v53 = vpack.c.bf16 %v3758_v34, %v3758_v34  ;;  %v3780_v55 = vunpack.c.l.b16 %v3764_v61 }
 0xa50   :  { %v6987_v13 = vpop.eup %6986  ;;  %v3761_v39 = vmul.f32 %v6985_v11, %v6969_v36  ;;  %v3767_v28 = vpack.c.bf16 %v3759_v54, %v3759_v54  ;;  %v3781_v3 = vunpack.c.l.b16 %v3765_v25 }
 0xa51   :  { %v6989_v51 = vpop.eup %6988  ;;  %v3762_v5 = vmul.f32 %v6987_v13, %v6971_v24  ;;  %v3768_v47 = vpack.c.bf16 %v3760_v15, %v3760_v15  ;;  %v3782_v31 = vunpack.c.l.b16 %v3766_v53  ;;  %v3788_v46 = vrot.slane %v3780_v55, 4  ;;  %v9775_v15 = vld [vmem:[#allocation7 + $0xe0] ss:$16 sps:$4 sm:$0xff]   ;;  %v9778_v53 = vld [vmem:[#allocation7 + $0xe8] ss:$16 sps:$4 sm:$0xff]  }
 0xa52   :  { %v3763_v9 = vmul.f32 %v6989_v51, %v6973_v27  ;;  %v3769_v42 = vpack.c.bf16 %v3761_v39, %v3761_v39  ;;  %v3783_v48 = vunpack.c.l.b16 %v3767_v28  ;;  %v3789_v38 = vrot.slane %v3781_v3, 3  ;;  %v9781_v55 = vld [vmem:[#allocation7 + $0xc4] ss:$16 sps:$4 sm:$0xff]   ;;  %v9784_v13 = vld [vmem:[#allocation7 + $0xcc] ss:$16 sps:$4 sm:$0xff]  }
 0xa53   :  { %v3770_v8 = vpack.c.bf16 %v3762_v5, %v3762_v5  ;;  %v3791_v62 = vrot.slane %v3782_v31, 2  ;;  %v3784_v21 = vunpack.c.l.b16 %v3768_v47  ;;  %v9789_v39 = vld [vmem:[#allocation7 + $0xc0] ss:$16 sps:$4 sm:$0xff]   ;;  %v9792_v28 = vld [vmem:[#allocation7 + $0xc8] ss:$16 sps:$4 sm:$0xff]  }
 0xa54   :  { %v3771_v40 = vpack.c.bf16 %v3763_v9, %v3763_v9  ;;  %v3785_v59 = vunpack.c.l.b16 %v3769_v42  ;;  %v3790_v41 = vsel %vm938_vm3, %v3789_v38, %v3788_v46  ;;  %v3793_v33 = vrot.slane %v3783_v48, 1  ;;  %v9795_v3 = vld [vmem:[#allocation7 + $0xa4] ss:$16 sps:$4 sm:$0xff]   ;;  %v9798_v51 = vld [vmem:[#allocation7 + $0xac] ss:$16 sps:$4 sm:$0xff]  }
 0xa55   :  { %v3786_v36 = vunpack.c.l.b16 %v3770_v8  ;;  %v3792_v60 = vsel %vm941_vm4, %v3791_v62, %v3790_v41  ;;  %v9801_v5 = vld [vmem:[#allocation7 + $0xa0] ss:$16 sps:$4 sm:$0xff]   ;;  %v9804_v47 = vld [vmem:[#allocation7 + $0xa8] ss:$16 sps:$4 sm:$0xff]   ;;  %v9807_v31 = vld [vmem:[#allocation7 + $0x84] ss:$16 sps:$4 sm:$0xff]  }
 0xa56   :  { %v3787_v7 = vunpack.c.l.b16 %v3771_v40  ;;  %v3794_v24 = vsel %vm944_vm5, %v3793_v33, %v3792_v60  ;;  %v3796_v43 = vrot.slane %v3785_v59, 7  ;;  %v9810_v46 = vld [vmem:[#allocation7 + $0x8c] ss:$16 sps:$4 sm:$0xff]   ;;  %v9813_v9 = vld [vmem:[#allocation7 + $0x80] ss:$16 sps:$4 sm:$0xff]  }
 0xa57   :  { %v3795_v27 = vsel %vm947_vm6, %v3784_v21, %v3794_v24  ;;  %v3798_v34 = vrot.slane %v3786_v36, 6  ;;  %v9816_v42 = vld [vmem:[#allocation7 + $0x88] ss:$16 sps:$4 sm:$0xff]   ;;  %v9819_v48 = vld [vmem:[#allocation7 + $0x64] ss:$16 sps:$4 sm:$0xff]  }
 0xa58   :  { %v3797_v61 = vsel %vm950_vm7, %v3796_v43, %v3795_v27  ;;  %v3800_v52 = vrot.slane %v3787_v7, 5  ;;  %v9822_v38 = vld [vmem:[#allocation7 + $0x6c] ss:$16 sps:$4 sm:$0xff]   ;;  %v9825_v8 = vld [vmem:[#allocation7 + $0x60] ss:$16 sps:$4 sm:$0xff]  }
 0xa59   :  { %v3799_v54 = vsel %vm953_vm8, %v3798_v34, %v3797_v61  ;;  %v9828_v62 = vld [vmem:[#allocation7 + $0x68] ss:$16 sps:$4 sm:$0xff]   ;;  %v9831_v40 = vld [vmem:[#allocation7 + $0x44] ss:$16 sps:$4 sm:$0xff]   ;;  %v9834_v59 = vld [vmem:[#allocation7 + $0x4c] ss:$16 sps:$4 sm:$0xff]  }
 0xa5a   :  { %v3801_v25 = vsel %vm956_vm9, %v3800_v52, %v3799_v54  ;;  %11476 = vst [vmem:[#allocation121_spill] sm:$0xff] %v9834_v59  ;;  %v9837_v41 = vld [vmem:[#allocation7 + $0x40] ss:$16 sps:$4 sm:$0xff]   ;;  %v9840_v33 = vld [vmem:[#allocation7 + $0x48] ss:$16 sps:$4 sm:$0xff]   ;;  %v3323_v54 = vadd.f32 %v9624_v16, %v11374_v29  ;;  %v3366_v16 = vadd.f32 %v9630_v4, %v11377_v22 }
 0xa5b   :  { %v9771_v11 = vpack.c.b16 %v3801_v25, %v3801_v25  ;;  %11477 = vst [vmem:[#allocation122_spill] sm:$0xff] %v9837_v41  ;;  %11478 = vst [vmem:[#allocation123_spill] sm:$0xff] %v9840_v33  ;;  %v9843_v21 = vld [vmem:[#allocation7 + $0x24] ss:$16 sps:$4 sm:$0xff]   ;;  %v9846_v36 = vld [vmem:[#allocation7 + $0x2c] ss:$16 sps:$4 sm:$0xff]  }
 0xa5c   :  { %11479 = vst [vmem:[#allocation124_spill] sm:$0xff] %v9843_v21  ;;  %11480 = vst [vmem:[#allocation125_spill] sm:$0xff] %v9846_v36  ;;  %v9849_v60 = vld [vmem:[#allocation7 + $0x20] ss:$16 sps:$4 sm:$0xff]   ;;  %v9852_v7 = vld [vmem:[#allocation7 + $0x28] ss:$16 sps:$4 sm:$0xff]  }
 0xa5d   :  { %3837 = vmatmul.mubr.bf16.vlgmr.msra.gmra.mxu0 %v9771_v11  ;;  %3878 = vmatmul.mubr.bf16.vlgmr.msra.gmra.mxu1 %v9771_v11  ;;  %11481 = vst [vmem:[#allocation126_spill] sm:$0xff] %v9849_v60  ;;  %11482 = vst [vmem:[#allocation127_spill] sm:$0xff] %v9852_v7  ;;  %v9855_v24 = vld [vmem:[#allocation7 + $0x4] ss:$16 sps:$4 sm:$0xff]   ;;  %v9858_v43 = vld [vmem:[#allocation7 + $0xc] ss:$16 sps:$4 sm:$0xff]  }
 0xa5e   :  { %3912 = vmatpush1.bf16.msra.mxu0 %v9775_v15  ;;  %3953 = vmatpush1.bf16.msra.mxu1 %v9778_v53  ;;  %11483 = vst [vmem:[#allocation128_spill] sm:$0xff] %v9855_v24  ;;  %11484 = vst [vmem:[#allocation129_spill] sm:$0xff] %v9858_v43  ;;  %v9861_v27 = vld [vmem:[#allocation7] ss:$16 sps:$4 sm:$0xff]   ;;  %v9864_v34 = vld [vmem:[#allocation7 + $0x8] ss:$16 sps:$4 sm:$0xff]  }
 0xa5f   :  { %3913 = vmatprep.subr.bf16.mxu0 %v9781_v55  ;;  %3954 = vmatprep.subr.bf16.mxu1 %v9784_v13  ;;  %11485 = vst [vmem:[#allocation130_spill] sm:$0xff] %v9861_v27  ;;  %11486 = vst [vmem:[#allocation131_spill] sm:$0xff] %v9864_v34  ;;  %v9867_v61 = vld [vmem:[#allocation3 + $0xe4] ss:$16 sps:$4 sm:$0xff]   ;;  %v9870_v52 = vld [vmem:[#allocation3 + $0xec] ss:$16 sps:$4 sm:$0xff]  }
 0xa60   :  { %3943 = vmatprep.mubr.bf16.mxu0 %v11036_v58  ;;  %3984 = vmatprep.mubr.bf16.mxu1 %v11036_v58  ;;  %11487 = vst [vmem:[#allocation132_spill] sm:$0xff] %v9867_v61  ;;  %11488 = vst [vmem:[#allocation133_spill] sm:$0xff] %v9870_v52 }
 0xa62   :  { %3914 = vmatpush1.bf16.msra.mxu0 %v9789_v39  ;;  %3955 = vmatpush1.bf16.msra.mxu1 %v9792_v28 }
 0xa63   :  { %3915 = vmatprep.subr.bf16.mxu0 %v9795_v3  ;;  %3956 = vmatprep.subr.bf16.mxu1 %v9798_v51 }
 0xa66   :  { %3916 = vmatpush1.bf16.msra.mxu0 %v9801_v5  ;;  %3957 = vmatpush1.bf16.msra.mxu1 %v9804_v47 }
 0xa67   :  { %3917 = vmatprep.subr.bf16.mxu0 %v9807_v31  ;;  %3958 = vmatprep.subr.bf16.mxu1 %v9810_v46 }
 0xa6a   :  { %3918 = vmatpush1.bf16.msra.mxu0 %v9813_v9  ;;  %3959 = vmatpush1.bf16.msra.mxu1 %v9816_v42 }
 0xa6b   :  { %3919 = vmatprep.subr.bf16.mxu0 %v9819_v48  ;;  %3960 = vmatprep.subr.bf16.mxu1 %v9822_v38 }
 0xa6e   :  { %3920 = vmatpush1.bf16.msra.mxu0 %v9825_v8  ;;  %3961 = vmatpush1.bf16.msra.mxu1 %v9828_v62 }
 0xa6f   :  { %3921 = vmatprep.subr.bf16.mxu0 %v9831_v40  ;;  %3962 = vmatprep.subr.bf16.mxu1 %v9834_v59 }
 0xa72   :  { %3922 = vmatpush1.bf16.msra.mxu0 %v9837_v41  ;;  %3963 = vmatpush1.bf16.msra.mxu1 %v9840_v33 }
 0xa73   :  { %3923 = vmatprep.subr.bf16.mxu0 %v9843_v21  ;;  %3964 = vmatprep.subr.bf16.mxu1 %v9846_v36 }
 0xa76   :  { %3924 = vmatpush1.bf16.msra.mxu0 %v9849_v60  ;;  %3965 = vmatpush1.bf16.msra.mxu1 %v9852_v7 }
 0xa77   :  { %3925 = vmatprep.subr.bf16.mxu0 %v9855_v24  ;;  %3966 = vmatprep.subr.bf16.mxu1 %v9858_v43 }
 0xa7a   :  { %3926 = vmatpush1.bf16.msra.mxu0 %v9861_v27  ;;  %3967 = vmatpush1.bf16.msra.mxu1 %v9864_v34  ;;  %v3325_v27 = vadd.f32 %v9628_v56, %v11375_v23 }
 0xa7b   :  { %3993 = vmatprep.subr.bf16.mxu0 %v9867_v61  ;;  %4034 = vmatprep.subr.bf16.mxu1 %v9870_v52  ;;  %v3364_v52 = vadd.f32 %v9626_v12, %v11379_v14 }
 0xb1d   :  { %v3838_v25 = vpop.f32.mrf.mxu0  ;;  %v3879_v43 = vpop.f32.mrf.mxu1 }
 0xb1e   :  { %v3839_v24 = vadd.f32 %v3838_v25, %v3323_v54  ;;  %v3880_v56 = vadd.f32 %v3879_v43, %v3364_v52  ;;  %v9894_v52 = vld [vmem:[#allocation3 + $0xcc] ss:$16 sps:$4 sm:$0xff]  }
 0xb1f   :  { %v3840_v7 = vpop.f32.mrf.mxu0  ;;  %v3881_v60 = vpop.f32.mrf.mxu1  ;;  %11493 = vst [vmem:[#allocation43_spill] sm:$0xff] %v9894_v52 }
 0xb20   :  { %v6045_v34 = vmul.f32 -1.442695, %v3839_v24  ;;  %v3841_v36 = vadd.f32 %v3840_v7, %v3325_v27  ;;  %v3882_v29 = vadd.f32 %v3881_v60, %v3366_v16  ;;  %v9899_v16 = vld [vmem:[#allocation3 + $0xc0] ss:$16 sps:$4 sm:$0xff]  }
 0xb21   :  { %v3842_v21 = vpop.f32.mrf.mxu0  ;;  %v3883_v33 = vpop.f32.mrf.mxu1  ;;  %11494 = vst [vmem:[#allocation44_spill] sm:$0xff] %v9899_v16 }
 0xb22   :  { %6990 = vpow2.f32 %v6045_v34  ;;  %v6046_v61 = vmul.f32 -1.442695, %v3841_v36  ;;  %v6047_v54 = vmul.f32 -1.442695, %v3882_v29 }
 0xb23   :  { %v3843_v41 = vpop.f32.mrf.mxu0  ;;  %v3884_v59 = vpop.f32.mrf.mxu1 }
 0xb24   :  { %6992 = vpow2.f32 %v6046_v61  ;;  %v9888_v61 = vld [vmem:[#allocation3 + $0xe8] ss:$16 sps:$4 sm:$0xff]  }
 0xb25   :  { %6994 = vtanh.f32 %v3880_v56  ;;  %11491 = vst [vmem:[#allocation136_spill] sm:$0xff] %v9888_v61  ;;  %v9902_v56 = vld [vmem:[#allocation3 + $0xc8] ss:$16 sps:$4 sm:$0xff]  }
 0xb26   :  { %6996 = vpow2.f32 %v6047_v54  ;;  %11495 = vst [vmem:[#allocation45_spill] sm:$0xff] %v9902_v56  ;;  %v9905_v54 = vld [vmem:[#allocation3 + $0xa4] ss:$16 sps:$4 sm:$0xff]  }
 0xb27   :  { %11496 = vst [vmem:[#allocation46_spill] sm:$0xff] %v9905_v54 }
 0xb2f   :  { %v6991_v25 = vpop.eup %6990 }
 0xb30   :  { %v3892_v23 = vadd.f32 1.0, %v6991_v25  ;;  %v9908_v25 = vld [vmem:[#allocation3 + $0xac] ss:$16 sps:$4 sm:$0xff]  }
 0xb31   :  { %v6993_v7 = vpop.eup %6992  ;;  %11497 = vst [vmem:[#allocation47_spill] sm:$0xff] %v9908_v25 }
 0xb32   :  { %6998 = vrcp.f32 %v3892_v23  ;;  %v3893_v33 = vadd.f32 1.0, %v6993_v7  ;;  %v6995_v41 = vpop.eup %6994  ;;  %v9885_v23 = vld [vmem:[#allocation3 + $0xe0] ss:$16 sps:$4 sm:$0xff]  }
 0xb33   :  { %v6997_v59 = vpop.eup %6996  ;;  %11490 = vst [vmem:[#allocation135_spill] sm:$0xff] %v9885_v23  ;;  %v9911_v7 = vld [vmem:[#allocation3 + $0xa0] ss:$16 sps:$4 sm:$0xff]  }
 0xb34   :  { %7000 = vrcp.f32 %v3893_v33  ;;  %v3902_v4 = vadd.f32 1.0, %v6997_v59  ;;  %11498 = vst [vmem:[#allocation48_spill] sm:$0xff] %v9911_v7  ;;  %v9914_v33 = vld [vmem:[#allocation3 + $0xa8] ss:$16 sps:$4 sm:$0xff]   ;;  %v9920_v59 = vld [vmem:[#allocation3 + $0x8c] ss:$16 sps:$4 sm:$0xff]  }
 0xb35   :  { %11499 = vst [vmem:[#allocation49_spill] sm:$0xff] %v9914_v33  ;;  %11501 = vst [vmem:[#allocation51_spill] sm:$0xff] %v9920_v59 }
 0xb36   :  { %7002 = vrcp.f32 %v3902_v4  ;;  %v9932_v4 = vld [vmem:[#allocation3 + $0x6c] ss:$16 sps:$4 sm:$0xff]  }
 0xb37   :  { %11505 = vst [vmem:[#allocation119_spill] sm:$0xff] %v9932_v4 }
 0xb3f   :  { %v6999_v21 = vpop.eup %6998 }
 0xb40   :  { %v3906_v36 = vmul.f32 %v6999_v21, %v6995_v41  ;;  %v9917_v41 = vld [vmem:[#allocation3 + $0x84] ss:$16 sps:$4 sm:$0xff]   ;;  %v9923_v21 = vld [vmem:[#allocation3 + $0x80] ss:$16 sps:$4 sm:$0xff]  }
 0xb41   :  { %v7001_v24 = vpop.eup %7000  ;;  %11500 = vst [vmem:[#allocation50_spill] sm:$0xff] %v9917_v41  ;;  %11502 = vst [vmem:[#allocation52_spill] sm:$0xff] %v9923_v21 }
 0xb42   :  { %v3905_v60 = vmul.f32 %v7001_v24, %v9547_v44  ;;  %v9891_v44 = vld [vmem:[#allocation3 + $0xc4] ss:$16 sps:$4 sm:$0xff]  }
 0xb43   :  { %v7003_v29 = vpop.eup %7002  ;;  %11492 = vst [vmem:[#allocation42_spill] sm:$0xff] %v9891_v44  ;;  %v9929_v24 = vld [vmem:[#allocation3 + $0x64] ss:$16 sps:$4 sm:$0xff]  }
 0xb44   :  { %v9882_v27 = vadd.f32 %v3906_v36, %v3905_v60  ;;  %v9926_v36 = vld [vmem:[#allocation3 + $0x88] ss:$16 sps:$4 sm:$0xff]   ;;  %11504 = vst [vmem:[#allocation54_spill] sm:$0xff] %v9929_v24  ;;  %v9935_v60 = vld [vmem:[#allocation3 + $0x60] ss:$16 sps:$4 sm:$0xff]  }
 0xb45   :  { %11503 = vst [vmem:[#allocation53_spill] sm:$0xff] %v9926_v36  ;;  %11506 = vst [vmem:[#allocation120_spill] sm:$0xff] %v9935_v60 }
 0xb46   :  { %11489 = vst [vmem:[#allocation134_spill] sm:$0xff] %v9882_v27  ;;  %7004 = vtanh.f32 %v9882_v27 }
 0xb53   :  { %v7005_v12 = vpop.eup %7004 }
 0xb54   :  { %v3909_v43 = vmul.f32 %v7005_v12, %v7003_v29  ;;  %v9938_v29 = vld [vmem:[#allocation3 + $0x68] ss:$16 sps:$4 sm:$0xff]   ;;  %v9941_v12 = vld [vmem:[#allocation3 + $0x44] ss:$16 sps:$4 sm:$0xff]  }
 0xb55   :  { %11507 = vst [vmem:[#allocation118_spill] sm:$0xff] %v9938_v29  ;;  %11508 = vst [vmem:[#allocation55_spill] sm:$0xff] %v9941_v12 }
 0xb56   :  { %v3910_v34 = vpack.c.bf16 %v3909_v43, %v3909_v43  ;;  %v9944_v43 = vld [vmem:[#allocation3 + $0x4c] ss:$16 sps:$4 sm:$0xff]  }
 0xb57   :  { %11509 = vst [vmem:[#allocation56_spill] sm:$0xff] %v9944_v43 }
 0xb58   :  { %3944 = vmatmul.mubr.bf16.vlgmr.msra.gmra.mxu0 %v3910_v34  ;;  %3985 = vmatmul.mubr.bf16.vlgmr.msra.gmra.mxu1 %v3910_v34  ;;  %v9947_v34 = vld [vmem:[#allocation3 + $0x40] ss:$16 sps:$4 sm:$0xff]  }
 0xb59   :  { %3994 = vmatpush1.bf16.msra.mxu0 %v9885_v23  ;;  %4035 = vmatpush1.bf16.msra.mxu1 %v9888_v61  ;;  %11510 = vst [vmem:[#allocation57_spill] sm:$0xff] %v9947_v34 }
 0xb5a   :  { %3995 = vmatprep.subr.bf16.mxu0 %v9891_v44  ;;  %4036 = vmatprep.subr.bf16.mxu1 %v9894_v52 }
 0xb5b   :  { %4025 = vmatprep.mubr.bf16.mxu0 %v11036_v58  ;;  %4066 = vmatprep.mubr.bf16.mxu1 %v11036_v58 }
 0xb5d   :  { %3996 = vmatpush1.bf16.msra.mxu0 %v9899_v16  ;;  %4037 = vmatpush1.bf16.msra.mxu1 %v9902_v56 }
 0xb5e   :  { %3997 = vmatprep.subr.bf16.mxu0 %v9905_v54  ;;  %4038 = vmatprep.subr.bf16.mxu1 %v9908_v25 }
 0xb61   :  { %3998 = vmatpush1.bf16.msra.mxu0 %v9911_v7  ;;  %4039 = vmatpush1.bf16.msra.mxu1 %v9914_v33 }
 0xb62   :  { %3999 = vmatprep.subr.bf16.mxu0 %v9917_v41  ;;  %4040 = vmatprep.subr.bf16.mxu1 %v9920_v59 }
 0xb65   :  { %4000 = vmatpush1.bf16.msra.mxu0 %v9923_v21  ;;  %4041 = vmatpush1.bf16.msra.mxu1 %v9926_v36 }
 0xb66   :  { %4001 = vmatprep.subr.bf16.mxu0 %v9929_v24  ;;  %4042 = vmatprep.subr.bf16.mxu1 %v9932_v4  ;;  %v9950_v4 = vld [vmem:[#allocation3 + $0x48] ss:$16 sps:$4 sm:$0xff]  }
 0xb67   :  { %11511 = vst [vmem:[#allocation58_spill] sm:$0xff] %v9950_v4 }
 0xb69   :  { %4002 = vmatpush1.bf16.msra.mxu0 %v9935_v60  ;;  %4043 = vmatpush1.bf16.msra.mxu1 %v9938_v29  ;;  %v9953_v60 = vld [vmem:[#allocation3 + $0x24] ss:$16 sps:$4 sm:$0xff]   ;;  %v9956_v29 = vld [vmem:[#allocation3 + $0x2c] ss:$16 sps:$4 sm:$0xff]  }
 0xb6a   :  { %4003 = vmatprep.subr.bf16.mxu0 %v9941_v12  ;;  %4044 = vmatprep.subr.bf16.mxu1 %v9944_v43  ;;  %11512 = vst [vmem:[#allocation59_spill] sm:$0xff] %v9953_v60  ;;  %11513 = vst [vmem:[#allocation60_spill] sm:$0xff] %v9956_v29  ;;  %v9959_v12 = vld [vmem:[#allocation3 + $0x20] ss:$16 sps:$4 sm:$0xff]   ;;  %v9962_v43 = vld [vmem:[#allocation3 + $0x28] ss:$16 sps:$4 sm:$0xff]  }
 0xb6b   :  { %11514 = vst [vmem:[#allocation61_spill] sm:$0xff] %v9959_v12  ;;  %11515 = vst [vmem:[#allocation62_spill] sm:$0xff] %v9962_v43 }
 0xb6d   :  { %4004 = vmatpush1.bf16.msra.mxu0 %v9947_v34  ;;  %4045 = vmatpush1.bf16.msra.mxu1 %v9950_v4  ;;  %v9965_v34 = vld [vmem:[#allocation3 + $0x4] ss:$16 sps:$4 sm:$0xff]   ;;  %v9968_v4 = vld [vmem:[#allocation3 + $0xc] ss:$16 sps:$4 sm:$0xff]  }
 0xb6e   :  { %4005 = vmatprep.subr.bf16.mxu0 %v9953_v60  ;;  %4046 = vmatprep.subr.bf16.mxu1 %v9956_v29  ;;  %11516 = vst [vmem:[#allocation63_spill] sm:$0xff] %v9965_v34  ;;  %11517 = vst [vmem:[#allocation64_spill] sm:$0xff] %v9968_v4  ;;  %v9971_v60 = vld [vmem:[#allocation3] ss:$16 sps:$4 sm:$0xff]   ;;  %v9974_v29 = vld [vmem:[#allocation3 + $0x8] ss:$16 sps:$4 sm:$0xff]  }
 0xb6f   :  { %11518 = vst [vmem:[#allocation65_spill] sm:$0xff] %v9971_v60  ;;  %11519 = vst [vmem:[#allocation66_spill] sm:$0xff] %v9974_v29 }
 0xb71   :  { %4006 = vmatpush1.bf16.msra.mxu0 %v9959_v12  ;;  %4047 = vmatpush1.bf16.msra.mxu1 %v9962_v43  ;;  %v9977_v12 = vld [vmem:[#allocation5 + $0xe4] ss:$16 sps:$4 sm:$0xff]   ;;  %v9980_v43 = vld [vmem:[#allocation5 + $0xec] ss:$16 sps:$4 sm:$0xff]  }
 0xb72   :  { %4007 = vmatprep.subr.bf16.mxu0 %v9965_v34  ;;  %4048 = vmatprep.subr.bf16.mxu1 %v9968_v4  ;;  %11520 = vst [vmem:[#allocation67_spill] sm:$0xff] %v9977_v12  ;;  %11521 = vst [vmem:[#allocation68_spill] sm:$0xff] %v9980_v43  ;;  %v9985_v4 = vld [vmem:[#allocation5 + $0xe0] ss:$16 sps:$4 sm:$0xff]  }
 0xb73   :  { %11522 = vst [vmem:[#allocation69_spill] sm:$0xff] %v9985_v4 }
 0xb75   :  { %4008 = vmatpush1.bf16.msra.mxu0 %v9971_v60  ;;  %4049 = vmatpush1.bf16.msra.mxu1 %v9974_v29  ;;  %v9988_v60 = vld [vmem:[#allocation5 + $0xe8] ss:$16 sps:$4 sm:$0xff]   ;;  %v9991_v29 = vld [vmem:[#allocation5 + $0xc4] ss:$16 sps:$4 sm:$0xff]  }
 0xb76   :  { %4427 = vmatprep.subr.bf16.mxu0 %v9977_v12  ;;  %4468 = vmatprep.subr.bf16.mxu1 %v9980_v43  ;;  %11523 = vst [vmem:[#allocation137_spill] sm:$0xff] %v9988_v60  ;;  %11524 = vst [vmem:[#allocation139_spill] sm:$0xff] %v9991_v29  ;;  %v9994_v12 = vld [vmem:[#allocation5 + $0xcc] ss:$16 sps:$4 sm:$0xff]   ;;  %v10014_v43 = vld [vmem:[#allocation5 + $0xa8] ss:$16 sps:$4 sm:$0xff]  }
 0xb77   :  { %11525 = vst [vmem:[#allocation140_spill] sm:$0xff] %v9994_v12  ;;  %11531 = vst [vmem:[#allocation78_spill] sm:$0xff] %v10014_v43 }
 0xb78   :  { %4026 = vmatmul.mubr.bf16.vlgmr.msra.gmra.mxu0 %v9771_v11  ;;  %4067 = vmatmul.mubr.bf16.vlgmr.msra.gmra.mxu1 %v9771_v11  ;;  %v9999_v11 = vld [vmem:[#allocation5 + $0xc0] ss:$16 sps:$4 sm:$0xff]  }
 0xb79   :  { %4428 = vmatpush1.bf16.msra.mxu0 %v9985_v4  ;;  %4469 = vmatpush1.bf16.msra.mxu1 %v9988_v60  ;;  %11526 = vst [vmem:[#allocation138_spill] sm:$0xff] %v9999_v11  ;;  %v10002_v4 = vld [vmem:[#allocation5 + $0xc8] ss:$16 sps:$4 sm:$0xff]   ;;  %v10005_v60 = vld [vmem:[#allocation5 + $0xa4] ss:$16 sps:$4 sm:$0xff]  }
 0xb7a   :  { %4429 = vmatprep.subr.bf16.mxu0 %v9991_v29  ;;  %4470 = vmatprep.subr.bf16.mxu1 %v9994_v12  ;;  %11527 = vst [vmem:[#allocation74_spill] sm:$0xff] %v10002_v4  ;;  %11528 = vst [vmem:[#allocation75_spill] sm:$0xff] %v10005_v60  ;;  %v10008_v29 = vld [vmem:[#allocation5 + $0xac] ss:$16 sps:$4 sm:$0xff]   ;;  %v10011_v12 = vld [vmem:[#allocation5 + $0xa0] ss:$16 sps:$4 sm:$0xff]  }
 0xb7b   :  { %4459 = vmatprep.mubr.bf16.mxu0 %v11036_v58  ;;  %4500 = vmatprep.mubr.bf16.mxu1 %v11036_v58  ;;  %11529 = vst [vmem:[#allocation76_spill] sm:$0xff] %v10008_v29  ;;  %11530 = vst [vmem:[#allocation77_spill] sm:$0xff] %v10011_v12 }
 0xb7d   :  { %4430 = vmatpush1.bf16.msra.mxu0 %v9999_v11  ;;  %4471 = vmatpush1.bf16.msra.mxu1 %v10002_v4  ;;  %v10017_v11 = vld [vmem:[#allocation5 + $0x84] ss:$16 sps:$4 sm:$0xff]   ;;  %v10020_v4 = vld [vmem:[#allocation5 + $0x8c] ss:$16 sps:$4 sm:$0xff]  }
 0xb7e   :  { %4431 = vmatprep.subr.bf16.mxu0 %v10005_v60  ;;  %4472 = vmatprep.subr.bf16.mxu1 %v10008_v29  ;;  %11532 = vst [vmem:[#allocation79_spill] sm:$0xff] %v10017_v11  ;;  %11533 = vst [vmem:[#allocation80_spill] sm:$0xff] %v10020_v4  ;;  %v10023_v60 = vld [vmem:[#allocation5 + $0x80] ss:$16 sps:$4 sm:$0xff]   ;;  %v10026_v29 = vld [vmem:[#allocation5 + $0x88] ss:$16 sps:$4 sm:$0xff]  }
 0xb7f   :  { %11534 = vst [vmem:[#allocation81_spill] sm:$0xff] %v10023_v60  ;;  %11535 = vst [vmem:[#allocation82_spill] sm:$0xff] %v10026_v29 }
 0xb81   :  { %4432 = vmatpush1.bf16.msra.mxu0 %v10011_v12  ;;  %4473 = vmatpush1.bf16.msra.mxu1 %v10014_v43  ;;  %v10029_v12 = vld [vmem:[#allocation5 + $0x64] ss:$16 sps:$4 sm:$0xff]   ;;  %v10032_v43 = vld [vmem:[#allocation5 + $0x6c] ss:$16 sps:$4 sm:$0xff]  }
 0xb82   :  { %4433 = vmatprep.subr.bf16.mxu0 %v10017_v11  ;;  %4474 = vmatprep.subr.bf16.mxu1 %v10020_v4  ;;  %11536 = vst [vmem:[#allocation83_spill] sm:$0xff] %v10029_v12  ;;  %11537 = vst [vmem:[#allocation84_spill] sm:$0xff] %v10032_v43  ;;  %v10035_v11 = vld [vmem:[#allocation5 + $0x60] ss:$16 sps:$4 sm:$0xff]   ;;  %v10038_v4 = vld [vmem:[#allocation5 + $0x68] ss:$16 sps:$4 sm:$0xff]  }
 0xb83   :  { %11538 = vst [vmem:[#allocation85_spill] sm:$0xff] %v10035_v11  ;;  %11539 = vst [vmem:[#allocation86_spill] sm:$0xff] %v10038_v4 }
 0xb85   :  { %4434 = vmatpush1.bf16.msra.mxu0 %v10023_v60  ;;  %4475 = vmatpush1.bf16.msra.mxu1 %v10026_v29  ;;  %v10041_v60 = vld [vmem:[#allocation5 + $0x44] ss:$16 sps:$4 sm:$0xff]   ;;  %v10044_v29 = vld [vmem:[#allocation5 + $0x4c] ss:$16 sps:$4 sm:$0xff]  }
 0xb86   :  { %4435 = vmatprep.subr.bf16.mxu0 %v10029_v12  ;;  %4476 = vmatprep.subr.bf16.mxu1 %v10032_v43  ;;  %11540 = vst [vmem:[#allocation87_spill] sm:$0xff] %v10041_v60  ;;  %11541 = vst [vmem:[#allocation88_spill] sm:$0xff] %v10044_v29  ;;  %v10047_v12 = vld [vmem:[#allocation5 + $0x40] ss:$16 sps:$4 sm:$0xff]   ;;  %v10050_v43 = vld [vmem:[#allocation5 + $0x48] ss:$16 sps:$4 sm:$0xff]  }
 0xb87   :  { %11542 = vst [vmem:[#allocation89_spill] sm:$0xff] %v10047_v12  ;;  %11543 = vst [vmem:[#allocation90_spill] sm:$0xff] %v10050_v43 }
 0xb89   :  { %4436 = vmatpush1.bf16.msra.mxu0 %v10035_v11  ;;  %4477 = vmatpush1.bf16.msra.mxu1 %v10038_v4  ;;  %v10053_v11 = vld [vmem:[#allocation5 + $0x24] ss:$16 sps:$4 sm:$0xff]   ;;  %v10056_v4 = vld [vmem:[#allocation5 + $0x2c] ss:$16 sps:$4 sm:$0xff]  }
 0xb8a   :  { %4437 = vmatprep.subr.bf16.mxu0 %v10041_v60  ;;  %4478 = vmatprep.subr.bf16.mxu1 %v10044_v29  ;;  %11544 = vst [vmem:[#allocation91_spill] sm:$0xff] %v10053_v11  ;;  %11545 = vst [vmem:[#allocation92_spill] sm:$0xff] %v10056_v4  ;;  %v10059_v60 = vld [vmem:[#allocation5 + $0x20] ss:$16 sps:$4 sm:$0xff]   ;;  %v10062_v29 = vld [vmem:[#allocation5 + $0x28] ss:$16 sps:$4 sm:$0xff]  }
 0xb8b   :  { %11546 = vst [vmem:[#allocation93_spill] sm:$0xff] %v10059_v60  ;;  %11547 = vst [vmem:[#allocation94_spill] sm:$0xff] %v10062_v29 }
 0xb8d   :  { %4438 = vmatpush1.bf16.msra.mxu0 %v10047_v12  ;;  %4479 = vmatpush1.bf16.msra.mxu1 %v10050_v43  ;;  %v10065_v12 = vld [vmem:[#allocation5 + $0x4] ss:$16 sps:$4 sm:$0xff]   ;;  %v10068_v43 = vld [vmem:[#allocation5 + $0xc] ss:$16 sps:$4 sm:$0xff]  }
 0xb8e   :  { %4439 = vmatprep.subr.bf16.mxu0 %v10053_v11  ;;  %4480 = vmatprep.subr.bf16.mxu1 %v10056_v4  ;;  %11548 = vst [vmem:[#allocation95_spill] sm:$0xff] %v10065_v12  ;;  %11549 = vst [vmem:[#allocation96_spill] sm:$0xff] %v10068_v43  ;;  %v10071_v11 = vld [vmem:[#allocation5] ss:$16 sps:$4 sm:$0xff]   ;;  %v10074_v4 = vld [vmem:[#allocation5 + $0x8] ss:$16 sps:$4 sm:$0xff]  }
 0xb8f   :  { %11550 = vst [vmem:[#allocation97_spill] sm:$0xff] %v10071_v11  ;;  %11551 = vst [vmem:[#allocation98_spill] sm:$0xff] %v10074_v4 }
 0xb91   :  { %4440 = vmatpush1.bf16.msra.mxu0 %v10059_v60  ;;  %4481 = vmatpush1.bf16.msra.mxu1 %v10062_v29 }
 0xb92   :  { %4441 = vmatprep.subr.bf16.mxu0 %v10065_v12  ;;  %4482 = vmatprep.subr.bf16.mxu1 %v10068_v43 }
 0xb95   :  { %4442 = vmatpush1.bf16.msra.mxu0 %v10071_v11  ;;  %4483 = vmatpush1.bf16.msra.mxu1 %v10074_v4 }
 0xb96   :  { %4534 = vmatprep.subr.bf16.mxu0 %v9618_v57  ;;  %4575 = vmatprep.subr.bf16.mxu1 %v9621_v19 }
 0xc18   :  { %v10079_v29 = vpop.f32.mrf.mxu0  ;;  %v10081_v60 = vpop.f32.mrf.mxu1 }
 0xc19   :  { %11552 = vst [vmem:[#allocation99_spill] sm:$0xff] %v10081_v60 }
 0xc1a   :  { %v10083_v12 = vpop.f32.mrf.mxu0  ;;  %v10085_v34 = vpop.f32.mrf.mxu1 }
 0xc1b   :  { %11553 = vst [vmem:[#allocation100_spill] sm:$0xff] %v10083_v12  ;;  %11554 = vst [vmem:[#allocation101_spill] sm:$0xff] %v10085_v34 }
 0xc1c   :  { %v3949_v43 = vpop.f32.mrf.mxu0  ;;  %v3990_v24 = vpop.f32.mrf.mxu1 }
 0xc1e   :  { %v3950_v36 = vpop.f32.mrf.mxu0  ;;  %v3991_v11 = vpop.f32.mrf.mxu1 }
 0xc38   :  { %v4027_v21 = vpop.f32.mrf.mxu0  ;;  %v4068_v59 = vpop.f32.mrf.mxu1 }
 0xc39   :  { %v4079_v41 = vrot.slane %v4027_v21, 3  ;;  %v4083_v4 = vrot.slane %v4027_v21, 4  ;;  %v4087_v33 = vrot.slane %v4027_v21, 5  ;;  %v4091_v57 = vrot.slane %v4027_v21, 6 }
 0xc3a   :  { %v4095_v7 = vrot.slane %v4027_v21, 7  ;;  %v4099_v19 = vrot.slane %v4027_v21, 1  ;;  %v4103_v25 = vrot.slane %v4027_v21, 2  ;;  %v4159_v54 = vadd.f32 %v4027_v21, %v11449_v37  ;;  %v10088_v56 = vpop.f32.mrf.mxu0  ;;  %v10090_v16 = vpop.f32.mrf.mxu1 }
 0xc3b   :  { %v4139_v43 = vadd.f32 %v4079_v41, %v11445_v50  ;;  %v4143_v36 = vadd.f32 %v4083_v4, %v11446_v49  ;;  %v4147_v24 = vadd.f32 %v4087_v33, %v11447_v45  ;;  %v4151_v11 = vadd.f32 %v4091_v57, %v11448_v10 }
 0xc3c   :  { %v4155_v52 = vadd.f32 %v4095_v7, %v11444_v32  ;;  %v4163_v44 = vadd.f32 %v4099_v19, %v11450_v6  ;;  %v6058_v61 = vmul.f32 -1.442695, %v4159_v54  ;;  %v4031_v23 = vpop.f32.mrf.mxu0  ;;  %v4072_v27 = vpop.f32.mrf.mxu1  ;;  %v4167_v21 = vadd.f32 %v4103_v25, %v11451_v30  ;;  %v11555_v19 = vld [vmem:[#allocation21_spill] sm:$0xff] }
 0xc3d   :  { %v6048_v37 = vmul.f32 -1.442695, %v4139_v43  ;;  %v6050_v60 = vmul.f32 -1.442695, %v4143_v36  ;;  %v6052_v14 = vmul.f32 -1.442695, %v4147_v24 }
 0xc3e   :  { %v6054_v34 = vmul.f32 -1.442695, %v4151_v11  ;;  %7006 = vpow2.f32 %v6058_v61  ;;  %v4032_v41 = vpop.f32.mrf.mxu0  ;;  %v4073_v4 = vpop.f32.mrf.mxu1  ;;  %v6056_v33 = vmul.f32 -1.442695, %v4155_v52  ;;  %v4081_v45 = vrot.slane %v4068_v59, 3  ;;  %v11556_v36 = vld [vmem:[#allocation22_spill] sm:$0xff] }
 0xc3f   :  { %7008 = vpow2.f32 %v6048_v37  ;;  %v4085_v57 = vrot.slane %v4068_v59, 4  ;;  %v6060_v7 = vmul.f32 -1.442695, %v4163_v44  ;;  %v4089_v32 = vrot.slane %v4068_v59, 5  ;;  %v11557_v24 = vld [vmem:[#allocation23_spill] sm:$0xff]  ;;  %v11558_v44 = vld [vmem:[#allocation24_spill] sm:$0xff] }
 0xc40   :  { %7010 = vpow2.f32 %v6050_v60  ;;  %v6062_v54 = vmul.f32 -1.442695, %v4167_v21  ;;  %v4093_v23 = vrot.slane %v4068_v59, 6  ;;  %v4097_v27 = vrot.slane %v4068_v59, 7 }
 0xc41   :  { %7012 = vpow2.f32 %v6052_v14  ;;  %v4141_v25 = vadd.f32 %v4081_v45, %v11452_v17  ;;  %v4145_v43 = vadd.f32 %v4085_v57, %v11555_v19  ;;  %v4101_v61 = vrot.slane %v4068_v59, 1  ;;  %v11559_v14 = vld [vmem:[#allocation25_spill] sm:$0xff]  ;;  %v11561_v45 = vld [vmem:[#allocation27_spill] sm:$0xff]  ;;  %v11566_v19 = vld [vmem:[#allocation34_spill] sm:$0xff] }
 0xc42   :  { %7014 = vpow2.f32 %v6054_v34  ;;  %v4149_v37 = vadd.f32 %v4089_v32, %v11556_v36  ;;  %v4105_v52 = vrot.slane %v4068_v59, 2  ;;  %v4153_v60 = vadd.f32 %v4093_v23, %v11557_v24  ;;  %v11560_v34 = vld [vmem:[#allocation26_spill] sm:$0xff]  ;;  %v11565_v24 = vld [vmem:[#allocation32_spill] sm:$0xff] }
 0xc43   :  { %7016 = vpow2.f32 %v6056_v33  ;;  %v4157_v11 = vadd.f32 %v4097_v27, %v11558_v44  ;;  %v4161_v21 = vadd.f32 %v4068_v59, %v11559_v14  ;;  %v4165_v41 = vadd.f32 %v4101_v61, %v11560_v34 }
 0xc44   :  { %7018 = vpow2.f32 %v6060_v7  ;;  %v4169_v4 = vadd.f32 %v4105_v52, %v11561_v45  ;;  %v4080_v33 = vrot.slane %v10088_v56, 3  ;;  %v4084_v57 = vrot.slane %v10088_v56, 4 }
 0xc45   :  { %7020 = vpow2.f32 %v6062_v54  ;;  %v4088_v23 = vrot.slane %v10088_v56, 5  ;;  %v4092_v59 = vrot.slane %v10088_v56, 6  ;;  %v4100_v52 = vrot.slane %v10088_v56, 1 }
 0xc46   :  { %7022 = vtanh.f32 %v4141_v25 }
 0xc47   :  { %7024 = vtanh.f32 %v4145_v43  ;;  %v4096_v43 = vrot.slane %v10088_v56, 7  ;;  %v4152_v36 = vadd.f32 %v4092_v59, %v11565_v24  ;;  %v4086_v59 = vrot.slane %v10090_v16, 4 }
 0xc48   :  { %7026 = vtanh.f32 %v4149_v37  ;;  %v4098_v24 = vrot.slane %v10090_v16, 7 }
 0xc49   :  { %7028 = vtanh.f32 %v4153_v60  ;;  %v11562_v60 = vld [vmem:[#allocation19_spill] sm:$0xff]  ;;  %v4156_v17 = vadd.f32 %v4096_v43, %v11566_v19 }
 0xc4a   :  { %7030 = vtanh.f32 %v4157_v11  ;;  %v4140_v11 = vadd.f32 %v4080_v33, %v11562_v60  ;;  %v11567_v33 = vld [vmem:[#allocation36_spill] sm:$0xff] }
 0xc4b   :  { %v7007_v32 = vpop.eup %7006  ;;  %7032 = vtanh.f32 %v4161_v21 }
 0xc4c   :  { %v7009_v7 = vpop.eup %7008  ;;  %v4229_v54 = vadd.f32 1.0, %v7007_v32  ;;  %7034 = vtanh.f32 %v4165_v41  ;;  %v4104_v41 = vrot.slane %v10088_v56, 2  ;;  %v11563_v32 = vld [vmem:[#allocation28_spill] sm:$0xff]  ;;  %v6049_v30 = vmul.f32 -1.442695, %v4140_v11 }
 0xc4d   :  { %v7011_v27 = vpop.eup %7010  ;;  %v4219_v25 = vadd.f32 1.0, %v7009_v7  ;;  %7036 = vtanh.f32 %v4169_v4  ;;  %v4144_v34 = vadd.f32 %v4084_v57, %v11563_v32  ;;  %v11564_v4 = vld [vmem:[#allocation30_spill] sm:$0xff]  ;;  %v4082_v57 = vrot.slane %v10090_v16, 3 }
 0xc4e   :  { %v7013_v61 = vpop.eup %7012  ;;  %v4221_v37 = vadd.f32 1.0, %v7011_v27  ;;  %7038 = vrcp.f32 %v4229_v54  ;;  %v4148_v7 = vadd.f32 %v4088_v23, %v11564_v4 }
 0xc4f   :  { %v7015_v21 = vpop.eup %7014  ;;  %v4223_v45 = vadd.f32 1.0, %v7013_v61  ;;  %7040 = vrcp.f32 %v4219_v25  ;;  %v4160_v61 = vadd.f32 %v10088_v56, %v11567_v33  ;;  %v6051_v23 = vmul.f32 -1.442695, %v4144_v34 }
 0xc50   :  { %v7017_v14 = vpop.eup %7016  ;;  %v4225_v44 = vadd.f32 1.0, %v7015_v21  ;;  %7042 = vrcp.f32 %v4221_v37  ;;  %v6053_v19 = vmul.f32 -1.442695, %v4148_v7  ;;  %v4090_v56 = vrot.slane %v10090_v16, 5 }
 0xc51   :  { %v7019_v27 = vpop.eup %7018  ;;  %v4227_v54 = vadd.f32 1.0, %v7017_v14  ;;  %7044 = vrcp.f32 %v4223_v45  ;;  %v11568_v45 = vld [vmem:[#allocation38_spill] sm:$0xff]  ;;  %v6055_v33 = vmul.f32 -1.442695, %v4152_v36  ;;  %v6057_v34 = vmul.f32 -1.442695, %v4156_v17 }
 0xc52   :  { %v7021_v25 = vpop.eup %7020  ;;  %v4231_v60 = vadd.f32 1.0, %v7019_v27  ;;  %7046 = vrcp.f32 %v4225_v44  ;;  %v4164_v43 = vadd.f32 %v4100_v52, %v11568_v45  ;;  %v11569_v44 = vld [vmem:[#allocation40_spill] sm:$0xff]  ;;  %v6059_v7 = vmul.f32 -1.442695, %v4160_v61  ;;  %v11571_v45 = vld [vmem:[#allocation29_spill] sm:$0xff]  ;;  %v11574_v61 = vld [vmem:[#allocation35_spill] sm:$0xff] }
 0xc53   :  { %v10122_v21 = vpop.eup %7022  ;;  %v4233_v37 = vadd.f32 1.0, %v7021_v25  ;;  %7048 = vrcp.f32 %v4227_v54  ;;  %v4168_v11 = vadd.f32 %v4104_v41, %v11569_v44  ;;  %v4094_v25 = vrot.slane %v10090_v16, 6  ;;  %v11572_v44 = vld [vmem:[#allocation31_spill] sm:$0xff] }
 0xc54   :  { %v10125_v14 = vpop.eup %7024  ;;  %7050 = vrcp.f32 %v4231_v60  ;;  %v11570_v60 = vld [vmem:[#allocation20_spill] sm:$0xff]  ;;  %v4146_v32 = vadd.f32 %v4086_v59, %v11571_v45  ;;  %v6061_v36 = vmul.f32 -1.442695, %v4164_v43  ;;  %v4102_v41 = vrot.slane %v10090_v16, 1  ;;  %v11575_v43 = vld [vmem:[#allocation37_spill] sm:$0xff] }
 0xc55   :  { %v10129_v27 = vpop.eup %7026  ;;  %7052 = vrcp.f32 %v4233_v37  ;;  %v4142_v4 = vadd.f32 %v4082_v57, %v11570_v60  ;;  %v4150_v10 = vadd.f32 %v4090_v56, %v11572_v44  ;;  %v6063_v17 = vmul.f32 -1.442695, %v4168_v11  ;;  %v11573_v60 = vld [vmem:[#allocation33_spill] sm:$0xff] }
 0xc56   :  { %v10133_v54 = vpop.eup %7028  ;;  %7054 = vpow2.f32 %v6049_v30  ;;  %v4106_v57 = vrot.slane %v10090_v16, 2  ;;  %v4154_v49 = vadd.f32 %v4094_v25, %v11573_v60  ;;  %v4158_v59 = vadd.f32 %v4098_v24, %v11574_v61 }
 0xc57   :  { %v10137_v52 = vpop.eup %7030  ;;  %7056 = vpow2.f32 %v6051_v23  ;;  %v6064_v45 = vmul.f32 -1.442695, %v4142_v4  ;;  %v4162_v56 = vadd.f32 %v10090_v16, %v11575_v43  ;;  %v6065_v44 = vmul.f32 -1.442695, %v4146_v32 }
 0xc58   :  { %v10140_v37 = vpop.eup %7032  ;;  %7058 = vpow2.f32 %v6053_v19  ;;  %v6066_v6 = vmul.f32 -1.442695, %v4150_v10  ;;  %v6067_v24 = vmul.f32 -1.442695, %v4154_v49 }
 0xc59   :  { %v10144_v30 = vpop.eup %7034  ;;  %7060 = vpow2.f32 %v6055_v33  ;;  %v11576_v33 = vld [vmem:[#allocation39_spill] sm:$0xff]  ;;  %v6069_v16 = vmul.f32 -1.442695, %v4162_v56 }
 0xc5a   :  { %v10148_v23 = vpop.eup %7036  ;;  %7062 = vpow2.f32 %v6057_v34  ;;  %v4166_v11 = vadd.f32 %v4102_v41, %v11576_v33  ;;  %v11577_v34 = vld [vmem:[#allocation41_spill] sm:$0xff] }
 0xc5b   :  { %v10151_v19 = vpop.eup %7038  ;;  %7064 = vpow2.f32 %v6059_v7  ;;  %v4170_v60 = vadd.f32 %v4106_v57, %v11577_v34  ;;  %v6068_v7 = vmul.f32 -1.442695, %v4158_v59 }
 0xc5c   :  { %v10155_v50 = vpop.eup %7040  ;;  %7066 = vpow2.f32 %v6061_v36  ;;  %v6070_v36 = vmul.f32 -1.442695, %v4166_v11 }
 0xc5d   :  { %v10158_v25 = vpop.eup %7042  ;;  %7068 = vpow2.f32 %v6063_v17  ;;  %v6071_v10 = vmul.f32 -1.442695, %v4170_v60 }
 0xc5e   :  { %v10161_v4 = vpop.eup %7044  ;;  %7070 = vpow2.f32 %v6064_v45 }
 0xc5f   :  { %v10163_v61 = vpop.eup %7046  ;;  %7072 = vpow2.f32 %v6065_v44 }
 0xc60   :  { %v10165_v32 = vpop.eup %7048  ;;  %7074 = vpow2.f32 %v6066_v6 }
 0xc61   :  { %v10167_v41 = vpop.eup %7050  ;;  %7076 = vpow2.f32 %v6067_v24 }
 0xc62   :  { %v10169_v17 = vpop.eup %7052  ;;  %7078 = vpow2.f32 %v6068_v7 }
 0xc63   :  { %v7055_v49 = vpop.eup %7054  ;;  %7080 = vpow2.f32 %v6069_v16 }
 0xc64   :  { %v7057_v57 = vpop.eup %7056  ;;  %v4220_v45 = vadd.f32 1.0, %v7055_v49  ;;  %7082 = vpow2.f32 %v6070_v36 }
 0xc65   :  { %v7059_v59 = vpop.eup %7058  ;;  %v4222_v34 = vadd.f32 1.0, %v7057_v57  ;;  %7084 = vpow2.f32 %v6071_v10 }
 0xc66   :  { %v7061_v44 = vpop.eup %7060  ;;  %v4224_v56 = vadd.f32 1.0, %v7059_v59  ;;  %7086 = vrcp.f32 %v4220_v45 }
 0xc67   :  { %v7063_v6 = vpop.eup %7062  ;;  %v4226_v11 = vadd.f32 1.0, %v7061_v44  ;;  %7088 = vrcp.f32 %v4222_v34 }
 0xc68   :  { %v7065_v33 = vpop.eup %7064  ;;  %v4228_v24 = vadd.f32 1.0, %v7063_v6  ;;  %7090 = vrcp.f32 %v4224_v56 }
 0xc69   :  { %v7067_v60 = vpop.eup %7066  ;;  %v4230_v43 = vadd.f32 1.0, %v7065_v33  ;;  %7092 = vrcp.f32 %v4226_v11  ;;  %v4331_v11 = vrot.slane %v9730_v18, 7  ;;  %v4337_v18 = vrot.slane %v9756_v63, 7 }
 0xc6a   :  { %v7069_v7 = vpop.eup %7068  ;;  %v4232_v16 = vadd.f32 1.0, %v7067_v60  ;;  %7094 = vrcp.f32 %v4228_v24  ;;  %v4332_v24 = vrot.slane %v9734_v20, 7  ;;  %v4355_v20 = vmul.f32 %v10155_v50, %v10122_v21 }
 0xc6b   :  { %v7071_v49 = vpop.eup %7070  ;;  %v4234_v36 = vadd.f32 1.0, %v7069_v7  ;;  %7096 = vrcp.f32 %v4230_v43  ;;  %v4334_v7 = vrot.slane %v9743_v35, 7  ;;  %v4358_v50 = vmul.f32 %v10163_v61, %v10133_v54 }
 0xc6c   :  { %v7073_v57 = vpop.eup %7072  ;;  %7098 = vrcp.f32 %v4232_v16  ;;  %v4299_v10 = vadd.f32 1.0, %v7071_v49  ;;  %v4333_v16 = vrot.slane %v9738_v0, 7  ;;  %v4338_v0 = vrot.slane %v9759_v1, 7 }
 0xc6d   :  { %v7075_v59 = vpop.eup %7074  ;;  %7100 = vrcp.f32 %v4234_v36  ;;  %v4300_v45 = vadd.f32 1.0, %v7073_v57  ;;  %v4335_v57 = vrot.slane %v9748_v26, 7 }
 0xc6e   :  { %v7077_v44 = vpop.eup %7076  ;;  %v4301_v34 = vadd.f32 1.0, %v7075_v59  ;;  %7102 = vrcp.f32 %v4299_v10 }
 0xc6f   :  { %v7079_v22 = vpop.eup %7078  ;;  %v4302_v6 = vadd.f32 1.0, %v7077_v44  ;;  %7104 = vrcp.f32 %v4300_v45  ;;  %v4356_v44 = vmul.f32 %v10158_v25, %v10125_v14  ;;  %v4359_v14 = vmul.f32 %v10165_v32, %v10137_v52 }
 0xc70   :  { %v7081_v56 = vpop.eup %7080  ;;  %v4303_v12 = vadd.f32 1.0, %v7079_v22  ;;  %7106 = vrcp.f32 %v4301_v34  ;;  %v4336_v22 = vrot.slane %v9753_v2, 7  ;;  %v4357_v2 = vmul.f32 %v10161_v4, %v10129_v27 }
 0xc71   :  { %v7083_v33 = vpop.eup %7082  ;;  %v4304_v60 = vadd.f32 1.0, %v7081_v56  ;;  %7108 = vrcp.f32 %v4302_v6  ;;  %v4360_v4 = vmul.f32 %v10151_v19, %v10140_v37 }
 0xc72   :  { %v7085_v43 = vpop.eup %7084  ;;  %v4305_v49 = vadd.f32 1.0, %v7083_v33  ;;  %7110 = vrcp.f32 %v4303_v12 }
 0xc73   :  { %v7087_v36 = vpop.eup %7086  ;;  %v4306_v10 = vadd.f32 1.0, %v7085_v43  ;;  %7112 = vrcp.f32 %v4304_v60  ;;  %v4361_v60 = vmul.f32 %v10167_v41, %v10144_v30  ;;  %v4362_v43 = vmul.f32 %v10169_v17, %v10148_v23 }
 0xc74   :  { %v7089_v59 = vpop.eup %7088  ;;  %v4347_v45 = vmul.f32 %v7087_v36, %v4331_v11  ;;  %7114 = vrcp.f32 %v4305_v49 }
 0xc75   :  { %v7091_v35 = vpop.eup %7090  ;;  %v4348_v34 = vmul.f32 %v7089_v59, %v4332_v24  ;;  %7116 = vrcp.f32 %v4306_v10 }
 0xc76   :  { %v7093_v26 = vpop.eup %7092  ;;  %v4349_v6 = vmul.f32 %v7091_v35, %v4333_v16  ;;  %v10185_v56 = vadd.f32 %v4355_v20, %v4347_v45 }
 0xc77   :  { %v7095_v63 = vpop.eup %7094  ;;  %v10189_v12 = vadd.f32 %v4356_v44, %v4348_v34  ;;  %v4350_v1 = vmul.f32 %v7093_v26, %v4334_v7 }
 0xc78   :  { %v7097_v21 = vpop.eup %7096  ;;  %v4351_v25 = vmul.f32 %v7095_v63, %v4335_v57  ;;  %v10193_v33 = vadd.f32 %v4357_v2, %v4349_v6  ;;  %7118 = vtanh.f32 %v10185_v56 }
 0xc79   :  { %v7099_v27 = vpop.eup %7098  ;;  %v4352_v11 = vmul.f32 %v7097_v21, %v4336_v22  ;;  %v10198_v24 = vadd.f32 %v4358_v50, %v4350_v1  ;;  %7120 = vtanh.f32 %v10189_v12 }
 0xc7a   :  { %v7101_v54 = vpop.eup %7100  ;;  %v4353_v61 = vmul.f32 %v7099_v27, %v4337_v18  ;;  %v10203_v52 = vadd.f32 %v4359_v14, %v4351_v25  ;;  %7122 = vtanh.f32 %v10193_v33 }
 0xc7b   :  { %v4354_v32 = vmul.f32 %v7101_v54, %v4338_v0  ;;  %v10208_v7 = vadd.f32 %v4360_v4, %v4352_v11  ;;  %7124 = vtanh.f32 %v10198_v24  ;;  %v7103_v19 = vpop.eup %7102 }
 0xc7c   :  { %v10211_v37 = vadd.f32 %v4361_v60, %v4353_v61  ;;  %7126 = vtanh.f32 %v10203_v52  ;;  %v7105_v30 = vpop.eup %7104 }
 0xc7d   :  { %v10214_v16 = vadd.f32 %v4362_v43, %v4354_v32  ;;  %7128 = vtanh.f32 %v10208_v7  ;;  %v7107_v41 = vpop.eup %7106 }
 0xc7e   :  { %7130 = vtanh.f32 %v10211_v37  ;;  %v7109_v23 = vpop.eup %7108 }
 0xc7f   :  { %7132 = vtanh.f32 %v10214_v16  ;;  %v7111_v17 = vpop.eup %7110 }
 0xc80   :  { %v7113_v49 = vpop.eup %7112 }
 0xc81   :  { %v7115_v36 = vpop.eup %7114 }
 0xc82   :  { %v7117_v57 = vpop.eup %7116 }
 0xc85   :  { %v7119_v22 = vpop.eup %7118 }
 0xc86   :  { %v7121_v10 = vpop.eup %7120  ;;  %v4379_v59 = vmul.f32 %v7119_v22, %v7103_v19 }
 0xc87   :  { %v7123_v18 = vpop.eup %7122  ;;  %v4380_v20 = vmul.f32 %v7121_v10, %v7105_v30 }
 0xc88   :  { %v7125_v45 = vpop.eup %7124  ;;  %v4381_v35 = vmul.f32 %v7123_v18, %v7107_v41  ;;  %v4387_v0 = vpack.c.bf16 %v4379_v59, %v4379_v59 }
 0xc89   :  { %v7127_v44 = vpop.eup %7126  ;;  %v4382_v34 = vmul.f32 %v7125_v45, %v7109_v23  ;;  %v4388_v26 = vpack.c.bf16 %v4380_v20, %v4380_v20 }
 0xc8a   :  { %v7129_v2 = vpop.eup %7128  ;;  %v4383_v6 = vmul.f32 %v7127_v44, %v7111_v17  ;;  %v4389_v63 = vpack.c.bf16 %v4381_v35, %v4381_v35  ;;  %v4403_v50 = vunpack.c.l.b16 %v4387_v0 }
 0xc8b   :  { %v7131_v1 = vpop.eup %7130  ;;  %v4384_v21 = vmul.f32 %v7129_v2, %v7113_v49  ;;  %v4390_v14 = vpack.c.bf16 %v4382_v34, %v4382_v34  ;;  %v4404_v25 = vunpack.c.l.b16 %v4388_v26 }
 0xc8c   :  { %v7133_v27 = vpop.eup %7132  ;;  %v4385_v4 = vmul.f32 %v7131_v1, %v7115_v36  ;;  %v4391_v11 = vpack.c.bf16 %v4383_v6, %v4383_v6  ;;  %v4405_v54 = vunpack.c.l.b16 %v4389_v63  ;;  %v4411_v61 = vrot.slane %v4403_v50, 5 }
 0xc8d   :  { %v4386_v60 = vmul.f32 %v7133_v27, %v7117_v57  ;;  %v4392_v32 = vpack.c.bf16 %v4384_v21, %v4384_v21  ;;  %v4406_v43 = vunpack.c.l.b16 %v4390_v14  ;;  %v4412_v19 = vrot.slane %v4404_v25, 4 }
 0xc8e   :  { %v4393_v30 = vpack.c.bf16 %v4385_v4, %v4385_v4  ;;  %v4407_v41 = vunpack.c.l.b16 %v4391_v11  ;;  %v4414_v23 = vrot.slane %v4405_v54, 3 }
 0xc8f   :  { %v4394_v22 = vpack.c.bf16 %v4386_v60, %v4386_v60  ;;  %v4413_v17 = vsel %vm938_vm3, %v4412_v19, %v4411_v61  ;;  %v4416_v10 = vrot.slane %v4406_v43, 2  ;;  %v4408_v20 = vunpack.c.l.b16 %v4392_v32  ;;  %v11594_v61 = vld [vmem:[#allocation72_spill] sm:$0xff]  ;;  %v11595_v60 = vld [vmem:[#allocation101_spill] sm:$0xff]  ;;  %v11597_v19 = vld [vmem:[#allocation99_spill] sm:$0xff] }
 0xc90   :  { %v4409_v59 = vunpack.c.l.b16 %v4393_v30  ;;  %v4415_v49 = vsel %vm941_vm4, %v4414_v23, %v4413_v17  ;;  %v4418_v18 = vrot.slane %v4407_v41, 1  ;;  %v11596_v43 = vld [vmem:[#allocation73_spill] sm:$0xff] }
 0xc91   :  { %v4410_v36 = vunpack.c.l.b16 %v4394_v22  ;;  %v4417_v45 = vsel %vm944_vm5, %v4416_v10, %v4415_v49  ;;  %v3987_v30 = vadd.f32 %v11597_v19, %v11596_v43  ;;  %v11628_v19 = vld [vmem:[#allocation66_spill] sm:$0xff] }
 0xc92   :  { %v4419_v57 = vsel %vm947_vm6, %v4418_v18, %v4417_v45  ;;  %v4421_v35 = vrot.slane %v4409_v59, 7 }
 0xc93   :  { %v4420_v0 = vsel %vm950_vm7, %v4408_v20, %v4419_v57  ;;  %v4423_v44 = vrot.slane %v4410_v36, 6 }
 0xc94   :  { %v4422_v34 = vsel %vm953_vm8, %v4421_v35, %v4420_v0  ;;  %v11598_v35 = vld [vmem:[#allocation134_spill] sm:$0xff] }
 0xc95   :  { %v4424_v26 = vsel %vm956_vm9, %v4423_v44, %v4422_v34 }
 0xc96   :  { %v10226_v2 = vpack.c.b16 %v4424_v26, %v4424_v26 }
 0xc98   :  { %4460 = vmatmul.mubr.bf16.vlgmr.msra.gmra.mxu0 %v10226_v2  ;;  %4501 = vmatmul.mubr.bf16.vlgmr.msra.gmra.mxu1 %v10226_v2 }
 0xc99   :  { %4535 = vmatpush1.bf16.msra.mxu0 %v9775_v15  ;;  %4576 = vmatpush1.bf16.msra.mxu1 %v9778_v53  ;;  %v11578_v15 = vld [vmem:[#allocation121_spill] sm:$0xff]  ;;  %v11579_v53 = vld [vmem:[#allocation122_spill] sm:$0xff] }
 0xc9a   :  { %4536 = vmatprep.subr.bf16.mxu0 %v9781_v55  ;;  %4577 = vmatprep.subr.bf16.mxu1 %v9784_v13  ;;  %v11580_v55 = vld [vmem:[#allocation123_spill] sm:$0xff]  ;;  %v11581_v13 = vld [vmem:[#allocation124_spill] sm:$0xff] }
 0xc9b   :  { %4566 = vmatprep.mubr.bf16.mxu0 %v11036_v58  ;;  %4607 = vmatprep.mubr.bf16.mxu1 %v11036_v58 }
 0xc9d   :  { %4537 = vmatpush1.bf16.msra.mxu0 %v9789_v39  ;;  %4578 = vmatpush1.bf16.msra.mxu1 %v9792_v28  ;;  %v11582_v39 = vld [vmem:[#allocation125_spill] sm:$0xff]  ;;  %v11583_v28 = vld [vmem:[#allocation126_spill] sm:$0xff] }
 0xc9e   :  { %4538 = vmatprep.subr.bf16.mxu0 %v9795_v3  ;;  %4579 = vmatprep.subr.bf16.mxu1 %v9798_v51  ;;  %v11584_v3 = vld [vmem:[#allocation127_spill] sm:$0xff]  ;;  %v11585_v51 = vld [vmem:[#allocation128_spill] sm:$0xff] }
 0xca1   :  { %4539 = vmatpush1.bf16.msra.mxu0 %v9801_v5  ;;  %4580 = vmatpush1.bf16.msra.mxu1 %v9804_v47  ;;  %v11586_v5 = vld [vmem:[#allocation129_spill] sm:$0xff]  ;;  %v11587_v47 = vld [vmem:[#allocation130_spill] sm:$0xff] }
 0xca2   :  { %4540 = vmatprep.subr.bf16.mxu0 %v9807_v31  ;;  %4581 = vmatprep.subr.bf16.mxu1 %v9810_v46  ;;  %v11588_v31 = vld [vmem:[#allocation131_spill] sm:$0xff]  ;;  %v11589_v46 = vld [vmem:[#allocation132_spill] sm:$0xff] }
 0xca5   :  { %4541 = vmatpush1.bf16.msra.mxu0 %v9813_v9  ;;  %4582 = vmatpush1.bf16.msra.mxu1 %v9816_v42  ;;  %v11590_v9 = vld [vmem:[#allocation133_spill] sm:$0xff]  ;;  %v11591_v42 = vld [vmem:[#allocation70_spill] sm:$0xff] }
 0xca6   :  { %4542 = vmatprep.subr.bf16.mxu0 %v9819_v48  ;;  %4583 = vmatprep.subr.bf16.mxu1 %v9822_v38  ;;  %v3946_v48 = vadd.f32 %v10079_v29, %v11591_v42  ;;  %v3989_v29 = vadd.f32 %v11595_v60, %v11594_v61  ;;  %v11625_v60 = vld [vmem:[#allocation63_spill] sm:$0xff] }
 0xca9   :  { %4543 = vmatpush1.bf16.msra.mxu0 %v9825_v8  ;;  %4584 = vmatpush1.bf16.msra.mxu1 %v9828_v62  ;;  %v11592_v62 = vld [vmem:[#allocation71_spill] sm:$0xff] }
 0xcaa   :  { %4544 = vmatprep.subr.bf16.mxu0 %v9831_v40  ;;  %4585 = vmatprep.subr.bf16.mxu1 %v11578_v15  ;;  %v11593_v40 = vld [vmem:[#allocation100_spill] sm:$0xff] }
 0xcab   :  { %v3948_v6 = vadd.f32 %v11593_v40, %v11592_v62  ;;  %v11613_v40 = vld [vmem:[#allocation54_spill] sm:$0xff] }
 0xcad   :  { %4545 = vmatpush1.bf16.msra.mxu0 %v11579_v53  ;;  %4586 = vmatpush1.bf16.msra.mxu1 %v11580_v55  ;;  %v11599_v55 = vld [vmem:[#allocation135_spill] sm:$0xff] }
 0xcae   :  { %4546 = vmatprep.subr.bf16.mxu0 %v11581_v13  ;;  %4587 = vmatprep.subr.bf16.mxu1 %v11582_v39  ;;  %v11600_v13 = vld [vmem:[#allocation136_spill] sm:$0xff]  ;;  %v11601_v39 = vld [vmem:[#allocation42_spill] sm:$0xff] }
 0xcb1   :  { %4547 = vmatpush1.bf16.msra.mxu0 %v11583_v28  ;;  %4588 = vmatpush1.bf16.msra.mxu1 %v11584_v3  ;;  %v11602_v28 = vld [vmem:[#allocation43_spill] sm:$0xff]  ;;  %v11603_v3 = vld [vmem:[#allocation44_spill] sm:$0xff] }
 0xcb2   :  { %4548 = vmatprep.subr.bf16.mxu0 %v11585_v51  ;;  %4589 = vmatprep.subr.bf16.mxu1 %v11586_v5  ;;  %v11604_v51 = vld [vmem:[#allocation45_spill] sm:$0xff]  ;;  %v11605_v5 = vld [vmem:[#allocation46_spill] sm:$0xff] }
 0xcb5   :  { %4549 = vmatpush1.bf16.msra.mxu0 %v11587_v47  ;;  %4590 = vmatpush1.bf16.msra.mxu1 %v11588_v31  ;;  %v11606_v47 = vld [vmem:[#allocation47_spill] sm:$0xff]  ;;  %v11607_v31 = vld [vmem:[#allocation48_spill] sm:$0xff] }
 0xcb6   :  { %4616 = vmatprep.subr.bf16.mxu0 %v11589_v46  ;;  %4657 = vmatprep.subr.bf16.mxu1 %v11590_v9  ;;  %v11608_v46 = vld [vmem:[#allocation49_spill] sm:$0xff]  ;;  %v11609_v9 = vld [vmem:[#allocation50_spill] sm:$0xff] }
 0xd58   :  { %v4461_v38 = vpop.f32.mrf.mxu0  ;;  %v4502_v8 = vpop.f32.mrf.mxu1 }
 0xd59   :  { %v4462_v63 = vadd.f32 %v4461_v38, %v3946_v48  ;;  %v4503_v41 = vadd.f32 %v4502_v8, %v3987_v30  ;;  %v11610_v48 = vld [vmem:[#allocation51_spill] sm:$0xff]  ;;  %v11611_v38 = vld [vmem:[#allocation52_spill] sm:$0xff]  ;;  %v11612_v8 = vld [vmem:[#allocation53_spill] sm:$0xff] }
 0xd5a   :  { %v4463_v50 = vpop.f32.mrf.mxu0  ;;  %v4504_v1 = vpop.f32.mrf.mxu1  ;;  %v11629_v30 = vld [vmem:[#allocation67_spill] sm:$0xff] }
 0xd5b   :  { %v6072_v21 = vmul.f32 -1.442695, %v4462_v63  ;;  %v4464_v14 = vadd.f32 %v4463_v50, %v3948_v6  ;;  %v4505_v32 = vadd.f32 %v4504_v1, %v3989_v29  ;;  %v11614_v6 = vld [vmem:[#allocation119_spill] sm:$0xff]  ;;  %v11615_v63 = vld [vmem:[#allocation120_spill] sm:$0xff]  ;;  %v11616_v50 = vld [vmem:[#allocation118_spill] sm:$0xff] }
 0xd5c   :  { %v4465_v25 = vpop.f32.mrf.mxu0  ;;  %v4506_v27 = vpop.f32.mrf.mxu1  ;;  %v11617_v1 = vld [vmem:[#allocation55_spill] sm:$0xff]  ;;  %v11626_v29 = vld [vmem:[#allocation64_spill] sm:$0xff] }
 0xd5d   :  { %7134 = vpow2.f32 %v6072_v21  ;;  %v6073_v4 = vmul.f32 -1.442695, %v4464_v14  ;;  %v6074_v23 = vmul.f32 -1.442695, %v4505_v32  ;;  %v11618_v21 = vld [vmem:[#allocation56_spill] sm:$0xff]  ;;  %v11619_v14 = vld [vmem:[#allocation57_spill] sm:$0xff] }
 0xd5e   :  { %v4466_v11 = vpop.f32.mrf.mxu0  ;;  %v4507_v54 = vpop.f32.mrf.mxu1  ;;  %v11620_v25 = vld [vmem:[#allocation58_spill] sm:$0xff]  ;;  %v11621_v27 = vld [vmem:[#allocation59_spill] sm:$0xff]  ;;  %v11627_v32 = vld [vmem:[#allocation65_spill] sm:$0xff] }
 0xd5f   :  { %7136 = vpow2.f32 %v6073_v4  ;;  %v11622_v4 = vld [vmem:[#allocation60_spill] sm:$0xff]  ;;  %v11623_v11 = vld [vmem:[#allocation61_spill] sm:$0xff]  ;;  %v11624_v54 = vld [vmem:[#allocation62_spill] sm:$0xff] }
 0xd60   :  { %7138 = vtanh.f32 %v4503_v41  ;;  %v11630_v41 = vld [vmem:[#allocation68_spill] sm:$0xff] }
 0xd61   :  { %7140 = vpow2.f32 %v6074_v23  ;;  %v11631_v23 = vld [vmem:[#allocation69_spill] sm:$0xff] }
 0xd6a   :  { %v7135_v22 = vpop.eup %7134 }
 0xd6b   :  { %v4515_v17 = vadd.f32 1.0, %v7135_v22  ;;  %v11632_v22 = vld [vmem:[#allocation137_spill] sm:$0xff] }
 0xd6c   :  { %v7137_v10 = vpop.eup %7136 }
 0xd6d   :  { %7142 = vrcp.f32 %v4515_v17  ;;  %v4516_v59 = vadd.f32 1.0, %v7137_v10  ;;  %v7139_v49 = vpop.eup %7138  ;;  %v11633_v17 = vld [vmem:[#allocation139_spill] sm:$0xff]  ;;  %v11634_v10 = vld [vmem:[#allocation140_spill] sm:$0xff] }
 0xd6e   :  { %v7141_v18 = vpop.eup %7140 }
 0xd6f   :  { %7144 = vrcp.f32 %v4516_v59  ;;  %v4525_v57 = vadd.f32 1.0, %v7141_v18  ;;  %v11635_v59 = vld [vmem:[#allocation138_spill] sm:$0xff]  ;;  %v11637_v18 = vld [vmem:[#allocation75_spill] sm:$0xff] }
 0xd71   :  { %7146 = vrcp.f32 %v4525_v57  ;;  %v11642_v57 = vld [vmem:[#allocation80_spill] sm:$0xff] }
 0xd7a   :  { %v7143_v20 = vpop.eup %7142 }
 0xd7b   :  { %v4529_v36 = vmul.f32 %v7143_v20, %v7139_v49  ;;  %v11636_v49 = vld [vmem:[#allocation74_spill] sm:$0xff]  ;;  %v11638_v20 = vld [vmem:[#allocation76_spill] sm:$0xff] }
 0xd7c   :  { %v7145_v45 = vpop.eup %7144 }
 0xd7d   :  { %v4528_v0 = vmul.f32 %v7145_v45, %v11598_v35  ;;  %v11641_v45 = vld [vmem:[#allocation79_spill] sm:$0xff]  ;;  %v11643_v35 = vld [vmem:[#allocation81_spill] sm:$0xff] }
 0xd7e   :  { %v7147_v34 = vpop.eup %7146 }
 0xd7f   :  { %v10273_v44 = vadd.f32 %v4529_v36, %v4528_v0  ;;  %v11640_v36 = vld [vmem:[#allocation78_spill] sm:$0xff] }
 0xd80   :  { %v11644_v0 = vld [vmem:[#allocation82_spill] sm:$0xff] }
 0xd81   :  { %7148 = vtanh.f32 %v10273_v44 }
 0xd8e   :  { %v7149_v26 = vpop.eup %7148 }
 0xd8f   :  { %v4532_v15 = vmul.f32 %v7149_v26, %v7147_v34  ;;  %v11645_v34 = vld [vmem:[#allocation83_spill] sm:$0xff]  ;;  %v11646_v26 = vld [vmem:[#allocation84_spill] sm:$0xff] }
 0xd91   :  { %v4533_v53 = vpack.c.bf16 %v4532_v15, %v4532_v15  ;;  %v11647_v15 = vld [vmem:[#allocation85_spill] sm:$0xff] }
 0xd93   :  { %4567 = vmatmul.mubr.bf16.vlgmr.msra.gmra.mxu0 %v4533_v53  ;;  %4608 = vmatmul.mubr.bf16.vlgmr.msra.gmra.mxu1 %v4533_v53  ;;  %v11648_v53 = vld [vmem:[#allocation86_spill] sm:$0xff] }
 0xd94   :  { %4617 = vmatpush1.bf16.msra.mxu0 %v11599_v55  ;;  %4658 = vmatpush1.bf16.msra.mxu1 %v11600_v13  ;;  %v11649_v55 = vld [vmem:[#allocation87_spill] sm:$0xff]  ;;  %v11650_v13 = vld [vmem:[#allocation88_spill] sm:$0xff] }
 0xd95   :  { %4618 = vmatprep.subr.bf16.mxu0 %v11601_v39  ;;  %4659 = vmatprep.subr.bf16.mxu1 %v11602_v28  ;;  %v11651_v39 = vld [vmem:[#allocation89_spill] sm:$0xff]  ;;  %v11652_v28 = vld [vmem:[#allocation90_spill] sm:$0xff] }
 0xd96   :  { %4648 = vmatprep.mubr.bf16.mxu0 %v11036_v58  ;;  %4689 = vmatprep.mubr.bf16.mxu1 %v11036_v58 }
 0xd98   :  { %4619 = vmatpush1.bf16.msra.mxu0 %v11603_v3  ;;  %4660 = vmatpush1.bf16.msra.mxu1 %v11604_v51  ;;  %v11653_v3 = vld [vmem:[#allocation91_spill] sm:$0xff]  ;;  %v11654_v51 = vld [vmem:[#allocation92_spill] sm:$0xff] }
 0xd99   :  { %4620 = vmatprep.subr.bf16.mxu0 %v11605_v5  ;;  %4661 = vmatprep.subr.bf16.mxu1 %v11606_v47  ;;  %v11655_v5 = vld [vmem:[#allocation93_spill] sm:$0xff]  ;;  %v11656_v47 = vld [vmem:[#allocation94_spill] sm:$0xff] }
 0xd9c   :  { %4621 = vmatpush1.bf16.msra.mxu0 %v11607_v31  ;;  %4662 = vmatpush1.bf16.msra.mxu1 %v11608_v46  ;;  %v11657_v31 = vld [vmem:[#allocation95_spill] sm:$0xff]  ;;  %v11658_v46 = vld [vmem:[#allocation96_spill] sm:$0xff] }
 0xd9d   :  { %4622 = vmatprep.subr.bf16.mxu0 %v11609_v9  ;;  %4663 = vmatprep.subr.bf16.mxu1 %v11610_v48  ;;  %v11659_v9 = vld [vmem:[#allocation97_spill] sm:$0xff]  ;;  %v11660_v48 = vld [vmem:[#allocation98_spill] sm:$0xff] }
 0xda0   :  { %4623 = vmatpush1.bf16.msra.mxu0 %v11611_v38  ;;  %4664 = vmatpush1.bf16.msra.mxu1 %v11612_v8  ;;  %v7694_v38 = vld [vmem:[#allocation7 + $0xe4] ss:$16 sps:$4 sm:$0xff]   ;;  %v7695_v8 = vld [vmem:[#allocation7 + $0xec] ss:$16 sps:$4 sm:$0xff]  }
 0xda1   :  { %4624 = vmatprep.subr.bf16.mxu0 %v11613_v40  ;;  %4665 = vmatprep.subr.bf16.mxu1 %v11614_v6 }
 0xda4   :  { %4625 = vmatpush1.bf16.msra.mxu0 %v11615_v63  ;;  %4666 = vmatpush1.bf16.msra.mxu1 %v11616_v50 }
 0xda5   :  { %4626 = vmatprep.subr.bf16.mxu0 %v11617_v1  ;;  %4667 = vmatprep.subr.bf16.mxu1 %v11618_v21 }
 0xda8   :  { %4627 = vmatpush1.bf16.msra.mxu0 %v11619_v14  ;;  %4668 = vmatpush1.bf16.msra.mxu1 %v11620_v25 }
 0xda9   :  { %4628 = vmatprep.subr.bf16.mxu0 %v11621_v27  ;;  %4669 = vmatprep.subr.bf16.mxu1 %v11622_v4 }
 0xdac   :  { %4629 = vmatpush1.bf16.msra.mxu0 %v11623_v11  ;;  %4670 = vmatpush1.bf16.msra.mxu1 %v11624_v54 }
 0xdad   :  { %4630 = vmatprep.subr.bf16.mxu0 %v11625_v60  ;;  %4671 = vmatprep.subr.bf16.mxu1 %v11626_v29 }
 0xdb0   :  { %4631 = vmatpush1.bf16.msra.mxu0 %v11627_v32  ;;  %4672 = vmatpush1.bf16.msra.mxu1 %v11628_v19 }
 0xdb1   :  { %5050 = vmatprep.subr.bf16.mxu0 %v11629_v30  ;;  %5091 = vmatprep.subr.bf16.mxu1 %v11630_v41  ;;  %v11661_v41 = vld [vmem:[#allocation16_spill] sm:$0xff] }
 0xdb3   :  { %4649 = vmatmul.mubr.bf16.vlgmr.msra.gmra.mxu0 %v10226_v2  ;;  %4690 = vmatmul.mubr.bf16.vlgmr.msra.gmra.mxu1 %v10226_v2  ;;  %v11639_v2 = vld [vmem:[#allocation77_spill] sm:$0xff] }
 0xdb4   :  { %5051 = vmatpush1.bf16.msra.mxu0 %v11631_v23  ;;  %5092 = vmatpush1.bf16.msra.mxu1 %v11632_v22 }
 0xdb5   :  { %5052 = vmatprep.subr.bf16.mxu0 %v11633_v17  ;;  %5093 = vmatprep.subr.bf16.mxu1 %v11634_v10  ;;  %v11662_v10 = vld [vmem:[#allocation10_spill] sm:$0xff] }
 0xdb6   :  { %5082 = vmatprep.mubr.bf16.mxu0 %v11036_v58  ;;  %5123 = vmatprep.mubr.bf16.mxu1 %v11036_v58 }
 0xdb8   :  { %5053 = vmatpush1.bf16.msra.mxu0 %v11635_v59  ;;  %5094 = vmatpush1.bf16.msra.mxu1 %v11636_v49  ;;  %v11663_v49 = vld [vmem:[#allocation11_spill] sm:$0xff] }
 0xdb9   :  { %5054 = vmatprep.subr.bf16.mxu0 %v11637_v18  ;;  %5095 = vmatprep.subr.bf16.mxu1 %v11638_v20  ;;  %v11664_v20 = vld [vmem:[#allocation12_spill] sm:$0xff] }
 0xdbc   :  { %5055 = vmatpush1.bf16.msra.mxu0 %v11639_v2  ;;  %5096 = vmatpush1.bf16.msra.mxu1 %v11640_v36  ;;  %v11665_v36 = vld [vmem:[#allocation13_spill] sm:$0xff] }
 0xdbd   :  { %5056 = vmatprep.subr.bf16.mxu0 %v11641_v45  ;;  %5097 = vmatprep.subr.bf16.mxu1 %v11642_v57  ;;  %v11666_v57 = vld [vmem:[#allocation14_spill] sm:$0xff] }
 0xdc0   :  { %5057 = vmatpush1.bf16.msra.mxu0 %v11643_v35  ;;  %5098 = vmatpush1.bf16.msra.mxu1 %v11644_v0  ;;  %v11667_v0 = vld [vmem:[#allocation15_spill] sm:$0xff] }
 0xdc1   :  { %5058 = vmatprep.subr.bf16.mxu0 %v11645_v34  ;;  %5099 = vmatprep.subr.bf16.mxu1 %v11646_v26 }
 0xdc4   :  { %5059 = vmatpush1.bf16.msra.mxu0 %v11647_v15  ;;  %5100 = vmatpush1.bf16.msra.mxu1 %v11648_v53 }
 0xdc5   :  { %5060 = vmatprep.subr.bf16.mxu0 %v11649_v55  ;;  %5101 = vmatprep.subr.bf16.mxu1 %v11650_v13  ;;  %v11668_v55 = vld [vmem:[#allocation17_spill] sm:$0xff] }
 0xdc8   :  { %5061 = vmatpush1.bf16.msra.mxu0 %v11651_v39  ;;  %5102 = vmatpush1.bf16.msra.mxu1 %v11652_v28 }
 0xdc9   :  { %5062 = vmatprep.subr.bf16.mxu0 %v11653_v3  ;;  %5103 = vmatprep.subr.bf16.mxu1 %v11654_v51 }
 0xdcc   :  { %5063 = vmatpush1.bf16.msra.mxu0 %v11655_v5  ;;  %5104 = vmatpush1.bf16.msra.mxu1 %v11656_v47 }
 0xdcd   :  { %5064 = vmatprep.subr.bf16.mxu0 %v11657_v31  ;;  %5105 = vmatprep.subr.bf16.mxu1 %v11658_v46 }
 0xdd0   :  { %5065 = vmatpush1.bf16.msra.mxu0 %v11659_v9  ;;  %5106 = vmatpush1.bf16.msra.mxu1 %v11660_v48 }
 0xdd1   :  { %5157 = vmatprep.subr.bf16.mxu0 %v7694_v38  ;;  %5198 = vmatprep.subr.bf16.mxu1 %v7695_v8 }
 0xe53   :  { %v10344_v40 = vpop.f32.mrf.mxu0  ;;  %v10346_v6 = vpop.f32.mrf.mxu1 }
 0xe55   :  { %v10348_v63 = vpop.f32.mrf.mxu0  ;;  %v10350_v50 = vpop.f32.mrf.mxu1 }
 0xe57   :  { %v4572_v1 = vpop.f32.mrf.mxu0  ;;  %v4613_v21 = vpop.f32.mrf.mxu1 }
 0xe59   :  { %v4573_v14 = vpop.f32.mrf.mxu0  ;;  %v4614_v25 = vpop.f32.mrf.mxu1 }
 0xe5a   :  { %v11669_v14 = vld [vmem:[#allocation18_spill] sm:$0xff] }
 0xe73   :  { %v4650_v27 = vpop.f32.mrf.mxu0  ;;  %v4691_v4 = vpop.f32.mrf.mxu1 }
 0xe74   :  { %v4702_v11 = vrot.slane %v4650_v27, 2  ;;  %v4706_v54 = vrot.slane %v4650_v27, 3  ;;  %v4710_v60 = vrot.slane %v4650_v27, 4  ;;  %v4714_v29 = vrot.slane %v4650_v27, 5 }
 0xe75   :  { %v4718_v32 = vrot.slane %v4650_v27, 6  ;;  %v4722_v19 = vrot.slane %v4650_v27, 7  ;;  %v4726_v30 = vrot.slane %v4650_v27, 1  ;;  %v4786_v23 = vadd.f32 %v4650_v27, %v11661_v41  ;;  %v10353_v22 = vpop.f32.mrf.mxu0  ;;  %v10355_v17 = vpop.f32.mrf.mxu1 }
 0xe76   :  { %v4762_v59 = vadd.f32 %v4702_v11, %v11662_v10  ;;  %v4766_v18 = vadd.f32 %v4706_v54, %v11663_v49  ;;  %v4770_v2 = vadd.f32 %v4710_v60, %v11664_v20  ;;  %v4774_v45 = vadd.f32 %v4714_v29, %v11665_v36  ;;  %v11670_v11 = vld [vmem:[#allocation21_spill] sm:$0xff]  ;;  %v11671_v60 = vld [vmem:[#allocation22_spill] sm:$0xff] }
 0xe77   :  { %v4778_v35 = vadd.f32 %v4718_v32, %v11666_v57  ;;  %v4782_v34 = vadd.f32 %v4722_v19, %v11667_v0  ;;  %v6087_v26 = vmul.f32 -1.442695, %v4786_v23  ;;  %v4654_v15 = vpop.f32.mrf.mxu0  ;;  %v4695_v53 = vpop.f32.mrf.mxu1  ;;  %v4790_v13 = vadd.f32 %v4726_v30, %v11668_v55  ;;  %v11672_v19 = vld [vmem:[#allocation23_spill] sm:$0xff]  ;;  %v11673_v23 = vld [vmem:[#allocation24_spill] sm:$0xff] }
 0xe78   :  { %v6075_v39 = vmul.f32 -1.442695, %v4762_v59  ;;  %v6077_v28 = vmul.f32 -1.442695, %v4766_v18  ;;  %v6079_v3 = vmul.f32 -1.442695, %v4770_v2 }
 0xe79   :  { %v6081_v51 = vmul.f32 -1.442695, %v4774_v45  ;;  %7150 = vpow2.f32 %v6087_v26  ;;  %v4655_v5 = vpop.f32.mrf.mxu0  ;;  %v4696_v47 = vpop.f32.mrf.mxu1  ;;  %v6083_v31 = vmul.f32 -1.442695, %v4778_v35  ;;  %v4704_v46 = vrot.slane %v4691_v4, 2  ;;  %v11674_v18 = vld [vmem:[#allocation25_spill] sm:$0xff] }
 0xe7a   :  { %7152 = vpow2.f32 %v6075_v39  ;;  %v4708_v9 = vrot.slane %v4691_v4, 3  ;;  %v6085_v48 = vmul.f32 -1.442695, %v4782_v34  ;;  %v4712_v38 = vrot.slane %v4691_v4, 4  ;;  %v11675_v45 = vld [vmem:[#allocation26_spill] sm:$0xff]  ;;  %v11676_v34 = vld [vmem:[#allocation27_spill] sm:$0xff] }
 0xe7b   :  { %7154 = vpow2.f32 %v6077_v28  ;;  %v6089_v8 = vmul.f32 -1.442695, %v4790_v13  ;;  %v4716_v1 = vrot.slane %v4691_v4, 5  ;;  %v4720_v21 = vrot.slane %v4691_v4, 6 }
 0xe7c   :  { %7156 = vpow2.f32 %v6079_v3  ;;  %v4764_v25 = vadd.f32 %v4704_v46, %v11669_v14  ;;  %v4724_v27 = vrot.slane %v4691_v4, 7  ;;  %v4768_v54 = vadd.f32 %v4708_v9, %v11670_v11 }
 0xe7d   :  { %7158 = vpow2.f32 %v6081_v51  ;;  %v4772_v29 = vadd.f32 %v4712_v38, %v11671_v60  ;;  %v4728_v32 = vrot.slane %v4691_v4, 1  ;;  %v4776_v30 = vadd.f32 %v4716_v1, %v11672_v19 }
 0xe7e   :  { %7160 = vpow2.f32 %v6083_v31  ;;  %v4780_v59 = vadd.f32 %v4720_v21, %v11673_v23  ;;  %v4784_v2 = vadd.f32 %v4724_v27, %v11674_v18  ;;  %v4788_v35 = vadd.f32 %v4691_v4, %v11675_v45 }
 0xe7f   :  { %7162 = vpow2.f32 %v6085_v48  ;;  %v4792_v26 = vadd.f32 %v4728_v32, %v11676_v34  ;;  %v4703_v15 = vrot.slane %v10353_v22, 2  ;;  %v4707_v13 = vrot.slane %v10353_v22, 3  ;;  %v11677_v48 = vld [vmem:[#allocation19_spill] sm:$0xff]  ;;  %v11679_v32 = vld [vmem:[#allocation30_spill] sm:$0xff] }
 0xe80   :  { %7164 = vpow2.f32 %v6089_v8  ;;  %v4711_v3 = vrot.slane %v10353_v22, 4  ;;  %v4715_v51 = vrot.slane %v10353_v22, 5  ;;  %v4719_v47 = vrot.slane %v10353_v22, 6 }
 0xe81   :  { %7166 = vtanh.f32 %v4764_v25  ;;  %v4723_v31 = vrot.slane %v10353_v22, 7  ;;  %v4763_v38 = vadd.f32 %v4703_v15, %v11677_v48  ;;  %v4727_v21 = vrot.slane %v10353_v22, 1  ;;  %v11678_v25 = vld [vmem:[#allocation28_spill] sm:$0xff] }
 0xe82   :  { %7168 = vtanh.f32 %v4768_v54  ;;  %v4767_v27 = vadd.f32 %v4707_v13, %v11678_v25  ;;  %v11682_v15 = vld [vmem:[#allocation36_spill] sm:$0xff]  ;;  %v4705_v13 = vrot.slane %v10355_v17, 2 }
 0xe83   :  { %7170 = vtanh.f32 %v4772_v29 }
 0xe84   :  { %7172 = vtanh.f32 %v4776_v30  ;;  %v4771_v30 = vadd.f32 %v4711_v3, %v11679_v32  ;;  %v6078_v3 = vmul.f32 -1.442695, %v4767_v27 }
 0xe85   :  { %7174 = vtanh.f32 %v4780_v59  ;;  %v11680_v59 = vld [vmem:[#allocation32_spill] sm:$0xff] }
 0xe86   :  { %v7151_v53 = vpop.eup %7150  ;;  %7176 = vtanh.f32 %v4784_v2  ;;  %v4775_v2 = vadd.f32 %v4715_v51, %v11680_v59  ;;  %v4709_v51 = vrot.slane %v10355_v17, 3 }
 0xe87   :  { %v7153_v39 = vpop.eup %7152  ;;  %v4854_v28 = vadd.f32 1.0, %v7151_v53  ;;  %7178 = vtanh.f32 %v4788_v35  ;;  %v11681_v53 = vld [vmem:[#allocation34_spill] sm:$0xff] }
 0xe88   :  { %v7155_v5 = vpop.eup %7154  ;;  %v4842_v4 = vadd.f32 1.0, %v7153_v39  ;;  %7180 = vtanh.f32 %v4792_v26  ;;  %v4779_v39 = vadd.f32 %v4719_v47, %v11681_v53  ;;  %v11685_v53 = vld [vmem:[#allocation20_spill] sm:$0xff] }
 0xe89   :  { %v7157_v46 = vpop.eup %7156  ;;  %v4844_v9 = vadd.f32 1.0, %v7155_v5  ;;  %7182 = vrcp.f32 %v4854_v28  ;;  %v4783_v28 = vadd.f32 %v4723_v31, %v11682_v15  ;;  %v6080_v31 = vmul.f32 -1.442695, %v4771_v30 }
 0xe8a   :  { %v7159_v8 = vpop.eup %7158  ;;  %v4846_v1 = vadd.f32 1.0, %v7157_v46  ;;  %7184 = vrcp.f32 %v4842_v4  ;;  %v6076_v46 = vmul.f32 -1.442695, %v4763_v38  ;;  %v11684_v38 = vld [vmem:[#allocation40_spill] sm:$0xff]  ;;  %v6082_v15 = vmul.f32 -1.442695, %v4775_v2 }
 0xe8b   :  { %v7161_v54 = vpop.eup %7160  ;;  %v4848_v29 = vadd.f32 1.0, %v7159_v8  ;;  %7186 = vrcp.f32 %v4844_v9  ;;  %v4765_v59 = vadd.f32 %v4705_v13, %v11685_v53  ;;  %v6086_v30 = vmul.f32 -1.442695, %v4783_v28  ;;  %v11688_v53 = vld [vmem:[#allocation33_spill] sm:$0xff]  ;;  %v11689_v28 = vld [vmem:[#allocation35_spill] sm:$0xff] }
 0xe8c   :  { %v7163_v35 = vpop.eup %7162  ;;  %v4850_v26 = vadd.f32 1.0, %v7161_v54  ;;  %7188 = vrcp.f32 %v4846_v1  ;;  %v11683_v1 = vld [vmem:[#allocation38_spill] sm:$0xff]  ;;  %v4713_v54 = vrot.slane %v10355_v17, 4  ;;  %v4729_v13 = vrot.slane %v10355_v17, 1 }
 0xe8d   :  { %v7165_v5 = vpop.eup %7164  ;;  %v4852_v4 = vadd.f32 1.0, %v7163_v35  ;;  %7190 = vrcp.f32 %v4848_v29  ;;  %v4787_v47 = vadd.f32 %v10353_v22, %v11683_v1  ;;  %v4791_v35 = vadd.f32 %v4727_v21, %v11684_v38  ;;  %v11687_v38 = vld [vmem:[#allocation31_spill] sm:$0xff] }
 0xe8e   :  { %v10386_v25 = vpop.eup %7166  ;;  %v4856_v9 = vadd.f32 1.0, %v7165_v5  ;;  %7192 = vrcp.f32 %v4850_v26  ;;  %v4717_v26 = vrot.slane %v10355_v17, 5  ;;  %v6084_v5 = vmul.f32 -1.442695, %v4779_v39 }
 0xe8f   :  { %v10389_v8 = vpop.eup %7168  ;;  %7194 = vrcp.f32 %v4852_v4  ;;  %v4721_v4 = vrot.slane %v10355_v17, 6  ;;  %v4725_v1 = vrot.slane %v10355_v17, 7  ;;  %v6088_v2 = vmul.f32 -1.442695, %v4787_v47  ;;  %v11690_v47 = vld [vmem:[#allocation37_spill] sm:$0xff] }
 0xe90   :  { %v10394_v29 = vpop.eup %7170  ;;  %7196 = vrcp.f32 %v4856_v9  ;;  %v11686_v9 = vld [vmem:[#allocation29_spill] sm:$0xff]  ;;  %v4773_v48 = vadd.f32 %v4713_v54, %v11687_v38  ;;  %v6090_v39 = vmul.f32 -1.442695, %v4791_v35  ;;  %v4777_v34 = vadd.f32 %v4717_v26, %v11688_v53 }
 0xe91   :  { %v10398_v27 = vpop.eup %7172  ;;  %7198 = vpow2.f32 %v6076_v46  ;;  %v4769_v32 = vadd.f32 %v4709_v51, %v11686_v9  ;;  %v4781_v45 = vadd.f32 %v4721_v4, %v11689_v28  ;;  %v6091_v51 = vmul.f32 -1.442695, %v4765_v59 }
 0xe92   :  { %v10402_v22 = vpop.eup %7174  ;;  %7200 = vpow2.f32 %v6078_v3  ;;  %v6093_v18 = vmul.f32 -1.442695, %v4773_v48  ;;  %v6094_v4 = vmul.f32 -1.442695, %v4777_v34 }
 0xe93   :  { %v10406_v21 = vpop.eup %7176  ;;  %7202 = vpow2.f32 %v6080_v31  ;;  %v4785_v31 = vadd.f32 %v4725_v1, %v11690_v47  ;;  %v6092_v54 = vmul.f32 -1.442695, %v4769_v32 }
 0xe94   :  { %v10409_v46 = vpop.eup %7178  ;;  %7204 = vpow2.f32 %v6082_v15  ;;  %v11691_v15 = vld [vmem:[#allocation39_spill] sm:$0xff] }
 0xe95   :  { %v10413_v3 = vpop.eup %7180  ;;  %7206 = vpow2.f32 %v6084_v5  ;;  %v4789_v35 = vadd.f32 %v10355_v17, %v11691_v15  ;;  %v11692_v5 = vld [vmem:[#allocation41_spill] sm:$0xff]  ;;  %v6096_v32 = vmul.f32 -1.442695, %v4785_v31 }
 0xe96   :  { %v10416_v9 = vpop.eup %7182  ;;  %7208 = vpow2.f32 %v6086_v30  ;;  %v4793_v53 = vadd.f32 %v4729_v13, %v11692_v5  ;;  %v6095_v30 = vmul.f32 -1.442695, %v4781_v45 }
 0xe97   :  { %v10419_v38 = vpop.eup %7184  ;;  %7210 = vpow2.f32 %v6088_v2  ;;  %v6097_v2 = vmul.f32 -1.442695, %v4789_v35 }
 0xe98   :  { %v10423_v26 = vpop.eup %7186  ;;  %7212 = vpow2.f32 %v6090_v39  ;;  %v6098_v48 = vmul.f32 -1.442695, %v4793_v53 }
 0xe99   :  { %v10426_v59 = vpop.eup %7188  ;;  %7214 = vpow2.f32 %v6091_v51 }
 0xe9a   :  { %v10428_v28 = vpop.eup %7190  ;;  %7216 = vpow2.f32 %v6092_v54 }
 0xe9b   :  { %v10430_v1 = vpop.eup %7192  ;;  %7218 = vpow2.f32 %v6093_v18 }
 0xe9c   :  { %v10432_v17 = vpop.eup %7194  ;;  %7220 = vpow2.f32 %v6094_v4 }
 0xe9d   :  { %v10434_v39 = vpop.eup %7196  ;;  %7222 = vpow2.f32 %v6095_v30 }
 0xe9e   :  { %v7199_v34 = vpop.eup %7198  ;;  %7224 = vpow2.f32 %v6096_v32 }
 0xe9f   :  { %v7201_v13 = vpop.eup %7200  ;;  %v4843_v51 = vadd.f32 1.0, %v7199_v34  ;;  %7226 = vpow2.f32 %v6097_v2 }
 0xea0   :  { %v7203_v45 = vpop.eup %7202  ;;  %v4845_v5 = vadd.f32 1.0, %v7201_v13  ;;  %7228 = vpow2.f32 %v6098_v48 }
 0xea1   :  { %v7205_v31 = vpop.eup %7204  ;;  %v4847_v54 = vadd.f32 1.0, %v7203_v45  ;;  %7230 = vrcp.f32 %v4843_v51 }
 0xea2   :  { %v7207_v18 = vpop.eup %7206  ;;  %v4849_v35 = vadd.f32 1.0, %v7205_v31  ;;  %7232 = vrcp.f32 %v4845_v5 }
 0xea3   :  { %v7209_v15 = vpop.eup %7208  ;;  %v4851_v4 = vadd.f32 1.0, %v7207_v18  ;;  %7234 = vrcp.f32 %v4847_v54 }
 0xea4   :  { %v7211_v53 = vpop.eup %7210  ;;  %v4853_v47 = vadd.f32 1.0, %v7209_v15  ;;  %7236 = vrcp.f32 %v4849_v35  ;;  %v4954_v35 = vrot.slane %v10185_v56, 7  ;;  %v4960_v56 = vrot.slane %v10211_v37, 7 }
 0xea5   :  { %v7213_v30 = vpop.eup %7212  ;;  %v4855_v32 = vadd.f32 1.0, %v7211_v53  ;;  %7238 = vrcp.f32 %v4851_v4  ;;  %v4955_v4 = vrot.slane %v10189_v12, 7  ;;  %v4978_v12 = vmul.f32 %v10419_v38, %v10386_v25 }
 0xea6   :  { %v7215_v34 = vpop.eup %7214  ;;  %v4857_v2 = vadd.f32 1.0, %v7213_v30  ;;  %7240 = vrcp.f32 %v4853_v47  ;;  %v4957_v30 = vrot.slane %v10198_v24, 7 }
 0xea7   :  { %v7217_v13 = vpop.eup %7216  ;;  %7242 = vrcp.f32 %v4855_v32  ;;  %v4922_v48 = vadd.f32 1.0, %v7215_v34  ;;  %v4956_v32 = vrot.slane %v10193_v33, 7  ;;  %v4961_v33 = vrot.slane %v10214_v16, 7 }
 0xea8   :  { %v7219_v45 = vpop.eup %7218  ;;  %7244 = vrcp.f32 %v4857_v2  ;;  %v4923_v51 = vadd.f32 1.0, %v7217_v13  ;;  %v4958_v13 = vrot.slane %v10203_v52, 7 }
 0xea9   :  { %v7221_v31 = vpop.eup %7220  ;;  %v4924_v5 = vadd.f32 1.0, %v7219_v45  ;;  %7246 = vrcp.f32 %v4922_v48 }
 0xeaa   :  { %v7223_v23 = vpop.eup %7222  ;;  %v4925_v18 = vadd.f32 1.0, %v7221_v31  ;;  %7248 = vrcp.f32 %v4923_v51  ;;  %v4979_v31 = vmul.f32 %v10423_v26, %v10389_v8  ;;  %v4982_v8 = vmul.f32 %v10430_v1, %v10402_v22 }
 0xeab   :  { %v7225_v54 = vpop.eup %7224  ;;  %v4926_v19 = vadd.f32 1.0, %v7223_v23  ;;  %7250 = vrcp.f32 %v4924_v5  ;;  %v4959_v23 = vrot.slane %v10208_v7, 7  ;;  %v4980_v7 = vmul.f32 %v10426_v59, %v10394_v29 }
 0xeac   :  { %v7227_v15 = vpop.eup %7226  ;;  %v4927_v53 = vadd.f32 1.0, %v7225_v54  ;;  %7252 = vrcp.f32 %v4925_v18 }
 0xead   :  { %v7229_v47 = vpop.eup %7228  ;;  %v4928_v34 = vadd.f32 1.0, %v7227_v15  ;;  %7254 = vrcp.f32 %v4926_v19  ;;  %v4981_v19 = vmul.f32 %v10428_v28, %v10398_v27 }
 0xeae   :  { %v7231_v2 = vpop.eup %7230  ;;  %v4929_v48 = vadd.f32 1.0, %v7229_v47  ;;  %7256 = vrcp.f32 %v4927_v53  ;;  %v4984_v53 = vmul.f32 %v10416_v9, %v10409_v46  ;;  %v4985_v47 = vmul.f32 %v10434_v39, %v10413_v3 }
 0xeaf   :  { %v7233_v45 = vpop.eup %7232  ;;  %v4970_v51 = vmul.f32 %v7231_v2, %v4954_v35  ;;  %7258 = vrcp.f32 %v4928_v34  ;;  %v4983_v35 = vmul.f32 %v10432_v17, %v10406_v21 }
 0xeb0   :  { %v7235_v24 = vpop.eup %7234  ;;  %v4971_v5 = vmul.f32 %v7233_v45, %v4955_v4  ;;  %7260 = vrcp.f32 %v4929_v48 }
 0xeb1   :  { %v7237_v52 = vpop.eup %7236  ;;  %v4972_v18 = vmul.f32 %v7235_v24, %v4956_v32  ;;  %v10450_v54 = vadd.f32 %v4978_v12, %v4970_v51 }
 0xeb2   :  { %v7239_v37 = vpop.eup %7238  ;;  %v10454_v25 = vadd.f32 %v4979_v31, %v4971_v5  ;;  %v4973_v16 = vmul.f32 %v7237_v52, %v4957_v30 }
 0xeb3   :  { %v7241_v38 = vpop.eup %7240  ;;  %v4974_v26 = vmul.f32 %v7239_v37, %v4958_v13  ;;  %v10458_v15 = vadd.f32 %v4980_v7, %v4972_v18  ;;  %7262 = vtanh.f32 %v10450_v54 }
 0xeb4   :  { %v7243_v29 = vpop.eup %7242  ;;  %v4975_v59 = vmul.f32 %v7241_v38, %v4959_v23  ;;  %v10463_v4 = vadd.f32 %v4981_v19, %v4973_v16  ;;  %7264 = vtanh.f32 %v10454_v25 }
 0xeb5   :  { %v7245_v27 = vpop.eup %7244  ;;  %v4976_v28 = vmul.f32 %v7243_v29, %v4960_v56  ;;  %v10468_v22 = vadd.f32 %v4982_v8, %v4974_v26  ;;  %7266 = vtanh.f32 %v10458_v15 }
 0xeb6   :  { %v4977_v1 = vmul.f32 %v7245_v27, %v4961_v33  ;;  %v10473_v30 = vadd.f32 %v4983_v35, %v4975_v59  ;;  %7268 = vtanh.f32 %v10463_v4  ;;  %v7247_v17 = vpop.eup %7246 }
 0xeb7   :  { %v10476_v21 = vadd.f32 %v4984_v53, %v4976_v28  ;;  %7270 = vtanh.f32 %v10468_v22  ;;  %v7249_v9 = vpop.eup %7248 }
 0xeb8   :  { %v10479_v32 = vadd.f32 %v4985_v47, %v4977_v1  ;;  %7272 = vtanh.f32 %v10473_v30  ;;  %v7251_v46 = vpop.eup %7250 }
 0xeb9   :  { %7274 = vtanh.f32 %v10476_v21  ;;  %v7253_v3 = vpop.eup %7252 }
 0xeba   :  { %7276 = vtanh.f32 %v10479_v32  ;;  %v7255_v39 = vpop.eup %7254 }
 0xebb   :  { %v7257_v34 = vpop.eup %7256 }
 0xebc   :  { %v7259_v2 = vpop.eup %7258 }
 0xebd   :  { %v7261_v13 = vpop.eup %7260 }
 0xec0   :  { %v7263_v23 = vpop.eup %7262 }
 0xec1   :  { %v7265_v48 = vpop.eup %7264  ;;  %v5002_v45 = vmul.f32 %v7263_v23, %v7247_v17 }
 0xec2   :  { %v7267_v56 = vpop.eup %7266  ;;  %v5003_v12 = vmul.f32 %v7265_v48, %v7249_v9 }
 0xec3   :  { %v7269_v51 = vpop.eup %7268  ;;  %v5004_v24 = vmul.f32 %v7267_v56, %v7251_v46  ;;  %v5010_v33 = vpack.c.bf16 %v5002_v45, %v5002_v45 }
 0xec4   :  { %v7271_v31 = vpop.eup %7270  ;;  %v5005_v5 = vmul.f32 %v7269_v51, %v7253_v3  ;;  %v5011_v52 = vpack.c.bf16 %v5003_v12, %v5003_v12 }
 0xec5   :  { %v7273_v7 = vpop.eup %7272  ;;  %v5006_v18 = vmul.f32 %v7271_v31, %v7255_v39  ;;  %v5012_v37 = vpack.c.bf16 %v5004_v24, %v5004_v24  ;;  %v5026_v19 = vunpack.c.l.b16 %v5010_v33 }
 0xec6   :  { %v7275_v16 = vpop.eup %7274  ;;  %v5007_v38 = vmul.f32 %v7273_v7, %v7257_v34  ;;  %v5013_v8 = vpack.c.bf16 %v5005_v5, %v5005_v5  ;;  %v5027_v26 = vunpack.c.l.b16 %v5011_v52 }
 0xec7   :  { %v7277_v29 = vpop.eup %7276  ;;  %v5008_v59 = vmul.f32 %v7275_v16, %v7259_v2  ;;  %v5014_v35 = vpack.c.bf16 %v5006_v18, %v5006_v18  ;;  %v5028_v27 = vunpack.c.l.b16 %v5012_v37  ;;  %v5034_v28 = vrot.slane %v5026_v19, 6  ;;  %v7696_v18 = vld [vmem:[#allocation7 + $0xe0] ss:$16 sps:$4 sm:$0xff]   ;;  %v7697_v37 = vld [vmem:[#allocation7 + $0xe8] ss:$16 sps:$4 sm:$0xff]  }
 0xec8   :  { %v5009_v53 = vmul.f32 %v7277_v29, %v7261_v13  ;;  %v5015_v1 = vpack.c.bf16 %v5007_v38, %v5007_v38  ;;  %v5029_v47 = vunpack.c.l.b16 %v5013_v8  ;;  %v5035_v17 = vrot.slane %v5027_v26, 5  ;;  %v7698_v19 = vld [vmem:[#allocation7 + $0xc4] ss:$16 sps:$4 sm:$0xff]   ;;  %v7699_v16 = vld [vmem:[#allocation7 + $0xcc] ss:$16 sps:$4 sm:$0xff]  }
 0xec9   :  { %v5016_v9 = vpack.c.bf16 %v5008_v59, %v5008_v59  ;;  %v5030_v46 = vunpack.c.l.b16 %v5014_v35  ;;  %v5037_v3 = vrot.slane %v5028_v27, 4  ;;  %v7700_v38 = vld [vmem:[#allocation7 + $0xc0] ss:$16 sps:$4 sm:$0xff]   ;;  %v7701_v8 = vld [vmem:[#allocation7 + $0xc8] ss:$16 sps:$4 sm:$0xff]  }
 0xeca   :  { %v5017_v23 = vpack.c.bf16 %v5009_v53, %v5009_v53  ;;  %v5031_v39 = vunpack.c.l.b16 %v5015_v1  ;;  %v5036_v48 = vsel %vm938_vm3, %v5035_v17, %v5034_v28  ;;  %v5039_v45 = vrot.slane %v5029_v47, 3  ;;  %v7702_v26 = vld [vmem:[#allocation7 + $0xa4] ss:$16 sps:$4 sm:$0xff]   ;;  %v7703_v29 = vld [vmem:[#allocation7 + $0xac] ss:$16 sps:$4 sm:$0xff]  }
 0xecb   :  { %v5038_v34 = vsel %vm941_vm4, %v5037_v3, %v5036_v48  ;;  %v5041_v56 = vrot.slane %v5030_v46, 2  ;;  %v5032_v24 = vunpack.c.l.b16 %v5016_v9  ;;  %v7704_v59 = vld [vmem:[#allocation7 + $0xa0] ss:$16 sps:$4 sm:$0xff]   ;;  %v7705_v35 = vld [vmem:[#allocation7 + $0xa8] ss:$16 sps:$4 sm:$0xff]  }
 0xecc   :  { %v5033_v12 = vunpack.c.l.b16 %v5017_v23  ;;  %v5040_v2 = vsel %vm944_vm5, %v5039_v45, %v5038_v34  ;;  %v5043_v51 = vrot.slane %v5031_v39, 1  ;;  %v7706_v27 = vld [vmem:[#allocation7 + $0x84] ss:$16 sps:$4 sm:$0xff]   ;;  %v7707_v28 = vld [vmem:[#allocation7 + $0x8c] ss:$16 sps:$4 sm:$0xff]  }
 0xecd   :  { %v5042_v13 = vsel %vm947_vm6, %v5041_v56, %v5040_v2  ;;  %v7708_v53 = vld [vmem:[#allocation7 + $0x80] ss:$16 sps:$4 sm:$0xff]   ;;  %v7709_v1 = vld [vmem:[#allocation7 + $0x88] ss:$16 sps:$4 sm:$0xff]   ;;  %v7710_v47 = vld [vmem:[#allocation7 + $0x64] ss:$16 sps:$4 sm:$0xff]  }
 0xece   :  { %v5044_v33 = vsel %vm950_vm7, %v5043_v51, %v5042_v13  ;;  %v5046_v31 = vrot.slane %v5033_v12, 7  ;;  %v7711_v17 = vld [vmem:[#allocation7 + $0x6c] ss:$16 sps:$4 sm:$0xff]   ;;  %v7712_v9 = vld [vmem:[#allocation7 + $0x60] ss:$16 sps:$4 sm:$0xff]  }
 0xecf   :  { %v5045_v5 = vsel %vm953_vm8, %v5032_v24, %v5044_v33  ;;  %v7713_v46 = vld [vmem:[#allocation7 + $0x68] ss:$16 sps:$4 sm:$0xff]   ;;  %v7714_v3 = vld [vmem:[#allocation7 + $0x44] ss:$16 sps:$4 sm:$0xff]   ;;  %v7715_v23 = vld [vmem:[#allocation7 + $0x4c] ss:$16 sps:$4 sm:$0xff]  }
 0xed0   :  { %v5047_v52 = vsel %vm956_vm9, %v5046_v31, %v5045_v5  ;;  %v7716_v39 = vld [vmem:[#allocation7 + $0x40] ss:$16 sps:$4 sm:$0xff]   ;;  %v7717_v48 = vld [vmem:[#allocation7 + $0x48] ss:$16 sps:$4 sm:$0xff]   ;;  %v7718_v45 = vld [vmem:[#allocation7 + $0x24] ss:$16 sps:$4 sm:$0xff]   ;;  %v4569_v5 = vadd.f32 %v10344_v40, %v11591_v42  ;;  %v4612_v40 = vadd.f32 %v10350_v50, %v11594_v61 }
 0xed1   :  { %v10491_v7 = vpack.c.b16 %v5047_v52, %v5047_v52  ;;  %v7719_v34 = vld [vmem:[#allocation7 + $0x2c] ss:$16 sps:$4 sm:$0xff]   ;;  %v7720_v56 = vld [vmem:[#allocation7 + $0x20] ss:$16 sps:$4 sm:$0xff]   ;;  %v7721_v12 = vld [vmem:[#allocation7 + $0x28] ss:$16 sps:$4 sm:$0xff]  }
 0xed2   :  { %v7722_v2 = vld [vmem:[#allocation7 + $0x4] ss:$16 sps:$4 sm:$0xff]   ;;  %v7723_v51 = vld [vmem:[#allocation7 + $0xc] ss:$16 sps:$4 sm:$0xff]   ;;  %v7724_v24 = vld [vmem:[#allocation7] ss:$16 sps:$4 sm:$0xff]  }
 0xed3   :  { %5083 = vmatmul.mubr.bf16.vlgmr.msra.gmra.mxu0 %v10491_v7  ;;  %5124 = vmatmul.mubr.bf16.vlgmr.msra.gmra.mxu1 %v10491_v7  ;;  %v7725_v13 = vld [vmem:[#allocation7 + $0x8] ss:$16 sps:$4 sm:$0xff]   ;;  %v7726_v33 = vld [vmem:[#allocation3 + $0xe4] ss:$16 sps:$4 sm:$0xff]   ;;  %v7727_v31 = vld [vmem:[#allocation3 + $0xec] ss:$16 sps:$4 sm:$0xff]  }
 0xed4   :  { %5158 = vmatpush1.bf16.msra.mxu0 %v7696_v18  ;;  %5199 = vmatpush1.bf16.msra.mxu1 %v7697_v37  ;;  %v4571_v37 = vadd.f32 %v10348_v63, %v11592_v62 }
 0xed5   :  { %5159 = vmatprep.subr.bf16.mxu0 %v7698_v19  ;;  %5200 = vmatprep.subr.bf16.mxu1 %v7699_v16 }
 0xed6   :  { %5189 = vmatprep.mubr.bf16.mxu0 %v11036_v58  ;;  %5230 = vmatprep.mubr.bf16.mxu1 %v11036_v58 }
 0xed8   :  { %5160 = vmatpush1.bf16.msra.mxu0 %v7700_v38  ;;  %5201 = vmatpush1.bf16.msra.mxu1 %v7701_v8 }
 0xed9   :  { %5161 = vmatprep.subr.bf16.mxu0 %v7702_v26  ;;  %5202 = vmatprep.subr.bf16.mxu1 %v7703_v29 }
 0xedc   :  { %5162 = vmatpush1.bf16.msra.mxu0 %v7704_v59  ;;  %5203 = vmatpush1.bf16.msra.mxu1 %v7705_v35 }
 0xedd   :  { %5163 = vmatprep.subr.bf16.mxu0 %v7706_v27  ;;  %5204 = vmatprep.subr.bf16.mxu1 %v7707_v28 }
 0xee0   :  { %5164 = vmatpush1.bf16.msra.mxu0 %v7708_v53  ;;  %5205 = vmatpush1.bf16.msra.mxu1 %v7709_v1  ;;  %v4610_v1 = vadd.f32 %v10346_v6, %v11596_v43 }
 0xee1   :  { %5165 = vmatprep.subr.bf16.mxu0 %v7710_v47  ;;  %5206 = vmatprep.subr.bf16.mxu1 %v7711_v17 }
 0xee4   :  { %5166 = vmatpush1.bf16.msra.mxu0 %v7712_v9  ;;  %5207 = vmatpush1.bf16.msra.mxu1 %v7713_v46 }
 0xee5   :  { %5167 = vmatprep.subr.bf16.mxu0 %v7714_v3  ;;  %5208 = vmatprep.subr.bf16.mxu1 %v7715_v23 }
 0xee8   :  { %5168 = vmatpush1.bf16.msra.mxu0 %v7716_v39  ;;  %5209 = vmatpush1.bf16.msra.mxu1 %v7717_v48 }
 0xee9   :  { %5169 = vmatprep.subr.bf16.mxu0 %v7718_v45  ;;  %5210 = vmatprep.subr.bf16.mxu1 %v7719_v34 }
 0xeec   :  { %5170 = vmatpush1.bf16.msra.mxu0 %v7720_v56  ;;  %5211 = vmatpush1.bf16.msra.mxu1 %v7721_v12 }
 0xeed   :  { %5171 = vmatprep.subr.bf16.mxu0 %v7722_v2  ;;  %5212 = vmatprep.subr.bf16.mxu1 %v7723_v51 }
 0xef0   :  { %5172 = vmatpush1.bf16.msra.mxu0 %v7724_v24  ;;  %5213 = vmatpush1.bf16.msra.mxu1 %v7725_v13  ;;  %v7728_v13 = vld [vmem:[#allocation3 + $0xe0] ss:$16 sps:$4 sm:$0xff]  }
 0xef1   :  { %5239 = vmatprep.subr.bf16.mxu0 %v7726_v33  ;;  %5280 = vmatprep.subr.bf16.mxu1 %v7727_v31  ;;  %v7729_v33 = vld [vmem:[#allocation3 + $0xe8] ss:$16 sps:$4 sm:$0xff]   ;;  %v7730_v31 = vld [vmem:[#allocation3 + $0xc4] ss:$16 sps:$4 sm:$0xff]  }
 0xf93   :  { %v5084_v52 = vpop.f32.mrf.mxu0  ;;  %v5125_v18 = vpop.f32.mrf.mxu1 }
 0xf94   :  { %v5085_v19 = vadd.f32 %v5084_v52, %v4569_v5  ;;  %v5126_v63 = vadd.f32 %v5125_v18, %v4610_v1  ;;  %v7731_v5 = vld [vmem:[#allocation3 + $0xcc] ss:$16 sps:$4 sm:$0xff]   ;;  %v7733_v52 = vld [vmem:[#allocation3 + $0xc8] ss:$16 sps:$4 sm:$0xff]   ;;  %v7734_v18 = vld [vmem:[#allocation3 + $0xa4] ss:$16 sps:$4 sm:$0xff]  }
 0xf95   :  { %v5086_v16 = vpop.f32.mrf.mxu0  ;;  %v5127_v38 = vpop.f32.mrf.mxu1  ;;  %v7748_v1 = vld [vmem:[#allocation3 + $0x40] ss:$16 sps:$4 sm:$0xff]  }
 0xf96   :  { %v6099_v8 = vmul.f32 -1.442695, %v5085_v19  ;;  %v5087_v26 = vadd.f32 %v5086_v16, %v4571_v37  ;;  %v5128_v53 = vadd.f32 %v5127_v38, %v4612_v40  ;;  %v7735_v37 = vld [vmem:[#allocation3 + $0xac] ss:$16 sps:$4 sm:$0xff]   ;;  %v7736_v19 = vld [vmem:[#allocation3 + $0xa0] ss:$16 sps:$4 sm:$0xff]  }
 0xf97   :  { %v5088_v29 = vpop.f32.mrf.mxu0  ;;  %v5129_v59 = vpop.f32.mrf.mxu1  ;;  %v7737_v16 = vld [vmem:[#allocation3 + $0xa8] ss:$16 sps:$4 sm:$0xff]   ;;  %v7738_v38 = vld [vmem:[#allocation3 + $0x84] ss:$16 sps:$4 sm:$0xff]  }
 0xf98   :  { %7278 = vpow2.f32 %v6099_v8  ;;  %v6100_v35 = vmul.f32 -1.442695, %v5087_v26  ;;  %v6101_v47 = vmul.f32 -1.442695, %v5128_v53  ;;  %v7739_v8 = vld [vmem:[#allocation3 + $0x8c] ss:$16 sps:$4 sm:$0xff]  }
 0xf99   :  { %v5089_v27 = vpop.f32.mrf.mxu0  ;;  %v5130_v28 = vpop.f32.mrf.mxu1  ;;  %v7740_v26 = vld [vmem:[#allocation3 + $0x80] ss:$16 sps:$4 sm:$0xff]   ;;  %v7741_v29 = vld [vmem:[#allocation3 + $0x88] ss:$16 sps:$4 sm:$0xff]   ;;  %v7742_v59 = vld [vmem:[#allocation3 + $0x64] ss:$16 sps:$4 sm:$0xff]  }
 0xf9a   :  { %7280 = vpow2.f32 %v6100_v35  ;;  %v7743_v35 = vld [vmem:[#allocation3 + $0x6c] ss:$16 sps:$4 sm:$0xff]   ;;  %v7744_v27 = vld [vmem:[#allocation3 + $0x60] ss:$16 sps:$4 sm:$0xff]   ;;  %v7745_v28 = vld [vmem:[#allocation3 + $0x68] ss:$16 sps:$4 sm:$0xff]  }
 0xf9b   :  { %7282 = vtanh.f32 %v5126_v63  ;;  %v7746_v40 = vld [vmem:[#allocation3 + $0x44] ss:$16 sps:$4 sm:$0xff]   ;;  %v7747_v53 = vld [vmem:[#allocation3 + $0x4c] ss:$16 sps:$4 sm:$0xff]   ;;  %v7749_v63 = vld [vmem:[#allocation3 + $0x48] ss:$16 sps:$4 sm:$0xff]  }
 0xf9c   :  { %7284 = vpow2.f32 %v6101_v47  ;;  %v7750_v47 = vld [vmem:[#allocation3 + $0x24] ss:$16 sps:$4 sm:$0xff]  }
 0xfa5   :  { %v7279_v17 = vpop.eup %7278 }
 0xfa6   :  { %v5138_v9 = vadd.f32 1.0, %v7279_v17  ;;  %v7751_v17 = vld [vmem:[#allocation3 + $0x2c] ss:$16 sps:$4 sm:$0xff]  }
 0xfa7   :  { %v7281_v46 = vpop.eup %7280 }
 0xfa8   :  { %7286 = vrcp.f32 %v5138_v9  ;;  %v5139_v3 = vadd.f32 1.0, %v7281_v46  ;;  %v7283_v23 = vpop.eup %7282  ;;  %v7752_v9 = vld [vmem:[#allocation3 + $0x20] ss:$16 sps:$4 sm:$0xff]   ;;  %v7753_v46 = vld [vmem:[#allocation3 + $0x28] ss:$16 sps:$4 sm:$0xff]  }
 0xfa9   :  { %v7285_v39 = vpop.eup %7284 }
 0xfaa   :  { %7288 = vrcp.f32 %v5139_v3  ;;  %v5148_v50 = vadd.f32 1.0, %v7285_v39  ;;  %v7754_v3 = vld [vmem:[#allocation3 + $0x4] ss:$16 sps:$4 sm:$0xff]   ;;  %v7756_v39 = vld [vmem:[#allocation3] ss:$16 sps:$4 sm:$0xff]  }
 0xfac   :  { %7290 = vrcp.f32 %v5148_v50  ;;  %v7760_v50 = vld [vmem:[#allocation5 + $0xe0] ss:$16 sps:$4 sm:$0xff]  }
 0xfb5   :  { %v7287_v48 = vpop.eup %7286 }
 0xfb6   :  { %v5152_v45 = vmul.f32 %v7287_v48, %v7283_v23  ;;  %v7755_v23 = vld [vmem:[#allocation3 + $0xc] ss:$16 sps:$4 sm:$0xff]   ;;  %v7757_v48 = vld [vmem:[#allocation3 + $0x8] ss:$16 sps:$4 sm:$0xff]  }
 0xfb7   :  { %v7289_v34 = vpop.eup %7288 }
 0xfb8   :  { %v5151_v56 = vmul.f32 %v7289_v34, %v10273_v44  ;;  %v7732_v44 = vld [vmem:[#allocation3 + $0xc0] ss:$16 sps:$4 sm:$0xff]   ;;  %v7759_v34 = vld [vmem:[#allocation5 + $0xec] ss:$16 sps:$4 sm:$0xff]  }
 0xfb9   :  { %v7291_v6 = vpop.eup %7290 }
 0xfba   :  { %v10506_v12 = vadd.f32 %v5152_v45, %v5151_v56  ;;  %v7758_v45 = vld [vmem:[#allocation5 + $0xe4] ss:$16 sps:$4 sm:$0xff]   ;;  %v7761_v56 = vld [vmem:[#allocation5 + $0xe8] ss:$16 sps:$4 sm:$0xff]  }
 0xfbc   :  { %7292 = vtanh.f32 %v10506_v12 }
 0xfc9   :  { %v7293_v2 = vpop.eup %7292 }
 0xfca   :  { %v5155_v51 = vmul.f32 %v7293_v2, %v7291_v6  ;;  %v7762_v6 = vld [vmem:[#allocation5 + $0xc4] ss:$16 sps:$4 sm:$0xff]   ;;  %v7763_v2 = vld [vmem:[#allocation5 + $0xcc] ss:$16 sps:$4 sm:$0xff]  }
 0xfcc   :  { %v5156_v24 = vpack.c.bf16 %v5155_v51, %v5155_v51  ;;  %v7764_v51 = vld [vmem:[#allocation5 + $0xc0] ss:$16 sps:$4 sm:$0xff]  }
 0xfce   :  { %5190 = vmatmul.mubr.bf16.vlgmr.msra.gmra.mxu0 %v5156_v24  ;;  %5231 = vmatmul.mubr.bf16.vlgmr.msra.gmra.mxu1 %v5156_v24  ;;  %v7765_v24 = vld [vmem:[#allocation5 + $0xc8] ss:$16 sps:$4 sm:$0xff]  }
 0xfcf   :  { %5240 = vmatpush1.bf16.msra.mxu0 %v7728_v13  ;;  %5281 = vmatpush1.bf16.msra.mxu1 %v7729_v33  ;;  %v7766_v13 = vld [vmem:[#allocation5 + $0xa4] ss:$16 sps:$4 sm:$0xff]   ;;  %v7767_v33 = vld [vmem:[#allocation5 + $0xac] ss:$16 sps:$4 sm:$0xff]  }
 0xfd0   :  { %5241 = vmatprep.subr.bf16.mxu0 %v7730_v31  ;;  %5282 = vmatprep.subr.bf16.mxu1 %v7731_v5  ;;  %v7769_v31 = vld [vmem:[#allocation5 + $0xa8] ss:$16 sps:$4 sm:$0xff]   ;;  %v7770_v5 = vld [vmem:[#allocation5 + $0x84] ss:$16 sps:$4 sm:$0xff]  }
 0xfd1   :  { %5271 = vmatprep.mubr.bf16.mxu0 %v11036_v58  ;;  %5312 = vmatprep.mubr.bf16.mxu1 %v11036_v58 }
 0xfd3   :  { %5242 = vmatpush1.bf16.msra.mxu0 %v7732_v44  ;;  %5283 = vmatpush1.bf16.msra.mxu1 %v7733_v52  ;;  %v7771_v44 = vld [vmem:[#allocation5 + $0x8c] ss:$16 sps:$4 sm:$0xff]   ;;  %v7772_v52 = vld [vmem:[#allocation5 + $0x80] ss:$16 sps:$4 sm:$0xff]  }
 0xfd4   :  { %5243 = vmatprep.subr.bf16.mxu0 %v7734_v18  ;;  %5284 = vmatprep.subr.bf16.mxu1 %v7735_v37  ;;  %v7773_v18 = vld [vmem:[#allocation5 + $0x88] ss:$16 sps:$4 sm:$0xff]   ;;  %v7775_v37 = vld [vmem:[#allocation5 + $0x6c] ss:$16 sps:$4 sm:$0xff]  }
 0xfd7   :  { %5244 = vmatpush1.bf16.msra.mxu0 %v7736_v19  ;;  %5285 = vmatpush1.bf16.msra.mxu1 %v7737_v16  ;;  %v7776_v19 = vld [vmem:[#allocation5 + $0x60] ss:$16 sps:$4 sm:$0xff]   ;;  %v7777_v16 = vld [vmem:[#allocation5 + $0x68] ss:$16 sps:$4 sm:$0xff]  }
 0xfd8   :  { %5245 = vmatprep.subr.bf16.mxu0 %v7738_v38  ;;  %5286 = vmatprep.subr.bf16.mxu1 %v7739_v8  ;;  %v7778_v38 = vld [vmem:[#allocation5 + $0x44] ss:$16 sps:$4 sm:$0xff]   ;;  %v7779_v8 = vld [vmem:[#allocation5 + $0x4c] ss:$16 sps:$4 sm:$0xff]  }
 0xfdb   :  { %5246 = vmatpush1.bf16.msra.mxu0 %v7740_v26  ;;  %5287 = vmatpush1.bf16.msra.mxu1 %v7741_v29  ;;  %v7780_v26 = vld [vmem:[#allocation5 + $0x40] ss:$16 sps:$4 sm:$0xff]   ;;  %v7781_v29 = vld [vmem:[#allocation5 + $0x48] ss:$16 sps:$4 sm:$0xff]  }
 0xfdc   :  { %5247 = vmatprep.subr.bf16.mxu0 %v7742_v59  ;;  %5288 = vmatprep.subr.bf16.mxu1 %v7743_v35  ;;  %v7782_v59 = vld [vmem:[#allocation5 + $0x24] ss:$16 sps:$4 sm:$0xff]   ;;  %v7783_v35 = vld [vmem:[#allocation5 + $0x2c] ss:$16 sps:$4 sm:$0xff]  }
 0xfdf   :  { %5248 = vmatpush1.bf16.msra.mxu0 %v7744_v27  ;;  %5289 = vmatpush1.bf16.msra.mxu1 %v7745_v28  ;;  %v7784_v27 = vld [vmem:[#allocation5 + $0x20] ss:$16 sps:$4 sm:$0xff]   ;;  %v7785_v28 = vld [vmem:[#allocation5 + $0x28] ss:$16 sps:$4 sm:$0xff]  }
 0xfe0   :  { %5249 = vmatprep.subr.bf16.mxu0 %v7746_v40  ;;  %5290 = vmatprep.subr.bf16.mxu1 %v7747_v53  ;;  %v7786_v40 = vld [vmem:[#allocation5 + $0x4] ss:$16 sps:$4 sm:$0xff]   ;;  %v7787_v53 = vld [vmem:[#allocation5 + $0xc] ss:$16 sps:$4 sm:$0xff]  }
 0xfe3   :  { %5250 = vmatpush1.bf16.msra.mxu0 %v7748_v1  ;;  %5291 = vmatpush1.bf16.msra.mxu1 %v7749_v63  ;;  %v7788_v1 = vld [vmem:[#allocation5] ss:$16 sps:$4 sm:$0xff]   ;;  %v7789_v63 = vld [vmem:[#allocation5 + $0x8] ss:$16 sps:$4 sm:$0xff]  }
 0xfe4   :  { %5251 = vmatprep.subr.bf16.mxu0 %v7750_v47  ;;  %5292 = vmatprep.subr.bf16.mxu1 %v7751_v17 }
 0xfe7   :  { %5252 = vmatpush1.bf16.msra.mxu0 %v7752_v9  ;;  %5293 = vmatpush1.bf16.msra.mxu1 %v7753_v46 }
 0xfe8   :  { %5253 = vmatprep.subr.bf16.mxu0 %v7754_v3  ;;  %5294 = vmatprep.subr.bf16.mxu1 %v7755_v23 }
 0xfeb   :  { %5254 = vmatpush1.bf16.msra.mxu0 %v7756_v39  ;;  %5295 = vmatpush1.bf16.msra.mxu1 %v7757_v48 }
 0xfec   :  { %5673 = vmatprep.subr.bf16.mxu0 %v7758_v45  ;;  %5714 = vmatprep.subr.bf16.mxu1 %v7759_v34 }
 0xfee   :  { %5272 = vmatmul.mubr.bf16.vlgmr.msra.gmra.mxu0 %v10491_v7  ;;  %5313 = vmatmul.mubr.bf16.vlgmr.msra.gmra.mxu1 %v10491_v7  ;;  %v7768_v7 = vld [vmem:[#allocation5 + $0xa0] ss:$16 sps:$4 sm:$0xff]  }
 0xfef   :  { %5674 = vmatpush1.bf16.msra.mxu0 %v7760_v50  ;;  %5715 = vmatpush1.bf16.msra.mxu1 %v7761_v56 }
 0xff0   :  { %5675 = vmatprep.subr.bf16.mxu0 %v7762_v6  ;;  %5716 = vmatprep.subr.bf16.mxu1 %v7763_v2 }
 0xff1   :  { %5705 = vmatprep.mubr.bf16.mxu0 %v11036_v58  ;;  %5746 = vmatprep.mubr.bf16.mxu1 %v11036_v58  ;;  %v7774_v58 = vld [vmem:[#allocation5 + $0x64] ss:$16 sps:$4 sm:$0xff]  }
 0xff3   :  { %5676 = vmatpush1.bf16.msra.mxu0 %v7764_v51  ;;  %5717 = vmatpush1.bf16.msra.mxu1 %v7765_v24 }
 0xff4   :  { %5677 = vmatprep.subr.bf16.mxu0 %v7766_v13  ;;  %5718 = vmatprep.subr.bf16.mxu1 %v7767_v33 }
 0xff7   :  { %5678 = vmatpush1.bf16.msra.mxu0 %v7768_v7  ;;  %5719 = vmatpush1.bf16.msra.mxu1 %v7769_v31 }
 0xff8   :  { %5679 = vmatprep.subr.bf16.mxu0 %v7770_v5  ;;  %5720 = vmatprep.subr.bf16.mxu1 %v7771_v44 }
 0xffb   :  { %5680 = vmatpush1.bf16.msra.mxu0 %v7772_v52  ;;  %5721 = vmatpush1.bf16.msra.mxu1 %v7773_v18 }
 0xffc   :  { %5681 = vmatprep.subr.bf16.mxu0 %v7774_v58  ;;  %5722 = vmatprep.subr.bf16.mxu1 %v7775_v37 }
 0xfff   :  { %5682 = vmatpush1.bf16.msra.mxu0 %v7776_v19  ;;  %5723 = vmatpush1.bf16.msra.mxu1 %v7777_v16 }
0x1000   :  { %5683 = vmatprep.subr.bf16.mxu0 %v7778_v38  ;;  %5724 = vmatprep.subr.bf16.mxu1 %v7779_v8 }
0x1003   :  { %5684 = vmatpush1.bf16.msra.mxu0 %v7780_v26  ;;  %5725 = vmatpush1.bf16.msra.mxu1 %v7781_v29 }
0x1004   :  { %5685 = vmatprep.subr.bf16.mxu0 %v7782_v59  ;;  %5726 = vmatprep.subr.bf16.mxu1 %v7783_v35 }
0x1007   :  { %5686 = vmatpush1.bf16.msra.mxu0 %v7784_v27  ;;  %5727 = vmatpush1.bf16.msra.mxu1 %v7785_v28 }
0x1008   :  { %5687 = vmatprep.subr.bf16.mxu0 %v7786_v40  ;;  %5728 = vmatprep.subr.bf16.mxu1 %v7787_v53 }
0x100b   :  { %5688 = vmatpush1.bf16.msra.mxu0 %v7788_v1  ;;  %5729 = vmatpush1.bf16.msra.mxu1 %v7789_v63 }
0x108e   :  { %v10515_v47 = vpop.f32.mrf.mxu0  ;;  %v10517_v17 = vpop.f32.mrf.mxu1 }
0x1090   :  { %v10519_v9 = vpop.f32.mrf.mxu0  ;;  %v10521_v46 = vpop.f32.mrf.mxu1 }
0x1092   :  { %v5195_v3 = vpop.f32.mrf.mxu0  ;;  %v5236_v23 = vpop.f32.mrf.mxu1 }
0x1093   :  { %v11693_v23 = vld [vmem:[#allocation23_spill] sm:$0xff] }
0x1094   :  { %v5196_v39 = vpop.f32.mrf.mxu0  ;;  %v5237_v48 = vpop.f32.mrf.mxu1 }
0x1095   :  { %v11694_v48 = vld [vmem:[#allocation24_spill] sm:$0xff] }
0x10ae   :  { %v5273_v45 = vpop.f32.mrf.mxu0  ;;  %v5314_v34 = vpop.f32.mrf.mxu1 }
0x10af   :  { %v5325_v50 = vrot.slane %v5273_v45, 1  ;;  %v5329_v56 = vrot.slane %v5273_v45, 2  ;;  %v5333_v6 = vrot.slane %v5273_v45, 3  ;;  %v5337_v2 = vrot.slane %v5273_v45, 4 }
0x10b0   :  { %v5341_v51 = vrot.slane %v5273_v45, 5  ;;  %v5345_v24 = vrot.slane %v5273_v45, 6  ;;  %v5349_v13 = vrot.slane %v5273_v45, 7  ;;  %v5413_v33 = vadd.f32 %v5273_v45, %v11668_v55  ;;  %v10524_v7 = vpop.f32.mrf.mxu0  ;;  %v10526_v31 = vpop.f32.mrf.mxu1 }
0x10b1   :  { %v5385_v5 = vadd.f32 %v5325_v50, %v11662_v10  ;;  %v5389_v44 = vadd.f32 %v5329_v56, %v11663_v49  ;;  %v5393_v52 = vadd.f32 %v5333_v6, %v11664_v20  ;;  %v5397_v18 = vadd.f32 %v5337_v2, %v11665_v36  ;;  %v11695_v50 = vld [vmem:[#allocation25_spill] sm:$0xff]  ;;  %v11696_v6 = vld [vmem:[#allocation26_spill] sm:$0xff] }
0x10b2   :  { %v5401_v58 = vadd.f32 %v5341_v51, %v11666_v57  ;;  %v5405_v37 = vadd.f32 %v5345_v24, %v11667_v0  ;;  %v6116_v19 = vmul.f32 -1.442695, %v5413_v33  ;;  %v5277_v16 = vpop.f32.mrf.mxu0  ;;  %v5318_v38 = vpop.f32.mrf.mxu1  ;;  %v5409_v55 = vadd.f32 %v5349_v13, %v11661_v41 }
0x10b3   :  { %v6102_v8 = vmul.f32 -1.442695, %v5385_v5  ;;  %v6104_v26 = vmul.f32 -1.442695, %v5389_v44  ;;  %v6106_v29 = vmul.f32 -1.442695, %v5393_v52 }
0x10b4   :  { %v6108_v59 = vmul.f32 -1.442695, %v5397_v18  ;;  %7294 = vpow2.f32 %v6116_v19  ;;  %v5278_v10 = vpop.f32.mrf.mxu0  ;;  %v5319_v49 = vpop.f32.mrf.mxu1  ;;  %v6110_v20 = vmul.f32 -1.442695, %v5401_v58  ;;  %v5327_v35 = vrot.slane %v5314_v34, 1  ;;  %v11698_v16 = vld [vmem:[#allocation19_spill] sm:$0xff] }
0x10b5   :  { %7296 = vpow2.f32 %v6102_v8  ;;  %v5331_v36 = vrot.slane %v5314_v34, 2  ;;  %v6112_v57 = vmul.f32 -1.442695, %v5405_v37  ;;  %v5335_v27 = vrot.slane %v5314_v34, 3 }
0x10b6   :  { %7298 = vpow2.f32 %v6104_v26  ;;  %v6114_v0 = vmul.f32 -1.442695, %v5409_v55  ;;  %v5339_v28 = vrot.slane %v5314_v34, 4  ;;  %v5343_v40 = vrot.slane %v5314_v34, 5 }
0x10b7   :  { %7300 = vpow2.f32 %v6106_v29  ;;  %v5387_v41 = vadd.f32 %v5327_v35, %v11669_v14  ;;  %v5347_v53 = vrot.slane %v5314_v34, 6  ;;  %v5391_v1 = vadd.f32 %v5331_v36, %v11670_v11  ;;  %v11697_v14 = vld [vmem:[#allocation27_spill] sm:$0xff]  ;;  %v11699_v29 = vld [vmem:[#allocation28_spill] sm:$0xff] }
0x10b8   :  { %7302 = vpow2.f32 %v6108_v59  ;;  %v5351_v63 = vrot.slane %v5314_v34, 7  ;;  %v5395_v3 = vadd.f32 %v5335_v27, %v11671_v60  ;;  %v5399_v39 = vadd.f32 %v5339_v28, %v11693_v23  ;;  %v11701_v36 = vld [vmem:[#allocation32_spill] sm:$0xff]  ;;  %v11702_v28 = vld [vmem:[#allocation34_spill] sm:$0xff] }
0x10b9   :  { %7304 = vpow2.f32 %v6110_v20  ;;  %v5403_v45 = vadd.f32 %v5343_v40, %v11694_v48  ;;  %v5407_v56 = vadd.f32 %v5347_v53, %v11695_v50  ;;  %v5415_v51 = vadd.f32 %v5314_v34, %v11697_v14  ;;  %v11700_v20 = vld [vmem:[#allocation30_spill] sm:$0xff] }
0x10ba   :  { %7306 = vpow2.f32 %v6112_v57  ;;  %v5411_v2 = vadd.f32 %v5351_v63, %v11696_v6  ;;  %v5326_v11 = vrot.slane %v10524_v7, 1  ;;  %v5330_v60 = vrot.slane %v10524_v7, 2  ;;  %v11704_v6 = vld [vmem:[#allocation38_spill] sm:$0xff] }
0x10bb   :  { %7308 = vpow2.f32 %v6114_v0  ;;  %v5334_v5 = vrot.slane %v10524_v7, 3  ;;  %v5338_v44 = vrot.slane %v10524_v7, 4  ;;  %v5342_v34 = vrot.slane %v10524_v7, 5 }
0x10bc   :  { %7310 = vtanh.f32 %v5387_v41  ;;  %v5346_v58 = vrot.slane %v10524_v7, 6  ;;  %v5386_v38 = vadd.f32 %v5326_v11, %v11698_v16  ;;  %v5350_v26 = vrot.slane %v10524_v7, 7  ;;  %v11703_v41 = vld [vmem:[#allocation36_spill] sm:$0xff]  ;;  %v11707_v16 = vld [vmem:[#allocation29_spill] sm:$0xff] }
0x10bd   :  { %7312 = vtanh.f32 %v5391_v1  ;;  %v5390_v59 = vadd.f32 %v5330_v60, %v11699_v29  ;;  %v5394_v35 = vadd.f32 %v5334_v5, %v11700_v20  ;;  %v5398_v57 = vadd.f32 %v5338_v44, %v11701_v36  ;;  %v11710_v36 = vld [vmem:[#allocation35_spill] sm:$0xff] }
0x10be   :  { %7314 = vtanh.f32 %v5395_v3  ;;  %v5402_v40 = vadd.f32 %v5342_v34, %v11702_v28  ;;  %v5406_v53 = vadd.f32 %v5346_v58, %v11703_v41  ;;  %v6103_v3 = vmul.f32 -1.442695, %v5386_v38  ;;  %v11711_v28 = vld [vmem:[#allocation37_spill] sm:$0xff] }
0x10bf   :  { %7316 = vtanh.f32 %v5399_v39  ;;  %v5328_v23 = vrot.slane %v10526_v31, 1  ;;  %v5332_v50 = vrot.slane %v10526_v31, 2  ;;  %v6107_v14 = vmul.f32 -1.442695, %v5394_v35 }
0x10c0   :  { %7318 = vtanh.f32 %v5403_v45  ;;  %v6105_v45 = vmul.f32 -1.442695, %v5390_v59  ;;  %v6111_v44 = vmul.f32 -1.442695, %v5402_v40 }
0x10c1   :  { %v7295_v24 = vpop.eup %7294  ;;  %7320 = vtanh.f32 %v5407_v56  ;;  %v5392_v38 = vadd.f32 %v5332_v50, %v11707_v16 }
0x10c2   :  { %v7297_v13 = vpop.eup %7296  ;;  %v5479_v33 = vadd.f32 1.0, %v7295_v24  ;;  %7322 = vtanh.f32 %v5411_v2  ;;  %v5410_v2 = vadd.f32 %v5350_v26, %v11704_v6  ;;  %v11705_v24 = vld [vmem:[#allocation40_spill] sm:$0xff]  ;;  %v11708_v26 = vld [vmem:[#allocation31_spill] sm:$0xff] }
0x10c3   :  { %v7299_v52 = vpop.eup %7298  ;;  %v5465_v18 = vadd.f32 1.0, %v7297_v13  ;;  %7324 = vtanh.f32 %v5415_v51  ;;  %v5336_v51 = vrot.slane %v10526_v31, 3  ;;  %v5414_v60 = vadd.f32 %v10524_v7, %v11705_v24 }
0x10c4   :  { %v7301_v37 = vpop.eup %7300  ;;  %v5467_v19 = vadd.f32 1.0, %v7299_v52  ;;  %7326 = vrcp.f32 %v5479_v33  ;;  %v6109_v13 = vmul.f32 -1.442695, %v5398_v57  ;;  %v5340_v33 = vrot.slane %v10526_v31, 4 }
0x10c5   :  { %v7303_v55 = vpop.eup %7302  ;;  %v5469_v8 = vadd.f32 1.0, %v7301_v37  ;;  %7328 = vrcp.f32 %v5465_v18  ;;  %v5344_v52 = vrot.slane %v10526_v31, 5  ;;  %v11706_v18 = vld [vmem:[#allocation20_spill] sm:$0xff]  ;;  %v6113_v37 = vmul.f32 -1.442695, %v5406_v53 }
0x10c6   :  { %v7305_v10 = vpop.eup %7304  ;;  %v5471_v49 = vadd.f32 1.0, %v7303_v55  ;;  %7330 = vrcp.f32 %v5467_v19  ;;  %v5388_v34 = vadd.f32 %v5328_v23, %v11706_v18  ;;  %v5348_v19 = vrot.slane %v10526_v31, 6 }
0x10c7   :  { %v7307_v27 = vpop.eup %7306  ;;  %v5473_v0 = vadd.f32 1.0, %v7305_v10  ;;  %7332 = vrcp.f32 %v5469_v8  ;;  %v6115_v55 = vmul.f32 -1.442695, %v5410_v2  ;;  %v5352_v8 = vrot.slane %v10526_v31, 7 }
0x10c8   :  { %v7309_v1 = vpop.eup %7308  ;;  %v5475_v63 = vadd.f32 1.0, %v7307_v27  ;;  %7334 = vrcp.f32 %v5471_v49  ;;  %v5396_v29 = vadd.f32 %v5336_v51, %v11708_v26  ;;  %v6117_v10 = vmul.f32 -1.442695, %v5414_v60  ;;  %v11709_v49 = vld [vmem:[#allocation33_spill] sm:$0xff] }
0x10c9   :  { %v10557_v39 = vpop.eup %7310  ;;  %v5477_v48 = vadd.f32 1.0, %v7309_v1  ;;  %7336 = vrcp.f32 %v5473_v0  ;;  %v5400_v20 = vadd.f32 %v5340_v33, %v11709_v49  ;;  %v5404_v57 = vadd.f32 %v5344_v52, %v11710_v36  ;;  %v11712_v1 = vld [vmem:[#allocation39_spill] sm:$0xff] }
0x10ca   :  { %v10560_v56 = vpop.eup %7312  ;;  %7338 = vrcp.f32 %v5475_v63  ;;  %v6118_v27 = vmul.f32 -1.442695, %v5388_v34  ;;  %v5408_v40 = vadd.f32 %v5348_v19, %v11711_v28  ;;  %v6119_v41 = vmul.f32 -1.442695, %v5392_v38 }
0x10cb   :  { %v10564_v11 = vpop.eup %7314  ;;  %7340 = vrcp.f32 %v5477_v48  ;;  %v5412_v63 = vadd.f32 %v5352_v8, %v11712_v1  ;;  %v11713_v48 = vld [vmem:[#allocation41_spill] sm:$0xff]  ;;  %v6121_v50 = vmul.f32 -1.442695, %v5400_v20  ;;  %v6122_v2 = vmul.f32 -1.442695, %v5404_v57 }
0x10cc   :  { %v10569_v5 = vpop.eup %7316  ;;  %7342 = vpow2.f32 %v6103_v3  ;;  %v6120_v3 = vmul.f32 -1.442695, %v5396_v29  ;;  %v6123_v51 = vmul.f32 -1.442695, %v5408_v40 }
0x10cd   :  { %v10573_v58 = vpop.eup %7318  ;;  %7344 = vpow2.f32 %v6105_v45  ;;  %v5416_v45 = vadd.f32 %v10526_v31, %v11713_v48  ;;  %v6124_v60 = vmul.f32 -1.442695, %v5412_v63 }
0x10ce   :  { %v10577_v7 = vpop.eup %7320  ;;  %7346 = vpow2.f32 %v6107_v14 }
0x10cf   :  { %v10581_v59 = vpop.eup %7322  ;;  %7348 = vpow2.f32 %v6109_v13  ;;  %v6125_v33 = vmul.f32 -1.442695, %v5416_v45 }
0x10d0   :  { %v10584_v35 = vpop.eup %7324  ;;  %7350 = vpow2.f32 %v6111_v44 }
0x10d1   :  { %v10587_v0 = vpop.eup %7326  ;;  %7352 = vpow2.f32 %v6113_v37 }
0x10d2   :  { %v10590_v53 = vpop.eup %7328  ;;  %7354 = vpow2.f32 %v6115_v55 }
0x10d3   :  { %v10593_v23 = vpop.eup %7330  ;;  %7356 = vpow2.f32 %v6117_v10 }
0x10d4   :  { %v10597_v6 = vpop.eup %7332  ;;  %7358 = vpow2.f32 %v6118_v27 }
0x10d5   :  { %v10599_v14 = vpop.eup %7334  ;;  %7360 = vpow2.f32 %v6119_v41 }
0x10d6   :  { %v10601_v24 = vpop.eup %7336  ;;  %7362 = vpow2.f32 %v6120_v3 }
0x10d7   :  { %v10603_v13 = vpop.eup %7338  ;;  %7364 = vpow2.f32 %v6121_v50 }
0x10d8   :  { %v10605_v44 = vpop.eup %7340  ;;  %7366 = vpow2.f32 %v6122_v2 }
0x10d9   :  { %v7343_v31 = vpop.eup %7342  ;;  %7368 = vpow2.f32 %v6123_v51  ;;  %v5577_v51 = vrot.slane %v10450_v54, 7  ;;  %v5583_v54 = vrot.slane %v10476_v21, 7 }
0x10da   :  { %v7345_v52 = vpop.eup %7344  ;;  %v5466_v18 = vadd.f32 1.0, %v7343_v31  ;;  %7370 = vpow2.f32 %v6124_v60  ;;  %v5578_v60 = vrot.slane %v10454_v25, 7  ;;  %v5601_v25 = vmul.f32 %v10590_v53, %v10557_v39 }
0x10db   :  { %v7347_v34 = vpop.eup %7346  ;;  %v5468_v37 = vadd.f32 1.0, %v7345_v52  ;;  %7372 = vpow2.f32 %v6125_v33  ;;  %v5580_v52 = vrot.slane %v10463_v4, 7  ;;  %v5604_v39 = vmul.f32 %v10599_v14, %v10569_v5 }
0x10dc   :  { %v7349_v19 = vpop.eup %7348  ;;  %v5470_v16 = vadd.f32 1.0, %v7347_v34  ;;  %7374 = vrcp.f32 %v5466_v18  ;;  %v5579_v18 = vrot.slane %v10458_v15, 7  ;;  %v5602_v15 = vmul.f32 %v10593_v23, %v10560_v56 }
0x10dd   :  { %v7351_v38 = vpop.eup %7350  ;;  %v5472_v55 = vadd.f32 1.0, %v7349_v19  ;;  %7376 = vrcp.f32 %v5468_v37  ;;  %v5581_v19 = vrot.slane %v10468_v22, 7  ;;  %v5584_v22 = vrot.slane %v10479_v32, 7 }
0x10de   :  { %v7353_v8 = vpop.eup %7352  ;;  %v5474_v26 = vadd.f32 1.0, %v7351_v38  ;;  %7378 = vrcp.f32 %v5470_v16  ;;  %v5582_v16 = vrot.slane %v10473_v30, 7  ;;  %v5603_v30 = vmul.f32 %v10597_v6, %v10564_v11 }
0x10df   :  { %v7355_v29 = vpop.eup %7354  ;;  %v5476_v10 = vadd.f32 1.0, %v7353_v8  ;;  %7380 = vrcp.f32 %v5472_v55  ;;  %v5605_v56 = vmul.f32 %v10601_v24, %v10573_v58  ;;  %v5606_v11 = vmul.f32 %v10603_v13, %v10577_v7 }
0x10e0   :  { %v7357_v49 = vpop.eup %7356  ;;  %v5478_v20 = vadd.f32 1.0, %v7355_v29  ;;  %7382 = vrcp.f32 %v5474_v26  ;;  %v5607_v5 = vmul.f32 %v10605_v44, %v10581_v59  ;;  %v5608_v58 = vmul.f32 %v10587_v0, %v10584_v35 }
0x10e1   :  { %v7359_v36 = vpop.eup %7358  ;;  %v5480_v57 = vadd.f32 1.0, %v7357_v49  ;;  %7384 = vrcp.f32 %v5476_v10 }
0x10e2   :  { %v7361_v27 = vpop.eup %7360  ;;  %7386 = vrcp.f32 %v5478_v20  ;;  %v5545_v28 = vadd.f32 1.0, %v7359_v36 }
0x10e3   :  { %v7363_v40 = vpop.eup %7362  ;;  %7388 = vrcp.f32 %v5480_v57  ;;  %v5546_v41 = vadd.f32 1.0, %v7361_v27 }
0x10e4   :  { %v7365_v1 = vpop.eup %7364  ;;  %v5547_v63 = vadd.f32 1.0, %v7363_v40  ;;  %7390 = vrcp.f32 %v5545_v28 }
0x10e5   :  { %v7367_v3 = vpop.eup %7366  ;;  %v5548_v48 = vadd.f32 1.0, %v7365_v1  ;;  %7392 = vrcp.f32 %v5546_v41 }
0x10e6   :  { %v7369_v45 = vpop.eup %7368  ;;  %v5549_v50 = vadd.f32 1.0, %v7367_v3  ;;  %7394 = vrcp.f32 %v5547_v63 }
0x10e7   :  { %v7371_v2 = vpop.eup %7370  ;;  %v5550_v33 = vadd.f32 1.0, %v7369_v45  ;;  %7396 = vrcp.f32 %v5548_v48 }
0x10e8   :  { %v7373_v31 = vpop.eup %7372  ;;  %v5551_v34 = vadd.f32 1.0, %v7371_v2  ;;  %7398 = vrcp.f32 %v5549_v50 }
0x10e9   :  { %v7375_v37 = vpop.eup %7374  ;;  %v5552_v38 = vadd.f32 1.0, %v7373_v31  ;;  %7400 = vrcp.f32 %v5550_v33 }
0x10ea   :  { %v7377_v55 = vpop.eup %7376  ;;  %v5593_v8 = vmul.f32 %v7375_v37, %v5577_v51  ;;  %7402 = vrcp.f32 %v5551_v34 }
0x10eb   :  { %v7379_v4 = vpop.eup %7378  ;;  %v5594_v26 = vmul.f32 %v7377_v55, %v5578_v60  ;;  %7404 = vrcp.f32 %v5552_v38 }
0x10ec   :  { %v7381_v29 = vpop.eup %7380  ;;  %v5595_v10 = vmul.f32 %v7379_v4, %v5579_v18  ;;  %v5609_v21 = vadd.f32 %v5601_v25, %v5593_v8 }
0x10ed   :  { %v7383_v49 = vpop.eup %7382  ;;  %v5596_v53 = vmul.f32 %v7381_v29, %v5580_v52  ;;  %v5610_v20 = vadd.f32 %v5602_v15, %v5594_v26 }
0x10ee   :  { %v7385_v36 = vpop.eup %7384  ;;  %v5597_v23 = vmul.f32 %v7383_v49, %v5581_v19  ;;  %v5611_v32 = vadd.f32 %v5603_v30, %v5595_v10  ;;  %7406 = vtanh.f32 %v5609_v21 }
0x10ef   :  { %v7387_v57 = vpop.eup %7386  ;;  %v5598_v27 = vmul.f32 %v7385_v36, %v5582_v16  ;;  %v5612_v6 = vadd.f32 %v5604_v39, %v5596_v53  ;;  %7408 = vtanh.f32 %v5610_v20 }
0x10f0   :  { %v7389_v28 = vpop.eup %7388  ;;  %v5599_v40 = vmul.f32 %v7387_v57, %v5583_v54  ;;  %v5613_v14 = vadd.f32 %v5605_v56, %v5597_v23  ;;  %7410 = vtanh.f32 %v5611_v32 }
0x10f1   :  { %v5600_v41 = vmul.f32 %v7389_v28, %v5584_v22  ;;  %v5614_v24 = vadd.f32 %v5606_v11, %v5598_v27  ;;  %7412 = vtanh.f32 %v5612_v6  ;;  %v7391_v63 = vpop.eup %7390 }
0x10f2   :  { %v5615_v1 = vadd.f32 %v5607_v5, %v5599_v40  ;;  %7414 = vtanh.f32 %v5613_v14  ;;  %v7393_v7 = vpop.eup %7392 }
0x10f3   :  { %v5616_v3 = vadd.f32 %v5608_v58, %v5600_v41  ;;  %7416 = vtanh.f32 %v5614_v24  ;;  %v7395_v13 = vpop.eup %7394 }
0x10f4   :  { %7418 = vtanh.f32 %v5615_v1  ;;  %v7397_v48 = vpop.eup %7396 }
0x10f5   :  { %7420 = vtanh.f32 %v5616_v3  ;;  %v7399_v45 = vpop.eup %7398  ;;  %v5192_v3 = vadd.f32 %v10515_v47, %v11591_v42  ;;  %v5235_v42 = vadd.f32 %v10521_v46, %v11594_v61 }
0x10f6   :  { %v7401_v59 = vpop.eup %7400 }
0x10f7   :  { %v7403_v44 = vpop.eup %7402 }
0x10f8   :  { %v7405_v50 = vpop.eup %7404 }
0x10fb   :  { %v7407_v2 = vpop.eup %7406 }
0x10fc   :  { %v7409_v51 = vpop.eup %7408  ;;  %v5625_v60 = vmul.f32 %v7407_v2, %v7391_v63 }
0x10fd   :  { %v7411_v35 = vpop.eup %7410  ;;  %v5626_v0 = vmul.f32 %v7409_v51, %v7393_v7 }
0x10fe   :  { %v7413_v33 = vpop.eup %7412  ;;  %v5627_v31 = vmul.f32 %v7411_v35, %v7395_v13  ;;  %v5633_v52 = vpack.c.bf16 %v5625_v60, %v5625_v60 }
0x10ff   :  { %v7415_v18 = vpop.eup %7414  ;;  %v5628_v34 = vmul.f32 %v7413_v33, %v7397_v48  ;;  %v5634_v37 = vpack.c.bf16 %v5626_v0, %v5626_v0  ;;  %v5194_v48 = vadd.f32 %v10519_v9, %v11592_v62 }
0x1100   :  { %v7417_v19 = vpop.eup %7416  ;;  %v5629_v16 = vmul.f32 %v7415_v18, %v7399_v45  ;;  %v5635_v38 = vpack.c.bf16 %v5627_v31, %v5627_v31  ;;  %v5649_v55 = vunpack.c.l.b16 %v5633_v52  ;;  %v5233_v31 = vadd.f32 %v10517_v17, %v11596_v43 }
0x1101   :  { %v7419_v54 = vpop.eup %7418  ;;  %v5630_v25 = vmul.f32 %v7417_v19, %v7401_v59  ;;  %v5636_v8 = vpack.c.bf16 %v5628_v34, %v5628_v34  ;;  %v5650_v4 = vunpack.c.l.b16 %v5634_v37 }
0x1102   :  { %v7421_v15 = vpop.eup %7420  ;;  %v5631_v26 = vmul.f32 %v7419_v54, %v7403_v44  ;;  %v5637_v22 = vpack.c.bf16 %v5629_v16, %v5629_v16  ;;  %v5651_v29 = vunpack.c.l.b16 %v5635_v38  ;;  %v5657_v30 = vrot.slane %v5649_v55, 7 }
0x1103   :  { %v5632_v10 = vmul.f32 %v7421_v15, %v7405_v50  ;;  %v5638_v21 = vpack.c.bf16 %v5630_v25, %v5630_v25  ;;  %v5652_v49 = vunpack.c.l.b16 %v5636_v8  ;;  %v5658_v39 = vrot.slane %v5650_v4, 6  ;;  %v6129_v8 = vld [vmem:[%s10660_s7] ss:$0 sm:$0xff] }
0x1104   :  { %v5639_v53 = vpack.c.bf16 %v5631_v26, %v5631_v26  ;;  %v5653_v20 = vunpack.c.l.b16 %v5637_v22  ;;  %v5660_v36 = vrot.slane %v5651_v29, 5  ;;  %v6130_v26 = vld [vmem:[#allocation2] ss:$0 sm:$0xff] }
0x1105   :  { %v5640_v56 = vpack.c.bf16 %v5632_v10, %v5632_v10  ;;  %v5654_v23 = vunpack.c.l.b16 %v5638_v21  ;;  %v5659_v32 = vsel %vm938_vm3, %v5658_v39, %v5657_v30  ;;  %v5662_v57 = vrot.slane %v5652_v49, 4 }
0x1106   :  { %v5655_v27 = vunpack.c.l.b16 %v5639_v53  ;;  %v5661_v11 = vsel %vm941_vm4, %v5660_v36, %v5659_v32  ;;  %v5664_v6 = vrot.slane %v5653_v20, 3 }
0x1107   :  { %v5663_v28 = vsel %vm944_vm5, %v5662_v57, %v5661_v11  ;;  %v5666_v40 = vrot.slane %v5654_v23, 2  ;;  %v5656_v41 = vunpack.c.l.b16 %v5640_v56 }
0x1108   :  { %v5665_v5 = vsel %vm947_vm6, %v5664_v6, %v5663_v28  ;;  %v5668_v14 = vrot.slane %v5655_v27, 1 }
0x1109   :  { %v5667_v58 = vsel %vm950_vm7, %v5666_v40, %v5665_v5 }
0x110a   :  { %v5669_v24 = vsel %vm953_vm8, %v5668_v14, %v5667_v58 }
0x110b   :  { %v5670_v1 = vsel %vm956_vm9, %v5656_v41, %v5669_v24 }
0x110c   :  { %v5671_v63 = vpack.c.b16 %v5670_v1, %v5670_v1 }
0x110e   :  { %5706 = vmatmul.mubr.bf16.vlgmr.msra.gmra.mxu0 %v5671_v63  ;;  %5747 = vmatmul.mubr.bf16.vlgmr.msra.gmra.mxu1 %v5671_v63 }
0x11ce   :  { %v5707_v7 = vpop.f32.mrf.mxu0  ;;  %v5748_v13 = vpop.f32.mrf.mxu1 }
0x11cf   :  { %v5708_v45 = vadd.f32 %v5707_v7, %v5192_v3  ;;  %v5749_v62 = vadd.f32 %v5748_v13, %v5233_v31 }
0x11d0   :  { %v5709_v59 = vpop.f32.mrf.mxu0  ;;  %v5750_v44 = vpop.f32.mrf.mxu1 }
0x11d1   :  { %v6126_v50 = vmul.f32 -1.442695, %v5708_v45  ;;  %v5710_v2 = vadd.f32 %v5709_v59, %v5194_v48  ;;  %v5751_v47 = vadd.f32 %v5750_v44, %v5235_v42 }
0x11d2   :  { %v5711_v51 = vpop.f32.mrf.mxu0  ;;  %v5752_v60 = vpop.f32.mrf.mxu1 }
0x11d3   :  { %7422 = vpow2.f32 %v6126_v50  ;;  %v6127_v35 = vmul.f32 -1.442695, %v5710_v2  ;;  %v6128_v9 = vmul.f32 -1.442695, %v5751_v47 }
0x11d4   :  { %v5712_v0 = vpop.f32.mrf.mxu0  ;;  %v5753_v33 = vpop.f32.mrf.mxu1 }
0x11d5   :  { %7424 = vpow2.f32 %v6127_v35 }
0x11d6   :  { %7426 = vtanh.f32 %v5749_v62 }
0x11d7   :  { %7428 = vpow2.f32 %v6128_v9 }
0x11e0   :  { %v7423_v52 = vpop.eup %7422 }
0x11e1   :  { %v5761_v18 = vadd.f32 1.0, %v7423_v52 }
0x11e2   :  { %v7425_v34 = vpop.eup %7424 }
0x11e3   :  { %7430 = vrcp.f32 %v5761_v18  ;;  %v5762_v37 = vadd.f32 1.0, %v7425_v34  ;;  %v7427_v19 = vpop.eup %7426 }
0x11e4   :  { %v7429_v16 = vpop.eup %7428 }
0x11e5   :  { %7432 = vrcp.f32 %v5762_v37  ;;  %v5771_v61 = vadd.f32 1.0, %v7429_v16 }
0x11e7   :  { %7434 = vrcp.f32 %v5771_v61 }
0x11f0   :  { %v7431_v38 = vpop.eup %7430 }
0x11f1   :  { %v5775_v55 = vmul.f32 %v7431_v38, %v7427_v19 }
0x11f2   :  { %v7433_v54 = vpop.eup %7432 }
0x11f3   :  { %v5774_v46 = vmul.f32 %v7433_v54, %v10506_v12 }
0x11f4   :  { %v7435_v43 = vpop.eup %7434 }
0x11f5   :  { %v5776_v25 = vadd.f32 %v5775_v55, %v5774_v46 }
0x11f7   :  { %7436 = vtanh.f32 %v5776_v25 }
0x1204   :  { %v7437_v17 = vpop.eup %7436 }
0x1205   :  { %v5778_v4 = vmul.f32 %v7437_v17, %v7435_v43 }
0x1207   :  { %v5786_v15 = vmul.f32 %v6129_v8, %v5778_v4 }
0x1209   :  { %5787 = vadd.xlane.f32.xlu0 %v5786_v15 }
0x1292   :  { %v5788_v22 = vpop.xlane.xlu0 %5787 }
0x1293   :  { %v5796_v29 = vadd.f32 %v6130_v26, %v5788_v22 }
0x1295   :  { %5798 = vst.msk [vmem:[%s10662_s9] sm:$0xff] %vm5797_vm10, %v5796_v29 }
0x1296   :  { %5803 = vsyncpa [#allocation4], 1 }
0x1297   :  { %5804 = vsyncpa [#allocation6], 1 }

</bundles_post_ra>
